<compile_context>
chip_gen: v7x
topology: tpu7x:2x2x1
jax: 0.10.0
libtpu: 0.0.40
codegen_flags: <defaults>
</compile_context>

<pallas_src>
import functools
import math

import jax
import jax.numpy as jnp
from jax.experimental import pallas as pl
from jax.experimental.pallas import tpu as pltpu

# ----------------------------- small config ---------------------------------
BATCH = 2
IMG_SIZE = 32           # H_in = W_in
PATCH = 8
EMBED_DIM = 32          # ViT embed dim
DEPTH = 2               # transformer blocks
HEADS = 2
HEAD_DIM = EMBED_DIM // HEADS
MLP_DIM = EMBED_DIM * 2
NECK_DIM = 32           # SAM neck output channels (FPN input dim)
FPN_OUT = 32            # SimpleFeaturePyramid per-level output channels
HP = WP = IMG_SIZE // PATCH
TOKENS = HP * WP
FEAT_EXTRACT_LAYERS = ("layer1", "layer2")          # model_cfg.args['feat_extract_layer']
REDUCE_OUT = (16, 16)                               # model_cfg.channel_reduce['out_channels']
LN_EPS = 1e-6
BN_EPS = 1e-5


# --------------------------- in-kernel helpers --------------------------------
def _ln_norm(x, eps):
    mu = jnp.mean(x, axis=-1, keepdims=True)
    xc = x - mu
    var = jnp.mean(xc * xc, axis=-1, keepdims=True)
    return xc * jax.lax.rsqrt(var + eps)


def _gelu(x):
    return jax.nn.gelu(x, approximate=True)


def _bdot(a, b):
    # bf16 MXU matmul with f32 accumulation
    return jnp.dot(a.astype(jnp.bfloat16), b.astype(jnp.bfloat16),
                   preferred_element_type=jnp.float32)


def _choose_bm(m, target=512):
    """Largest M-tile that divides M, multiple of 8, and gives >=2 grid steps."""
    if m < 16:
        return m
    cap = min(target, m // 2)
    bm = (cap // 8) * 8
    while bm >= 8:
        if m % bm == 0:
            return bm
        bm -= 8
    return m


# ------------------------------ fused matmul ----------------------------------
def _mm_kernel(*refs, has_bias, pre_ln, pre_gelu, eps):
    it = iter(refs)
    x_ref = next(it)
    w_ref = next(it)
    b_ref = next(it) if has_bias else None
    gi_ref = next(it) if pre_ln else None
    bi_ref = next(it) if pre_ln else None
    o_ref = next(it)

    x = x_ref[...]
    if pre_ln:
        x = _ln_norm(x.astype(jnp.float32), eps) * gi_ref[...] + bi_ref[...]
    if pre_gelu:
        x = _gelu(x)
    y = _bdot(x, w_ref[...])
    if has_bias:
        y = y + b_ref[...]
    o_ref[...] = y.astype(o_ref.dtype)


def fused_matmul(x, w, bias=None, pre_ln=None, pre_gelu=False, out_dtype=jnp.float32):
    """(M,K)@(K,N), bf16 operands / f32 accumulation, fused pre-LN / GELU / bias."""
    x = x.astype(jnp.bfloat16)
    w = w.astype(jnp.bfloat16)
    M, K = x.shape
    N = w.shape[1]
    bm = _choose_bm(M)

    args = [x, w]
    in_specs = [pl.BlockSpec((bm, K), lambda i: (i, 0)),
                pl.BlockSpec((K, N), lambda i: (0, 0))]
    if bias is not None:
        args.append(bias.reshape(1, N).astype(jnp.float32))
        in_specs.append(pl.BlockSpec((1, N), lambda i: (0, 0)))
    if pre_ln is not None:
        g, b = pre_ln
        args += [g.reshape(1, K).astype(jnp.float32), b.reshape(1, K).astype(jnp.float32)]
        in_specs += [pl.BlockSpec((1, K), lambda i: (0, 0)),
                     pl.BlockSpec((1, K), lambda i: (0, 0))]

    return pl.pallas_call(
        functools.partial(_mm_kernel, has_bias=bias is not None,
                          pre_ln=pre_ln is not None, pre_gelu=pre_gelu, eps=LN_EPS),
        out_shape=jax.ShapeDtypeStruct((M, N), out_dtype),
        grid=(M // bm,),
        in_specs=in_specs,
        out_specs=pl.BlockSpec((bm, N), lambda i: (i, 0)),
        compiler_params=pltpu.CompilerParams(dimension_semantics=("parallel",)),
    )(*args)


# -------------------- fused ViT stack (patch embed + all blocks) --------------
def _vit_stack_kernel(x_ref, pw_ref, pb_ref, pos_ref,
                      ln1g_ref, ln1b_ref, qkvw_ref, qkvb_ref,
                      projw_ref, projb_ref, ln2g_ref, ln2b_ref,
                      fc1w_ref, fc1b_ref, fc2w_ref, fc2b_ref,
                      o_ref, *, heads, head_dim, eps, scale):
    emb = heads * head_dim

    @pl.when(pl.program_id(1) == 0)
    def _():
        # fused patch-embed matmul + bias + absolute positional embedding
        o_ref[0] = _bdot(x_ref[0], pw_ref[...]) + pb_ref[...] + pos_ref[0]

    x = o_ref[0]                                          # (T, E) f32 residual stream

    # ---- attention branch (per-head softmax; proj accumulated, no concat) ----
    h = _ln_norm(x, eps) * ln1g_ref[0] + ln1b_ref[0]
    qkv = _bdot(h, qkvw_ref[0]) + qkvb_ref[0]             # (T, 3E) f32
    projw = projw_ref[0]                                  # (E, E) bf16
    attn = jnp.zeros_like(x)
    for i in range(heads):
        q = qkv[:, i * head_dim:(i + 1) * head_dim]
        k = qkv[:, emb + i * head_dim:emb + (i + 1) * head_dim]
        v = qkv[:, 2 * emb + i * head_dim:2 * emb + (i + 1) * head_dim]
        s = jax.lax.dot_general(q.astype(jnp.bfloat16), k.astype(jnp.bfloat16),
                                (((1,), (1,)), ((), ())),
                                preferred_element_type=jnp.float32) * scale
        p = jnp.exp(s - jnp.max(s, axis=-1, keepdims=True))
        p = p / jnp.sum(p, axis=-1, keepdims=True)        # exact divide (parity)
        o = _bdot(p, v)                                   # (T, head_dim)
        attn = attn + _bdot(o, projw[i * head_dim:(i + 1) * head_dim, :])
    x = x + attn + projb_ref[0]

    # ---- MLP branch ----
    h = _ln_norm(x, eps) * ln2g_ref[0] + ln2b_ref[0]
    h = _gelu(_bdot(h, fc1w_ref[0]) + fc1b_ref[0])
    x = x + _bdot(h, fc2w_ref[0]) + fc2b_ref[0]
    o_ref[0] = x


def vit_stack(patches, P):
    """One pallas_call for patch-embed + DEPTH transformer blocks.

    grid = (batch 'parallel', depth 'arbitrary'); the token stream stays resident
    in the output block across the depth axis.
    """
    N, T, Kp = patches.shape
    B = P["blocks"]
    f32 = lambda a: a.astype(jnp.float32)
    bf16 = lambda a: a.astype(jnp.bfloat16)

    args = [patches,
            bf16(P["patch_w"]), f32(P["patch_b"]).reshape(1, EMBED_DIM),
            f32(P["pos_embed"]),
            f32(B["ln1_g"]), f32(B["ln1_b"]),
            bf16(B["qkv_w"]), f32(B["qkv_b"]),
            bf16(B["proj_w"]), f32(B["proj_b"]),
            f32(B["ln2_g"]), f32(B["ln2_b"]),
            bf16(B["fc1_w"]), f32(B["fc1_b"]),
            bf16(B["fc2_w"]), f32(B["fc2_b"])]

    fixed_specs = [pl.BlockSpec((1, T, Kp), lambda b, d: (b, 0, 0)),
                   pl.BlockSpec((Kp, EMBED_DIM), lambda b, d: (0, 0)),
                   pl.BlockSpec((1, EMBED_DIM), lambda b, d: (0, 0)),
                   pl.BlockSpec((1, T, EMBED_DIM), lambda b, d: (0, 0, 0))]
    stacked_specs = [pl.BlockSpec((1,) + a.shape[1:], lambda b, d: (d, 0, 0))
                     for a in args[4:]]

    return pl.pallas_call(
        functools.partial(_vit_stack_kernel, heads=HEADS, head_dim=HEAD_DIM,
                          eps=LN_EPS, scale=1.0 / math.sqrt(HEAD_DIM)),
        out_shape=jax.ShapeDtypeStruct((N, T, EMBED_DIM), jnp.float32),
        grid=(N, DEPTH),
        in_specs=fixed_specs + stacked_specs,
        out_specs=pl.BlockSpec((1, T, EMBED_DIM), lambda b, d: (b, 0, 0)),
        compiler_params=pltpu.CompilerParams(
            dimension_semantics=("parallel", "arbitrary")),
    )(*args)


# --------- fused conv block: 1x1+LN -> 3x3+LN (shift-and-accumulate) ----------
def _conv_block_kernel(x_ref, w1_ref, g1_ref, b1_ref, w3_ref, g2_ref, b2_ref,
                       *rest, H, W, eps, reduce):
    if reduce:
        rwt_ref, rb_ref, o_ref, pad_ref = rest
    else:
        o_ref, pad_ref = rest

    c1 = w1_ref.shape[-1]
    c2 = w3_ref.shape[-1]

    # 1x1 conv (bias-free) + LayerNorm2d (channels-last LN)
    x = x_ref[0].reshape(H * W, -1)                               # (H*W, Cin) bf16
    y1 = _bdot(x, w1_ref[...])                                    # (H*W, C1) f32
    y1 = _ln_norm(y1, eps) * g1_ref[...] + b1_ref[...]

    # halo-padded copy in VMEM scratch; pre-pad of 8 keeps the interior store aligned
    pad_ref[...] = jnp.zeros(pad_ref.shape, pad_ref.dtype)
    pad_ref[8:H + 8, 8:W + 8, :] = y1.reshape(H, W, c1)

    # 3x3 conv (pad=1, stride=1, bias-free) as 9 tall shift-and-accumulate matmuls
    acc = jnp.zeros((H * W, c2), jnp.float32)
    for kh in range(3):
        for kw in range(3):
            tap = pad_ref[7 + kh:7 + kh + H, 7 + kw:7 + kw + W, :]
            acc = acc + _bdot(tap.reshape(H * W, c1), w3_ref[kh * 3 + kw])
    y = _ln_norm(acc, eps) * g2_ref[...] + b2_ref[...]            # (H*W, C2)

    if reduce:
        # fused channel-reduce (1x1 conv + folded BN + ReLU), emitted transposed so the
        # store is channel-major (lane-dense) and the result is already NCHW.
        yt = jax.lax.dot_general(rwt_ref[...], y.astype(jnp.bfloat16),
                                 (((1,), (1,)), ((), ())),
                                 preferred_element_type=jnp.float32)   # (Cf, H*W)
        o_ref[0] = jnp.maximum(yt + rb_ref[...], 0.0).astype(o_ref.dtype)
    else:
        o_ref[0] = y.astype(o_ref.dtype)


def conv_block(x, p, reduce=None, out_dtype=jnp.float32):
    """Fused [1x1 conv -> LN2d -> 3x3 conv(pad=1) -> LN2d (-> reduce+BN+ReLU)].

    Returns NHWC when reduce is None; NCHW (channel-major kernel store) otherwise.
    """
    N, H, W, Cin = x.shape
    C1 = p["conv1_w"].shape[-1]
    C2 = p["conv3_w"].shape[-1]

    args = [x.astype(jnp.bfloat16),
            p["conv1_w"].astype(jnp.bfloat16),
            p["ln1_g"].reshape(1, C1).astype(jnp.float32),
            p["ln1_b"].reshape(1, C1).astype(jnp.float32),
            p["conv3_w"].astype(jnp.bfloat16),
            p["ln2_g"].reshape(1, C2).astype(jnp.float32),
            p["ln2_b"].reshape(1, C2).astype(jnp.float32)]
    in_specs = [pl.BlockSpec((1, H, W, Cin), lambda n: (n, 0, 0, 0)),
                pl.BlockSpec((Cin, C1), lambda n: (0, 0)),
                pl.BlockSpec((1, C1), lambda n: (0, 0)),
                pl.BlockSpec((1, C1), lambda n: (0, 0)),
                pl.BlockSpec((9, C1, C2), lambda n: (0, 0, 0)),
                pl.BlockSpec((1, C2), lambda n: (0, 0)),
                pl.BlockSpec((1, C2), lambda n: (0, 0))]

    if reduce is not None:
        rw, rb = reduce                                   # (C2, Cf), (Cf,)
        Cf = rw.shape[-1]
        args += [rw.T.astype(jnp.bfloat16), rb.reshape(Cf, 1).astype(jnp.float32)]
        in_specs += [pl.BlockSpec((Cf, C2), lambda n: (0, 0)),
                     pl.BlockSpec((Cf, 1), lambda n: (0, 0))]
        out_shape = jax.ShapeDtypeStruct((N, Cf, H * W), out_dtype)
        out_spec = pl.BlockSpec((1, Cf, H * W), lambda n: (n, 0, 0))
    else:
        out_shape = jax.ShapeDtypeStruct((N, H * W, C2), out_dtype)
        out_spec = pl.BlockSpec((1, H * W, C2), lambda n: (n, 0, 0))

    out = pl.pallas_call(
        functools.partial(_conv_block_kernel, H=H, W=W, eps=LN_EPS,
                          reduce=reduce is not None),
        out_shape=out_shape,
        grid=(N,),
        in_specs=in_specs,
        out_specs=out_spec,
        scratch_shapes=[pltpu.VMEM((H + 9, W + 9, C1), jnp.float32)],
        compiler_params=pltpu.CompilerParams(dimension_semantics=("parallel",)),
    )(*args)

    if reduce is not None:
        return out.reshape(N, rw.shape[-1], H, W)   # already channel-major == NCHW
    return out.reshape(N, H, W, C2)


# ---------------------------- misc NHWC helpers --------------------------------
def deconv2x2(x, w, bias, pre_ln=None, pre_gelu=False):
    """ConvTranspose2d(kernel=2, stride=2); w columns ordered (kh, kw, cout)."""
    N, H, W, Cin = x.shape
    Cout = w.shape[1] // 4
    out = fused_matmul(x.reshape(-1, Cin), w, jnp.tile(bias, 4),
                       pre_ln=pre_ln, pre_gelu=pre_gelu,
                       out_dtype=jnp.bfloat16)            # (N*H*W, 4*Cout)
    # TODO(synk): the 2x2 sub-pixel rearrangement is a tiny XLA reshuffle; kept in XLA.
    out = out.reshape(N, H, W, 2, 2, Cout).transpose(0, 1, 3, 2, 4, 5)
    return out.reshape(N, 2 * H, 2 * W, Cout)


def _fold_bn(rp):
    """Fold eval-mode BatchNorm into the 1x1 channel-reduce conv (BasicBlock2D)."""
    scale = rp["bn_gamma"] * jax.lax.rsqrt(rp["bn_var"] + BN_EPS)
    return rp["w"] * scale[None, :], rp["bn_beta"] - rp["bn_mean"] * scale


# ------------------------------ model forward ---------------------------------
def sam_fpn_forward(P, images):
    """images: (N, H_in, W_in, 3) — same signature as the PyTorch module."""
    N = images.shape[0]

    # --- SAM ViT encoder: patchify (XLA reshuffle) + one fused stack kernel ---
    patches = images.reshape(N, HP, PATCH, WP, PATCH, 3).transpose(0, 1, 3, 2, 4, 5)
    patches = patches.reshape(N, TOKENS, PATCH * PATCH * 3).astype(jnp.bfloat16)
    tokens = vit_stack(patches, P)                               # (N, T, E) f32

    # --- SAM neck: 1x1 conv + LN2d -> 3x3 conv + LN2d, one fused kernel ---
    x = tokens.reshape(N, HP, WP, EMBED_DIM).astype(jnp.bfloat16)
    feat = conv_block(x, P["neck"], out_dtype=jnp.bfloat16)      # (N, HP, WP, NECK)

    batch_dict = {}
    # Only the extracted pyramid levels are computed (layer3 / layer4 skipped entirely).
    if "layer1" in FEAT_EXTRACT_LAYERS:                          # scale 4.0 branch
        ri = FEAT_EXTRACT_LAYERS.index("layer1")
        x4 = deconv2x2(feat, P["s4_deconv1_w"], P["s4_deconv1_b"])
        x4 = deconv2x2(x4, P["s4_deconv2_w"], P["s4_deconv2_b"],
                       pre_ln=(P["s4_ln_g"], P["s4_ln_b"]), pre_gelu=True)
        batch_dict["layer1_feat2d"] = conv_block(
            x4, P["fpn_out"][0], reduce=_fold_bn(P["reduce"][ri]))   # NCHW directly
    if "layer2" in FEAT_EXTRACT_LAYERS:                          # scale 2.0 branch
        ri = FEAT_EXTRACT_LAYERS.index("layer2")
        x2 = deconv2x2(feat, P["s2_deconv_w"], P["s2_deconv_b"])
        batch_dict["layer2_feat2d"] = conv_block(
            x2, P["fpn_out"][1], reduce=_fold_bn(P["reduce"][ri]))
    # TODO(synk): fuse_type='avg' cross-level fusion not applied (unknown semantics).
    return batch_dict


# ------------------------------ parameter init --------------------------------
def init_params(seed=0):
    keys = iter(jax.random.split(jax.random.PRNGKey(seed), 64))
    nk = lambda: next(keys)
    nrm = lambda shape, s=0.02: s * jax.random.normal(nk(), shape, dtype=jnp.float32)
    ones = lambda *s: jnp.ones(s, jnp.float32)
    zeros = lambda *s: jnp.zeros(s, jnp.float32)

    half, quart = NECK_DIM // 2, NECK_DIM // 4
    P = {
        "patch_w": nrm((PATCH * PATCH * 3, EMBED_DIM)),
        "patch_b": nrm((EMBED_DIM,)),
        "pos_embed": nrm((1, TOKENS, EMBED_DIM)),
        "blocks": {
            "ln1_g": ones(DEPTH, 1, EMBED_DIM), "ln1_b": zeros(DEPTH, 1, EMBED_DIM),
            "qkv_w": nrm((DEPTH, EMBED_DIM, 3 * EMBED_DIM)),
            "qkv_b": nrm((DEPTH, 1, 3 * EMBED_DIM)),
            "proj_w": nrm((DEPTH, EMBED_DIM, EMBED_DIM)),
            "proj_b": nrm((DEPTH, 1, EMBED_DIM)),
            "ln2_g": ones(DEPTH, 1, EMBED_DIM), "ln2_b": zeros(DEPTH, 1, EMBED_DIM),
            "fc1_w": nrm((DEPTH, EMBED_DIM, MLP_DIM)),
            "fc1_b": nrm((DEPTH, 1, MLP_DIM)),
            "fc2_w": nrm((DEPTH, MLP_DIM, EMBED_DIM)),
            "fc2_b": nrm((DEPTH, 1, EMBED_DIM)),
        },
        "neck": {
            "conv1_w": nrm((EMBED_DIM, NECK_DIM)),
            "ln1_g": ones(NECK_DIM), "ln1_b": zeros(NECK_DIM),
            "conv3_w": nrm((9, NECK_DIM, NECK_DIM)),
            "ln2_g": ones(NECK_DIM), "ln2_b": zeros(NECK_DIM),
        },
        "s4_deconv1_w": nrm((NECK_DIM, 4 * half)), "s4_deconv1_b": nrm((half,)),
        "s4_ln_g": ones(half), "s4_ln_b": zeros(half),
        "s4_deconv2_w": nrm((half, 4 * quart)), "s4_deconv2_b": nrm((quart,)),
        "s2_deconv_w": nrm((NECK_DIM, 4 * half)), "s2_deconv_b": nrm((half,)),
    }
    P["fpn_out"] = []
    for cin in (quart, half, NECK_DIM, NECK_DIM):
        P["fpn_out"].append({
            "conv1_w": nrm((cin, FPN_OUT)),
            "ln1_g": ones(FPN_OUT), "ln1_b": zeros(FPN_OUT),
            "conv3_w": nrm((9, FPN_OUT, FPN_OUT)),
            "ln2_g": ones(FPN_OUT), "ln2_b": zeros(FPN_OUT),
        })
    P["reduce"] = []
    for cout in REDUCE_OUT:
        P["reduce"].append({
            "w": nrm((FPN_OUT, cout)),
            "bn_gamma": 1.0 + nrm((cout,)),
            "bn_beta": nrm((cout,)),
            "bn_mean": nrm((cout,)),
            "bn_var": 1.0 + jnp.abs(nrm((cout,))),
        })
    return P


# ---------------------------------- main --------------------------------------
if __name__ == "__main__":
    params = init_params(0)
    images = jax.random.normal(
        jax.random.PRNGKey(0), (BATCH, IMG_SIZE, IMG_SIZE, 3), dtype=jnp.float32)

    fwd = jax.jit(sam_fpn_forward)
    out = jax.block_until_ready(fwd(params, images))

    # sanity: expected shapes (NCHW, as the PyTorch module returns)
    assert out["layer1_feat2d"].shape == (BATCH, REDUCE_OUT[0], 4 * HP, 4 * WP)
    assert out["layer2_feat2d"].shape == (BATCH, REDUCE_OUT[1], 2 * HP, 2 * WP)
    assert all(bool(jnp.all(jnp.isfinite(v))) for v in out.values())
    print("KERNEL_OK")
</pallas_src>

<mosaic_0001>
module attributes {stable_mosaic.version = 11 : i64} {
  func.func @_vit_stack_kernel(%arg0: i32, %arg1: i32, %arg2: memref<1x16x192xbf16, #tpu.memory_space<vmem>>, %arg3: memref<192x32xbf16, #tpu.memory_space<vmem>>, %arg4: memref<1x32xf32, #tpu.memory_space<vmem>>, %arg5: memref<1x16x32xf32, #tpu.memory_space<vmem>>, %arg6: memref<1x1x32xf32, #tpu.memory_space<vmem>>, %arg7: memref<1x1x32xf32, #tpu.memory_space<vmem>>, %arg8: memref<1x32x96xbf16, #tpu.memory_space<vmem>>, %arg9: memref<1x1x96xf32, #tpu.memory_space<vmem>>, %arg10: memref<1x32x32xbf16, #tpu.memory_space<vmem>>, %arg11: memref<1x1x32xf32, #tpu.memory_space<vmem>>, %arg12: memref<1x1x32xf32, #tpu.memory_space<vmem>>, %arg13: memref<1x1x32xf32, #tpu.memory_space<vmem>>, %arg14: memref<1x32x64xbf16, #tpu.memory_space<vmem>>, %arg15: memref<1x1x64xf32, #tpu.memory_space<vmem>>, %arg16: memref<1x64x32xbf16, #tpu.memory_space<vmem>>, %arg17: memref<1x1x32xf32, #tpu.memory_space<vmem>>, %arg18: memref<1x16x32xf32, #tpu.memory_space<vmem>>) attributes {dimension_semantics = [#tpu.dimension_semantics<parallel>, #tpu.dimension_semantics<arbitrary>], iteration_bounds = array<i64: 2, 2>, scalar_prefetch = 0 : i64, scratch_operands = 0 : i64, tpu.core_type = #tpu.core_type<tc>, window_params = [{transform_indices = @transform_0, window_bounds = array<i64: 1, 16, 192>}, {pipeline_mode = #tpu.pipeline_mode<synchronous>, transform_indices = @transform_1, window_bounds = array<i64: 192, 32>}, {pipeline_mode = #tpu.pipeline_mode<synchronous>, transform_indices = @transform_2, window_bounds = array<i64: 1, 32>}, {pipeline_mode = #tpu.pipeline_mode<synchronous>, transform_indices = @transform_3, window_bounds = array<i64: 1, 16, 32>}, {transform_indices = @transform_4, window_bounds = array<i64: 1, 1, 32>}, {transform_indices = @transform_5, window_bounds = array<i64: 1, 1, 32>}, {transform_indices = @transform_6, window_bounds = array<i64: 1, 32, 96>}, {transform_indices = @transform_7, window_bounds = array<i64: 1, 1, 96>}, {transform_indices = @transform_8, window_bounds = array<i64: 1, 32, 32>}, {transform_indices = @transform_9, window_bounds = array<i64: 1, 1, 32>}, {transform_indices = @transform_10, window_bounds = array<i64: 1, 1, 32>}, {transform_indices = @transform_11, window_bounds = array<i64: 1, 1, 32>}, {transform_indices = @transform_12, window_bounds = array<i64: 1, 32, 64>}, {transform_indices = @transform_13, window_bounds = array<i64: 1, 1, 64>}, {transform_indices = @transform_14, window_bounds = array<i64: 1, 64, 32>}, {transform_indices = @transform_15, window_bounds = array<i64: 1, 1, 32>}, {transform_indices = @transform_16, window_bounds = array<i64: 1, 16, 32>}]} {
    %c0_i32 = arith.constant 0 : i32
    %0 = arith.cmpi eq, %arg1, %c0_i32 : i32
    %1 = arith.extui %0 : i1 to i32
    %c0_i32_0 = arith.constant 0 : i32
    %2 = arith.cmpi ne, %1, %c0_i32_0 : i32
    scf.if %2 {
      %c0_71 = arith.constant 0 : index
      %c0_72 = arith.constant 0 : index
      %c0_73 = arith.constant 0 : index
      %150 = vector.load %arg2[%c0_71, %c0_72, %c0_73] : memref<1x16x192xbf16, #tpu.memory_space<vmem>>, vector<1x16x192xbf16>
      %151 = vector.shape_cast %150 : vector<1x16x192xbf16> to vector<16x192xbf16>
      %c0_74 = arith.constant 0 : index
      %c0_75 = arith.constant 0 : index
      %152 = vector.load %arg3[%c0_74, %c0_75] : memref<192x32xbf16, #tpu.memory_space<vmem>>, vector<192x32xbf16>
      %cst_76 = arith.constant dense<0.000000e+00> : vector<16x32xf32>
      %153 = tpu.matmul %151, %152, %cst_76 {dimension_numbers = #tpu.dot_dimension_numbers<[1], [0], [0], [1], [0, 0, 1, 1], [], []>} : vector<16x192xbf16>, vector<192x32xbf16>, vector<16x32xf32> -> vector<16x32xf32>
      %c0_77 = arith.constant 0 : index
      %c0_78 = arith.constant 0 : index
      %154 = vector.load %arg4[%c0_77, %c0_78] : memref<1x32xf32, #tpu.memory_space<vmem>>, vector<1x32xf32>
      %155 = vector.broadcast %154 : vector<1x32xf32> to vector<16x32xf32>
      %156 = arith.addf %153, %155 : vector<16x32xf32>
      %c0_79 = arith.constant 0 : index
      %c0_80 = arith.constant 0 : index
      %c0_81 = arith.constant 0 : index
      %157 = vector.load %arg5[%c0_79, %c0_80, %c0_81] : memref<1x16x32xf32, #tpu.memory_space<vmem>>, vector<1x16x32xf32>
      %158 = vector.shape_cast %157 : vector<1x16x32xf32> to vector<16x32xf32>
      %159 = arith.addf %156, %158 : vector<16x32xf32>
      %c0_82 = arith.constant 0 : index
      %c0_83 = arith.constant 0 : index
      %c0_84 = arith.constant 0 : index
      %160 = vector.load %arg18[%c0_82, %c0_83, %c0_84] : memref<1x16x32xf32, #tpu.memory_space<vmem>>, vector<1x16x32xf32>
      %161 = vector.shape_cast %160 : vector<1x16x32xf32> to vector<16x32xf32>
      %162 = vector.shape_cast %159 : vector<16x32xf32> to vector<1x16x32xf32>
      tpu.vector_store %arg18[%c0_82, %c0_83, %c0_84], %162 {strides = array<i32>} : memref<1x16x32xf32, #tpu.memory_space<vmem>>, vector<1x16x32xf32>,
    } else {
    }
    %c0 = arith.constant 0 : index
    %c0_1 = arith.constant 0 : index
    %c0_2 = arith.constant 0 : index
    %3 = vector.load %arg18[%c0, %c0_1, %c0_2] : memref<1x16x32xf32, #tpu.memory_space<vmem>>, vector<1x16x32xf32>
    %4 = vector.shape_cast %3 : vector<1x16x32xf32> to vector<16x32xf32>
    %cst = arith.constant dense<0.000000e+00> : vector<16xf32>
    %5 = vector.multi_reduction <add>, %4, %cst [1] : vector<16x32xf32> to vector<16xf32>
    %6 = vector.shape_cast %5 : vector<16xf32> to vector<16x1xf32>
    %cst_3 = arith.constant 3.200000e+01 : f32
    %7 = vector.broadcast %cst_3 : f32 to vector<16x1xf32>
    %8 = arith.divf %6, %7 : vector<16x1xf32>
    %9 = vector.broadcast %8 : vector<16x1xf32> to vector<16x32xf32>
    %10 = arith.subf %4, %9 : vector<16x32xf32>
    %11 = arith.mulf %10, %10 : vector<16x32xf32>
    %cst_4 = arith.constant dense<0.000000e+00> : vector<16xf32>
    %12 = vector.multi_reduction <add>, %11, %cst_4 [1] : vector<16x32xf32> to vector<16xf32>
    %13 = vector.shape_cast %12 : vector<16xf32> to vector<16x1xf32>
    %cst_5 = arith.constant 3.200000e+01 : f32
    %14 = vector.broadcast %cst_5 : f32 to vector<16x1xf32>
    %15 = arith.divf %13, %14 : vector<16x1xf32>
    %cst_6 = arith.constant 9.99999997E-7 : f32
    %16 = vector.broadcast %cst_6 : f32 to vector<16x1xf32>
    %17 = arith.addf %15, %16 : vector<16x1xf32>
    %18 = math.rsqrt %17 : vector<16x1xf32>
    %19 = vector.broadcast %18 : vector<16x1xf32> to vector<16x32xf32>
    %20 = arith.mulf %10, %19 : vector<16x32xf32>
    %c0_7 = arith.constant 0 : index
    %c0_8 = arith.constant 0 : index
    %c0_9 = arith.constant 0 : index
    %21 = vector.load %arg6[%c0_7, %c0_8, %c0_9] : memref<1x1x32xf32, #tpu.memory_space<vmem>>, vector<1x1x32xf32>
    %22 = vector.shape_cast %21 : vector<1x1x32xf32> to vector<1x32xf32>
    %23 = vector.broadcast %22 : vector<1x32xf32> to vector<16x32xf32>
    %24 = arith.mulf %20, %23 : vector<16x32xf32>
    %c0_10 = arith.constant 0 : index
    %c0_11 = arith.constant 0 : index
    %c0_12 = arith.constant 0 : index
    %25 = vector.load %arg7[%c0_10, %c0_11, %c0_12] : memref<1x1x32xf32, #tpu.memory_space<vmem>>, vector<1x1x32xf32>
    %26 = vector.shape_cast %25 : vector<1x1x32xf32> to vector<1x32xf32>
    %27 = vector.broadcast %26 : vector<1x32xf32> to vector<16x32xf32>
    %28 = arith.addf %24, %27 : vector<16x32xf32>
    %c0_13 = arith.constant 0 : index
    %c0_14 = arith.constant 0 : index
    %c0_15 = arith.constant 0 : index
    %29 = vector.load %arg8[%c0_13, %c0_14, %c0_15] : memref<1x32x96xbf16, #tpu.memory_space<vmem>>, vector<1x32x96xbf16>
    %30 = vector.shape_cast %29 : vector<1x32x96xbf16> to vector<32x96xbf16>
    %31 = arith.truncf %28 : vector<16x32xf32> to vector<16x32xbf16>
    %cst_16 = arith.constant dense<0.000000e+00> : vector<16x96xf32>
    %32 = tpu.matmul %31, %30, %cst_16 {dimension_numbers = #tpu.dot_dimension_numbers<[1], [0], [0], [1], [0, 0, 1, 1], [], []>} : vector<16x32xbf16>, vector<32x96xbf16>, vector<16x96xf32> -> vector<16x96xf32>
    %c0_17 = arith.constant 0 : index
    %c0_18 = arith.constant 0 : index
    %c0_19 = arith.constant 0 : index
    %33 = vector.load %arg9[%c0_17, %c0_18, %c0_19] : memref<1x1x96xf32, #tpu.memory_space<vmem>>, vector<1x1x96xf32>
    %34 = vector.shape_cast %33 : vector<1x1x96xf32> to vector<1x96xf32>
    %35 = vector.broadcast %34 : vector<1x96xf32> to vector<16x96xf32>
    %36 = arith.addf %32, %35 : vector<16x96xf32>
    %c0_20 = arith.constant 0 : index
    %c0_21 = arith.constant 0 : index
    %c0_22 = arith.constant 0 : index
    %37 = vector.load %arg10[%c0_20, %c0_21, %c0_22] : memref<1x32x32xbf16, #tpu.memory_space<vmem>>, vector<1x32x32xbf16>
    %38 = vector.shape_cast %37 : vector<1x32x32xbf16> to vector<32x32xbf16>
    %cst_23 = arith.constant 0.000000e+00 : f32
    %39 = vector.broadcast %cst_23 : f32 to vector<16x32xf32>
    %40 = vector.extract_strided_slice %36 {offsets = [0, 0], sizes = [16, 16], strides = [1, 1]} : vector<16x96xf32> to vector<16x16xf32>
    %41 = vector.extract_strided_slice %36 {offsets = [0, 32], sizes = [16, 16], strides = [1, 1]} : vector<16x96xf32> to vector<16x16xf32>
    %42 = vector.extract_strided_slice %36 {offsets = [0, 64], sizes = [16, 16], strides = [1, 1]} : vector<16x96xf32> to vector<16x16xf32>
    %43 = arith.truncf %40 : vector<16x16xf32> to vector<16x16xbf16>
    %44 = arith.truncf %41 : vector<16x16xf32> to vector<16x16xbf16>
    %cst_24 = arith.constant dense<0.000000e+00> : vector<16x16xf32>
    %45 = tpu.matmul %43, %44, %cst_24 {dimension_numbers = #tpu.dot_dimension_numbers<[1], [1], [0], [0], [0, 0, 1, 0], [], []>} : vector<16x16xbf16>, vector<16x16xbf16>, vector<16x16xf32> -> vector<16x16xf32>
    %cst_25 = arith.constant 2.500000e-01 : f32
    %46 = vector.broadcast %cst_25 : f32 to vector<16x16xf32>
    %47 = arith.mulf %45, %46 : vector<16x16xf32>
    %cst_26 = arith.constant dense<0xFF800000> : vector<16xf32>
    %48 = vector.multi_reduction <maximumf>, %47, %cst_26 [1] : vector<16x16xf32> to vector<16xf32>
    %49 = vector.shape_cast %48 : vector<16xf32> to vector<16x1xf32>
    %50 = vector.broadcast %49 : vector<16x1xf32> to vector<16x16xf32>
    %51 = arith.subf %47, %50 : vector<16x16xf32>
    %52 = math.exp %51 : vector<16x16xf32>
    %cst_27 = arith.constant dense<0.000000e+00> : vector<16xf32>
    %53 = vector.multi_reduction <add>, %52, %cst_27 [1] : vector<16x16xf32> to vector<16xf32>
    %54 = vector.shape_cast %53 : vector<16xf32> to vector<16x1xf32>
    %55 = vector.broadcast %54 : vector<16x1xf32> to vector<16x16xf32>
    %56 = arith.divf %52, %55 : vector<16x16xf32>
    %57 = arith.truncf %56 : vector<16x16xf32> to vector<16x16xbf16>
    %58 = arith.truncf %42 : vector<16x16xf32> to vector<16x16xbf16>
    %cst_28 = arith.constant dense<0.000000e+00> : vector<16x16xf32>
    %59 = tpu.matmul %57, %58, %cst_28 {dimension_numbers = #tpu.dot_dimension_numbers<[1], [0], [0], [1], [0, 0, 1, 1], [], []>} : vector<16x16xbf16>, vector<16x16xbf16>, vector<16x16xf32> -> vector<16x16xf32>
    %60 = vector.extract_strided_slice %38 {offsets = [0, 0], sizes = [16, 32], strides = [1, 1]} : vector<32x32xbf16> to vector<16x32xbf16>
    %61 = arith.truncf %59 : vector<16x16xf32> to vector<16x16xbf16>
    %cst_29 = arith.constant dense<0.000000e+00> : vector<16x32xf32>
    %62 = tpu.matmul %61, %60, %cst_29 {dimension_numbers = #tpu.dot_dimension_numbers<[1], [0], [0], [1], [0, 0, 1, 1], [], []>} : vector<16x16xbf16>, vector<16x32xbf16>, vector<16x32xf32> -> vector<16x32xf32>
    %63 = arith.addf %39, %62 : vector<16x32xf32>
    %64 = vector.extract_strided_slice %36 {offsets = [0, 16], sizes = [16, 16], strides = [1, 1]} : vector<16x96xf32> to vector<16x16xf32>
    %65 = vector.extract_strided_slice %36 {offsets = [0, 48], sizes = [16, 16], strides = [1, 1]} : vector<16x96xf32> to vector<16x16xf32>
    %66 = vector.extract_strided_slice %36 {offsets = [0, 80], sizes = [16, 16], strides = [1, 1]} : vector<16x96xf32> to vector<16x16xf32>
    %67 = arith.truncf %64 : vector<16x16xf32> to vector<16x16xbf16>
    %68 = arith.truncf %65 : vector<16x16xf32> to vector<16x16xbf16>
    %cst_30 = arith.constant dense<0.000000e+00> : vector<16x16xf32>
    %69 = tpu.matmul %67, %68, %cst_30 {dimension_numbers = #tpu.dot_dimension_numbers<[1], [1], [0], [0], [0, 0, 1, 0], [], []>} : vector<16x16xbf16>, vector<16x16xbf16>, vector<16x16xf32> -> vector<16x16xf32>
    %cst_31 = arith.constant 2.500000e-01 : f32
    %70 = vector.broadcast %cst_31 : f32 to vector<16x16xf32>
    %71 = arith.mulf %69, %70 : vector<16x16xf32>
    %cst_32 = arith.constant dense<0xFF800000> : vector<16xf32>
    %72 = vector.multi_reduction <maximumf>, %71, %cst_32 [1] : vector<16x16xf32> to vector<16xf32>
    %73 = vector.shape_cast %72 : vector<16xf32> to vector<16x1xf32>
    %74 = vector.broadcast %73 : vector<16x1xf32> to vector<16x16xf32>
    %75 = arith.subf %71, %74 : vector<16x16xf32>
    %76 = math.exp %75 : vector<16x16xf32>
    %cst_33 = arith.constant dense<0.000000e+00> : vector<16xf32>
    %77 = vector.multi_reduction <add>, %76, %cst_33 [1] : vector<16x16xf32> to vector<16xf32>
    %78 = vector.shape_cast %77 : vector<16xf32> to vector<16x1xf32>
    %79 = vector.broadcast %78 : vector<16x1xf32> to vector<16x16xf32>
    %80 = arith.divf %76, %79 : vector<16x16xf32>
    %81 = arith.truncf %80 : vector<16x16xf32> to vector<16x16xbf16>
    %82 = arith.truncf %66 : vector<16x16xf32> to vector<16x16xbf16>
    %cst_34 = arith.constant dense<0.000000e+00> : vector<16x16xf32>
    %83 = tpu.matmul %81, %82, %cst_34 {dimension_numbers = #tpu.dot_dimension_numbers<[1], [0], [0], [1], [0, 0, 1, 1], [], []>} : vector<16x16xbf16>, vector<16x16xbf16>, vector<16x16xf32> -> vector<16x16xf32>
    %84 = vector.extract_strided_slice %38 {offsets = [16, 0], sizes = [16, 32], strides = [1, 1]} : vector<32x32xbf16> to vector<16x32xbf16>
    %85 = arith.truncf %83 : vector<16x16xf32> to vector<16x16xbf16>
    %cst_35 = arith.constant dense<0.000000e+00> : vector<16x32xf32>
    %86 = tpu.matmul %85, %84, %cst_35 {dimension_numbers = #tpu.dot_dimension_numbers<[1], [0], [0], [1], [0, 0, 1, 1], [], []>} : vector<16x16xbf16>, vector<16x32xbf16>, vector<16x32xf32> -> vector<16x32xf32>
    %87 = arith.addf %63, %86 : vector<16x32xf32>
    %88 = arith.addf %4, %87 : vector<16x32xf32>
    %c0_36 = arith.constant 0 : index
    %c0_37 = arith.constant 0 : index
    %c0_38 = arith.constant 0 : index
    %89 = vector.load %arg11[%c0_36, %c0_37, %c0_38] : memref<1x1x32xf32, #tpu.memory_space<vmem>>, vector<1x1x32xf32>
    %90 = vector.shape_cast %89 : vector<1x1x32xf32> to vector<1x32xf32>
    %91 = vector.broadcast %90 : vector<1x32xf32> to vector<16x32xf32>
    %92 = arith.addf %88, %91 : vector<16x32xf32>
    %cst_39 = arith.constant dense<0.000000e+00> : vector<16xf32>
    %93 = vector.multi_reduction <add>, %92, %cst_39 [1] : vector<16x32xf32> to vector<16xf32>
    %94 = vector.shape_cast %93 : vector<16xf32> to vector<16x1xf32>
    %cst_40 = arith.constant 3.200000e+01 : f32
    %95 = vector.broadcast %cst_40 : f32 to vector<16x1xf32>
    %96 = arith.divf %94, %95 : vector<16x1xf32>
    %97 = vector.broadcast %96 : vector<16x1xf32> to vector<16x32xf32>
    %98 = arith.subf %92, %97 : vector<16x32xf32>
    %99 = arith.mulf %98, %98 : vector<16x32xf32>
    %cst_41 = arith.constant dense<0.000000e+00> : vector<16xf32>
    %100 = vector.multi_reduction <add>, %99, %cst_41 [1] : vector<16x32xf32> to vector<16xf32>
    %101 = vector.shape_cast %100 : vector<16xf32> to vector<16x1xf32>
    %cst_42 = arith.constant 3.200000e+01 : f32
    %102 = vector.broadcast %cst_42 : f32 to vector<16x1xf32>
    %103 = arith.divf %101, %102 : vector<16x1xf32>
    %cst_43 = arith.constant 9.99999997E-7 : f32
    %104 = vector.broadcast %cst_43 : f32 to vector<16x1xf32>
    %105 = arith.addf %103, %104 : vector<16x1xf32>
    %106 = math.rsqrt %105 : vector<16x1xf32>
    %107 = vector.broadcast %106 : vector<16x1xf32> to vector<16x32xf32>
    %108 = arith.mulf %98, %107 : vector<16x32xf32>
    %c0_44 = arith.constant 0 : index
    %c0_45 = arith.constant 0 : index
    %c0_46 = arith.constant 0 : index
    %109 = vector.load %arg12[%c0_44, %c0_45, %c0_46] : memref<1x1x32xf32, #tpu.memory_space<vmem>>, vector<1x1x32xf32>
    %110 = vector.shape_cast %109 : vector<1x1x32xf32> to vector<1x32xf32>
    %111 = vector.broadcast %110 : vector<1x32xf32> to vector<16x32xf32>
    %112 = arith.mulf %108, %111 : vector<16x32xf32>
    %c0_47 = arith.constant 0 : index
    %c0_48 = arith.constant 0 : index
    %c0_49 = arith.constant 0 : index
    %113 = vector.load %arg13[%c0_47, %c0_48, %c0_49] : memref<1x1x32xf32, #tpu.memory_space<vmem>>, vector<1x1x32xf32>
    %114 = vector.shape_cast %113 : vector<1x1x32xf32> to vector<1x32xf32>
    %115 = vector.broadcast %114 : vector<1x32xf32> to vector<16x32xf32>
    %116 = arith.addf %112, %115 : vector<16x32xf32>
    %c0_50 = arith.constant 0 : index
    %c0_51 = arith.constant 0 : index
    %c0_52 = arith.constant 0 : index
    %117 = vector.load %arg14[%c0_50, %c0_51, %c0_52] : memref<1x32x64xbf16, #tpu.memory_space<vmem>>, vector<1x32x64xbf16>
    %118 = vector.shape_cast %117 : vector<1x32x64xbf16> to vector<32x64xbf16>
    %119 = arith.truncf %116 : vector<16x32xf32> to vector<16x32xbf16>
    %cst_53 = arith.constant dense<0.000000e+00> : vector<16x64xf32>
    %120 = tpu.matmul %119, %118, %cst_53 {dimension_numbers = #tpu.dot_dimension_numbers<[1], [0], [0], [1], [0, 0, 1, 1], [], []>} : vector<16x32xbf16>, vector<32x64xbf16>, vector<16x64xf32> -> vector<16x64xf32>
    %c0_54 = arith.constant 0 : index
    %c0_55 = arith.constant 0 : index
    %c0_56 = arith.constant 0 : index
    %121 = vector.load %arg15[%c0_54, %c0_55, %c0_56] : memref<1x1x64xf32, #tpu.memory_space<vmem>>, vector<1x1x64xf32>
    %122 = vector.shape_cast %121 : vector<1x1x64xf32> to vector<1x64xf32>
    %123 = vector.broadcast %122 : vector<1x64xf32> to vector<16x64xf32>
    %124 = arith.addf %120, %123 : vector<16x64xf32>
    %125 = arith.mulf %124, %124 : vector<16x64xf32>
    %126 = arith.mulf %124, %125 : vector<16x64xf32>
    %cst_57 = arith.constant 4.471500e-02 : f32
    %127 = vector.broadcast %cst_57 : f32 to vector<16x64xf32>
    %128 = arith.mulf %127, %126 : vector<16x64xf32>
    %129 = arith.addf %124, %128 : vector<16x64xf32>
    %cst_58 = arith.constant 0.797884583 : f32
    %130 = vector.broadcast %cst_58 : f32 to vector<16x64xf32>
    %131 = arith.mulf %130, %129 : vector<16x64xf32>
    %132 = math.tanh %131 : vector<16x64xf32>
    %cst_59 = arith.constant 1.000000e+00 : f32
    %133 = vector.broadcast %cst_59 : f32 to vector<16x64xf32>
    %134 = arith.addf %133, %132 : vector<16x64xf32>
    %cst_60 = arith.constant 5.000000e-01 : f32
    %135 = vector.broadcast %cst_60 : f32 to vector<16x64xf32>
    %136 = arith.mulf %135, %134 : vector<16x64xf32>
    %137 = arith.mulf %124, %136 : vector<16x64xf32>
    %c0_61 = arith.constant 0 : index
    %c0_62 = arith.constant 0 : index
    %c0_63 = arith.constant 0 : index
    %138 = vector.load %arg16[%c0_61, %c0_62, %c0_63] : memref<1x64x32xbf16, #tpu.memory_space<vmem>>, vector<1x64x32xbf16>
    %139 = vector.shape_cast %138 : vector<1x64x32xbf16> to vector<64x32xbf16>
    %140 = arith.truncf %137 : vector<16x64xf32> to vector<16x64xbf16>
    %cst_64 = arith.constant dense<0.000000e+00> : vector<16x32xf32>
    %141 = tpu.matmul %140, %139, %cst_64 {dimension_numbers = #tpu.dot_dimension_numbers<[1], [0], [0], [1], [0, 0, 1, 1], [], []>} : vector<16x64xbf16>, vector<64x32xbf16>, vector<16x32xf32> -> vector<16x32xf32>
    %142 = arith.addf %92, %141 : vector<16x32xf32>
    %c0_65 = arith.constant 0 : index
    %c0_66 = arith.constant 0 : index
    %c0_67 = arith.constant 0 : index
    %143 = vector.load %arg17[%c0_65, %c0_66, %c0_67] : memref<1x1x32xf32, #tpu.memory_space<vmem>>, vector<1x1x32xf32>
    %144 = vector.shape_cast %143 : vector<1x1x32xf32> to vector<1x32xf32>
    %145 = vector.broadcast %144 : vector<1x32xf32> to vector<16x32xf32>
    %146 = arith.addf %142, %145 : vector<16x32xf32>
    %c0_68 = arith.constant 0 : index
    %c0_69 = arith.constant 0 : index
    %c0_70 = arith.constant 0 : index
    %147 = vector.load %arg18[%c0_68, %c0_69, %c0_70] : memref<1x16x32xf32, #tpu.memory_space<vmem>>, vector<1x16x32xf32>
    %148 = vector.shape_cast %147 : vector<1x16x32xf32> to vector<16x32xf32>
    %149 = vector.shape_cast %146 : vector<16x32xf32> to vector<1x16x32xf32>
    tpu.vector_store %arg18[%c0_68, %c0_69, %c0_70], %149 {strides = array<i32>} : memref<1x16x32xf32, #tpu.memory_space<vmem>>, vector<1x16x32xf32>,
    return
  }
  func.func @transform_0(%arg0: i32, %arg1: i32) -> (i32, i32, i32) {
    %c0_i32 = arith.constant 0 : i32
    %c0_i32_0 = arith.constant 0 : i32
    %c0_i32_1 = arith.constant 0 : i32
    return %arg0, %c0_i32, %c0_i32_0 : i32, i32, i32
  }
  func.func @transform_1(%arg0: i32, %arg1: i32) -> (i32, i32) {
    %c0_i32 = arith.constant 0 : i32
    %c0_i32_0 = arith.constant 0 : i32
    %c0_i32_1 = arith.constant 0 : i32
    return %c0_i32, %c0_i32_0 : i32, i32
  }
  func.func @transform_2(%arg0: i32, %arg1: i32) -> (i32, i32) {
    %c0_i32 = arith.constant 0 : i32
    %c0_i32_0 = arith.constant 0 : i32
    %c0_i32_1 = arith.constant 0 : i32
    return %c0_i32, %c0_i32_0 : i32, i32
  }
  func.func @transform_3(%arg0: i32, %arg1: i32) -> (i32, i32, i32) {
    %c0_i32 = arith.constant 0 : i32
    %c0_i32_0 = arith.constant 0 : i32
    %c0_i32_1 = arith.constant 0 : i32
    %c0_i32_2 = arith.constant 0 : i32
    return %c0_i32, %c0_i32_0, %c0_i32_1 : i32, i32, i32
  }
  func.func @transform_4(%arg0: i32, %arg1: i32) -> (i32, i32, i32) {
    %c0_i32 = arith.constant 0 : i32
    %c0_i32_0 = arith.constant 0 : i32
    %c0_i32_1 = arith.constant 0 : i32
    return %arg1, %c0_i32, %c0_i32_0 : i32, i32, i32
  }
  func.func @transform_5(%arg0: i32, %arg1: i32) -> (i32, i32, i32) {
    %c0_i32 = arith.constant 0 : i32
    %c0_i32_0 = arith.constant 0 : i32
    %c0_i32_1 = arith.constant 0 : i32
    return %arg1, %c0_i32, %c0_i32_0 : i32, i32, i32
  }
  func.func @transform_6(%arg0: i32, %arg1: i32) -> (i32, i32, i32) {
    %c0_i32 = arith.constant 0 : i32
    %c0_i32_0 = arith.constant 0 : i32
    %c0_i32_1 = arith.constant 0 : i32
    return %arg1, %c0_i32, %c0_i32_0 : i32, i32, i32
  }
  func.func @transform_7(%arg0: i32, %arg1: i32) -> (i32, i32, i32) {
    %c0_i32 = arith.constant 0 : i32
    %c0_i32_0 = arith.constant 0 : i32
    %c0_i32_1 = arith.constant 0 : i32
    return %arg1, %c0_i32, %c0_i32_0 : i32, i32, i32
  }
  func.func @transform_8(%arg0: i32, %arg1: i32) -> (i32, i32, i32) {
    %c0_i32 = arith.constant 0 : i32
    %c0_i32_0 = arith.constant 0 : i32
    %c0_i32_1 = arith.constant 0 : i32
    return %arg1, %c0_i32, %c0_i32_0 : i32, i32, i32
  }
  func.func @transform_9(%arg0: i32, %arg1: i32) -> (i32, i32, i32) {
    %c0_i32 = arith.constant 0 : i32
    %c0_i32_0 = arith.constant 0 : i32
    %c0_i32_1 = arith.constant 0 : i32
    return %arg1, %c0_i32, %c0_i32_0 : i32, i32, i32
  }
  func.func @transform_10(%arg0: i32, %arg1: i32) -> (i32, i32, i32) {
    %c0_i32 = arith.constant 0 : i32
    %c0_i32_0 = arith.constant 0 : i32
    %c0_i32_1 = arith.constant 0 : i32
    return %arg1, %c0_i32, %c0_i32_0 : i32, i32, i32
  }
  func.func @transform_11(%arg0: i32, %arg1: i32) -> (i32, i32, i32) {
    %c0_i32 = arith.constant 0 : i32
    %c0_i32_0 = arith.constant 0 : i32
    %c0_i32_1 = arith.constant 0 : i32
    return %arg1, %c0_i32, %c0_i32_0 : i32, i32, i32
  }
  func.func @transform_12(%arg0: i32, %arg1: i32) -> (i32, i32, i32) {
    %c0_i32 = arith.constant 0 : i32
    %c0_i32_0 = arith.constant 0 : i32
    %c0_i32_1 = arith.constant 0 : i32
    return %arg1, %c0_i32, %c0_i32_0 : i32, i32, i32
  }
  func.func @transform_13(%arg0: i32, %arg1: i32) -> (i32, i32, i32) {
    %c0_i32 = arith.constant 0 : i32
    %c0_i32_0 = arith.constant 0 : i32
    %c0_i32_1 = arith.constant 0 : i32
    return %arg1, %c0_i32, %c0_i32_0 : i32, i32, i32
  }
  func.func @transform_14(%arg0: i32, %arg1: i32) -> (i32, i32, i32) {
    %c0_i32 = arith.constant 0 : i32
    %c0_i32_0 = arith.constant 0 : i32
    %c0_i32_1 = arith.constant 0 : i32
    return %arg1, %c0_i32, %c0_i32_0 : i32, i32, i32
  }
  func.func @transform_15(%arg0: i32, %arg1: i32) -> (i32, i32, i32) {
    %c0_i32 = arith.constant 0 : i32
    %c0_i32_0 = arith.constant 0 : i32
    %c0_i32_1 = arith.constant 0 : i32
    return %arg1, %c0_i32, %c0_i32_0 : i32, i32, i32
  }
  func.func @transform_16(%arg0: i32, %arg1: i32) -> (i32, i32, i32) {
    %c0_i32 = arith.constant 0 : i32
    %c0_i32_0 = arith.constant 0 : i32
    %c0_i32_1 = arith.constant 0 : i32
    return %arg0, %c0_i32, %c0_i32_0 : i32, i32, i32
  }
}

module attributes {stable_mosaic.version = 11 : i64} {
  func.func @_conv_block_kernel(%arg0: i32, %arg1: memref<1x4x4x32xbf16, #tpu.memory_space<vmem>>, %arg2: memref<32x32xbf16, #tpu.memory_space<vmem>>, %arg3: memref<1x32xf32, #tpu.memory_space<vmem>>, %arg4: memref<1x32xf32, #tpu.memory_space<vmem>>, %arg5: memref<9x32x32xbf16, #tpu.memory_space<vmem>>, %arg6: memref<1x32xf32, #tpu.memory_space<vmem>>, %arg7: memref<1x32xf32, #tpu.memory_space<vmem>>, %arg8: memref<1x16x32xbf16, #tpu.memory_space<vmem>>, %arg9: memref<13x13x32xf32, #tpu.memory_space<vmem>>) attributes {dimension_semantics = [#tpu.dimension_semantics<parallel>], iteration_bounds = array<i64: 2>, scalar_prefetch = 0 : i64, scratch_operands = 1 : i64, tpu.core_type = #tpu.core_type<tc>, window_params = [{transform_indices = @transform_0, window_bounds = array<i64: 1, 4, 4, 32>}, {pipeline_mode = #tpu.pipeline_mode<synchronous>, transform_indices = @transform_1, window_bounds = array<i64: 32, 32>}, {pipeline_mode = #tpu.pipeline_mode<synchronous>, transform_indices = @transform_2, window_bounds = array<i64: 1, 32>}, {pipeline_mode = #tpu.pipeline_mode<synchronous>, transform_indices = @transform_3, window_bounds = array<i64: 1, 32>}, {pipeline_mode = #tpu.pipeline_mode<synchronous>, transform_indices = @transform_4, window_bounds = array<i64: 9, 32, 32>}, {pipeline_mode = #tpu.pipeline_mode<synchronous>, transform_indices = @transform_5, window_bounds = array<i64: 1, 32>}, {pipeline_mode = #tpu.pipeline_mode<synchronous>, transform_indices = @transform_6, window_bounds = array<i64: 1, 32>}, {transform_indices = @transform_7, window_bounds = array<i64: 1, 16, 32>}]} {
    %c0 = arith.constant 0 : index
    %c0_0 = arith.constant 0 : index
    %c0_1 = arith.constant 0 : index
    %c0_2 = arith.constant 0 : index
    %0 = vector.load %arg1[%c0, %c0_0, %c0_1, %c0_2] : memref<1x4x4x32xbf16, #tpu.memory_space<vmem>>, vector<1x4x4x32xbf16>
    %1 = vector.shape_cast %0 : vector<1x4x4x32xbf16> to vector<4x4x32xbf16>
    %2 = vector.shape_cast %1 : vector<4x4x32xbf16> to vector<16x32xbf16>
    %c0_3 = arith.constant 0 : index
    %c0_4 = arith.constant 0 : index
    %3 = vector.load %arg2[%c0_3, %c0_4] : memref<32x32xbf16, #tpu.memory_space<vmem>>, vector<32x32xbf16>
    %cst = arith.constant dense<0.000000e+00> : vector<16x32xf32>
    %4 = tpu.matmul %2, %3, %cst {dimension_numbers = #tpu.dot_dimension_numbers<[1], [0], [0], [1], [0, 0, 1, 1], [], []>} : vector<16x32xbf16>, vector<32x32xbf16>, vector<16x32xf32> -> vector<16x32xf32>
    %cst_5 = arith.constant dense<0.000000e+00> : vector<16xf32>
    %5 = vector.multi_reduction <add>, %4, %cst_5 [1] : vector<16x32xf32> to vector<16xf32>
    %6 = vector.shape_cast %5 : vector<16xf32> to vector<16x1xf32>
    %cst_6 = arith.constant 3.200000e+01 : f32
    %7 = vector.broadcast %cst_6 : f32 to vector<16x1xf32>
    %8 = arith.divf %6, %7 : vector<16x1xf32>
    %9 = vector.broadcast %8 : vector<16x1xf32> to vector<16x32xf32>
    %10 = arith.subf %4, %9 : vector<16x32xf32>
    %11 = arith.mulf %10, %10 : vector<16x32xf32>
    %cst_7 = arith.constant dense<0.000000e+00> : vector<16xf32>
    %12 = vector.multi_reduction <add>, %11, %cst_7 [1] : vector<16x32xf32> to vector<16xf32>
    %13 = vector.shape_cast %12 : vector<16xf32> to vector<16x1xf32>
    %cst_8 = arith.constant 3.200000e+01 : f32
    %14 = vector.broadcast %cst_8 : f32 to vector<16x1xf32>
    %15 = arith.divf %13, %14 : vector<16x1xf32>
    %cst_9 = arith.constant 9.99999997E-7 : f32
    %16 = vector.broadcast %cst_9 : f32 to vector<16x1xf32>
    %17 = arith.addf %15, %16 : vector<16x1xf32>
    %18 = math.rsqrt %17 : vector<16x1xf32>
    %19 = vector.broadcast %18 : vector<16x1xf32> to vector<16x32xf32>
    %20 = arith.mulf %10, %19 : vector<16x32xf32>
    %c0_10 = arith.constant 0 : index
    %c0_11 = arith.constant 0 : index
    %21 = vector.load %arg3[%c0_10, %c0_11] : memref<1x32xf32, #tpu.memory_space<vmem>>, vector<1x32xf32>
    %22 = vector.broadcast %21 : vector<1x32xf32> to vector<16x32xf32>
    %23 = arith.mulf %20, %22 : vector<16x32xf32>
    %c0_12 = arith.constant 0 : index
    %c0_13 = arith.constant 0 : index
    %24 = vector.load %arg4[%c0_12, %c0_13] : memref<1x32xf32, #tpu.memory_space<vmem>>, vector<1x32xf32>
    %25 = vector.broadcast %24 : vector<1x32xf32> to vector<16x32xf32>
    %26 = arith.addf %23, %25 : vector<16x32xf32>
    %cst_14 = arith.constant 0.000000e+00 : f32
    %27 = vector.broadcast %cst_14 : f32 to vector<13x13x32xf32>
    %c0_15 = arith.constant 0 : index
    %c0_16 = arith.constant 0 : index
    %c0_17 = arith.constant 0 : index
    %28 = vector.load %arg9[%c0_15, %c0_16, %c0_17] : memref<13x13x32xf32, #tpu.memory_space<vmem>>, vector<13x13x32xf32>
    tpu.vector_store %arg9[%c0_15, %c0_16, %c0_17], %27 {strides = array<i32>} : memref<13x13x32xf32, #tpu.memory_space<vmem>>, vector<13x13x32xf32>,
    %29 = vector.shape_cast %26 : vector<16x32xf32> to vector<4x4x32xf32>
    %c8 = arith.constant 8 : index
    %c8_18 = arith.constant 8 : index
    %c0_19 = arith.constant 0 : index
    %30 = vector.load %arg9[%c8, %c8_18, %c0_19] : memref<13x13x32xf32, #tpu.memory_space<vmem>>, vector<4x4x32xf32>
    tpu.vector_store %arg9[%c8, %c8_18, %c0_19], %29 {strides = array<i32>} : memref<13x13x32xf32, #tpu.memory_space<vmem>>, vector<4x4x32xf32>,
    %cst_20 = arith.constant 0.000000e+00 : f32
    %31 = vector.broadcast %cst_20 : f32 to vector<16x32xf32>
    %c7 = arith.constant 7 : index
    %c7_21 = arith.constant 7 : index
    %c0_22 = arith.constant 0 : index
    %32 = vector.load %arg9[%c7, %c7_21, %c0_22] : memref<13x13x32xf32, #tpu.memory_space<vmem>>, vector<4x4x32xf32>
    %33 = vector.shape_cast %32 : vector<4x4x32xf32> to vector<16x32xf32>
    %c0_23 = arith.constant 0 : index
    %c0_24 = arith.constant 0 : index
    %c0_25 = arith.constant 0 : index
    %34 = vector.load %arg5[%c0_23, %c0_24, %c0_25] : memref<9x32x32xbf16, #tpu.memory_space<vmem>>, vector<1x32x32xbf16>
    %35 = vector.shape_cast %34 : vector<1x32x32xbf16> to vector<32x32xbf16>
    %36 = arith.truncf %33 : vector<16x32xf32> to vector<16x32xbf16>
    %cst_26 = arith.constant dense<0.000000e+00> : vector<16x32xf32>
    %37 = tpu.matmul %36, %35, %cst_26 {dimension_numbers = #tpu.dot_dimension_numbers<[1], [0], [0], [1], [0, 0, 1, 1], [], []>} : vector<16x32xbf16>, vector<32x32xbf16>, vector<16x32xf32> -> vector<16x32xf32>
    %38 = arith.addf %31, %37 : vector<16x32xf32>
    %c7_27 = arith.constant 7 : index
    %c8_28 = arith.constant 8 : index
    %c0_29 = arith.constant 0 : index
    %39 = vector.load %arg9[%c7_27, %c8_28, %c0_29] : memref<13x13x32xf32, #tpu.memory_space<vmem>>, vector<4x4x32xf32>
    %40 = vector.shape_cast %39 : vector<4x4x32xf32> to vector<16x32xf32>
    %c1 = arith.constant 1 : index
    %c0_30 = arith.constant 0 : index
    %c0_31 = arith.constant 0 : index
    %41 = vector.load %arg5[%c1, %c0_30, %c0_31] : memref<9x32x32xbf16, #tpu.memory_space<vmem>>, vector<1x32x32xbf16>
    %42 = vector.shape_cast %41 : vector<1x32x32xbf16> to vector<32x32xbf16>
    %43 = arith.truncf %40 : vector<16x32xf32> to vector<16x32xbf16>
    %cst_32 = arith.constant dense<0.000000e+00> : vector<16x32xf32>
    %44 = tpu.matmul %43, %42, %cst_32 {dimension_numbers = #tpu.dot_dimension_numbers<[1], [0], [0], [1], [0, 0, 1, 1], [], []>} : vector<16x32xbf16>, vector<32x32xbf16>, vector<16x32xf32> -> vector<16x32xf32>
    %45 = arith.addf %38, %44 : vector<16x32xf32>
    %c7_33 = arith.constant 7 : index
    %c9 = arith.constant 9 : index
    %c0_34 = arith.constant 0 : index
    %46 = vector.load %arg9[%c7_33, %c9, %c0_34] : memref<13x13x32xf32, #tpu.memory_space<vmem>>, vector<4x4x32xf32>
    %47 = vector.shape_cast %46 : vector<4x4x32xf32> to vector<16x32xf32>
    %c2 = arith.constant 2 : index
    %c0_35 = arith.constant 0 : index
    %c0_36 = arith.constant 0 : index
    %48 = vector.load %arg5[%c2, %c0_35, %c0_36] : memref<9x32x32xbf16, #tpu.memory_space<vmem>>, vector<1x32x32xbf16>
    %49 = vector.shape_cast %48 : vector<1x32x32xbf16> to vector<32x32xbf16>
    %50 = arith.truncf %47 : vector<16x32xf32> to vector<16x32xbf16>
    %cst_37 = arith.constant dense<0.000000e+00> : vector<16x32xf32>
    %51 = tpu.matmul %50, %49, %cst_37 {dimension_numbers = #tpu.dot_dimension_numbers<[1], [0], [0], [1], [0, 0, 1, 1], [], []>} : vector<16x32xbf16>, vector<32x32xbf16>, vector<16x32xf32> -> vector<16x32xf32>
    %52 = arith.addf %45, %51 : vector<16x32xf32>
    %c8_38 = arith.constant 8 : index
    %c7_39 = arith.constant 7 : index
    %c0_40 = arith.constant 0 : index
    %53 = vector.load %arg9[%c8_38, %c7_39, %c0_40] : memref<13x13x32xf32, #tpu.memory_space<vmem>>, vector<4x4x32xf32>
    %54 = vector.shape_cast %53 : vector<4x4x32xf32> to vector<16x32xf32>
    %c3 = arith.constant 3 : index
    %c0_41 = arith.constant 0 : index
    %c0_42 = arith.constant 0 : index
    %55 = vector.load %arg5[%c3, %c0_41, %c0_42] : memref<9x32x32xbf16, #tpu.memory_space<vmem>>, vector<1x32x32xbf16>
    %56 = vector.shape_cast %55 : vector<1x32x32xbf16> to vector<32x32xbf16>
    %57 = arith.truncf %54 : vector<16x32xf32> to vector<16x32xbf16>
    %cst_43 = arith.constant dense<0.000000e+00> : vector<16x32xf32>
    %58 = tpu.matmul %57, %56, %cst_43 {dimension_numbers = #tpu.dot_dimension_numbers<[1], [0], [0], [1], [0, 0, 1, 1], [], []>} : vector<16x32xbf16>, vector<32x32xbf16>, vector<16x32xf32> -> vector<16x32xf32>
    %59 = arith.addf %52, %58 : vector<16x32xf32>
    %c8_44 = arith.constant 8 : index
    %c8_45 = arith.constant 8 : index
    %c0_46 = arith.constant 0 : index
    %60 = vector.load %arg9[%c8_44, %c8_45, %c0_46] : memref<13x13x32xf32, #tpu.memory_space<vmem>>, vector<4x4x32xf32>
    %61 = vector.shape_cast %60 : vector<4x4x32xf32> to vector<16x32xf32>
    %c4 = arith.constant 4 : index
    %c0_47 = arith.constant 0 : index
    %c0_48 = arith.constant 0 : index
    %62 = vector.load %arg5[%c4, %c0_47, %c0_48] : memref<9x32x32xbf16, #tpu.memory_space<vmem>>, vector<1x32x32xbf16>
    %63 = vector.shape_cast %62 : vector<1x32x32xbf16> to vector<32x32xbf16>
    %64 = arith.truncf %61 : vector<16x32xf32> to vector<16x32xbf16>
    %cst_49 = arith.constant dense<0.000000e+00> : vector<16x32xf32>
    %65 = tpu.matmul %64, %63, %cst_49 {dimension_numbers = #tpu.dot_dimension_numbers<[1], [0], [0], [1], [0, 0, 1, 1], [], []>} : vector<16x32xbf16>, vector<32x32xbf16>, vector<16x32xf32> -> vector<16x32xf32>
    %66 = arith.addf %59, %65 : vector<16x32xf32>
    %c8_50 = arith.constant 8 : index
    %c9_51 = arith.constant 9 : index
    %c0_52 = arith.constant 0 : index
    %67 = vector.load %arg9[%c8_50, %c9_51, %c0_52] : memref<13x13x32xf32, #tpu.memory_space<vmem>>, vector<4x4x32xf32>
    %68 = vector.shape_cast %67 : vector<4x4x32xf32> to vector<16x32xf32>
    %c5 = arith.constant 5 : index
    %c0_53 = arith.constant 0 : index
    %c0_54 = arith.constant 0 : index
    %69 = vector.load %arg5[%c5, %c0_53, %c0_54] : memref<9x32x32xbf16, #tpu.memory_space<vmem>>, vector<1x32x32xbf16>
    %70 = vector.shape_cast %69 : vector<1x32x32xbf16> to vector<32x32xbf16>
    %71 = arith.truncf %68 : vector<16x32xf32> to vector<16x32xbf16>
    %cst_55 = arith.constant dense<0.000000e+00> : vector<16x32xf32>
    %72 = tpu.matmul %71, %70, %cst_55 {dimension_numbers = #tpu.dot_dimension_numbers<[1], [0], [0], [1], [0, 0, 1, 1], [], []>} : vector<16x32xbf16>, vector<32x32xbf16>, vector<16x32xf32> -> vector<16x32xf32>
    %73 = arith.addf %66, %72 : vector<16x32xf32>
    %c9_56 = arith.constant 9 : index
    %c7_57 = arith.constant 7 : index
    %c0_58 = arith.constant 0 : index
    %74 = vector.load %arg9[%c9_56, %c7_57, %c0_58] : memref<13x13x32xf32, #tpu.memory_space<vmem>>, vector<4x4x32xf32>
    %75 = vector.shape_cast %74 : vector<4x4x32xf32> to vector<16x32xf32>
    %c6 = arith.constant 6 : index
    %c0_59 = arith.constant 0 : index
    %c0_60 = arith.constant 0 : index
    %76 = vector.load %arg5[%c6, %c0_59, %c0_60] : memref<9x32x32xbf16, #tpu.memory_space<vmem>>, vector<1x32x32xbf16>
    %77 = vector.shape_cast %76 : vector<1x32x32xbf16> to vector<32x32xbf16>
    %78 = arith.truncf %75 : vector<16x32xf32> to vector<16x32xbf16>
    %cst_61 = arith.constant dense<0.000000e+00> : vector<16x32xf32>
    %79 = tpu.matmul %78, %77, %cst_61 {dimension_numbers = #tpu.dot_dimension_numbers<[1], [0], [0], [1], [0, 0, 1, 1], [], []>} : vector<16x32xbf16>, vector<32x32xbf16>, vector<16x32xf32> -> vector<16x32xf32>
    %80 = arith.addf %73, %79 : vector<16x32xf32>
    %c9_62 = arith.constant 9 : index
    %c8_63 = arith.constant 8 : index
    %c0_64 = arith.constant 0 : index
    %81 = vector.load %arg9[%c9_62, %c8_63, %c0_64] : memref<13x13x32xf32, #tpu.memory_space<vmem>>, vector<4x4x32xf32>
    %82 = vector.shape_cast %81 : vector<4x4x32xf32> to vector<16x32xf32>
    %c7_65 = arith.constant 7 : index
    %c0_66 = arith.constant 0 : index
    %c0_67 = arith.constant 0 : index
    %83 = vector.load %arg5[%c7_65, %c0_66, %c0_67] : memref<9x32x32xbf16, #tpu.memory_space<vmem>>, vector<1x32x32xbf16>
    %84 = vector.shape_cast %83 : vector<1x32x32xbf16> to vector<32x32xbf16>
    %85 = arith.truncf %82 : vector<16x32xf32> to vector<16x32xbf16>
    %cst_68 = arith.constant dense<0.000000e+00> : vector<16x32xf32>
    %86 = tpu.matmul %85, %84, %cst_68 {dimension_numbers = #tpu.dot_dimension_numbers<[1], [0], [0], [1], [0, 0, 1, 1], [], []>} : vector<16x32xbf16>, vector<32x32xbf16>, vector<16x32xf32> -> vector<16x32xf32>
    %87 = arith.addf %80, %86 : vector<16x32xf32>
    %c9_69 = arith.constant 9 : index
    %c9_70 = arith.constant 9 : index
    %c0_71 = arith.constant 0 : index
    %88 = vector.load %arg9[%c9_69, %c9_70, %c0_71] : memref<13x13x32xf32, #tpu.memory_space<vmem>>, vector<4x4x32xf32>
    %89 = vector.shape_cast %88 : vector<4x4x32xf32> to vector<16x32xf32>
    %c8_72 = arith.constant 8 : index
    %c0_73 = arith.constant 0 : index
    %c0_74 = arith.constant 0 : index
    %90 = vector.load %arg5[%c8_72, %c0_73, %c0_74] : memref<9x32x32xbf16, #tpu.memory_space<vmem>>, vector<1x32x32xbf16>
    %91 = vector.shape_cast %90 : vector<1x32x32xbf16> to vector<32x32xbf16>
    %92 = arith.truncf %89 : vector<16x32xf32> to vector<16x32xbf16>
    %cst_75 = arith.constant dense<0.000000e+00> : vector<16x32xf32>
    %93 = tpu.matmul %92, %91, %cst_75 {dimension_numbers = #tpu.dot_dimension_numbers<[1], [0], [0], [1], [0, 0, 1, 1], [], []>} : vector<16x32xbf16>, vector<32x32xbf16>, vector<16x32xf32> -> vector<16x32xf32>
    %94 = arith.addf %87, %93 : vector<16x32xf32>
    %cst_76 = arith.constant dense<0.000000e+00> : vector<16xf32>
    %95 = vector.multi_reduction <add>, %94, %cst_76 [1] : vector<16x32xf32> to vector<16xf32>
    %96 = vector.shape_cast %95 : vector<16xf32> to vector<16x1xf32>
    %cst_77 = arith.constant 3.200000e+01 : f32
    %97 = vector.broadcast %cst_77 : f32 to vector<16x1xf32>
    %98 = arith.divf %96, %97 : vector<16x1xf32>
    %99 = vector.broadcast %98 : vector<16x1xf32> to vector<16x32xf32>
    %100 = arith.subf %94, %99 : vector<16x32xf32>
    %101 = arith.mulf %100, %100 : vector<16x32xf32>
    %cst_78 = arith.constant dense<0.000000e+00> : vector<16xf32>
    %102 = vector.multi_reduction <add>, %101, %cst_78 [1] : vector<16x32xf32> to vector<16xf32>
    %103 = vector.shape_cast %102 : vector<16xf32> to vector<16x1xf32>
    %cst_79 = arith.constant 3.200000e+01 : f32
    %104 = vector.broadcast %cst_79 : f32 to vector<16x1xf32>
    %105 = arith.divf %103, %104 : vector<16x1xf32>
    %cst_80 = arith.constant 9.99999997E-7 : f32
    %106 = vector.broadcast %cst_80 : f32 to vector<16x1xf32>
    %107 = arith.addf %105, %106 : vector<16x1xf32>
    %108 = math.rsqrt %107 : vector<16x1xf32>
    %109 = vector.broadcast %108 : vector<16x1xf32> to vector<16x32xf32>
    %110 = arith.mulf %100, %109 : vector<16x32xf32>
    %c0_81 = arith.constant 0 : index
    %c0_82 = arith.constant 0 : index
    %111 = vector.load %arg6[%c0_81, %c0_82] : memref<1x32xf32, #tpu.memory_space<vmem>>, vector<1x32xf32>
    %112 = vector.broadcast %111 : vector<1x32xf32> to vector<16x32xf32>
    %113 = arith.mulf %110, %112 : vector<16x32xf32>
    %c0_83 = arith.constant 0 : index
    %c0_84 = arith.constant 0 : index
    %114 = vector.load %arg7[%c0_83, %c0_84] : memref<1x32xf32, #tpu.memory_space<vmem>>, vector<1x32xf32>
    %115 = vector.broadcast %114 : vector<1x32xf32> to vector<16x32xf32>
    %116 = arith.addf %113, %115 : vector<16x32xf32>
    %117 = arith.truncf %116 : vector<16x32xf32> to vector<16x32xbf16>
    %c0_85 = arith.constant 0 : index
    %c0_86 = arith.constant 0 : index
    %c0_87 = arith.constant 0 : index
    %118 = vector.load %arg8[%c0_85, %c0_86, %c0_87] : memref<1x16x32xbf16, #tpu.memory_space<vmem>>, vector<1x16x32xbf16>
    %119 = vector.shape_cast %118 : vector<1x16x32xbf16> to vector<16x32xbf16>
    %120 = vector.shape_cast %117 : vector<16x32xbf16> to vector<1x16x32xbf16>
    tpu.vector_store %arg8[%c0_85, %c0_86, %c0_87], %120 {strides = array<i32>} : memref<1x16x32xbf16, #tpu.memory_space<vmem>>, vector<1x16x32xbf16>,
    return
  }
  func.func @transform_0(%arg0: i32) -> (i32, i32, i32, i32) {
    %c0_i32 = arith.constant 0 : i32
    %c0_i32_0 = arith.constant 0 : i32
    %c0_i32_1 = arith.constant 0 : i32
    %c0_i32_2 = arith.constant 0 : i32
    return %arg0, %c0_i32, %c0_i32_0, %c0_i32_1 : i32, i32, i32, i32
  }
  func.func @transform_1(%arg0: i32) -> (i32, i32) {
    %c0_i32 = arith.constant 0 : i32
    %c0_i32_0 = arith.constant 0 : i32
    %c0_i32_1 = arith.constant 0 : i32
    return %c0_i32, %c0_i32_0 : i32, i32
  }
  func.func @transform_2(%arg0: i32) -> (i32, i32) {
    %c0_i32 = arith.constant 0 : i32
    %c0_i32_0 = arith.constant 0 : i32
    %c0_i32_1 = arith.constant 0 : i32
    return %c0_i32, %c0_i32_0 : i32, i32
  }
  func.func @transform_3(%arg0: i32) -> (i32, i32) {
    %c0_i32 = arith.constant 0 : i32
    %c0_i32_0 = arith.constant 0 : i32
    %c0_i32_1 = arith.constant 0 : i32
    return %c0_i32, %c0_i32_0 : i32, i32
  }
  func.func @transform_4(%arg0: i32) -> (i32, i32, i32) {
    %c0_i32 = arith.constant 0 : i32
    %c0_i32_0 = arith.constant 0 : i32
    %c0_i32_1 = arith.constant 0 : i32
    %c0_i32_2 = arith.constant 0 : i32
    return %c0_i32, %c0_i32_0, %c0_i32_1 : i32, i32, i32
  }
  func.func @transform_5(%arg0: i32) -> (i32, i32) {
    %c0_i32 = arith.constant 0 : i32
    %c0_i32_0 = arith.constant 0 : i32
    %c0_i32_1 = arith.constant 0 : i32
    return %c0_i32, %c0_i32_0 : i32, i32
  }
  func.func @transform_6(%arg0: i32) -> (i32, i32) {
    %c0_i32 = arith.constant 0 : i32
    %c0_i32_0 = arith.constant 0 : i32
    %c0_i32_1 = arith.constant 0 : i32
    return %c0_i32, %c0_i32_0 : i32, i32
  }
  func.func @transform_7(%arg0: i32) -> (i32, i32, i32) {
    %c0_i32 = arith.constant 0 : i32
    %c0_i32_0 = arith.constant 0 : i32
    %c0_i32_1 = arith.constant 0 : i32
    return %arg0, %c0_i32, %c0_i32_0 : i32, i32, i32
  }
}

module attributes {stable_mosaic.version = 11 : i64} {
  func.func @_mm_kernel(%arg0: i32, %arg1: memref<16x32xbf16, #tpu.memory_space<vmem>>, %arg2: memref<32x64xbf16, #tpu.memory_space<vmem>>, %arg3: memref<1x64xf32, #tpu.memory_space<vmem>>, %arg4: memref<16x64xbf16, #tpu.memory_space<vmem>>) attributes {dimension_semantics = [#tpu.dimension_semantics<parallel>], iteration_bounds = array<i64: 2>, scalar_prefetch = 0 : i64, scratch_operands = 0 : i64, tpu.core_type = #tpu.core_type<tc>, window_params = [{transform_indices = @transform_0, window_bounds = array<i64: 16, 32>}, {pipeline_mode = #tpu.pipeline_mode<synchronous>, transform_indices = @transform_1, window_bounds = array<i64: 32, 64>}, {pipeline_mode = #tpu.pipeline_mode<synchronous>, transform_indices = @transform_2, window_bounds = array<i64: 1, 64>}, {transform_indices = @transform_3, window_bounds = array<i64: 16, 64>}]} {
    %c0 = arith.constant 0 : index
    %c0_0 = arith.constant 0 : index
    %0 = vector.load %arg1[%c0, %c0_0] : memref<16x32xbf16, #tpu.memory_space<vmem>>, vector<16x32xbf16>
    %c0_1 = arith.constant 0 : index
    %c0_2 = arith.constant 0 : index
    %1 = vector.load %arg2[%c0_1, %c0_2] : memref<32x64xbf16, #tpu.memory_space<vmem>>, vector<32x64xbf16>
    %cst = arith.constant dense<0.000000e+00> : vector<16x64xf32>
    %2 = tpu.matmul %0, %1, %cst {dimension_numbers = #tpu.dot_dimension_numbers<[1], [0], [0], [1], [0, 0, 1, 1], [], []>} : vector<16x32xbf16>, vector<32x64xbf16>, vector<16x64xf32> -> vector<16x64xf32>
    %c0_3 = arith.constant 0 : index
    %c0_4 = arith.constant 0 : index
    %3 = vector.load %arg3[%c0_3, %c0_4] : memref<1x64xf32, #tpu.memory_space<vmem>>, vector<1x64xf32>
    %4 = vector.broadcast %3 : vector<1x64xf32> to vector<16x64xf32>
    %5 = arith.addf %2, %4 : vector<16x64xf32>
    %6 = arith.truncf %5 : vector<16x64xf32> to vector<16x64xbf16>
    %c0_5 = arith.constant 0 : index
    %c0_6 = arith.constant 0 : index
    %7 = vector.load %arg4[%c0_5, %c0_6] : memref<16x64xbf16, #tpu.memory_space<vmem>>, vector<16x64xbf16>
    tpu.vector_store %arg4[%c0_5, %c0_6], %6 {strides = array<i32>} : memref<16x64xbf16, #tpu.memory_space<vmem>>, vector<16x64xbf16>,
    return
  }
  func.func @transform_0(%arg0: i32) -> (i32, i32) {
    %c0_i32 = arith.constant 0 : i32
    %c0_i32_0 = arith.constant 0 : i32
    return %arg0, %c0_i32 : i32, i32
  }
  func.func @transform_1(%arg0: i32) -> (i32, i32) {
    %c0_i32 = arith.constant 0 : i32
    %c0_i32_0 = arith.constant 0 : i32
    %c0_i32_1 = arith.constant 0 : i32
    return %c0_i32, %c0_i32_0 : i32, i32
  }
  func.func @transform_2(%arg0: i32) -> (i32, i32) {
    %c0_i32 = arith.constant 0 : i32
    %c0_i32_0 = arith.constant 0 : i32
    %c0_i32_1 = arith.constant 0 : i32
    return %c0_i32, %c0_i32_0 : i32, i32
  }
  func.func @transform_3(%arg0: i32) -> (i32, i32) {
    %c0_i32 = arith.constant 0 : i32
    %c0_i32_0 = arith.constant 0 : i32
    return %arg0, %c0_i32 : i32, i32
  }
}

module attributes {stable_mosaic.version = 11 : i64} {
  func.func @_mm_kernel(%arg0: i32, %arg1: memref<64x16xbf16, #tpu.memory_space<vmem>>, %arg2: memref<16x32xbf16, #tpu.memory_space<vmem>>, %arg3: memref<1x32xf32, #tpu.memory_space<vmem>>, %arg4: memref<1x16xf32, #tpu.memory_space<vmem>>, %arg5: memref<1x16xf32, #tpu.memory_space<vmem>>, %arg6: memref<64x32xbf16, #tpu.memory_space<vmem>>) attributes {dimension_semantics = [#tpu.dimension_semantics<parallel>], iteration_bounds = array<i64: 2>, scalar_prefetch = 0 : i64, scratch_operands = 0 : i64, tpu.core_type = #tpu.core_type<tc>, window_params = [{transform_indices = @transform_0, window_bounds = array<i64: 64, 16>}, {pipeline_mode = #tpu.pipeline_mode<synchronous>, transform_indices = @transform_1, window_bounds = array<i64: 16, 32>}, {pipeline_mode = #tpu.pipeline_mode<synchronous>, transform_indices = @transform_2, window_bounds = array<i64: 1, 32>}, {pipeline_mode = #tpu.pipeline_mode<synchronous>, transform_indices = @transform_3, window_bounds = array<i64: 1, 16>}, {pipeline_mode = #tpu.pipeline_mode<synchronous>, transform_indices = @transform_4, window_bounds = array<i64: 1, 16>}, {transform_indices = @transform_5, window_bounds = array<i64: 64, 32>}]} {
    %c0 = arith.constant 0 : index
    %c0_0 = arith.constant 0 : index
    %0 = vector.load %arg1[%c0, %c0_0] : memref<64x16xbf16, #tpu.memory_space<vmem>>, vector<64x16xbf16>
    %1 = arith.extf %0 : vector<64x16xbf16> to vector<64x16xf32>
    %cst = arith.constant dense<0.000000e+00> : vector<64xf32>
    %2 = vector.multi_reduction <add>, %1, %cst [1] : vector<64x16xf32> to vector<64xf32>
    %3 = vector.shape_cast %2 : vector<64xf32> to vector<64x1xf32>
    %cst_1 = arith.constant 1.600000e+01 : f32
    %4 = vector.broadcast %cst_1 : f32 to vector<64x1xf32>
    %5 = arith.divf %3, %4 : vector<64x1xf32>
    %6 = vector.broadcast %5 : vector<64x1xf32> to vector<64x16xf32>
    %7 = arith.subf %1, %6 : vector<64x16xf32>
    %8 = arith.mulf %7, %7 : vector<64x16xf32>
    %cst_2 = arith.constant dense<0.000000e+00> : vector<64xf32>
    %9 = vector.multi_reduction <add>, %8, %cst_2 [1] : vector<64x16xf32> to vector<64xf32>
    %10 = vector.shape_cast %9 : vector<64xf32> to vector<64x1xf32>
    %cst_3 = arith.constant 1.600000e+01 : f32
    %11 = vector.broadcast %cst_3 : f32 to vector<64x1xf32>
    %12 = arith.divf %10, %11 : vector<64x1xf32>
    %cst_4 = arith.constant 9.99999997E-7 : f32
    %13 = vector.broadcast %cst_4 : f32 to vector<64x1xf32>
    %14 = arith.addf %12, %13 : vector<64x1xf32>
    %15 = math.rsqrt %14 : vector<64x1xf32>
    %16 = vector.broadcast %15 : vector<64x1xf32> to vector<64x16xf32>
    %17 = arith.mulf %7, %16 : vector<64x16xf32>
    %c0_5 = arith.constant 0 : index
    %c0_6 = arith.constant 0 : index
    %18 = vector.load %arg4[%c0_5, %c0_6] : memref<1x16xf32, #tpu.memory_space<vmem>>, vector<1x16xf32>
    %19 = vector.broadcast %18 : vector<1x16xf32> to vector<64x16xf32>
    %20 = arith.mulf %17, %19 : vector<64x16xf32>
    %c0_7 = arith.constant 0 : index
    %c0_8 = arith.constant 0 : index
    %21 = vector.load %arg5[%c0_7, %c0_8] : memref<1x16xf32, #tpu.memory_space<vmem>>, vector<1x16xf32>
    %22 = vector.broadcast %21 : vector<1x16xf32> to vector<64x16xf32>
    %23 = arith.addf %20, %22 : vector<64x16xf32>
    %24 = arith.mulf %23, %23 : vector<64x16xf32>
    %25 = arith.mulf %23, %24 : vector<64x16xf32>
    %cst_9 = arith.constant 4.471500e-02 : f32
    %26 = vector.broadcast %cst_9 : f32 to vector<64x16xf32>
    %27 = arith.mulf %26, %25 : vector<64x16xf32>
    %28 = arith.addf %23, %27 : vector<64x16xf32>
    %cst_10 = arith.constant 0.797884583 : f32
    %29 = vector.broadcast %cst_10 : f32 to vector<64x16xf32>
    %30 = arith.mulf %29, %28 : vector<64x16xf32>
    %31 = math.tanh %30 : vector<64x16xf32>
    %cst_11 = arith.constant 1.000000e+00 : f32
    %32 = vector.broadcast %cst_11 : f32 to vector<64x16xf32>
    %33 = arith.addf %32, %31 : vector<64x16xf32>
    %cst_12 = arith.constant 5.000000e-01 : f32
    %34 = vector.broadcast %cst_12 : f32 to vector<64x16xf32>
    %35 = arith.mulf %34, %33 : vector<64x16xf32>
    %36 = arith.mulf %23, %35 : vector<64x16xf32>
    %c0_13 = arith.constant 0 : index
    %c0_14 = arith.constant 0 : index
    %37 = vector.load %arg2[%c0_13, %c0_14] : memref<16x32xbf16, #tpu.memory_space<vmem>>, vector<16x32xbf16>
    %38 = arith.truncf %36 : vector<64x16xf32> to vector<64x16xbf16>
    %cst_15 = arith.constant dense<0.000000e+00> : vector<64x32xf32>
    %39 = tpu.matmul %38, %37, %cst_15 {dimension_numbers = #tpu.dot_dimension_numbers<[1], [0], [0], [1], [0, 0, 1, 1], [], []>} : vector<64x16xbf16>, vector<16x32xbf16>, vector<64x32xf32> -> vector<64x32xf32>
    %c0_16 = arith.constant 0 : index
    %c0_17 = arith.constant 0 : index
    %40 = vector.load %arg3[%c0_16, %c0_17] : memref<1x32xf32, #tpu.memory_space<vmem>>, vector<1x32xf32>
    %41 = vector.broadcast %40 : vector<1x32xf32> to vector<64x32xf32>
    %42 = arith.addf %39, %41 : vector<64x32xf32>
    %43 = arith.truncf %42 : vector<64x32xf32> to vector<64x32xbf16>
    %c0_18 = arith.constant 0 : index
    %c0_19 = arith.constant 0 : index
    %44 = vector.load %arg6[%c0_18, %c0_19] : memref<64x32xbf16, #tpu.memory_space<vmem>>, vector<64x32xbf16>
    tpu.vector_store %arg6[%c0_18, %c0_19], %43 {strides = array<i32>} : memref<64x32xbf16, #tpu.memory_space<vmem>>, vector<64x32xbf16>,
    return
  }
  func.func @transform_0(%arg0: i32) -> (i32, i32) {
    %c0_i32 = arith.constant 0 : i32
    %c0_i32_0 = arith.constant 0 : i32
    return %arg0, %c0_i32 : i32, i32
  }
  func.func @transform_1(%arg0: i32) -> (i32, i32) {
    %c0_i32 = arith.constant 0 : i32
    %c0_i32_0 = arith.constant 0 : i32
    %c0_i32_1 = arith.constant 0 : i32
    return %c0_i32, %c0_i32_0 : i32, i32
  }
  func.func @transform_2(%arg0: i32) -> (i32, i32) {
    %c0_i32 = arith.constant 0 : i32
    %c0_i32_0 = arith.constant 0 : i32
    %c0_i32_1 = arith.constant 0 : i32
    return %c0_i32, %c0_i32_0 : i32, i32
  }
  func.func @transform_3(%arg0: i32) -> (i32, i32) {
    %c0_i32 = arith.constant 0 : i32
    %c0_i32_0 = arith.constant 0 : i32
    %c0_i32_1 = arith.constant 0 : i32
    return %c0_i32, %c0_i32_0 : i32, i32
  }
  func.func @transform_4(%arg0: i32) -> (i32, i32) {
    %c0_i32 = arith.constant 0 : i32
    %c0_i32_0 = arith.constant 0 : i32
    %c0_i32_1 = arith.constant 0 : i32
    return %c0_i32, %c0_i32_0 : i32, i32
  }
  func.func @transform_5(%arg0: i32) -> (i32, i32) {
    %c0_i32 = arith.constant 0 : i32
    %c0_i32_0 = arith.constant 0 : i32
    return %arg0, %c0_i32 : i32, i32
  }
}

module attributes {stable_mosaic.version = 11 : i64} {
  func.func @_conv_block_kernel(%arg0: i32, %arg1: memref<1x16x16x8xbf16, #tpu.memory_space<vmem>>, %arg2: memref<8x32xbf16, #tpu.memory_space<vmem>>, %arg3: memref<1x32xf32, #tpu.memory_space<vmem>>, %arg4: memref<1x32xf32, #tpu.memory_space<vmem>>, %arg5: memref<9x32x32xbf16, #tpu.memory_space<vmem>>, %arg6: memref<1x32xf32, #tpu.memory_space<vmem>>, %arg7: memref<1x32xf32, #tpu.memory_space<vmem>>, %arg8: memref<16x32xbf16, #tpu.memory_space<vmem>>, %arg9: memref<16x1xf32, #tpu.memory_space<vmem>>, %arg10: memref<1x16x256xf32, #tpu.memory_space<vmem>>, %arg11: memref<25x25x32xf32, #tpu.memory_space<vmem>>) attributes {dimension_semantics = [#tpu.dimension_semantics<parallel>], iteration_bounds = array<i64: 2>, scalar_prefetch = 0 : i64, scratch_operands = 1 : i64, tpu.core_type = #tpu.core_type<tc>, window_params = [{transform_indices = @transform_0, window_bounds = array<i64: 1, 16, 16, 8>}, {pipeline_mode = #tpu.pipeline_mode<synchronous>, transform_indices = @transform_1, window_bounds = array<i64: 8, 32>}, {pipeline_mode = #tpu.pipeline_mode<synchronous>, transform_indices = @transform_2, window_bounds = array<i64: 1, 32>}, {pipeline_mode = #tpu.pipeline_mode<synchronous>, transform_indices = @transform_3, window_bounds = array<i64: 1, 32>}, {pipeline_mode = #tpu.pipeline_mode<synchronous>, transform_indices = @transform_4, window_bounds = array<i64: 9, 32, 32>}, {pipeline_mode = #tpu.pipeline_mode<synchronous>, transform_indices = @transform_5, window_bounds = array<i64: 1, 32>}, {pipeline_mode = #tpu.pipeline_mode<synchronous>, transform_indices = @transform_6, window_bounds = array<i64: 1, 32>}, {pipeline_mode = #tpu.pipeline_mode<synchronous>, transform_indices = @transform_7, window_bounds = array<i64: 16, 32>}, {pipeline_mode = #tpu.pipeline_mode<synchronous>, transform_indices = @transform_8, window_bounds = array<i64: 16, 1>}, {transform_indices = @transform_9, window_bounds = array<i64: 1, 16, 256>}]} {
    %c0 = arith.constant 0 : index
    %c0_0 = arith.constant 0 : index
    %c0_1 = arith.constant 0 : index
    %c0_2 = arith.constant 0 : index
    %0 = vector.load %arg1[%c0, %c0_0, %c0_1, %c0_2] : memref<1x16x16x8xbf16, #tpu.memory_space<vmem>>, vector<1x16x16x8xbf16>
    %1 = vector.shape_cast %0 : vector<1x16x16x8xbf16> to vector<16x16x8xbf16>
    %2 = vector.shape_cast %1 : vector<16x16x8xbf16> to vector<256x8xbf16>
    %c0_3 = arith.constant 0 : index
    %c0_4 = arith.constant 0 : index
    %3 = vector.load %arg2[%c0_3, %c0_4] : memref<8x32xbf16, #tpu.memory_space<vmem>>, vector<8x32xbf16>
    %cst = arith.constant dense<0.000000e+00> : vector<256x32xf32>
    %4 = tpu.matmul %2, %3, %cst {dimension_numbers = #tpu.dot_dimension_numbers<[1], [0], [0], [1], [0, 0, 1, 1], [], []>} : vector<256x8xbf16>, vector<8x32xbf16>, vector<256x32xf32> -> vector<256x32xf32>
    %cst_5 = arith.constant dense<0.000000e+00> : vector<256xf32>
    %5 = vector.multi_reduction <add>, %4, %cst_5 [1] : vector<256x32xf32> to vector<256xf32>
    %6 = vector.shape_cast %5 : vector<256xf32> to vector<256x1xf32>
    %cst_6 = arith.constant 3.200000e+01 : f32
    %7 = vector.broadcast %cst_6 : f32 to vector<256x1xf32>
    %8 = arith.divf %6, %7 : vector<256x1xf32>
    %9 = vector.broadcast %8 : vector<256x1xf32> to vector<256x32xf32>
    %10 = arith.subf %4, %9 : vector<256x32xf32>
    %11 = arith.mulf %10, %10 : vector<256x32xf32>
    %cst_7 = arith.constant dense<0.000000e+00> : vector<256xf32>
    %12 = vector.multi_reduction <add>, %11, %cst_7 [1] : vector<256x32xf32> to vector<256xf32>
    %13 = vector.shape_cast %12 : vector<256xf32> to vector<256x1xf32>
    %cst_8 = arith.constant 3.200000e+01 : f32
    %14 = vector.broadcast %cst_8 : f32 to vector<256x1xf32>
    %15 = arith.divf %13, %14 : vector<256x1xf32>
    %cst_9 = arith.constant 9.99999997E-7 : f32
    %16 = vector.broadcast %cst_9 : f32 to vector<256x1xf32>
    %17 = arith.addf %15, %16 : vector<256x1xf32>
    %18 = math.rsqrt %17 : vector<256x1xf32>
    %19 = vector.broadcast %18 : vector<256x1xf32> to vector<256x32xf32>
    %20 = arith.mulf %10, %19 : vector<256x32xf32>
    %c0_10 = arith.constant 0 : index
    %c0_11 = arith.constant 0 : index
    %21 = vector.load %arg3[%c0_10, %c0_11] : memref<1x32xf32, #tpu.memory_space<vmem>>, vector<1x32xf32>
    %22 = vector.broadcast %21 : vector<1x32xf32> to vector<256x32xf32>
    %23 = arith.mulf %20, %22 : vector<256x32xf32>
    %c0_12 = arith.constant 0 : index
    %c0_13 = arith.constant 0 : index
    %24 = vector.load %arg4[%c0_12, %c0_13] : memref<1x32xf32, #tpu.memory_space<vmem>>, vector<1x32xf32>
    %25 = vector.broadcast %24 : vector<1x32xf32> to vector<256x32xf32>
    %26 = arith.addf %23, %25 : vector<256x32xf32>
    %cst_14 = arith.constant 0.000000e+00 : f32
    %27 = vector.broadcast %cst_14 : f32 to vector<25x25x32xf32>
    %c0_15 = arith.constant 0 : index
    %c0_16 = arith.constant 0 : index
    %c0_17 = arith.constant 0 : index
    %28 = vector.load %arg11[%c0_15, %c0_16, %c0_17] : memref<25x25x32xf32, #tpu.memory_space<vmem>>, vector<25x25x32xf32>
    tpu.vector_store %arg11[%c0_15, %c0_16, %c0_17], %27 {strides = array<i32>} : memref<25x25x32xf32, #tpu.memory_space<vmem>>, vector<25x25x32xf32>,
    %29 = vector.shape_cast %26 : vector<256x32xf32> to vector<16x16x32xf32>
    %c8 = arith.constant 8 : index
    %c8_18 = arith.constant 8 : index
    %c0_19 = arith.constant 0 : index
    %30 = vector.load %arg11[%c8, %c8_18, %c0_19] : memref<25x25x32xf32, #tpu.memory_space<vmem>>, vector<16x16x32xf32>
    tpu.vector_store %arg11[%c8, %c8_18, %c0_19], %29 {strides = array<i32>} : memref<25x25x32xf32, #tpu.memory_space<vmem>>, vector<16x16x32xf32>,
    %cst_20 = arith.constant 0.000000e+00 : f32
    %31 = vector.broadcast %cst_20 : f32 to vector<256x32xf32>
    %c7 = arith.constant 7 : index
    %c7_21 = arith.constant 7 : index
    %c0_22 = arith.constant 0 : index
    %32 = vector.load %arg11[%c7, %c7_21, %c0_22] : memref<25x25x32xf32, #tpu.memory_space<vmem>>, vector<16x16x32xf32>
    %33 = vector.shape_cast %32 : vector<16x16x32xf32> to vector<256x32xf32>
    %c0_23 = arith.constant 0 : index
    %c0_24 = arith.constant 0 : index
    %c0_25 = arith.constant 0 : index
    %34 = vector.load %arg5[%c0_23, %c0_24, %c0_25] : memref<9x32x32xbf16, #tpu.memory_space<vmem>>, vector<1x32x32xbf16>
    %35 = vector.shape_cast %34 : vector<1x32x32xbf16> to vector<32x32xbf16>
    %36 = arith.truncf %33 : vector<256x32xf32> to vector<256x32xbf16>
    %cst_26 = arith.constant dense<0.000000e+00> : vector<256x32xf32>
    %37 = tpu.matmul %36, %35, %cst_26 {dimension_numbers = #tpu.dot_dimension_numbers<[1], [0], [0], [1], [0, 0, 1, 1], [], []>} : vector<256x32xbf16>, vector<32x32xbf16>, vector<256x32xf32> -> vector<256x32xf32>
    %38 = arith.addf %31, %37 : vector<256x32xf32>
    %c7_27 = arith.constant 7 : index
    %c8_28 = arith.constant 8 : index
    %c0_29 = arith.constant 0 : index
    %39 = vector.load %arg11[%c7_27, %c8_28, %c0_29] : memref<25x25x32xf32, #tpu.memory_space<vmem>>, vector<16x16x32xf32>
    %40 = vector.shape_cast %39 : vector<16x16x32xf32> to vector<256x32xf32>
    %c1 = arith.constant 1 : index
    %c0_30 = arith.constant 0 : index
    %c0_31 = arith.constant 0 : index
    %41 = vector.load %arg5[%c1, %c0_30, %c0_31] : memref<9x32x32xbf16, #tpu.memory_space<vmem>>, vector<1x32x32xbf16>
    %42 = vector.shape_cast %41 : vector<1x32x32xbf16> to vector<32x32xbf16>
    %43 = arith.truncf %40 : vector<256x32xf32> to vector<256x32xbf16>
    %cst_32 = arith.constant dense<0.000000e+00> : vector<256x32xf32>
    %44 = tpu.matmul %43, %42, %cst_32 {dimension_numbers = #tpu.dot_dimension_numbers<[1], [0], [0], [1], [0, 0, 1, 1], [], []>} : vector<256x32xbf16>, vector<32x32xbf16>, vector<256x32xf32> -> vector<256x32xf32>
    %45 = arith.addf %38, %44 : vector<256x32xf32>
    %c7_33 = arith.constant 7 : index
    %c9 = arith.constant 9 : index
    %c0_34 = arith.constant 0 : index
    %46 = vector.load %arg11[%c7_33, %c9, %c0_34] : memref<25x25x32xf32, #tpu.memory_space<vmem>>, vector<16x16x32xf32>
    %47 = vector.shape_cast %46 : vector<16x16x32xf32> to vector<256x32xf32>
    %c2 = arith.constant 2 : index
    %c0_35 = arith.constant 0 : index
    %c0_36 = arith.constant 0 : index
    %48 = vector.load %arg5[%c2, %c0_35, %c0_36] : memref<9x32x32xbf16, #tpu.memory_space<vmem>>, vector<1x32x32xbf16>
    %49 = vector.shape_cast %48 : vector<1x32x32xbf16> to vector<32x32xbf16>
    %50 = arith.truncf %47 : vector<256x32xf32> to vector<256x32xbf16>
    %cst_37 = arith.constant dense<0.000000e+00> : vector<256x32xf32>
    %51 = tpu.matmul %50, %49, %cst_37 {dimension_numbers = #tpu.dot_dimension_numbers<[1], [0], [0], [1], [0, 0, 1, 1], [], []>} : vector<256x32xbf16>, vector<32x32xbf16>, vector<256x32xf32> -> vector<256x32xf32>
    %52 = arith.addf %45, %51 : vector<256x32xf32>
    %c8_38 = arith.constant 8 : index
    %c7_39 = arith.constant 7 : index
    %c0_40 = arith.constant 0 : index
    %53 = vector.load %arg11[%c8_38, %c7_39, %c0_40] : memref<25x25x32xf32, #tpu.memory_space<vmem>>, vector<16x16x32xf32>
    %54 = vector.shape_cast %53 : vector<16x16x32xf32> to vector<256x32xf32>
    %c3 = arith.constant 3 : index
    %c0_41 = arith.constant 0 : index
    %c0_42 = arith.constant 0 : index
    %55 = vector.load %arg5[%c3, %c0_41, %c0_42] : memref<9x32x32xbf16, #tpu.memory_space<vmem>>, vector<1x32x32xbf16>
    %56 = vector.shape_cast %55 : vector<1x32x32xbf16> to vector<32x32xbf16>
    %57 = arith.truncf %54 : vector<256x32xf32> to vector<256x32xbf16>
    %cst_43 = arith.constant dense<0.000000e+00> : vector<256x32xf32>
    %58 = tpu.matmul %57, %56, %cst_43 {dimension_numbers = #tpu.dot_dimension_numbers<[1], [0], [0], [1], [0, 0, 1, 1], [], []>} : vector<256x32xbf16>, vector<32x32xbf16>, vector<256x32xf32> -> vector<256x32xf32>
    %59 = arith.addf %52, %58 : vector<256x32xf32>
    %c8_44 = arith.constant 8 : index
    %c8_45 = arith.constant 8 : index
    %c0_46 = arith.constant 0 : index
    %60 = vector.load %arg11[%c8_44, %c8_45, %c0_46] : memref<25x25x32xf32, #tpu.memory_space<vmem>>, vector<16x16x32xf32>
    %61 = vector.shape_cast %60 : vector<16x16x32xf32> to vector<256x32xf32>
    %c4 = arith.constant 4 : index
    %c0_47 = arith.constant 0 : index
    %c0_48 = arith.constant 0 : index
    %62 = vector.load %arg5[%c4, %c0_47, %c0_48] : memref<9x32x32xbf16, #tpu.memory_space<vmem>>, vector<1x32x32xbf16>
    %63 = vector.shape_cast %62 : vector<1x32x32xbf16> to vector<32x32xbf16>
    %64 = arith.truncf %61 : vector<256x32xf32> to vector<256x32xbf16>
    %cst_49 = arith.constant dense<0.000000e+00> : vector<256x32xf32>
    %65 = tpu.matmul %64, %63, %cst_49 {dimension_numbers = #tpu.dot_dimension_numbers<[1], [0], [0], [1], [0, 0, 1, 1], [], []>} : vector<256x32xbf16>, vector<32x32xbf16>, vector<256x32xf32> -> vector<256x32xf32>
    %66 = arith.addf %59, %65 : vector<256x32xf32>
    %c8_50 = arith.constant 8 : index
    %c9_51 = arith.constant 9 : index
    %c0_52 = arith.constant 0 : index
    %67 = vector.load %arg11[%c8_50, %c9_51, %c0_52] : memref<25x25x32xf32, #tpu.memory_space<vmem>>, vector<16x16x32xf32>
    %68 = vector.shape_cast %67 : vector<16x16x32xf32> to vector<256x32xf32>
    %c5 = arith.constant 5 : index
    %c0_53 = arith.constant 0 : index
    %c0_54 = arith.constant 0 : index
    %69 = vector.load %arg5[%c5, %c0_53, %c0_54] : memref<9x32x32xbf16, #tpu.memory_space<vmem>>, vector<1x32x32xbf16>
    %70 = vector.shape_cast %69 : vector<1x32x32xbf16> to vector<32x32xbf16>
    %71 = arith.truncf %68 : vector<256x32xf32> to vector<256x32xbf16>
    %cst_55 = arith.constant dense<0.000000e+00> : vector<256x32xf32>
    %72 = tpu.matmul %71, %70, %cst_55 {dimension_numbers = #tpu.dot_dimension_numbers<[1], [0], [0], [1], [0, 0, 1, 1], [], []>} : vector<256x32xbf16>, vector<32x32xbf16>, vector<256x32xf32> -> vector<256x32xf32>
    %73 = arith.addf %66, %72 : vector<256x32xf32>
    %c9_56 = arith.constant 9 : index
    %c7_57 = arith.constant 7 : index
    %c0_58 = arith.constant 0 : index
    %74 = vector.load %arg11[%c9_56, %c7_57, %c0_58] : memref<25x25x32xf32, #tpu.memory_space<vmem>>, vector<16x16x32xf32>
    %75 = vector.shape_cast %74 : vector<16x16x32xf32> to vector<256x32xf32>
    %c6 = arith.constant 6 : index
    %c0_59 = arith.constant 0 : index
    %c0_60 = arith.constant 0 : index
    %76 = vector.load %arg5[%c6, %c0_59, %c0_60] : memref<9x32x32xbf16, #tpu.memory_space<vmem>>, vector<1x32x32xbf16>
    %77 = vector.shape_cast %76 : vector<1x32x32xbf16> to vector<32x32xbf16>
    %78 = arith.truncf %75 : vector<256x32xf32> to vector<256x32xbf16>
    %cst_61 = arith.constant dense<0.000000e+00> : vector<256x32xf32>
    %79 = tpu.matmul %78, %77, %cst_61 {dimension_numbers = #tpu.dot_dimension_numbers<[1], [0], [0], [1], [0, 0, 1, 1], [], []>} : vector<256x32xbf16>, vector<32x32xbf16>, vector<256x32xf32> -> vector<256x32xf32>
    %80 = arith.addf %73, %79 : vector<256x32xf32>
    %c9_62 = arith.constant 9 : index
    %c8_63 = arith.constant 8 : index
    %c0_64 = arith.constant 0 : index
    %81 = vector.load %arg11[%c9_62, %c8_63, %c0_64] : memref<25x25x32xf32, #tpu.memory_space<vmem>>, vector<16x16x32xf32>
    %82 = vector.shape_cast %81 : vector<16x16x32xf32> to vector<256x32xf32>
    %c7_65 = arith.constant 7 : index
    %c0_66 = arith.constant 0 : index
    %c0_67 = arith.constant 0 : index
    %83 = vector.load %arg5[%c7_65, %c0_66, %c0_67] : memref<9x32x32xbf16, #tpu.memory_space<vmem>>, vector<1x32x32xbf16>
    %84 = vector.shape_cast %83 : vector<1x32x32xbf16> to vector<32x32xbf16>
    %85 = arith.truncf %82 : vector<256x32xf32> to vector<256x32xbf16>
    %cst_68 = arith.constant dense<0.000000e+00> : vector<256x32xf32>
    %86 = tpu.matmul %85, %84, %cst_68 {dimension_numbers = #tpu.dot_dimension_numbers<[1], [0], [0], [1], [0, 0, 1, 1], [], []>} : vector<256x32xbf16>, vector<32x32xbf16>, vector<256x32xf32> -> vector<256x32xf32>
    %87 = arith.addf %80, %86 : vector<256x32xf32>
    %c9_69 = arith.constant 9 : index
    %c9_70 = arith.constant 9 : index
    %c0_71 = arith.constant 0 : index
    %88 = vector.load %arg11[%c9_69, %c9_70, %c0_71] : memref<25x25x32xf32, #tpu.memory_space<vmem>>, vector<16x16x32xf32>
    %89 = vector.shape_cast %88 : vector<16x16x32xf32> to vector<256x32xf32>
    %c8_72 = arith.constant 8 : index
    %c0_73 = arith.constant 0 : index
    %c0_74 = arith.constant 0 : index
    %90 = vector.load %arg5[%c8_72, %c0_73, %c0_74] : memref<9x32x32xbf16, #tpu.memory_space<vmem>>, vector<1x32x32xbf16>
    %91 = vector.shape_cast %90 : vector<1x32x32xbf16> to vector<32x32xbf16>
    %92 = arith.truncf %89 : vector<256x32xf32> to vector<256x32xbf16>
    %cst_75 = arith.constant dense<0.000000e+00> : vector<256x32xf32>
    %93 = tpu.matmul %92, %91, %cst_75 {dimension_numbers = #tpu.dot_dimension_numbers<[1], [0], [0], [1], [0, 0, 1, 1], [], []>} : vector<256x32xbf16>, vector<32x32xbf16>, vector<256x32xf32> -> vector<256x32xf32>
    %94 = arith.addf %87, %93 : vector<256x32xf32>
    %cst_76 = arith.constant dense<0.000000e+00> : vector<256xf32>
    %95 = vector.multi_reduction <add>, %94, %cst_76 [1] : vector<256x32xf32> to vector<256xf32>
    %96 = vector.shape_cast %95 : vector<256xf32> to vector<256x1xf32>
    %cst_77 = arith.constant 3.200000e+01 : f32
    %97 = vector.broadcast %cst_77 : f32 to vector<256x1xf32>
    %98 = arith.divf %96, %97 : vector<256x1xf32>
    %99 = vector.broadcast %98 : vector<256x1xf32> to vector<256x32xf32>
    %100 = arith.subf %94, %99 : vector<256x32xf32>
    %101 = arith.mulf %100, %100 : vector<256x32xf32>
    %cst_78 = arith.constant dense<0.000000e+00> : vector<256xf32>
    %102 = vector.multi_reduction <add>, %101, %cst_78 [1] : vector<256x32xf32> to vector<256xf32>
    %103 = vector.shape_cast %102 : vector<256xf32> to vector<256x1xf32>
    %cst_79 = arith.constant 3.200000e+01 : f32
    %104 = vector.broadcast %cst_79 : f32 to vector<256x1xf32>
    %105 = arith.divf %103, %104 : vector<256x1xf32>
    %cst_80 = arith.constant 9.99999997E-7 : f32
    %106 = vector.broadcast %cst_80 : f32 to vector<256x1xf32>
    %107 = arith.addf %105, %106 : vector<256x1xf32>
    %108 = math.rsqrt %107 : vector<256x1xf32>
    %109 = vector.broadcast %108 : vector<256x1xf32> to vector<256x32xf32>
    %110 = arith.mulf %100, %109 : vector<256x32xf32>
    %c0_81 = arith.constant 0 : index
    %c0_82 = arith.constant 0 : index
    %111 = vector.load %arg6[%c0_81, %c0_82] : memref<1x32xf32, #tpu.memory_space<vmem>>, vector<1x32xf32>
    %112 = vector.broadcast %111 : vector<1x32xf32> to vector<256x32xf32>
    %113 = arith.mulf %110, %112 : vector<256x32xf32>
    %c0_83 = arith.constant 0 : index
    %c0_84 = arith.constant 0 : index
    %114 = vector.load %arg7[%c0_83, %c0_84] : memref<1x32xf32, #tpu.memory_space<vmem>>, vector<1x32xf32>
    %115 = vector.broadcast %114 : vector<1x32xf32> to vector<256x32xf32>
    %116 = arith.addf %113, %115 : vector<256x32xf32>
    %c0_85 = arith.constant 0 : index
    %c0_86 = arith.constant 0 : index
    %117 = vector.load %arg8[%c0_85, %c0_86] : memref<16x32xbf16, #tpu.memory_space<vmem>>, vector<16x32xbf16>
    %118 = arith.truncf %116 : vector<256x32xf32> to vector<256x32xbf16>
    %cst_87 = arith.constant dense<0.000000e+00> : vector<16x256xf32>
    %119 = tpu.matmul %117, %118, %cst_87 {dimension_numbers = #tpu.dot_dimension_numbers<[1], [1], [0], [0], [0, 0, 1, 0], [], []>} : vector<16x32xbf16>, vector<256x32xbf16>, vector<16x256xf32> -> vector<16x256xf32>
    %c0_88 = arith.constant 0 : index
    %c0_89 = arith.constant 0 : index
    %120 = vector.load %arg9[%c0_88, %c0_89] : memref<16x1xf32, #tpu.memory_space<vmem>>, vector<16x1xf32>
    %121 = vector.broadcast %120 : vector<16x1xf32> to vector<16x256xf32>
    %122 = arith.addf %119, %121 : vector<16x256xf32>
    %cst_90 = arith.constant 0.000000e+00 : f32
    %123 = vector.broadcast %cst_90 : f32 to vector<16x256xf32>
    %124 = arith.maximumf %122, %123 : vector<16x256xf32>
    %c0_91 = arith.constant 0 : index
    %c0_92 = arith.constant 0 : index
    %c0_93 = arith.constant 0 : index
    %125 = vector.load %arg10[%c0_91, %c0_92, %c0_93] : memref<1x16x256xf32, #tpu.memory_space<vmem>>, vector<1x16x256xf32>
    %126 = vector.shape_cast %125 : vector<1x16x256xf32> to vector<16x256xf32>
    %127 = vector.shape_cast %124 : vector<16x256xf32> to vector<1x16x256xf32>
    tpu.vector_store %arg10[%c0_91, %c0_92, %c0_93], %127 {strides = array<i32>} : memref<1x16x256xf32, #tpu.memory_space<vmem>>, vector<1x16x256xf32>,
    return
  }
  func.func @transform_0(%arg0: i32) -> (i32, i32, i32, i32) {
    %c0_i32 = arith.constant 0 : i32
    %c0_i32_0 = arith.constant 0 : i32
    %c0_i32_1 = arith.constant 0 : i32
    %c0_i32_2 = arith.constant 0 : i32
    return %arg0, %c0_i32, %c0_i32_0, %c0_i32_1 : i32, i32, i32, i32
  }
  func.func @transform_1(%arg0: i32) -> (i32, i32) {
    %c0_i32 = arith.constant 0 : i32
    %c0_i32_0 = arith.constant 0 : i32
    %c0_i32_1 = arith.constant 0 : i32
    return %c0_i32, %c0_i32_0 : i32, i32
  }
  func.func @transform_2(%arg0: i32) -> (i32, i32) {
    %c0_i32 = arith.constant 0 : i32
    %c0_i32_0 = arith.constant 0 : i32
    %c0_i32_1 = arith.constant 0 : i32
    return %c0_i32, %c0_i32_0 : i32, i32
  }
  func.func @transform_3(%arg0: i32) -> (i32, i32) {
    %c0_i32 = arith.constant 0 : i32
    %c0_i32_0 = arith.constant 0 : i32
    %c0_i32_1 = arith.constant 0 : i32
    return %c0_i32, %c0_i32_0 : i32, i32
  }
  func.func @transform_4(%arg0: i32) -> (i32, i32, i32) {
    %c0_i32 = arith.constant 0 : i32
    %c0_i32_0 = arith.constant 0 : i32
    %c0_i32_1 = arith.constant 0 : i32
    %c0_i32_2 = arith.constant 0 : i32
    return %c0_i32, %c0_i32_0, %c0_i32_1 : i32, i32, i32
  }
  func.func @transform_5(%arg0: i32) -> (i32, i32) {
    %c0_i32 = arith.constant 0 : i32
    %c0_i32_0 = arith.constant 0 : i32
    %c0_i32_1 = arith.constant 0 : i32
    return %c0_i32, %c0_i32_0 : i32, i32
  }
  func.func @transform_6(%arg0: i32) -> (i32, i32) {
    %c0_i32 = arith.constant 0 : i32
    %c0_i32_0 = arith.constant 0 : i32
    %c0_i32_1 = arith.constant 0 : i32
    return %c0_i32, %c0_i32_0 : i32, i32
  }
  func.func @transform_7(%arg0: i32) -> (i32, i32) {
    %c0_i32 = arith.constant 0 : i32
    %c0_i32_0 = arith.constant 0 : i32
    %c0_i32_1 = arith.constant 0 : i32
    return %c0_i32, %c0_i32_0 : i32, i32
  }
  func.func @transform_8(%arg0: i32) -> (i32, i32) {
    %c0_i32 = arith.constant 0 : i32
    %c0_i32_0 = arith.constant 0 : i32
    %c0_i32_1 = arith.constant 0 : i32
    return %c0_i32, %c0_i32_0 : i32, i32
  }
  func.func @transform_9(%arg0: i32) -> (i32, i32, i32) {
    %c0_i32 = arith.constant 0 : i32
    %c0_i32_0 = arith.constant 0 : i32
    %c0_i32_1 = arith.constant 0 : i32
    return %arg0, %c0_i32, %c0_i32_0 : i32, i32, i32
  }
}

module attributes {stable_mosaic.version = 11 : i64} {
  func.func @_conv_block_kernel(%arg0: i32, %arg1: memref<1x8x8x16xbf16, #tpu.memory_space<vmem>>, %arg2: memref<16x32xbf16, #tpu.memory_space<vmem>>, %arg3: memref<1x32xf32, #tpu.memory_space<vmem>>, %arg4: memref<1x32xf32, #tpu.memory_space<vmem>>, %arg5: memref<9x32x32xbf16, #tpu.memory_space<vmem>>, %arg6: memref<1x32xf32, #tpu.memory_space<vmem>>, %arg7: memref<1x32xf32, #tpu.memory_space<vmem>>, %arg8: memref<16x32xbf16, #tpu.memory_space<vmem>>, %arg9: memref<16x1xf32, #tpu.memory_space<vmem>>, %arg10: memref<1x16x64xf32, #tpu.memory_space<vmem>>, %arg11: memref<17x17x32xf32, #tpu.memory_space<vmem>>) attributes {dimension_semantics = [#tpu.dimension_semantics<parallel>], iteration_bounds = array<i64: 2>, scalar_prefetch = 0 : i64, scratch_operands = 1 : i64, tpu.core_type = #tpu.core_type<tc>, window_params = [{transform_indices = @transform_0, window_bounds = array<i64: 1, 8, 8, 16>}, {pipeline_mode = #tpu.pipeline_mode<synchronous>, transform_indices = @transform_1, window_bounds = array<i64: 16, 32>}, {pipeline_mode = #tpu.pipeline_mode<synchronous>, transform_indices = @transform_2, window_bounds = array<i64: 1, 32>}, {pipeline_mode = #tpu.pipeline_mode<synchronous>, transform_indices = @transform_3, window_bounds = array<i64: 1, 32>}, {pipeline_mode = #tpu.pipeline_mode<synchronous>, transform_indices = @transform_4, window_bounds = array<i64: 9, 32, 32>}, {pipeline_mode = #tpu.pipeline_mode<synchronous>, transform_indices = @transform_5, window_bounds = array<i64: 1, 32>}, {pipeline_mode = #tpu.pipeline_mode<synchronous>, transform_indices = @transform_6, window_bounds = array<i64: 1, 32>}, {pipeline_mode = #tpu.pipeline_mode<synchronous>, transform_indices = @transform_7, window_bounds = array<i64: 16, 32>}, {pipeline_mode = #tpu.pipeline_mode<synchronous>, transform_indices = @transform_8, window_bounds = array<i64: 16, 1>}, {transform_indices = @transform_9, window_bounds = array<i64: 1, 16, 64>}]} {
    %c0 = arith.constant 0 : index
    %c0_0 = arith.constant 0 : index
    %c0_1 = arith.constant 0 : index
    %c0_2 = arith.constant 0 : index
    %0 = vector.load %arg1[%c0, %c0_0, %c0_1, %c0_2] : memref<1x8x8x16xbf16, #tpu.memory_space<vmem>>, vector<1x8x8x16xbf16>
    %1 = vector.shape_cast %0 : vector<1x8x8x16xbf16> to vector<8x8x16xbf16>
    %2 = vector.shape_cast %1 : vector<8x8x16xbf16> to vector<64x16xbf16>
    %c0_3 = arith.constant 0 : index
    %c0_4 = arith.constant 0 : index
    %3 = vector.load %arg2[%c0_3, %c0_4] : memref<16x32xbf16, #tpu.memory_space<vmem>>, vector<16x32xbf16>
    %cst = arith.constant dense<0.000000e+00> : vector<64x32xf32>
    %4 = tpu.matmul %2, %3, %cst {dimension_numbers = #tpu.dot_dimension_numbers<[1], [0], [0], [1], [0, 0, 1, 1], [], []>} : vector<64x16xbf16>, vector<16x32xbf16>, vector<64x32xf32> -> vector<64x32xf32>
    %cst_5 = arith.constant dense<0.000000e+00> : vector<64xf32>
    %5 = vector.multi_reduction <add>, %4, %cst_5 [1] : vector<64x32xf32> to vector<64xf32>
    %6 = vector.shape_cast %5 : vector<64xf32> to vector<64x1xf32>
    %cst_6 = arith.constant 3.200000e+01 : f32
    %7 = vector.broadcast %cst_6 : f32 to vector<64x1xf32>
    %8 = arith.divf %6, %7 : vector<64x1xf32>
    %9 = vector.broadcast %8 : vector<64x1xf32> to vector<64x32xf32>
    %10 = arith.subf %4, %9 : vector<64x32xf32>
    %11 = arith.mulf %10, %10 : vector<64x32xf32>
    %cst_7 = arith.constant dense<0.000000e+00> : vector<64xf32>
    %12 = vector.multi_reduction <add>, %11, %cst_7 [1] : vector<64x32xf32> to vector<64xf32>
    %13 = vector.shape_cast %12 : vector<64xf32> to vector<64x1xf32>
    %cst_8 = arith.constant 3.200000e+01 : f32
    %14 = vector.broadcast %cst_8 : f32 to vector<64x1xf32>
    %15 = arith.divf %13, %14 : vector<64x1xf32>
    %cst_9 = arith.constant 9.99999997E-7 : f32
    %16 = vector.broadcast %cst_9 : f32 to vector<64x1xf32>
    %17 = arith.addf %15, %16 : vector<64x1xf32>
    %18 = math.rsqrt %17 : vector<64x1xf32>
    %19 = vector.broadcast %18 : vector<64x1xf32> to vector<64x32xf32>
    %20 = arith.mulf %10, %19 : vector<64x32xf32>
    %c0_10 = arith.constant 0 : index
    %c0_11 = arith.constant 0 : index
    %21 = vector.load %arg3[%c0_10, %c0_11] : memref<1x32xf32, #tpu.memory_space<vmem>>, vector<1x32xf32>
    %22 = vector.broadcast %21 : vector<1x32xf32> to vector<64x32xf32>
    %23 = arith.mulf %20, %22 : vector<64x32xf32>
    %c0_12 = arith.constant 0 : index
    %c0_13 = arith.constant 0 : index
    %24 = vector.load %arg4[%c0_12, %c0_13] : memref<1x32xf32, #tpu.memory_space<vmem>>, vector<1x32xf32>
    %25 = vector.broadcast %24 : vector<1x32xf32> to vector<64x32xf32>
    %26 = arith.addf %23, %25 : vector<64x32xf32>
    %cst_14 = arith.constant 0.000000e+00 : f32
    %27 = vector.broadcast %cst_14 : f32 to vector<17x17x32xf32>
    %c0_15 = arith.constant 0 : index
    %c0_16 = arith.constant 0 : index
    %c0_17 = arith.constant 0 : index
    %28 = vector.load %arg11[%c0_15, %c0_16, %c0_17] : memref<17x17x32xf32, #tpu.memory_space<vmem>>, vector<17x17x32xf32>
    tpu.vector_store %arg11[%c0_15, %c0_16, %c0_17], %27 {strides = array<i32>} : memref<17x17x32xf32, #tpu.memory_space<vmem>>, vector<17x17x32xf32>,
    %29 = vector.shape_cast %26 : vector<64x32xf32> to vector<8x8x32xf32>
    %c8 = arith.constant 8 : index
    %c8_18 = arith.constant 8 : index
    %c0_19 = arith.constant 0 : index
    %30 = vector.load %arg11[%c8, %c8_18, %c0_19] : memref<17x17x32xf32, #tpu.memory_space<vmem>>, vector<8x8x32xf32>
    tpu.vector_store %arg11[%c8, %c8_18, %c0_19], %29 {strides = array<i32>} : memref<17x17x32xf32, #tpu.memory_space<vmem>>, vector<8x8x32xf32>,
    %cst_20 = arith.constant 0.000000e+00 : f32
    %31 = vector.broadcast %cst_20 : f32 to vector<64x32xf32>
    %c7 = arith.constant 7 : index
    %c7_21 = arith.constant 7 : index
    %c0_22 = arith.constant 0 : index
    %32 = vector.load %arg11[%c7, %c7_21, %c0_22] : memref<17x17x32xf32, #tpu.memory_space<vmem>>, vector<8x8x32xf32>
    %33 = vector.shape_cast %32 : vector<8x8x32xf32> to vector<64x32xf32>
    %c0_23 = arith.constant 0 : index
    %c0_24 = arith.constant 0 : index
    %c0_25 = arith.constant 0 : index
    %34 = vector.load %arg5[%c0_23, %c0_24, %c0_25] : memref<9x32x32xbf16, #tpu.memory_space<vmem>>, vector<1x32x32xbf16>
    %35 = vector.shape_cast %34 : vector<1x32x32xbf16> to vector<32x32xbf16>
    %36 = arith.truncf %33 : vector<64x32xf32> to vector<64x32xbf16>
    %cst_26 = arith.constant dense<0.000000e+00> : vector<64x32xf32>
    %37 = tpu.matmul %36, %35, %cst_26 {dimension_numbers = #tpu.dot_dimension_numbers<[1], [0], [0], [1], [0, 0, 1, 1], [], []>} : vector<64x32xbf16>, vector<32x32xbf16>, vector<64x32xf32> -> vector<64x32xf32>
    %38 = arith.addf %31, %37 : vector<64x32xf32>
    %c7_27 = arith.constant 7 : index
    %c8_28 = arith.constant 8 : index
    %c0_29 = arith.constant 0 : index
    %39 = vector.load %arg11[%c7_27, %c8_28, %c0_29] : memref<17x17x32xf32, #tpu.memory_space<vmem>>, vector<8x8x32xf32>
    %40 = vector.shape_cast %39 : vector<8x8x32xf32> to vector<64x32xf32>
    %c1 = arith.constant 1 : index
    %c0_30 = arith.constant 0 : index
    %c0_31 = arith.constant 0 : index
    %41 = vector.load %arg5[%c1, %c0_30, %c0_31] : memref<9x32x32xbf16, #tpu.memory_space<vmem>>, vector<1x32x32xbf16>
    %42 = vector.shape_cast %41 : vector<1x32x32xbf16> to vector<32x32xbf16>
    %43 = arith.truncf %40 : vector<64x32xf32> to vector<64x32xbf16>
    %cst_32 = arith.constant dense<0.000000e+00> : vector<64x32xf32>
    %44 = tpu.matmul %43, %42, %cst_32 {dimension_numbers = #tpu.dot_dimension_numbers<[1], [0], [0], [1], [0, 0, 1, 1], [], []>} : vector<64x32xbf16>, vector<32x32xbf16>, vector<64x32xf32> -> vector<64x32xf32>
    %45 = arith.addf %38, %44 : vector<64x32xf32>
    %c7_33 = arith.constant 7 : index
    %c9 = arith.constant 9 : index
    %c0_34 = arith.constant 0 : index
    %46 = vector.load %arg11[%c7_33, %c9, %c0_34] : memref<17x17x32xf32, #tpu.memory_space<vmem>>, vector<8x8x32xf32>
    %47 = vector.shape_cast %46 : vector<8x8x32xf32> to vector<64x32xf32>
    %c2 = arith.constant 2 : index
    %c0_35 = arith.constant 0 : index
    %c0_36 = arith.constant 0 : index
    %48 = vector.load %arg5[%c2, %c0_35, %c0_36] : memref<9x32x32xbf16, #tpu.memory_space<vmem>>, vector<1x32x32xbf16>
    %49 = vector.shape_cast %48 : vector<1x32x32xbf16> to vector<32x32xbf16>
    %50 = arith.truncf %47 : vector<64x32xf32> to vector<64x32xbf16>
    %cst_37 = arith.constant dense<0.000000e+00> : vector<64x32xf32>
    %51 = tpu.matmul %50, %49, %cst_37 {dimension_numbers = #tpu.dot_dimension_numbers<[1], [0], [0], [1], [0, 0, 1, 1], [], []>} : vector<64x32xbf16>, vector<32x32xbf16>, vector<64x32xf32> -> vector<64x32xf32>
    %52 = arith.addf %45, %51 : vector<64x32xf32>
    %c8_38 = arith.constant 8 : index
    %c7_39 = arith.constant 7 : index
    %c0_40 = arith.constant 0 : index
    %53 = vector.load %arg11[%c8_38, %c7_39, %c0_40] : memref<17x17x32xf32, #tpu.memory_space<vmem>>, vector<8x8x32xf32>
    %54 = vector.shape_cast %53 : vector<8x8x32xf32> to vector<64x32xf32>
    %c3 = arith.constant 3 : index
    %c0_41 = arith.constant 0 : index
    %c0_42 = arith.constant 0 : index
    %55 = vector.load %arg5[%c3, %c0_41, %c0_42] : memref<9x32x32xbf16, #tpu.memory_space<vmem>>, vector<1x32x32xbf16>
    %56 = vector.shape_cast %55 : vector<1x32x32xbf16> to vector<32x32xbf16>
    %57 = arith.truncf %54 : vector<64x32xf32> to vector<64x32xbf16>
    %cst_43 = arith.constant dense<0.000000e+00> : vector<64x32xf32>
    %58 = tpu.matmul %57, %56, %cst_43 {dimension_numbers = #tpu.dot_dimension_numbers<[1], [0], [0], [1], [0, 0, 1, 1], [], []>} : vector<64x32xbf16>, vector<32x32xbf16>, vector<64x32xf32> -> vector<64x32xf32>
    %59 = arith.addf %52, %58 : vector<64x32xf32>
    %c8_44 = arith.constant 8 : index
    %c8_45 = arith.constant 8 : index
    %c0_46 = arith.constant 0 : index
    %60 = vector.load %arg11[%c8_44, %c8_45, %c0_46] : memref<17x17x32xf32, #tpu.memory_space<vmem>>, vector<8x8x32xf32>
    %61 = vector.shape_cast %60 : vector<8x8x32xf32> to vector<64x32xf32>
    %c4 = arith.constant 4 : index
    %c0_47 = arith.constant 0 : index
    %c0_48 = arith.constant 0 : index
    %62 = vector.load %arg5[%c4, %c0_47, %c0_48] : memref<9x32x32xbf16, #tpu.memory_space<vmem>>, vector<1x32x32xbf16>
    %63 = vector.shape_cast %62 : vector<1x32x32xbf16> to vector<32x32xbf16>
    %64 = arith.truncf %61 : vector<64x32xf32> to vector<64x32xbf16>
    %cst_49 = arith.constant dense<0.000000e+00> : vector<64x32xf32>
    %65 = tpu.matmul %64, %63, %cst_49 {dimension_numbers = #tpu.dot_dimension_numbers<[1], [0], [0], [1], [0, 0, 1, 1], [], []>} : vector<64x32xbf16>, vector<32x32xbf16>, vector<64x32xf32> -> vector<64x32xf32>
    %66 = arith.addf %59, %65 : vector<64x32xf32>
    %c8_50 = arith.constant 8 : index
    %c9_51 = arith.constant 9 : index
    %c0_52 = arith.constant 0 : index
    %67 = vector.load %arg11[%c8_50, %c9_51, %c0_52] : memref<17x17x32xf32, #tpu.memory_space<vmem>>, vector<8x8x32xf32>
    %68 = vector.shape_cast %67 : vector<8x8x32xf32> to vector<64x32xf32>
    %c5 = arith.constant 5 : index
    %c0_53 = arith.constant 0 : index
    %c0_54 = arith.constant 0 : index
    %69 = vector.load %arg5[%c5, %c0_53, %c0_54] : memref<9x32x32xbf16, #tpu.memory_space<vmem>>, vector<1x32x32xbf16>
    %70 = vector.shape_cast %69 : vector<1x32x32xbf16> to vector<32x32xbf16>
    %71 = arith.truncf %68 : vector<64x32xf32> to vector<64x32xbf16>
    %cst_55 = arith.constant dense<0.000000e+00> : vector<64x32xf32>
    %72 = tpu.matmul %71, %70, %cst_55 {dimension_numbers = #tpu.dot_dimension_numbers<[1], [0], [0], [1], [0, 0, 1, 1], [], []>} : vector<64x32xbf16>, vector<32x32xbf16>, vector<64x32xf32> -> vector<64x32xf32>
    %73 = arith.addf %66, %72 : vector<64x32xf32>
    %c9_56 = arith.constant 9 : index
    %c7_57 = arith.constant 7 : index
    %c0_58 = arith.constant 0 : index
    %74 = vector.load %arg11[%c9_56, %c7_57, %c0_58] : memref<17x17x32xf32, #tpu.memory_space<vmem>>, vector<8x8x32xf32>
    %75 = vector.shape_cast %74 : vector<8x8x32xf32> to vector<64x32xf32>
    %c6 = arith.constant 6 : index
    %c0_59 = arith.constant 0 : index
    %c0_60 = arith.constant 0 : index
    %76 = vector.load %arg5[%c6, %c0_59, %c0_60] : memref<9x32x32xbf16, #tpu.memory_space<vmem>>, vector<1x32x32xbf16>
    %77 = vector.shape_cast %76 : vector<1x32x32xbf16> to vector<32x32xbf16>
    %78 = arith.truncf %75 : vector<64x32xf32> to vector<64x32xbf16>
    %cst_61 = arith.constant dense<0.000000e+00> : vector<64x32xf32>
    %79 = tpu.matmul %78, %77, %cst_61 {dimension_numbers = #tpu.dot_dimension_numbers<[1], [0], [0], [1], [0, 0, 1, 1], [], []>} : vector<64x32xbf16>, vector<32x32xbf16>, vector<64x32xf32> -> vector<64x32xf32>
    %80 = arith.addf %73, %79 : vector<64x32xf32>
    %c9_62 = arith.constant 9 : index
    %c8_63 = arith.constant 8 : index
    %c0_64 = arith.constant 0 : index
    %81 = vector.load %arg11[%c9_62, %c8_63, %c0_64] : memref<17x17x32xf32, #tpu.memory_space<vmem>>, vector<8x8x32xf32>
    %82 = vector.shape_cast %81 : vector<8x8x32xf32> to vector<64x32xf32>
    %c7_65 = arith.constant 7 : index
    %c0_66 = arith.constant 0 : index
    %c0_67 = arith.constant 0 : index
    %83 = vector.load %arg5[%c7_65, %c0_66, %c0_67] : memref<9x32x32xbf16, #tpu.memory_space<vmem>>, vector<1x32x32xbf16>
    %84 = vector.shape_cast %83 : vector<1x32x32xbf16> to vector<32x32xbf16>
    %85 = arith.truncf %82 : vector<64x32xf32> to vector<64x32xbf16>
    %cst_68 = arith.constant dense<0.000000e+00> : vector<64x32xf32>
    %86 = tpu.matmul %85, %84, %cst_68 {dimension_numbers = #tpu.dot_dimension_numbers<[1], [0], [0], [1], [0, 0, 1, 1], [], []>} : vector<64x32xbf16>, vector<32x32xbf16>, vector<64x32xf32> -> vector<64x32xf32>
    %87 = arith.addf %80, %86 : vector<64x32xf32>
    %c9_69 = arith.constant 9 : index
    %c9_70 = arith.constant 9 : index
    %c0_71 = arith.constant 0 : index
    %88 = vector.load %arg11[%c9_69, %c9_70, %c0_71] : memref<17x17x32xf32, #tpu.memory_space<vmem>>, vector<8x8x32xf32>
    %89 = vector.shape_cast %88 : vector<8x8x32xf32> to vector<64x32xf32>
    %c8_72 = arith.constant 8 : index
    %c0_73 = arith.constant 0 : index
    %c0_74 = arith.constant 0 : index
    %90 = vector.load %arg5[%c8_72, %c0_73, %c0_74] : memref<9x32x32xbf16, #tpu.memory_space<vmem>>, vector<1x32x32xbf16>
    %91 = vector.shape_cast %90 : vector<1x32x32xbf16> to vector<32x32xbf16>
    %92 = arith.truncf %89 : vector<64x32xf32> to vector<64x32xbf16>
    %cst_75 = arith.constant dense<0.000000e+00> : vector<64x32xf32>
    %93 = tpu.matmul %92, %91, %cst_75 {dimension_numbers = #tpu.dot_dimension_numbers<[1], [0], [0], [1], [0, 0, 1, 1], [], []>} : vector<64x32xbf16>, vector<32x32xbf16>, vector<64x32xf32> -> vector<64x32xf32>
    %94 = arith.addf %87, %93 : vector<64x32xf32>
    %cst_76 = arith.constant dense<0.000000e+00> : vector<64xf32>
    %95 = vector.multi_reduction <add>, %94, %cst_76 [1] : vector<64x32xf32> to vector<64xf32>
    %96 = vector.shape_cast %95 : vector<64xf32> to vector<64x1xf32>
    %cst_77 = arith.constant 3.200000e+01 : f32
    %97 = vector.broadcast %cst_77 : f32 to vector<64x1xf32>
    %98 = arith.divf %96, %97 : vector<64x1xf32>
    %99 = vector.broadcast %98 : vector<64x1xf32> to vector<64x32xf32>
    %100 = arith.subf %94, %99 : vector<64x32xf32>
    %101 = arith.mulf %100, %100 : vector<64x32xf32>
    %cst_78 = arith.constant dense<0.000000e+00> : vector<64xf32>
    %102 = vector.multi_reduction <add>, %101, %cst_78 [1] : vector<64x32xf32> to vector<64xf32>
    %103 = vector.shape_cast %102 : vector<64xf32> to vector<64x1xf32>
    %cst_79 = arith.constant 3.200000e+01 : f32
    %104 = vector.broadcast %cst_79 : f32 to vector<64x1xf32>
    %105 = arith.divf %103, %104 : vector<64x1xf32>
    %cst_80 = arith.constant 9.99999997E-7 : f32
    %106 = vector.broadcast %cst_80 : f32 to vector<64x1xf32>
    %107 = arith.addf %105, %106 : vector<64x1xf32>
    %108 = math.rsqrt %107 : vector<64x1xf32>
    %109 = vector.broadcast %108 : vector<64x1xf32> to vector<64x32xf32>
    %110 = arith.mulf %100, %109 : vector<64x32xf32>
    %c0_81 = arith.constant 0 : index
    %c0_82 = arith.constant 0 : index
    %111 = vector.load %arg6[%c0_81, %c0_82] : memref<1x32xf32, #tpu.memory_space<vmem>>, vector<1x32xf32>
    %112 = vector.broadcast %111 : vector<1x32xf32> to vector<64x32xf32>
    %113 = arith.mulf %110, %112 : vector<64x32xf32>
    %c0_83 = arith.constant 0 : index
    %c0_84 = arith.constant 0 : index
    %114 = vector.load %arg7[%c0_83, %c0_84] : memref<1x32xf32, #tpu.memory_space<vmem>>, vector<1x32xf32>
    %115 = vector.broadcast %114 : vector<1x32xf32> to vector<64x32xf32>
    %116 = arith.addf %113, %115 : vector<64x32xf32>
    %c0_85 = arith.constant 0 : index
    %c0_86 = arith.constant 0 : index
    %117 = vector.load %arg8[%c0_85, %c0_86] : memref<16x32xbf16, #tpu.memory_space<vmem>>, vector<16x32xbf16>
    %118 = arith.truncf %116 : vector<64x32xf32> to vector<64x32xbf16>
    %cst_87 = arith.constant dense<0.000000e+00> : vector<16x64xf32>
    %119 = tpu.matmul %117, %118, %cst_87 {dimension_numbers = #tpu.dot_dimension_numbers<[1], [1], [0], [0], [0, 0, 1, 0], [], []>} : vector<16x32xbf16>, vector<64x32xbf16>, vector<16x64xf32> -> vector<16x64xf32>
    %c0_88 = arith.constant 0 : index
    %c0_89 = arith.constant 0 : index
    %120 = vector.load %arg9[%c0_88, %c0_89] : memref<16x1xf32, #tpu.memory_space<vmem>>, vector<16x1xf32>
    %121 = vector.broadcast %120 : vector<16x1xf32> to vector<16x64xf32>
    %122 = arith.addf %119, %121 : vector<16x64xf32>
    %cst_90 = arith.constant 0.000000e+00 : f32
    %123 = vector.broadcast %cst_90 : f32 to vector<16x64xf32>
    %124 = arith.maximumf %122, %123 : vector<16x64xf32>
    %c0_91 = arith.constant 0 : index
    %c0_92 = arith.constant 0 : index
    %c0_93 = arith.constant 0 : index
    %125 = vector.load %arg10[%c0_91, %c0_92, %c0_93] : memref<1x16x64xf32, #tpu.memory_space<vmem>>, vector<1x16x64xf32>
    %126 = vector.shape_cast %125 : vector<1x16x64xf32> to vector<16x64xf32>
    %127 = vector.shape_cast %124 : vector<16x64xf32> to vector<1x16x64xf32>
    tpu.vector_store %arg10[%c0_91, %c0_92, %c0_93], %127 {strides = array<i32>} : memref<1x16x64xf32, #tpu.memory_space<vmem>>, vector<1x16x64xf32>,
    return
  }
  func.func @transform_0(%arg0: i32) -> (i32, i32, i32, i32) {
    %c0_i32 = arith.constant 0 : i32
    %c0_i32_0 = arith.constant 0 : i32
    %c0_i32_1 = arith.constant 0 : i32
    %c0_i32_2 = arith.constant 0 : i32
    return %arg0, %c0_i32, %c0_i32_0, %c0_i32_1 : i32, i32, i32, i32
  }
  func.func @transform_1(%arg0: i32) -> (i32, i32) {
    %c0_i32 = arith.constant 0 : i32
    %c0_i32_0 = arith.constant 0 : i32
    %c0_i32_1 = arith.constant 0 : i32
    return %c0_i32, %c0_i32_0 : i32, i32
  }
  func.func @transform_2(%arg0: i32) -> (i32, i32) {
    %c0_i32 = arith.constant 0 : i32
    %c0_i32_0 = arith.constant 0 : i32
    %c0_i32_1 = arith.constant 0 : i32
    return %c0_i32, %c0_i32_0 : i32, i32
  }
  func.func @transform_3(%arg0: i32) -> (i32, i32) {
    %c0_i32 = arith.constant 0 : i32
    %c0_i32_0 = arith.constant 0 : i32
    %c0_i32_1 = arith.constant 0 : i32
    return %c0_i32, %c0_i32_0 : i32, i32
  }
  func.func @transform_4(%arg0: i32) -> (i32, i32, i32) {
    %c0_i32 = arith.constant 0 : i32
    %c0_i32_0 = arith.constant 0 : i32
    %c0_i32_1 = arith.constant 0 : i32
    %c0_i32_2 = arith.constant 0 : i32
    return %c0_i32, %c0_i32_0, %c0_i32_1 : i32, i32, i32
  }
  func.func @transform_5(%arg0: i32) -> (i32, i32) {
    %c0_i32 = arith.constant 0 : i32
    %c0_i32_0 = arith.constant 0 : i32
    %c0_i32_1 = arith.constant 0 : i32
    return %c0_i32, %c0_i32_0 : i32, i32
  }
  func.func @transform_6(%arg0: i32) -> (i32, i32) {
    %c0_i32 = arith.constant 0 : i32
    %c0_i32_0 = arith.constant 0 : i32
    %c0_i32_1 = arith.constant 0 : i32
    return %c0_i32, %c0_i32_0 : i32, i32
  }
  func.func @transform_7(%arg0: i32) -> (i32, i32) {
    %c0_i32 = arith.constant 0 : i32
    %c0_i32_0 = arith.constant 0 : i32
    %c0_i32_1 = arith.constant 0 : i32
    return %c0_i32, %c0_i32_0 : i32, i32
  }
  func.func @transform_8(%arg0: i32) -> (i32, i32) {
    %c0_i32 = arith.constant 0 : i32
    %c0_i32_0 = arith.constant 0 : i32
    %c0_i32_1 = arith.constant 0 : i32
    return %c0_i32, %c0_i32_0 : i32, i32
  }
  func.func @transform_9(%arg0: i32) -> (i32, i32, i32) {
    %c0_i32 = arith.constant 0 : i32
    %c0_i32_0 = arith.constant 0 : i32
    %c0_i32_1 = arith.constant 0 : i32
    return %arg0, %c0_i32, %c0_i32_0 : i32, i32, i32
  }
}

</mosaic_0001>

<bundles_post_ra>
// kernel: tile.18
= control target key start
LH: loop header
LB: loop body
LE: loop exit
PB: predicated region body
PF: predicated region fallthrough
CT: control target
= control target key end

     0   :  { %s22_s0 = inlined_call_operand.vmem [shape: f32[16], index: 0, kind: input, shape index: {}]   ;;  %s23_s1 = inlined_call_operand.vmem [shape: f32[4,16], index: 1, kind: output, shape index: {}]  }
   0x1   :  { %v4_v0 = vld [vmem:[%s22_s0] ss:$0 sm:$0xff] }
   0x2   :  { %5 = vst [vmem:[%s23_s1] sm:$0xf] %v4_v0 }

// kernel: tile.19
= control target key start
LH: loop header
LB: loop body
LE: loop exit
PB: predicated region body
PF: predicated region fallthrough
CT: control target
= control target key end

     0   :  { %vm7_vm0 = vcmask 130048   ;;  %s37_s8 = smov 16   ;;  %s38_s9 = smov 32   ;;  %vm13_vm1 = vcmask 523648   ;;  %vm19_vm2 = vcmask 392448   ;;  %vm25_vm3 = vcmask 261248   ;;  %s55_s0 = inlined_call_operand.vmem [shape: f32[4,16], index: 0, kind: input, shape index: {}]   ;;  %s56_s1 = inlined_call_operand.vmem [shape: f32[1,64], index: 1, kind: output, shape index: {}]  }
   0x1   :  { %v4_v0 = vld [vmem:[%s55_s0] sm:$0xf]  ;;  %s36_s0 = smov 48  }
   0x2   :  { %5 = vst [vmem:[#allocation1] sm:$0xf] %v4_v0 }
   0x9   :  { %v10_v1 = vld [vmem:[#allocation1 + $0x3] sm:$0x1]   ;;  %v22_v2 = vld [vmem:[#allocation1 + $0x1] sm:$0x1]   ;;  %v6_v3 = vld [vmem:[#allocation1] sm:$0x1]  }
   0xa   :  { %11 = vrot.lane.b32.xlu0 %v10_v1, %s36_s0  ;;  %23 = vrot.lane.b32.xlu1 %v22_v2, %s37_s8  ;;  %v16_v4 = vld [vmem:[#allocation1 + $0x2] sm:$0x1]   ;;  %8 = vst.msk [vmem:[#allocation0] sm:$0x1] %vm7_vm0, %v6_v3  }
   0xe   :  { %17 = vrot.lane.b32.xlu0 %v16_v4, %s38_s9 }
  0x7c   :  { %v12_v5 = vpop.permute.xlu0 %11   ;;  %v24_v6 = vpop.permute.xlu1 %23  }
  0x7d   :  { %14 = vst.msk [vmem:[#allocation0] sm:$0x1] %vm13_vm1, %v12_v5  }
  0x80   :  { %v18_v7 = vpop.permute.xlu0 %17  }
  0x81   :  { %20 = vst.msk [vmem:[#allocation0] sm:$0x1] %vm19_vm2, %v18_v7  }
  0x82   :  { %26 = vst.msk [vmem:[#allocation0] sm:$0x1] %vm25_vm3, %v24_v6  }
  0x89   :  { %v30_v8 = vld [vmem:[#allocation0] sm:$0x1] }
  0x8a   :  { %32 = vst [vmem:[%s56_s1] sm:$0x1] %v30_v8 }

// kernel: sam_fpn_forward.7
= control target key start
LH: loop header
LB: loop body
LE: loop exit
PB: predicated region body
PF: predicated region fallthrough
CT: control target
= control target key end

     0   :  { %s2174_s21 = smov 0   ;;  %s2176_s22 = smov 0   ;;  %s2481_s0 = inlined_call_operand.vmem [shape: bf16[2,16,192], index: 0, kind: input, shape index: {}]   ;;  %s2482_s1 = inlined_call_operand.vmem [shape: bf16[192,32], index: 1, kind: input, shape index: {}]   ;;  %s2483_s2 = inlined_call_operand.vmem [shape: f32[1,32], index: 2, kind: input, shape index: {}]   ;;  %s2484_s3 = inlined_call_operand.vmem [shape: f32[1,16,32], index: 3, kind: input, shape index: {}]   ;;  %s2485_s4 = inlined_call_operand.vmem [shape: f32[2,1,32], index: 4, kind: input, shape index: {}]   ;;  %s2486_s5 = inlined_call_operand.vmem [shape: f32[2,1,32], index: 5, kind: input, shape index: {}]   ;;  %s2487_s6 = inlined_call_operand.vmem [shape: bf16[2,32,96], index: 6, kind: input, shape index: {}]   ;;  %s2488_s7 = inlined_call_operand.vmem [shape: f32[2,1,96], index: 7, kind: input, shape index: {}]   ;;  %s2489_s8 = inlined_call_operand.vmem [shape: bf16[2,32,32], index: 8, kind: input, shape index: {}]   ;;  %s2490_s9 = inlined_call_operand.vmem [shape: f32[2,1,32], index: 9, kind: input, shape index: {}]   ;;  %s2491_s10 = inlined_call_operand.vmem [shape: f32[2,1,32], index: 10, kind: input, shape index: {}]   ;;  %s2492_s11 = inlined_call_operand.vmem [shape: f32[2,1,32], index: 11, kind: input, shape index: {}]   ;;  %s2493_s12 = inlined_call_operand.vmem [shape: bf16[2,32,64], index: 12, kind: input, shape index: {}]   ;;  %s2494_s13 = inlined_call_operand.vmem [shape: f32[2,1,64], index: 13, kind: input, shape index: {}]   ;;  %s2495_s14 = inlined_call_operand.vmem [shape: bf16[2,64,32], index: 14, kind: input, shape index: {}]   ;;  %s2496_s15 = inlined_call_operand.vmem [shape: f32[2,1,32], index: 15, kind: input, shape index: {}]   ;;  %s2497_s16 = inlined_call_operand.vmem [shape: f32[2,16,32], index: 16, kind: output, shape index: {}]  }
   0x1   :  { %2505 = sst [smem:[#allocation9_spill]] %s2481_s0  ;;  %s2178_s23 = smov 0  }
   0x2   :  { %2506 = sst [smem:[#allocation10_spill]] %s2482_s1  ;;  %s2180_s24 = smov 0  }
   0x3   :  { %2507 = sst [smem:[#allocation11_spill]] %s2483_s2  ;;  %s2182_s25 = smov 0  }
   0x4   :  { %2508 = sst [smem:[#allocation12_spill]] %s2484_s3 }
   0x5   :  { %2509 = sst [smem:[#allocation13_spill]] %s2486_s5 }
   0x6   :  { %2510 = sst [smem:[#allocation14_spill]] %s2487_s6 }
   0x7   :  { %2511 = sst [smem:[#allocation15_spill]] %s2489_s8 }
   0x8 LB: > { %2512 = sst [smem:[#allocation2_spill]] %s2063_s21  ;;  %s35_s26 = sadd.s32 1, %s2071_s23  ;;  %s2079_s25 = sphi %s2182_s25, %s26_s25   ;;  %s2075_s24 = sphi %s2180_s24, %s2539_s24   ;;  %s2071_s23 = sphi %s2178_s23, %s2538_s23   ;;  %s2067_s22 = sphi %s2176_s22, %s2537_s22   ;;  %s2063_s21 = sphi %s2174_s21, %s2536_s21  }
   0x9   : > { %2513 = sst [smem:[#allocation3_spill]] %s2071_s23  ;;  %s38_s27 = sadd.s32 1, %s2075_s24 }
   0xa   : > { %2514 = sst [smem:[#allocation4_spill]] %s2075_s24  ;;  %p36_p0 = scmp.ge.s32.totalorder %s35_s26, 2 }
   0xb   : > { %2515 = sst [smem:[#allocation5_spill]] %s2079_s25  ;;  %p1788_p1 = scmp.ge.s32.totalorder %s2079_s25, 1 }
   0xc   : > { %p578_p2 = scmp.lt.s32.totalorder %s2079_s25, 5  ;;  %s2541_s26 = smov (%p36_p0, %s35_s26), 0 }
   0xd   : > { %2516 = sst [smem:[#allocation6_spill]] %s2541_s26  ;;  %s2543_s27 = smov (!%p36_p0, %s38_s27), %s2075_s24 }
   0xe   : > { %p579_p3 = pnand %p1788_p1, %p578_p2  ;;  %p40_p4 = scmp.ge.s32.totalorder %s2543_s27, 2 }
  0x10   : > { %s2545_s27 = smov (%p40_p4, %s2543_s27), 0  ;;  %582 = sbr.rel (%p579_p3) target bundleno = 2735 (0xaaf), region = 84 }
  0x11   : > { %2517 = sst [smem:[#allocation7_spill]] %s2545_s27 }
  0x17   : > { %p672_p5 = scmp.lt.s32.totalorder %s2067_s22, 1  ;;  %p677_p6 = scmp.lt.s32.totalorder %s2063_s21, 1 }
  0x18   : > { %s2518_s17 = sld [smem:[#allocation9_spill]]  ;;  %s2521_s6 = sld [smem:[#allocation14_spill]] }
  0x19   : > { %s2547_s22 = smov (!%p672_p5, %s2067_s22), 1  ;;  %s2522_s8 = sld [smem:[#allocation15_spill]] }
  0x1a   : > { %s2208_s28 = scalar_select %p677_p6, %s2063_s21, 1 }
  0x1b   : > { %s1847_s29 = sshll.u32 %s2547_s22, 4 }
  0x1c   : > { %s1848_s25 = sshll.u32 %s2208_s28, 4  ;;  %s720_s24 = scalar_lea.vmem %s2496_s15, %s2208_s28 }
  0x1d   : > { %s2253_s22 = scalar_lea.vmem %s2493_s12, %s1848_s25  ;;  %s2272_s5 = scalar_lea.vmem %s2497_s16, %s1847_s29 }
  0x1e   : > { %s2213_s18 = scalar_lea.vmem %s2518_s17, %s1847_s29  ;;  %s2227_s1 = scalar_lea.vmem %s2521_s6, %s1848_s25 }
  0x1f   : > { %2519 = sst [smem:[#allocation8_spill]] %s2213_s18  ;;  %s2236_s18 = scalar_lea.vmem %s2522_s8, %s1848_s25 }
  0x20   : > { %s704_s6 = scalar_lea.vmem %s2492_s11, %s2208_s28  ;;  %s1851_s8 = sshll.u32 %s2208_s28, 5 }
  0x21   : > { %s2267_s27 = scalar_lea.vmem %s2495_s14, %s1851_s8  ;;  %s2523_s25 = sld [smem:[#allocation2_spill]] }
  0x27   : > { %p1801_p7 = scmp.ne.s32.totalorder %s2523_s25, 0 }
  0x28   : > { %s2524_s17 = sld [smem:[#allocation10_spill]] (!%p1801_p7)  ;;  %s2525_s30 = sld [smem:[#allocation8_spill]] (!%p1801_p7)  ;;  %v2081_v1 = vmov (!%p1801_p7), 0   ;;  %vm845_vm0 = vcmask (!%p1801_p7), 523264   ;;  %vm894_vm1 = vcmask (!%p1801_p7), 261120  }
  0x29   : > { %730 = sbr.rel (%p1801_p7) target bundleno = 313 (0x139), region = 88  ;;  %849 = vmatprep.subr.bf16.mxu0 (!%p1801_p7), %v2081_v1  ;;  %s2526_s8 = sld [smem:[#allocation11_spill]] (!%p1801_p7) }
  0x2a   : > { %s2527_s26 = sld [smem:[#allocation12_spill]] (!%p1801_p7) }
  0x2e   : > { %v1988_v0 = vld [vmem:[%s2524_s17] sm:$0xff] (!%p1801_p7)   ;;  %v1989_v2 = vld [vmem:[%s2524_s17 + $0x8] sm:$0xff] (!%p1801_p7)   ;;  %v1990_v3 = vld [vmem:[%s2524_s17 + $0x10] sm:$0xff] (!%p1801_p7)  }
  0x2f   : > { %850 = vmatpush1.bf16.msra.mxu0 (!%p1801_p7), %v1988_v0  ;;  %v1991_v4 = vld [vmem:[%s2524_s17 + $0x18] sm:$0xff] (!%p1801_p7)   ;;  %v2002_v5 = vld [vmem:[%s2525_s30 + $0x4] ss:$8 sps:$4 sm:$0xff] (!%p1801_p7)   ;;  %v1994_v8 = vld [vmem:[%s2524_s17 + $0x30] sm:$0xff] (!%p1801_p7)  }
  0x30   : > { %851 = vmatprep.subr.bf16.mxu0 %v2081_v1  ;;  %v1992_v6 = vld [vmem:[%s2524_s17 + $0x20] sm:$0xff]   ;;  %1817 = vmatprep.mubr.msk.bf16.mxu0 %vm845_vm0, %v2002_v5  ;;  %v1993_v7 = vld [vmem:[%s2524_s17 + $0x28] sm:$0xff]   ;;  %v1995_v9 = vld [vmem:[%s2524_s17 + $0x38] sm:$0xff]  }
  0x31   : > { %v1996_v10 = vld [vmem:[%s2524_s17 + $0x40] sm:$0xff]   ;;  %v1997_v11 = vld [vmem:[%s2524_s17 + $0x48] sm:$0xff]   ;;  %v1998_v12 = vld [vmem:[%s2524_s17 + $0x50] sm:$0xff]  }
  0x32   : > { %v1999_v13 = vld [vmem:[%s2524_s17 + $0x58] sm:$0xff]   ;;  %v2000_v14 = vld [vmem:[%s2525_s30] ss:$8 sps:$4 sm:$0xff]  }
  0x33   : > { %852 = vmatpush1.bf16.msra.mxu0 %v1989_v2  ;;  %v1802_v15 = vld [vmem:[%s2526_s8] ss:$0 sm:$0xff]  ;;  %v891_v21 = vld [vmem:[%s2527_s26 + $0x8] sm:$0xff] }
  0x34   : > { %853 = vmatprep.subr.bf16.mxu0 %v2081_v1  ;;  %v890_v17 = vld [vmem:[%s2527_s26] sm:$0xff] }
  0x37   : > { %854 = vmatpush1.bf16.msra.mxu0 %v1990_v3 }
  0x38   : > { %855 = vmatprep.subr.bf16.mxu0 %v2081_v1 }
  0x3b   : > { %856 = vmatpush1.bf16.msra.mxu0 %v1991_v4 }
  0x3c   : > { %857 = vmatprep.subr.bf16.mxu0 %v2081_v1 }
  0x3f   : > { %858 = vmatpush1.bf16.msra.mxu0 %v1992_v6 }
  0x40   : > { %859 = vmatprep.subr.bf16.mxu0 %v2081_v1 }
  0x43   : > { %860 = vmatpush1.bf16.msra.mxu0 %v1993_v7 }
  0x44   : > { %861 = vmatprep.subr.bf16.mxu0 %v2081_v1 }
  0x47   : > { %862 = vmatpush1.bf16.msra.mxu0 %v1994_v8 }
  0x48   : > { %863 = vmatprep.subr.bf16.mxu0 %v2081_v1 }
  0x4b   : > { %864 = vmatpush1.bf16.msra.mxu0 %v1995_v9 }
  0x4c   : > { %865 = vmatprep.subr.bf16.mxu0 %v2081_v1 }
  0x4f   : > { %866 = vmatpush1.bf16.msra.mxu0 %v1996_v10 }
  0x50   : > { %867 = vmatprep.subr.bf16.mxu0 %v2081_v1 }
  0x53   : > { %868 = vmatpush1.bf16.msra.mxu0 %v1997_v11 }
  0x54   : > { %869 = vmatprep.subr.bf16.mxu0 %v2081_v1 }
  0x57   : > { %870 = vmatpush1.bf16.msra.mxu0 %v1998_v12 }
  0x58   : > { %871 = vmatprep.subr.bf16.mxu0 %v2081_v1 }
  0x5b   : > { %872 = vmatpush1.bf16.msra.mxu0 %v1999_v13 }
  0x5e   : > { %882 = vmatmul.mubr.bf16.vlgmr.msra.gmra.mrb[0].mxu0 %v2000_v14 }
 0x131   : > { %v883_v16 = vpop.f32.mrb[0].mxu0 }
 0x132   : > { %v884_v18 = vadd.f32 %v1802_v15, %v883_v16  ;;  %v885_v19 = vpop.f32.mrb[1].mxu0 }
 0x133   : > { %v886_v20 = vpop.f32.mrb[2].mxu0 }
 0x134   : > { %v892_v22 = vadd.f32 %v890_v17, %v884_v18  ;;  %v887_v23 = vadd.f32 %v1802_v15, %v886_v20  ;;  %v888_v24 = vpop.f32.mrb[3].mxu0 }
 0x136   : > { %895 = vst.msk [vmem:[%s2272_s5] sm:$0xff] %vm894_vm1, %v892_v22  ;;  %v893_v25 = vadd.f32 %v891_v21, %v887_v23 }
 0x138   : > { %896 = vst.msk [vmem:[%s2272_s5 + $0x8] sm:$0xff] %vm894_vm1, %v893_v25 }
 0x139 PF: > { %vm899_vm2 = vcmask 261120   ;;  %v2003_v40 = vld [vmem:[%s2227_s1] sm:$0xff]   ;;  %v2082_v41 = vmov 0.0   ;;  %v2004_v42 = vld [vmem:[%s2227_s1 + $0x8] sm:$0xff]   ;;  %vm2083_vm3 = vmmov 0   ;;  %s2528_s25 = scalar_lea.vmem %s2485_s4, %s2208_s28  ;;  %s2529_s19 = sld [smem:[#allocation13_spill]] }
 0x13a   : > { %1876 = vmatprep.subr.bf16.mxu1 %v2082_v41  ;;  %1890 = vmatprep.subr.bf16.mxu0 %v2082_v41  ;;  %v1818_v51 = vld [vmem:[%s2528_s25] ss:$0 sm:$0xff]  ;;  %s2531_s23 = scalar_lea.vmem %s2488_s7, %s2208_s28  ;;  %s2084_s2 = smov 80   ;;  %vm1021_vm4 = vcmask 130048   ;;  %vm1540_vm5 = vcmask 523264  }
 0x13b   : > { %1877 = vmatpush3.bf16.msra.mxu1 %v2003_v40  ;;  %1880 = vmatprep.mubr.msk.bf16.mxu1 %vm2083_vm3, %v2082_v41  ;;  %v1820_v60 = vld [vmem:[%s2531_s23] ss:$0 sm:$0xff]  ;;  %s2085_s3 = smov 96   ;;  %s2086_s1 = smov 112  }
 0x13c   : > { %1878 = vmatprep.subr.bf16.mxu1 %v2082_v41  ;;  %1892 = vmatprep.mubr.msk.bf16.mxu0 %vm2083_vm3, %v2082_v41  ;;  %s2087_s30 = smov 64   ;;  %s2088_s25 = smov 48  }
 0x13d   : > { %v2325_v26 = vld [vmem:[%s2272_s5] sm:$0xff]  ;;  %s2532_s0 = scalar_lea.vmem %s2490_s9, %s2208_s28  ;;  %s2533_s8 = scalar_lea.vmem %s2491_s10, %s2208_s28 }
 0x13e   : > { %v900_v28 = vsel %vm899_vm2, %v2325_v26, 0.0 }
 0x13f   : > { %v2328_v27 = vld [vmem:[%s2272_s5 + $0x8] sm:$0xff]  ;;  %901 = vadd.xlane.f32.xlu0 %v900_v28  ;;  %1879 = vmatpush3.bf16.msra.mxu1 %v2004_v42  ;;  %s2530_s20 = scalar_lea.vmem %s2529_s19, %s2208_s28 }
 0x140   : > { %v903_v29 = vsel %vm899_vm2, %v2328_v27, 0.0  ;;  %1884 = vmatprep.subr.bf16.mxu1 %v2082_v41  ;;  %v1819_v55 = vld [vmem:[%s2530_s20] ss:$0 sm:$0xff] }
 0x143   : > { %904 = vadd.xlane.f32.xlu0 %v903_v29 }
 0x1cc   : > { %v902_v30 = vpop.xlane.xlu0 %901 }
 0x1cd   : > { %v907_v31 = vmul.f32 0.03125, %v902_v30 }
 0x1cf   : > { %v909_v32 = vsub.f32 %v2325_v26, %v907_v31 }
 0x1d0   : > { %v905_v33 = vpop.xlane.xlu0 %904 }
 0x1d1   : > { %v908_v34 = vmul.f32 0.03125, %v905_v33  ;;  %v911_v35 = vmul.f32 %v909_v32, %v909_v32 }
 0x1d3   : > { %v910_v36 = vsub.f32 %v2328_v27, %v908_v34  ;;  %v913_v37 = vsel %vm899_vm2, %v911_v35, 0.0 }
 0x1d4   : > { %914 = vadd.xlane.f32.xlu1 %v913_v37 }
 0x1d5   : > { %v912_v38 = vmul.f32 %v910_v36, %v910_v36 }
 0x1d7   : > { %v916_v39 = vsel %vm899_vm2, %v912_v38, 0.0 }
 0x1d8   : > { %917 = vadd.xlane.f32.xlu1 %v916_v39 }
 0x261   : > { %v915_v43 = vpop.xlane.xlu1 %914 }
 0x262   : > { %v919_v44 = vmul.f32 0.03125, %v915_v43 }
 0x264   : > { %v921_v45 = vadd.f32 1e-06, %v919_v44 }
 0x265   : > { %v918_v46 = vpop.xlane.xlu1 %917 }
 0x266   : > { %2013 = vrsqrt.f32 %v921_v45  ;;  %v920_v47 = vmul.f32 0.03125, %v918_v46 }
 0x268   : > { %v922_v48 = vadd.f32 1e-06, %v920_v47 }
 0x26a   : > { %2015 = vrsqrt.f32 %v922_v48 }
 0x270   : > { %v2014_v49 = vpop.eup %2013 }
 0x271   : > { %v925_v50 = vmul.f32 %v2014_v49, %v909_v32 }
 0x273   : > { %v934_v54 = vmul.f32 %v1818_v51, %v925_v50 }
 0x274   : > { %v2016_v52 = vpop.eup %2015 }
 0x275   : > { %v926_v53 = vmul.f32 %v2016_v52, %v910_v36  ;;  %v943_v57 = vadd.f32 %v1819_v55, %v934_v54 }
 0x277   : > { %v935_v56 = vmul.f32 %v1818_v51, %v926_v53 }
 0x279   : > { %v944_v58 = vadd.f32 %v1819_v55, %v935_v56 }
 0x27b   : > { %v949_v59 = vpack.c.bf16 %v944_v58, %v943_v57 }
 0x27d   : > { %1881 = vmatmul.mubr.msk.bf16.vlgmr.msra.gmra.mrb[0].mxu1 %vm899_vm2, %v949_v59 }
 0x27e   : > { %1886 = vmatprep.mubr.msk.bf16.mxu1 %vm2083_vm3, %v2082_v41 }
 0x350   : > { %v1006_v61 = vpop.f32.mrb[0].mxu1 }
 0x351   : > { %v1882_v62 = vpop.f32.mrb[1].mxu1  ;;  %v1007_v0 = vadd.f32 %v1820_v60, %v1006_v61 }
 0x352   : > { %v1009_v63 = vpop.f32.mrb[2].mxu1 }
 0x353   : > { %v1010_v1 = vadd.f32 %v1820_v60, %v1009_v63  ;;  %v1883_v2 = vpop.f32.mrb[3].mxu1 }
 0x355   : > { %v2366_v3 = vpack.c.bf16 %v1010_v1, %v1007_v0  ;;  %v2005_v0 = vld [vmem:[%s2236_s18] sm:$0xff]   ;;  %v2006_v1 = vld [vmem:[%s2236_s18 + $0x8] sm:$0xff]  }
 0x357   : > { %1144 = vrot.lane.b32.xlu1 %v2366_v3, %s2084_s2  ;;  %1019 = vrot.lane.b32.xlu0 %v2366_v3, %s2085_s3  ;;  %s2534_s2 = scalar_lea.vmem %s2494_s13, %s2208_s28 }
 0x35b   : > { %1142 = vrot.lane.b32.xlu1 %v2366_v3, %s2086_s1 }
 0x3c9   : > { %v1020_v4 = vpop.permute.xlu0 %1019  ;;  %v1145_v6 = vpop.permute.xlu1 %1144 }
 0x3ca   : > { %v1026_v5 = vsel %vm1021_vm4, %v1020_v4, 0  ;;  %v1150_v7 = vsel %vm1021_vm4, %v1145_v6, 0 }
 0x3cb   : > { %1885 = vmatpush3.bf16.xpose.msra.mxu1 %v1026_v5 }
 0x3cc   : > { %1896 = vmatprep.subr.bf16.mxu1 %v2082_v41 }
 0x3cd   : > { %v1143_v8 = vpop.permute.xlu1 %1142 }
 0x3d2   : > { %1887 = vmatmul.mubr.msk.bf16.vlgmr.msra.gmra.mrb[4].mxu1 %vm1021_vm4, %v2366_v3 }
 0x3d3   : > { %1897 = vmatpush3.bf16.xpose.msra.mxu1 %v1150_v7  ;;  %1898 = vmatprep.mubr.msk.bf16.mxu1 %vm2083_vm3, %v2082_v41 }
 0x3d4   : > { %1908 = vmatprep.subr.bf16.mxu1 %v2082_v41 }
 0x3da   : > { %1899 = vmatmul.mubr.msk.bf16.vlgmr.msra.gmra.mrb[8].mxu1 %vm1021_vm4, %v1143_v8 }
 0x3db   : > { %1910 = vmatprep.mubr.msk.bf16.mxu1 %vm2083_vm3, %v2082_v41  ;;  %1909 = vmatpush3.bf16.msra.mxu1 %v2006_v1 }
 0x3dc   : > { %1920 = vmatprep.subr.bf16.mxu1 %v2082_v41 }
 0x4a5   : > { %v1062_v9 = vpop.f32.mrb[4].mxu1 }
 0x4a6   : > { %v1069_v10 = vmul.f32 0.25, %v1062_v9  ;;  %v1888_v11 = vpop.f32.mrb[5].mxu1 }
 0x4a7   : > { %v1065_v12 = vpop.f32.mrb[6].mxu1 }
 0x4a8   : > { %v1070_v13 = vmul.f32 0.25, %v1065_v12  ;;  %v1889_v14 = vpop.f32.mrb[7].mxu1  ;;  %v1071_v15 = vsel %vm1021_vm4, %v1069_v10, -inf }
 0x4a9   : > { %1072 = vmax.xlane.f32.xlu1 %v1071_v15 }
 0x4aa   : > { %v1074_v16 = vsel %vm1021_vm4, %v1070_v13, -inf }
 0x4ab   : > { %1075 = vmax.xlane.f32.xlu0 %v1074_v16 }
 0x4ad   : > { %v1186_v17 = vpop.f32.mrb[8].mxu1 }
 0x4ae   : > { %v1193_v18 = vmul.f32 0.25, %v1186_v17  ;;  %v1900_v19 = vpop.f32.mrb[9].mxu1 }
 0x4af   : > { %v1189_v20 = vpop.f32.mrb[10].mxu1  ;;  %v1832_v19 = vld [vmem:[%s2532_s0] ss:$0 sm:$0xff] }
 0x4b0   : > { %v1194_v21 = vmul.f32 0.25, %v1189_v20  ;;  %v1901_v22 = vpop.f32.mrb[11].mxu1  ;;  %v1195_v23 = vsel %vm1021_vm4, %v1193_v18, -inf }
 0x4b1   : > { %1196 = vmax.xlane.f32.xlu0 %v1195_v23 }
 0x4b2   : > { %v1198_v24 = vsel %vm1021_vm4, %v1194_v21, -inf }
 0x4b5   : > { %1199 = vmax.xlane.f32.xlu0 %v1198_v24 }
 0x536   : > { %v1073_v25 = vpop.xlane.xlu1 %1072 }
 0x537   : > { %v1077_v28 = vsub.f32 %v1069_v10, %v1073_v25 }
 0x538   : > { %v1076_v29 = vpop.xlane.xlu0 %1075 }
 0x539   : > { %v1079_v30 = vmul.f32 1.442695, %v1077_v28  ;;  %v1078_v31 = vsub.f32 %v1070_v13, %v1076_v29 }
 0x53b   : > { %2017 = vpow2.f32 %v1079_v30  ;;  %v1081_v32 = vmul.f32 1.442695, %v1078_v31 }
 0x53d   : > { %2019 = vpow2.f32 %v1081_v32 }
 0x53e   : > { %v1197_v33 = vpop.xlane.xlu0 %1196 }
 0x53f   : > { %v1201_v34 = vsub.f32 %v1193_v18, %v1197_v33 }
 0x541   : > { %v1203_v35 = vmul.f32 1.442695, %v1201_v34 }
 0x542   : > { %v1200_v36 = vpop.xlane.xlu0 %1199 }
 0x543   : > { %2021 = vpow2.f32 %v1203_v35  ;;  %v1202_v37 = vsub.f32 %v1194_v21, %v1200_v36 }
 0x545   : > { %v2018_v38 = vpop.eup %2017  ;;  %v1205_v39 = vmul.f32 1.442695, %v1202_v37 }
 0x546   : > { %v1083_v40 = vsel %vm1021_vm4, %v2018_v38, 0.0 }
 0x547   : > { %v2020_v42 = vpop.eup %2019  ;;  %2023 = vpow2.f32 %v1205_v39  ;;  %1084 = vadd.xlane.f32.xlu1 %v1083_v40  ;;  %v2007_v39 = vld [vmem:[%s2253_s22] sm:$0xff]   ;;  %v2008_v40 = vld [vmem:[%s2253_s22 + $0x8] sm:$0xff]  }
 0x548   : > { %v1086_v43 = vsel %vm1021_vm4, %v2020_v42, 0.0 }
 0x549   : > { %1087 = vadd.xlane.f32.xlu0 %v1086_v43 }
 0x54d   : > { %v2022_v44 = vpop.eup %2021 }
 0x54e   : > { %v1207_v45 = vsel %vm1021_vm4, %v2022_v44, 0.0 }
 0x54f   : > { %1208 = vadd.xlane.f32.xlu1 %v1207_v45 }
 0x551   : > { %v2024_v46 = vpop.eup %2023 }
 0x552   : > { %v1210_v47 = vsel %vm1021_vm4, %v2024_v46, 0.0 }
 0x553   : > { %1211 = vadd.xlane.f32.xlu0 %v1210_v47 }
 0x560   : > { %1094 = vrot.lane.b32.xlu1 %v2366_v3, %s2087_s30 }
 0x569   : > { %1218 = vrot.lane.b32.xlu0 %v2366_v3, %s2088_s25 }
 0x5d4   : > { %v1085_v48 = vpop.xlane.xlu1 %1084 }
 0x5d5   : > { %2025 = vrcp.f32 %v1085_v48 }
 0x5d6   : > { %v1088_v49 = vpop.xlane.xlu0 %1087 }
 0x5d7   : > { %2027 = vrcp.f32 %v1088_v49  ;;  %v1833_v49 = vld [vmem:[%s2533_s8] ss:$0 sm:$0xff] }
 0x5dc   : > { %v1209_v50 = vpop.xlane.xlu1 %1208 }
 0x5dd   : > { %2029 = vrcp.f32 %v1209_v50 }
 0x5df   : > { %v2026_v51 = vpop.eup %2025 }
 0x5e0   : > { %v1095_v52 = vpop.permute.xlu1 %1094  ;;  %v1212_v53 = vpop.xlane.xlu0 %1211  ;;  %v1090_v55 = vmul.f32 %v2026_v51, %v2018_v38 }
 0x5e1   : > { %v2028_v54 = vpop.eup %2027  ;;  %2031 = vrcp.f32 %v1212_v53  ;;  %1891 = vmatpush3.bf16.msra.mxu0 %v1095_v52 }
 0x5e2   : > { %1902 = vmatprep.subr.bf16.mxu0 %v2082_v41  ;;  %v1092_v56 = vmul.f32 %v2028_v54, %v2020_v42  ;;  %v1834_v54 = vld [vmem:[%s704_s6] ss:$0 sm:$0xff] }
 0x5e4   : > { %v1219_v57 = vpop.permute.xlu0 %1218  ;;  %v1093_v58 = vpack.c.bf16 %v1092_v56, %v1090_v55 }
 0x5e6   : > { %1893 = vmatmul.mubr.msk.bf16.vlgmr.msra.gmra.mrb[0].mxu0 %vm1021_vm4, %v1093_v58 }
 0x5e7   : > { %1903 = vmatpush3.bf16.msra.mxu0 %v1219_v57  ;;  %1904 = vmatprep.mubr.msk.bf16.mxu0 %vm2083_vm3, %v2082_v41  ;;  %v2030_v59 = vpop.eup %2029 }
 0x5e8   : > { %1914 = vmatprep.subr.bf16.mxu0 %v2082_v41  ;;  %v1214_v61 = vmul.f32 %v2030_v59, %v2022_v44  ;;  %v2009_v59 = vld [vmem:[%s2267_s27] sm:$0xff]  }
 0x5eb   : > { %v2032_v60 = vpop.eup %2031 }
 0x5ec   : > { %v1216_v62 = vmul.f32 %v2032_v60, %v2024_v46  ;;  %v2010_v60 = vld [vmem:[%s2267_s27 + $0x8] sm:$0xff]  }
 0x5ee   : > { %v1217_v63 = vpack.c.bf16 %v1216_v62, %v1214_v61  ;;  %v2011_v61 = vld [vmem:[%s2267_s27 + $0x10] sm:$0xff]   ;;  %v2012_v62 = vld [vmem:[%s2267_s27 + $0x18] sm:$0xff]  }
 0x5f0   : > { %1905 = vmatmul.mubr.msk.bf16.vlgmr.msra.gmra.mrb[4].mxu0 %vm1021_vm4, %v1217_v63  ;;  %v1835_v63 = vld [vmem:[%s2534_s2] ss:$0 sm:$0xff] }
 0x5f1   : > { %1916 = vmatprep.mubr.msk.bf16.mxu0 %vm2083_vm3, %v2082_v41  ;;  %1915 = vmatpush3.bf16.msra.mxu0 %v2005_v0 }
 0x5f2   : > { %1928 = vmatprep.subr.bf16.mxu0 %v2082_v41 }
 0x6b9   : > { %v1134_v2 = vpop.f32.mrb[0].mxu0 }
 0x6ba   : > { %v1894_v3 = vpop.f32.mrb[1].mxu0 }
 0x6bb   : > { %v1137_v4 = vpop.f32.mrb[2].mxu0 }
 0x6bc   : > { %v1141_v5 = vpack.c.bf16 %v1137_v4, %v1134_v2  ;;  %v1895_v6 = vpop.f32.mrb[3].mxu0 }
 0x6be   : > { %1917 = vmatmul.mubr.msk.bf16.vlgmr.msra.gmra.mrb[8].mxu0 %vm1021_vm4, %v1141_v5 }
 0x6bf   : > { %1936 = vmatprep.mubr.msk.bf16.mxu0 %vm2083_vm3, %v2082_v41  ;;  %1929 = vmatpush3.bf16.msra.mxu0 %v2009_v59 }
 0x6c0   : > { %1930 = vmatprep.subr.bf16.mxu0 %v2082_v41 }
 0x6c3   : > { %v1258_v7 = vpop.f32.mrb[4].mxu0  ;;  %1931 = vmatpush3.bf16.msra.mxu0 %v2010_v60 }
 0x6c4   : > { %v1906_v8 = vpop.f32.mrb[5].mxu0  ;;  %1932 = vmatprep.subr.bf16.mxu0 %v2082_v41 }
 0x6c5   : > { %v1261_v9 = vpop.f32.mrb[6].mxu0 }
 0x6c6   : > { %v1265_v10 = vpack.c.bf16 %v1261_v9, %v1258_v7  ;;  %v1907_v11 = vpop.f32.mrb[7].mxu0 }
 0x6c7   : > { %1933 = vmatpush3.bf16.msra.mxu0 %v2011_v61 }
 0x6c8   : > { %1911 = vmatmul.mubr.msk.bf16.vlgmr.msra.gmra.mrb[12].mxu1 %vm1021_vm4, %v1265_v10  ;;  %1934 = vmatprep.subr.bf16.mxu0 %v2082_v41 }
 0x6c9   : > { %1924 = vmatprep.mubr.msk.bf16.mxu1 %vm2083_vm3, %v2082_v41  ;;  %1921 = vmatpush3.bf16.msra.mxu1 %v2007_v39 }
 0x6ca   : > { %1922 = vmatprep.subr.bf16.mxu1 %v2082_v41 }
 0x6cb   : > { %1935 = vmatpush3.bf16.msra.mxu0 %v2012_v62 }
 0x6cd   : > { %1923 = vmatpush3.bf16.msra.mxu1 %v2008_v40 }
 0x791   : > { %v1359_v12 = vpop.f32.mrb[8].mxu0 }
 0x792   : > { %v1918_v13 = vpop.f32.mrb[9].mxu0 }
 0x793   : > { %v1362_v14 = vpop.f32.mrb[10].mxu0 }
 0x794   : > { %v1919_v15 = vpop.f32.mrb[11].mxu0 }
 0x79b   : > { %v1309_v16 = vpop.f32.mrb[12].mxu1 }
 0x79c   : > { %v1360_v17 = vadd.f32 %v1359_v12, %v1309_v16  ;;  %v1912_v18 = vpop.f32.mrb[13].mxu1 }
 0x79d   : > { %v1312_v20 = vpop.f32.mrb[14].mxu1 }
 0x79e   : > { %v1366_v21 = vadd.f32 %v1360_v17, %v2325_v26  ;;  %v1363_v22 = vadd.f32 %v1362_v14, %v1312_v20  ;;  %v1913_v23 = vpop.f32.mrb[15].mxu1 }
 0x7a0   : > { %v2416_v24 = vadd.f32 %v1832_v19, %v1366_v21  ;;  %v1367_v25 = vadd.f32 %v1363_v22, %v2328_v27 }
 0x7a2   : > { %v2419_v28 = vadd.f32 %v1832_v19, %v1367_v25  ;;  %v1377_v29 = vsel %vm899_vm2, %v2416_v24, 0.0 }
 0x7a3   : > { %1378 = vadd.xlane.f32.xlu1 %v1377_v29  ;;  %v1844_v29 = vld [vmem:[%s720_s24] ss:$0 sm:$0xff] }
 0x7a4   : > { %v1380_v30 = vsel %vm899_vm2, %v2419_v28, 0.0 }
 0x7a5   : > { %1381 = vadd.xlane.f32.xlu0 %v1380_v30 }
 0x830   : > { %v1379_v31 = vpop.xlane.xlu1 %1378 }
 0x831   : > { %v1383_v26 = vmul.f32 0.03125, %v1379_v31 }
 0x832   : > { %v1382_v32 = vpop.xlane.xlu0 %1381 }
 0x833   : > { %v1385_v33 = vsub.f32 %v2416_v24, %v1383_v26  ;;  %v1384_v34 = vmul.f32 0.03125, %v1382_v32 }
 0x835   : > { %v1386_v27 = vsub.f32 %v2419_v28, %v1384_v34  ;;  %v1387_v35 = vmul.f32 %v1385_v33, %v1385_v33 }
 0x837   : > { %v1389_v36 = vsel %vm899_vm2, %v1387_v35, 0.0  ;;  %v1388_v37 = vmul.f32 %v1386_v27, %v1386_v27 }
 0x838   : > { %1390 = vadd.xlane.f32.xlu1 %v1389_v36 }
 0x839   : > { %v1392_v38 = vsel %vm899_vm2, %v1388_v37, 0.0 }
 0x83a   : > { %1393 = vadd.xlane.f32.xlu0 %v1392_v38 }
 0x8c5   : > { %v1391_v42 = vpop.xlane.xlu1 %1390 }
 0x8c6   : > { %v1395_v43 = vmul.f32 0.03125, %v1391_v42 }
 0x8c7   : > { %v1394_v44 = vpop.xlane.xlu0 %1393 }
 0x8c8   : > { %v1397_v45 = vadd.f32 1e-06, %v1395_v43  ;;  %v1396_v46 = vmul.f32 0.03125, %v1394_v44 }
 0x8ca   : > { %2033 = vrsqrt.f32 %v1397_v45  ;;  %v1398_v47 = vadd.f32 1e-06, %v1396_v46 }
 0x8cc   : > { %2035 = vrsqrt.f32 %v1398_v47 }
 0x8d4   : > { %v2034_v48 = vpop.eup %2033 }
 0x8d5   : > { %v1401_v50 = vmul.f32 %v2034_v48, %v1385_v33 }
 0x8d6   : > { %v2036_v51 = vpop.eup %2035 }
 0x8d7   : > { %v1410_v52 = vmul.f32 %v1833_v49, %v1401_v50  ;;  %v1402_v53 = vmul.f32 %v2036_v51, %v1386_v27 }
 0x8d9   : > { %v1411_v55 = vmul.f32 %v1833_v49, %v1402_v53  ;;  %v1419_v56 = vadd.f32 %v1834_v54, %v1410_v52 }
 0x8db   : > { %v1420_v57 = vadd.f32 %v1834_v54, %v1411_v55 }
 0x8dd   : > { %v1425_v58 = vpack.c.bf16 %v1420_v57, %v1419_v56 }
 0x8df   : > { %1925 = vmatmul.mubr.msk.bf16.vlgmr.msra.gmra.mrb[16].mxu1 %vm899_vm2, %v1425_v58 }
 0x9b2   : > { %v1482_v0 = vpop.f32.mrb[16].mxu1 }
 0x9b3   : > { %v1483_v1 = vadd.f32 %v1835_v63, %v1482_v0  ;;  %v1926_v2 = vpop.f32.mrb[17].mxu1 }
 0x9b4   : > { %v1485_v3 = vpop.f32.mrb[18].mxu1 }
 0x9b5   : > { %v1489_v4 = vmul.f32 %v1483_v1, %v1483_v1  ;;  %v1486_v5 = vadd.f32 %v1835_v63, %v1485_v3  ;;  %v1927_v6 = vpop.f32.mrb[19].mxu1 }
 0x9b7   : > { %v1491_v7 = vmul.f32 %v1489_v4, %v1483_v1  ;;  %v1490_v8 = vmul.f32 %v1486_v5, %v1486_v5 }
 0x9b9   : > { %v1493_v9 = vmul.f32 0.044715, %v1491_v7  ;;  %v1492_v10 = vmul.f32 %v1490_v8, %v1486_v5 }
 0x9bb   : > { %v1495_v11 = vadd.f32 %v1493_v9, %v1483_v1  ;;  %v1494_v41 = vmul.f32 0.044715, %v1492_v10 }
 0x9bd   : > { %v1497_v12 = vmul.f32 0.7978846, %v1495_v11  ;;  %v1496_v13 = vadd.f32 %v1494_v41, %v1486_v5 }
 0x9bf   : > { %2037 = vtanh.f32 %v1497_v12  ;;  %v1498_v14 = vmul.f32 0.7978846, %v1496_v13 }
 0x9c1   : > { %2039 = vtanh.f32 %v1498_v14 }
 0x9c9   : > { %v2038_v15 = vpop.eup %2037 }
 0x9ca   : > { %v1501_v16 = vadd.f32 1.0, %v2038_v15 }
 0x9cb   : > { %v2040_v17 = vpop.eup %2039 }
 0x9cc   : > { %v1503_v18 = vmul.f32 0.5, %v1501_v16  ;;  %v1502_v19 = vadd.f32 1.0, %v2040_v17 }
 0x9ce   : > { %v1504_v20 = vmul.f32 0.5, %v1502_v19  ;;  %v1505_v21 = vmul.f32 %v1503_v18, %v1483_v1 }
 0x9d0   : > { %v1506_v22 = vmul.f32 %v1504_v20, %v1486_v5 }
 0x9d2   : > { %v1515_v23 = vpack.c.bf16 %v1506_v22, %v1505_v21 }
 0x9d4   : > { %1937 = vmatmul.mubr.msk.bf16.vlgmr.msra.gmra.mrb[12].mxu0 %vm1540_vm5, %v1515_v23 }
 0xaa7   : > { %v1578_v25 = vpop.f32.mrb[12].mxu0 }
 0xaa8   : > { %v1585_v30 = vadd.f32 %v1578_v25, %v2416_v24  ;;  %v1938_v31 = vpop.f32.mrb[13].mxu0 }
 0xaa9   : > { %v1581_v26 = vpop.f32.mrb[14].mxu0 }
 0xaaa   : > { %v1594_v32 = vadd.f32 %v1844_v29, %v1585_v30  ;;  %v1586_v33 = vadd.f32 %v1581_v26, %v2419_v28  ;;  %v1939_v34 = vpop.f32.mrb[15].mxu0 }
 0xaac   : > { %1596 = vst.msk [vmem:[%s2272_s5] sm:$0xff] %vm899_vm2, %v1594_v32  ;;  %v1595_v27 = vadd.f32 %v1844_v29, %v1586_v33 }
 0xaae   : > { %1597 = vst.msk [vmem:[%s2272_s5 + $0x8] sm:$0xff] %vm899_vm2, %v1595_v27 }
 0xaaf PF: > { %s2535_s1 = sld [smem:[#allocation5_spill]]  ;;  %s2536_s21 = sld [smem:[#allocation3_spill]] }
 0xab0   : > { %s2537_s22 = sld [smem:[#allocation4_spill]]  ;;  %s2538_s23 = sld [smem:[#allocation6_spill]] }
 0xab1   : > { %s2539_s24 = sld [smem:[#allocation7_spill]] }
 0xab5   : > { %s26_s25 = sadd.s32 1, %s2535_s1  }
 0xab6   : > { %p23_p8 = scmp.ge.s32.totalorder %s26_s25, 6  }
 0xab8   :  { %25 = sbr.rel (!%p23_p8) target bundleno = 8 (0x8), region = 154 }

// kernel: sam_fpn_forward.8
= control target key start
LH: loop header
LB: loop body
LE: loop exit
PB: predicated region body
PF: predicated region fallthrough
CT: control target
= control target key end

     0   :  { %s1571_s24 = smov 0   ;;  %s1749_s0 = inlined_call_operand.vmem [shape: bf16[2,4,4,32], index: 0, kind: input, shape index: {}]   ;;  %s1750_s1 = inlined_call_operand.vmem [shape: bf16[32,32], index: 1, kind: input, shape index: {}]   ;;  %s1751_s2 = inlined_call_operand.vmem [shape: f32[1,32], index: 2, kind: input, shape index: {}]   ;;  %s1752_s3 = inlined_call_operand.vmem [shape: f32[1,32], index: 3, kind: input, shape index: {}]   ;;  %s1753_s4 = inlined_call_operand.vmem [shape: bf16[9,32,32], index: 4, kind: input, shape index: {}]   ;;  %s1754_s5 = inlined_call_operand.vmem [shape: f32[1,32], index: 5, kind: input, shape index: {}]   ;;  %s1755_s6 = inlined_call_operand.vmem [shape: f32[1,32], index: 6, kind: input, shape index: {}]   ;;  %s1756_s7 = inlined_call_operand.vmem [shape: bf16[2,16,32], index: 7, kind: output, shape index: {}]  }
   0x1 LB: > { %s1240_s25 = sadd.s32 4294967295, %s1526_s24   ;;  %p1244_p0 = scmp.ge.s32.totalorder %s1526_s24, 1  ;;  %s1526_s24 = sphi %s1571_s24, %s17_s24  }
   0x2   : > { %p237_p1 = scmp.lt.s32.totalorder %s1526_s24, 3 }
   0x4   : > { %p238_p2 = pnand %p1244_p0, %p237_p1 }
   0x5   : > { %v1474_v0 = vld [vmem:[%s1750_s1] sm:$0xff] (!%p238_p2)   ;;  %v297_v1 = vlaneseq (!%p238_p2)  ;;  %v1528_v2 = vmov (!%p238_p2), 0.0   ;;  %v1475_v3 = vld [vmem:[%s1750_s1 + $0x8] sm:$0xff] (!%p238_p2)   ;;  %vm1529_vm0 = vmmov (!%p238_p2), 0   ;;  %p269_p3 = scmp.lt.s32.totalorder (!%p238_p2), %s1240_s25, 1  ;;  %vm321_vm1 = vcmask (!%p238_p2), 261120  }
   0x6   : > { %241 = sbr.rel (%p238_p2) target bundleno = 1145 (0x479), region = 48  ;;  %1353 = vmatprep.subr.bf16.mxu0 (!%p238_p2), %v1528_v2  ;;  %1393 = vmatprep.subr.bf16.mxu1 (!%p238_p2), %v1528_v2  ;;  %v1530_v5 = vmov (!%p238_p2), 1983009808   ;;  %426 = vst.msk [vmem:[#allocation2 + $0x70] sm:$0xff] (!%p238_p2), %vm321_vm1, %v1528_v2  ;;  %428 = vst.msk [vmem:[#allocation2 + $0x80] sm:$0xff] (!%p238_p2), %vm321_vm1, %v1528_v2  ;;  %vm412_vm2 = vcmask (!%p238_p2), 258048  }
   0x7   : > { %1354 = vmatpush3.bf16.msra.mxu0 (!%p238_p2), %v1474_v0  ;;  %1357 = vmatprep.mubr.msk.bf16.mxu0 (!%p238_p2), %vm1529_vm0, %v1528_v2  ;;  %v298_v4 = vshrl.u32 (!%p238_p2), %v297_v1, 7  ;;  %v295_v6 = vunpack.c.l.s4 (!%p238_p2), %v1530_v5  ;;  %430 = vst.msk [vmem:[#allocation2 + $0x90] sm:$0xff] (!%p238_p2), %vm321_vm1, %v1528_v2  ;;  %432 = vst.msk [vmem:[#allocation2 + $0xa0] sm:$0xff] (!%p238_p2), %vm321_vm1, %v1528_v2  ;;  %v1476_v34 = vld [vmem:[%s1753_s4 + $0x10] sm:$0xff] (!%p238_p2)   ;;  %v1477_v35 = vld [vmem:[%s1753_s4 + $0x40] sm:$0xff] (!%p238_p2)   ;;  %vm445_vm3 = vcmask (!%p238_p2), 257024  }
   0x8   : > { %1355 = vmatprep.subr.bf16.mxu0 (!%p238_p2), %v1528_v2  ;;  %434 = vst.msk [vmem:[#allocation2 + $0xb0] sm:$0xff] (!%p238_p2), %vm321_vm1, %v1528_v2  ;;  %436 = vst.msk [vmem:[#allocation2 + $0xc0] sm:$0xff] (!%p238_p2), %vm321_vm1, %v1528_v2  ;;  %1397 = vmatprep.mubr.msk.bf16.mxu1 (!%p238_p2), %vm1529_vm0, %v1528_v2  ;;  %v1478_v36 = vld [vmem:[%s1753_s4 + $0x18] sm:$0xff] (!%p238_p2)   ;;  %v1479_v37 = vld [vmem:[%s1753_s4 + $0x48] sm:$0xff] (!%p238_p2)  }
   0x9   : > { %v296_v7 = vunpack.c.0.s8 (!%p238_p2), %v295_v6  ;;  %429 = vst.msk [vmem:[#allocation2 + $0x88] sm:$0x1f] (!%p238_p2), %vm412_vm2, %v1528_v2  ;;  %431 = vst.msk [vmem:[#allocation2 + $0x98] sm:$0x1f] (!%p238_p2), %vm412_vm2, %v1528_v2  ;;  %1394 = vmatpush3.bf16.msra.mxu1 (!%p238_p2), %v1477_v35  ;;  %v1252_v45 = vld [vmem:[%s1751_s2] ss:$0 sm:$0xff] (!%p238_p2) }
   0xa   : > { %427 = vst.msk [vmem:[#allocation2 + $0x78] sm:$0x1f] (!%p238_p2), %vm412_vm2, %v1528_v2  ;;  %433 = vst.msk [vmem:[#allocation2 + $0xa8] sm:$0x1f] (!%p238_p2), %vm412_vm2, %v1528_v2  ;;  %1395 = vmatprep.subr.bf16.mxu1 (!%p238_p2), %v1528_v2  ;;  %v1253_v47 = vld [vmem:[%s1752_s3] ss:$0 sm:$0xff] (!%p238_p2) }
   0xb   : > { %1356 = vmatpush3.bf16.msra.mxu0 (!%p238_p2), %v1475_v3  ;;  %v299_v8 = vsub.s32 (!%p238_p2), %v296_v7, %v298_v4  ;;  %435 = vst.msk [vmem:[#allocation2 + $0xb8] sm:$0x1f] (!%p238_p2), %vm412_vm2, %v1528_v2  ;;  %437 = vst.msk [vmem:[#allocation2 + $0xc8] sm:$0x1f] (!%p238_p2), %vm412_vm2, %v1528_v2  ;;  %v1485_v57 = vld [vmem:[%s1753_s4] sm:$0xff] (!%p238_p2)   ;;  %v1484_v62 = vld [vmem:[%s1753_s4 + $0x50] sm:$0xff] (!%p238_p2)  }
   0xc   : > { %1361 = vmatprep.subr.bf16.mxu0 (!%p238_p2), %v1528_v2  ;;  %v1487_v0 = vld [vmem:[%s1753_s4 + $0x8] sm:$0xff] (!%p238_p2)   ;;  %v1486_v1 = vld [vmem:[%s1753_s4 + $0x58] sm:$0xff] (!%p238_p2)   ;;  %v1493_v6 = vld [vmem:[%s1753_s4 + $0x20] sm:$0xff] (!%p238_p2)  }
   0xd   : > { %s1758_s25 = smov (!%p269_p3, %s1240_s25), 1  ;;  %1396 = vmatpush3.bf16.msra.mxu1 %v1479_v37 }
   0xe   : > { %s1319_s30 = sshll.u32 %s1758_s25, 3  ;;  %1401 = vmatprep.subr.bf16.mxu1 %v1528_v2 }
   0xf   : > { %s273_s10 = scalar_lea.vmem %s1749_s0, %s1319_s30  ;;  %s278_s17 = scalar_lea.vmem %s1756_s7, %s1319_s30 }
  0x10   : > { %v280_v9 = vld [vmem:[%s273_s10] sm:$0x3]  ;;  %v281_v10 = vld [vmem:[%s273_s10 + $0x2] sm:$0x3]  ;;  %v282_v11 = vld [vmem:[%s273_s10 + $0x4] sm:$0x3] }
  0x11   : > { %v283_v12 = vld [vmem:[%s273_s10 + $0x6] sm:$0x3]  ;;  %v292_v13 = vcombine.low %v280_v9, %v281_v10 }
  0x12   : > { %v293_v14 = vcombine.low %v282_v11, %v283_v12  ;;  %v1492_v9 = vld [vmem:[%s1753_s4 + $0x60] sm:$0xff]   ;;  %v1495_v11 = vld [vmem:[%s1753_s4 + $0x28] sm:$0xff]  }
  0x13   : > { %v300_v15 = vrot.slane %v292_v13, %v299_v8  ;;  %v1494_v12 = vld [vmem:[%s1753_s4 + $0x68] sm:$0xff]  }
  0x14   : > { %v307_v16 = vrot.slane %v293_v14, %v299_v8 }
  0x16   : > { %v308_v17 = vcombine.low %v300_v15, %v307_v16  ;;  %v1501_v16 = vld [vmem:[%s1753_s4 + $0x30] sm:$0xff]  }
  0x18   : > { %1358 = vmatmul.mubr.msk.bf16.vlgmr.msra.gmra.mrb[0].mxu0 %vm321_vm1, %v308_v17 }
  0x19   : > { %1365 = vmatprep.mubr.msk.bf16.mxu0 %vm1529_vm0, %v1528_v2  ;;  %1362 = vmatpush3.bf16.msra.mxu0 %v1476_v34 }
  0x1a   : > { %1363 = vmatprep.subr.bf16.mxu0 %v1528_v2 }
  0x1d   : > { %1364 = vmatpush3.bf16.msra.mxu0 %v1478_v36 }
  0x1e   : > { %1369 = vmatprep.subr.bf16.mxu0 %v1528_v2 }
  0xeb   : > { %v359_v18 = vpop.f32.mrb[0].mxu0 }
  0xec   : > { %v1359_v19 = vpop.f32.mrb[1].mxu0  ;;  %v366_v20 = vsel %vm321_vm1, %v359_v18, 0.0 }
  0xed   : > { %367 = vadd.xlane.f32.xlu0 %v366_v20  ;;  %v362_v21 = vpop.f32.mrb[2].mxu0  ;;  %v1500_v19 = vld [vmem:[%s1753_s4 + $0x70] sm:$0xff]  }
  0xee   : > { %v1360_v22 = vpop.f32.mrb[3].mxu0  ;;  %v369_v23 = vsel %vm321_vm1, %v362_v21, 0.0 }
  0xef   : > { %v1502_v22 = vld [vmem:[%s1753_s4 + $0x78] sm:$0xff]  }
  0xf1   : > { %370 = vadd.xlane.f32.xlu0 %v369_v23 }
 0x17a   : > { %v368_v24 = vpop.xlane.xlu0 %367 }
 0x17b   : > { %v373_v25 = vmul.f32 0.03125, %v368_v24 }
 0x17d   : > { %v375_v26 = vsub.f32 %v359_v18, %v373_v25 }
 0x17e   : > { %v371_v27 = vpop.xlane.xlu0 %370 }
 0x17f   : > { %v374_v28 = vmul.f32 0.03125, %v371_v27  ;;  %v377_v29 = vmul.f32 %v375_v26, %v375_v26 }
 0x181   : > { %v376_v30 = vsub.f32 %v362_v21, %v374_v28  ;;  %v379_v31 = vsel %vm321_vm1, %v377_v29, 0.0  ;;  %v1503_v21 = vld [vmem:[%s1753_s4 + $0x38] sm:$0xff]   ;;  %v1508_v28 = vld [vmem:[%s1753_s4 + $0x80] sm:$0xff]  }
 0x182   : > { %380 = vadd.xlane.f32.xlu1 %v379_v31 }
 0x183   : > { %v378_v32 = vmul.f32 %v376_v30, %v376_v30 }
 0x185   : > { %v382_v33 = vsel %vm321_vm1, %v378_v32, 0.0 }
 0x186   : > { %383 = vadd.xlane.f32.xlu1 %v382_v33 }
 0x20f   : > { %v381_v38 = vpop.xlane.xlu1 %380 }
 0x210   : > { %v385_v39 = vmul.f32 0.03125, %v381_v38 }
 0x212   : > { %v387_v40 = vadd.f32 1e-06, %v385_v39 }
 0x213   : > { %v384_v41 = vpop.xlane.xlu1 %383 }
 0x214   : > { %1512 = vrsqrt.f32 %v387_v40  ;;  %v386_v42 = vmul.f32 0.03125, %v384_v41 }
 0x216   : > { %v388_v43 = vadd.f32 1e-06, %v386_v42 }
 0x218   : > { %1514 = vrsqrt.f32 %v388_v43 }
 0x21e   : > { %v1513_v44 = vpop.eup %1512 }
 0x21f   : > { %v391_v46 = vmul.f32 %v1513_v44, %v375_v26 }
 0x221   : > { %v400_v48 = vmul.f32 %v1252_v45, %v391_v46 }
 0x222   : > { %v1515_v49 = vpop.eup %1514 }
 0x223   : > { %v409_v50 = vadd.f32 %v1253_v47, %v400_v48  ;;  %v392_v51 = vmul.f32 %v1515_v49, %v376_v30  ;;  %v1509_v30 = vld [vmem:[%s1753_s4 + $0x88] sm:$0xff]  }
 0x225   : > { %v440_v52 = vcombine.high %v409_v50, %v409_v50  ;;  %446 = vst.msk [vmem:[#allocation2 + $0x88] sm:$0xf] %vm445_vm3, %v409_v50  ;;  %v401_v53 = vmul.f32 %v1252_v45, %v392_v51 }
 0x227   : > { %447 = vst.msk [vmem:[#allocation2 + $0x98] sm:$0xf] %vm445_vm3, %v440_v52  ;;  %v410_v54 = vadd.f32 %v1253_v47, %v401_v53 }
 0x229   : > { %v441_v55 = vcombine.high %v410_v54, %v410_v54  ;;  %448 = vst.msk [vmem:[#allocation2 + $0xa8] sm:$0xf] %vm445_vm3, %v410_v54 }
 0x22b   : > { %449 = vst.msk [vmem:[#allocation2 + $0xb8] sm:$0xf] %vm445_vm3, %v441_v55 }
 0x22c   : > { %v1480_v56 = vld [vmem:[#allocation2 + $0x78] ss:$16 sps:$4 sm:$0xff]  }
 0x22d   : > { %v1488_v4 = vld [vmem:[#allocation2 + $0x77] ss:$16 sps:$4 sm:$0xff]  }
 0x22e   : > { %v1482_v59 = vld [vmem:[#allocation2 + $0x88] ss:$16 sps:$4 sm:$0xff]  }
 0x22f   : > { %v1490_v8 = vld [vmem:[#allocation2 + $0x89] ss:$16 sps:$4 sm:$0xff]  }
 0x230   : > { %v1481_v58 = vld [vmem:[#allocation2 + $0x98] ss:$16 sps:$4 sm:$0xff]  }
 0x231   : > { %v485_v60 = vpack.c.bf16 %v1481_v58, %v1480_v56  ;;  %v1489_v3 = vld [vmem:[#allocation2 + $0x97] ss:$16 sps:$4 sm:$0xff]  }
 0x232   : > { %v1483_v61 = vld [vmem:[#allocation2 + $0xa8] ss:$16 sps:$4 sm:$0xff]   ;;  %v467_v7 = vpack.c.bf16 %v1489_v3, %v1488_v4 }
 0x233   : > { %1366 = vmatmul.mubr.msk.bf16.vlgmr.msra.gmra.mrb[4].mxu0 %vm321_vm1, %v485_v60  ;;  %v767_v63 = vpack.c.bf16 %v1483_v61, %v1482_v59  ;;  %v1491_v5 = vld [vmem:[#allocation2 + $0xa9] ss:$16 sps:$4 sm:$0xff]  }
 0x234   : > { %1370 = vmatpush3.bf16.msra.mxu0 %v1485_v57  ;;  %1373 = vmatprep.mubr.msk.bf16.mxu0 %vm1529_vm0, %v1528_v2  ;;  %v843_v10 = vpack.c.bf16 %v1491_v5, %v1490_v8  ;;  %v1497_v13 = vld [vmem:[#allocation2 + $0x99] ss:$16 sps:$4 sm:$0xff]  }
 0x235   : > { %1398 = vmatmul.mubr.msk.bf16.vlgmr.msra.gmra.mrb[0].mxu1 %vm321_vm1, %v767_v63  ;;  %1371 = vmatprep.subr.bf16.mxu0 %v1528_v2  ;;  %v1496_v14 = vld [vmem:[#allocation2 + $0x79] ss:$16 sps:$4 sm:$0xff]  }
 0x236   : > { %1402 = vmatpush3.bf16.msra.mxu1 %v1484_v62  ;;  %1405 = vmatprep.mubr.msk.bf16.mxu1 %vm1529_vm0, %v1528_v2  ;;  %v1499_v15 = vld [vmem:[#allocation2 + $0xb7] ss:$16 sps:$4 sm:$0xff]   ;;  %v615_v17 = vpack.c.bf16 %v1497_v13, %v1496_v14  ;;  %v1313_v62 = vld [vmem:[%s1754_s5] ss:$0 sm:$0xff] }
 0x237   : > { %1403 = vmatprep.subr.bf16.mxu1 %v1528_v2  ;;  %v1498_v18 = vld [vmem:[#allocation2 + $0x97] ss:$16 sps:$4 sm:$0xff]  }
 0x238   : > { %1372 = vmatpush3.bf16.msra.mxu0 %v1487_v0  ;;  %v920_v20 = vpack.c.bf16 %v1499_v15, %v1498_v18  ;;  %v1505_v23 = vld [vmem:[#allocation2 + $0xa7] ss:$16 sps:$4 sm:$0xff]  }
 0x239   : > { %1377 = vmatprep.subr.bf16.mxu0 %v1528_v2  ;;  %v1504_v24 = vld [vmem:[#allocation2 + $0x87] ss:$16 sps:$4 sm:$0xff]  }
 0x23a   : > { %1404 = vmatpush3.bf16.msra.mxu1 %v1486_v1  ;;  %v1507_v25 = vld [vmem:[#allocation2 + $0xb8] ss:$16 sps:$4 sm:$0xff]   ;;  %v691_v26 = vpack.c.bf16 %v1505_v23, %v1504_v24  ;;  %v1314_v1 = vld [vmem:[%s1755_s6] ss:$0 sm:$0xff] }
 0x23b   : > { %1409 = vmatprep.subr.bf16.mxu1 %v1528_v2  ;;  %v1506_v27 = vld [vmem:[#allocation2 + $0x98] ss:$16 sps:$4 sm:$0xff]  }
 0x23c   : > { %v996_v29 = vpack.c.bf16 %v1507_v25, %v1506_v27  ;;  %v1511_v31 = vld [vmem:[#allocation2 + $0xb9] ss:$16 sps:$4 sm:$0xff]  }
 0x23d   : > { %v1510_v32 = vld [vmem:[#allocation2 + $0x99] ss:$16 sps:$4 sm:$0xff]  }
 0x23e   : > { %v1072_v33 = vpack.c.bf16 %v1511_v31, %v1510_v32 }
 0x23f   : > { %1374 = vmatmul.mubr.msk.bf16.vlgmr.msra.gmra.mrb[4].mxu0 %vm321_vm1, %v467_v7 }
 0x240   : > { %1378 = vmatpush3.bf16.msra.mxu0 %v1493_v6  ;;  %1381 = vmatprep.mubr.msk.bf16.mxu0 %vm1529_vm0, %v1528_v2 }
 0x241   : > { %1406 = vmatmul.mubr.msk.bf16.vlgmr.msra.gmra.mrb[0].mxu1 %vm321_vm1, %v843_v10  ;;  %1379 = vmatprep.subr.bf16.mxu0 %v1528_v2 }
 0x242   : > { %1410 = vmatpush3.bf16.msra.mxu1 %v1492_v9  ;;  %1413 = vmatprep.mubr.msk.bf16.mxu1 %vm1529_vm0, %v1528_v2 }
 0x243   : > { %1411 = vmatprep.subr.bf16.mxu1 %v1528_v2 }
 0x244   : > { %1380 = vmatpush3.bf16.msra.mxu0 %v1495_v11 }
 0x245   : > { %1385 = vmatprep.subr.bf16.mxu0 %v1528_v2 }
 0x246   : > { %1412 = vmatpush3.bf16.msra.mxu1 %v1494_v12 }
 0x247   : > { %1417 = vmatprep.subr.bf16.mxu1 %v1528_v2 }
 0x24b   : > { %1382 = vmatmul.mubr.msk.bf16.vlgmr.msra.gmra.mrb[4].mxu0 %vm321_vm1, %v615_v17 }
 0x24c   : > { %1386 = vmatpush3.bf16.msra.mxu0 %v1501_v16  ;;  %1389 = vmatprep.mubr.msk.bf16.mxu0 %vm1529_vm0, %v1528_v2 }
 0x24d   : > { %1414 = vmatmul.mubr.msk.bf16.vlgmr.msra.gmra.mrb[0].mxu1 %vm321_vm1, %v920_v20  ;;  %1387 = vmatprep.subr.bf16.mxu0 %v1528_v2 }
 0x24e   : > { %1418 = vmatpush3.bf16.msra.mxu1 %v1500_v19  ;;  %1421 = vmatprep.mubr.msk.bf16.mxu1 %vm1529_vm0, %v1528_v2 }
 0x24f   : > { %1419 = vmatprep.subr.bf16.mxu1 %v1528_v2 }
 0x250   : > { %1388 = vmatpush3.bf16.msra.mxu0 %v1503_v21 }
 0x252   : > { %1420 = vmatpush3.bf16.msra.mxu1 %v1502_v22 }
 0x253   : > { %1425 = vmatprep.subr.bf16.mxu1 %v1528_v2 }
 0x257   : > { %1390 = vmatmul.mubr.msk.bf16.vlgmr.msra.gmra.mrb[4].mxu0 %vm321_vm1, %v691_v26 }
 0x259   : > { %1422 = vmatmul.mubr.msk.bf16.vlgmr.msra.gmra.mrb[0].mxu1 %vm321_vm1, %v996_v29 }
 0x25a   : > { %1426 = vmatpush3.bf16.msra.mxu1 %v1508_v28  ;;  %1429 = vmatprep.mubr.msk.bf16.mxu1 %vm1529_vm0, %v1528_v2 }
 0x25b   : > { %1427 = vmatprep.subr.bf16.mxu1 %v1528_v2 }
 0x25e   : > { %1428 = vmatpush3.bf16.msra.mxu1 %v1509_v30 }
 0x265   : > { %1430 = vmatmul.mubr.msk.bf16.vlgmr.msra.gmra.mrb[0].mxu1 %vm321_vm1, %v1072_v33 }
 0x32a   : > { %v741_v34 = vpop.f32.mrb[4].mxu0 }
 0x32b   : > { %v1391_v35 = vpop.f32.mrb[5].mxu0 }
 0x32c   : > { %v744_v36 = vpop.f32.mrb[6].mxu0 }
 0x32d   : > { %v1392_v37 = vpop.f32.mrb[7].mxu0 }
 0x338   : > { %v1122_v38 = vpop.f32.mrb[0].mxu1 }
 0x339   : > { %v1433_v39 = vadd.f32 %v1122_v38, %v741_v34  ;;  %v1431_v40 = vpop.f32.mrb[1].mxu1 }
 0x33a   : > { %v1125_v41 = vpop.f32.mrb[2].mxu1 }
 0x33b   : > { %v1434_v42 = vadd.f32 %v1125_v41, %v744_v36  ;;  %v1432_v43 = vpop.f32.mrb[3].mxu1  ;;  %v1131_v44 = vsel %vm321_vm1, %v1433_v39, 0.0 }
 0x33c   : > { %1132 = vadd.xlane.f32.xlu0 %v1131_v44 }
 0x33d   : > { %v1134_v2 = vsel %vm321_vm1, %v1434_v42, 0.0 }
 0x33e   : > { %1135 = vadd.xlane.f32.xlu1 %v1134_v2 }
 0x3c9   : > { %v1133_v45 = vpop.xlane.xlu0 %1132 }
 0x3ca   : > { %v1137_v46 = vmul.f32 0.03125, %v1133_v45 }
 0x3cb   : > { %v1136_v47 = vpop.xlane.xlu1 %1135 }
 0x3cc   : > { %v1139_v48 = vsub.f32 %v1433_v39, %v1137_v46  ;;  %v1138_v49 = vmul.f32 0.03125, %v1136_v47 }
 0x3ce   : > { %v1140_v50 = vsub.f32 %v1434_v42, %v1138_v49  ;;  %v1141_v51 = vmul.f32 %v1139_v48, %v1139_v48 }
 0x3d0   : > { %v1143_v52 = vsel %vm321_vm1, %v1141_v51, 0.0  ;;  %v1142_v53 = vmul.f32 %v1140_v50, %v1140_v50 }
 0x3d1   : > { %1144 = vadd.xlane.f32.xlu0 %v1143_v52 }
 0x3d2   : > { %v1146_v54 = vsel %vm321_vm1, %v1142_v53, 0.0 }
 0x3d3   : > { %1147 = vadd.xlane.f32.xlu1 %v1146_v54 }
 0x45e   : > { %v1145_v55 = vpop.xlane.xlu0 %1144 }
 0x45f   : > { %v1149_v56 = vmul.f32 0.03125, %v1145_v55 }
 0x460   : > { %v1148_v57 = vpop.xlane.xlu1 %1147 }
 0x461   : > { %v1151_v58 = vadd.f32 1e-06, %v1149_v56  ;;  %v1150_v59 = vmul.f32 0.03125, %v1148_v57 }
 0x463   : > { %1516 = vrsqrt.f32 %v1151_v58  ;;  %v1152_v60 = vadd.f32 1e-06, %v1150_v59 }
 0x465   : > { %1518 = vrsqrt.f32 %v1152_v60 }
 0x46d   : > { %v1517_v61 = vpop.eup %1516 }
 0x46e   : > { %v1155_v63 = vmul.f32 %v1517_v61, %v1139_v48 }
 0x46f   : > { %v1519_v0 = vpop.eup %1518 }
 0x470   : > { %v1164_v3 = vmul.f32 %v1313_v62, %v1155_v63  ;;  %v1156_v4 = vmul.f32 %v1519_v0, %v1140_v50 }
 0x472   : > { %v1173_v5 = vadd.f32 %v1314_v1, %v1164_v3  ;;  %v1165_v6 = vmul.f32 %v1313_v62, %v1156_v4 }
 0x474   : > { %v1321_v7 = vpack.c.bf16 %v1173_v5, %v1173_v5  ;;  %v1174_v8 = vadd.f32 %v1314_v1, %v1165_v6 }
 0x476   : > { %1183 = vst.msk [vmem:[%s278_s17] sm:$0xf] %vm445_vm3, %v1321_v7  ;;  %v1322_v9 = vpack.c.bf16 %v1174_v8, %v1174_v8 }
 0x478   : > { %1184 = vst.msk [vmem:[%s278_s17 + $0x4] sm:$0xf] %vm445_vm3, %v1322_v9 }
 0x479 PF: > { %s17_s24 = sadd.s32 1, %s1526_s24  }
 0x47a   : > { %p14_p4 = scmp.ge.s32.totalorder %s17_s24, 4  }
 0x47c   :  { %16 = sbr.rel (!%p14_p4) target bundleno = 1 (0x1), region = 89 }

// kernel: tile.23
= control target key start
LH: loop header
LB: loop body
LE: loop exit
PB: predicated region body
PF: predicated region fallthrough
CT: control target
= control target key end

     0   :  { %s22_s0 = inlined_call_operand.vmem [shape: f32[8], index: 0, kind: input, shape index: {}]   ;;  %s23_s1 = inlined_call_operand.vmem [shape: f32[4,8], index: 1, kind: output, shape index: {}]  }
   0x1   :  { %v4_v0 = vld [vmem:[%s22_s0] ss:$0 sm:$0xff] }
   0x2   :  { %5 = vst [vmem:[%s23_s1] sm:$0xf] %v4_v0 }

// kernel: sam_fpn_forward.9
= control target key start
LH: loop header
LB: loop body
LE: loop exit
PB: predicated region body
PF: predicated region fallthrough
CT: control target
= control target key end

     0   :  { %s391_s12 = smov 0   ;;  %s417_s0 = inlined_call_operand.vmem [shape: bf16[32,32], index: 0, kind: input, shape index: {}]   ;;  %s418_s1 = inlined_call_operand.vmem [shape: bf16[32,64], index: 1, kind: input, shape index: {}]   ;;  %s419_s2 = inlined_call_operand.vmem [shape: f32[1,64], index: 2, kind: input, shape index: {}]   ;;  %s420_s3 = inlined_call_operand.vmem [shape: bf16[32,64], index: 3, kind: output, shape index: {}]  }
   0x1 LB: > { %s317_s13 = sadd.s32 4294967295, %s367_s12   ;;  %p321_p0 = scmp.ge.s32.totalorder %s367_s12, 1  ;;  %s367_s12 = sphi %s391_s12, %s13_s12  }
   0x2   : > { %p138_p1 = scmp.lt.s32.totalorder %s367_s12, 3 }
   0x4   : > { %p139_p2 = pnand %p321_p0, %p138_p1 }
   0x5   : > { %v358_v0 = vld [vmem:[%s418_s1] sm:$0xff] (!%p139_p2)   ;;  %v369_v1 = vmov (!%p139_p2), 0.0   ;;  %v359_v2 = vld [vmem:[%s418_s1 + $0x8] sm:$0xff] (!%p139_p2)   ;;  %vm370_vm0 = vmmov (!%p139_p2), 0   ;;  %s322_s18 = sshll.u32 (!%p139_p2), %s317_s13, 1  ;;  %vm205_vm1 = vcmask (!%p139_p2), 261120  }
   0x6   : > { %142 = sbr.rel (%p139_p2) target bundleno = 236 (0xec), region = 32  ;;  %340 = vmatprep.subr.bf16.mxu0 (!%p139_p2), %v369_v1  ;;  %344 = vmatprep.mubr.msk.bf16.mxu0 (!%p139_p2), %vm370_vm0, %v369_v1  ;;  %p163_p3 = scmp.lt.s32.totalorder (!%p139_p2), %s322_s18, 3  ;;  %v326_v4 = vld [vmem:[%s419_s2] ss:$0 sm:$0xff] (!%p139_p2)  ;;  %vm258_vm2 = vcmask (!%p139_p2), 519168  }
   0x7   : > { %341 = vmatpush3.bf16.msra.mxu0 (!%p139_p2), %v358_v0 }
   0x8   : > { %342 = vmatprep.subr.bf16.mxu0 (!%p139_p2), %v369_v1 }
   0xb   : > { %343 = vmatpush3.bf16.msra.mxu0 (!%p139_p2), %v359_v2 }
   0xd   : > { %s422_s18 = smov (!%p163_p3, %s322_s18), 3 }
   0xe   : > { %s323_s19 = sshll.u32 %s422_s18, 2 }
   0xf   : > { %s166_s22 = scalar_lea.vmem %s417_s0, %s323_s19  ;;  %s172_s27 = scalar_lea.vmem %s420_s3, %s323_s19 }
  0x10   : > { %v360_v3 = vld [vmem:[%s166_s22] sm:$0xff]  }
  0x11   : > { %345 = vmatmul.mubr.msk.bf16.vlgmr.msra.gmra.mrb[0].mxu0 %vm205_vm1, %v360_v3 }
  0xe4   : > { %v243_v5 = vpop.f32.mrb[0].mxu0 }
  0xe5   : > { %v244_v6 = vadd.f32 %v326_v4, %v243_v5  ;;  %v346_v7 = vpop.f32.mrb[1].mxu0 }
  0xe6   : > { %v246_v8 = vpop.f32.mrb[2].mxu0 }
  0xe7   : > { %v335_v9 = vpack.c.bf16 %v244_v6, %v244_v6  ;;  %v247_v10 = vadd.f32 %v326_v4, %v246_v8  ;;  %v347_v11 = vpop.f32.mrb[3].mxu0 }
  0xe9   : > { %259 = vst.msk [vmem:[%s172_s27] sm:$0xf] %vm258_vm2, %v335_v9  ;;  %v336_v12 = vpack.c.bf16 %v247_v10, %v247_v10 }
  0xeb   : > { %260 = vst.msk [vmem:[%s172_s27 + $0x4] sm:$0xf] %vm258_vm2, %v336_v12 }
  0xec PF: > { %s13_s12 = sadd.s32 1, %s367_s12  }
  0xed   : > { %p10_p4 = scmp.ge.s32.totalorder %s13_s12, 4  }
  0xef   :  { %12 = sbr.rel (!%p10_p4) target bundleno = 1 (0x1), region = 62 }

// kernel: tile.24
= control target key start
LH: loop header
LB: loop body
LE: loop exit
PB: predicated region body
PF: predicated region fallthrough
CT: control target
= control target key end

     0   :  { %vm7_vm0 = vcmask 64512   ;;  %s37_s8 = smov 8   ;;  %s38_s9 = smov 16   ;;  %vm13_vm1 = vcmask 261312   ;;  %vm19_vm2 = vcmask 195712   ;;  %vm25_vm3 = vcmask 130112   ;;  %s55_s0 = inlined_call_operand.vmem [shape: f32[4,8], index: 0, kind: input, shape index: {}]   ;;  %s56_s1 = inlined_call_operand.vmem [shape: f32[1,32], index: 1, kind: output, shape index: {}]  }
   0x1   :  { %v4_v0 = vld [vmem:[%s55_s0] sm:$0xf]  ;;  %s36_s0 = smov 24  }
   0x2   :  { %5 = vst [vmem:[#allocation1] sm:$0xf] %v4_v0 }
   0x9   :  { %v10_v1 = vld [vmem:[#allocation1 + $0x3] sm:$0x1]   ;;  %v22_v2 = vld [vmem:[#allocation1 + $0x1] sm:$0x1]   ;;  %v6_v3 = vld [vmem:[#allocation1] sm:$0x1]  }
   0xa   :  { %11 = vrot.lane.b32.xlu0 %v10_v1, %s36_s0  ;;  %23 = vrot.lane.b32.xlu1 %v22_v2, %s37_s8  ;;  %v16_v4 = vld [vmem:[#allocation1 + $0x2] sm:$0x1]   ;;  %8 = vst.msk [vmem:[#allocation0] sm:$0x1] %vm7_vm0, %v6_v3  }
   0xe   :  { %17 = vrot.lane.b32.xlu0 %v16_v4, %s38_s9 }
  0x7c   :  { %v12_v5 = vpop.permute.xlu0 %11   ;;  %v24_v6 = vpop.permute.xlu1 %23  }
  0x7d   :  { %14 = vst.msk [vmem:[#allocation0] sm:$0x1] %vm13_vm1, %v12_v5  }
  0x80   :  { %v18_v7 = vpop.permute.xlu0 %17  }
  0x81   :  { %20 = vst.msk [vmem:[#allocation0] sm:$0x1] %vm19_vm2, %v18_v7  }
  0x82   :  { %26 = vst.msk [vmem:[#allocation0] sm:$0x1] %vm25_vm3, %v24_v6  }
  0x89   :  { %v30_v8 = vld [vmem:[#allocation0] sm:$0x1] }
  0x8a   :  { %32 = vst [vmem:[%s56_s1] sm:$0x1] %v30_v8 }

// kernel: sam_fpn_forward.10
= control target key start
LH: loop header
LB: loop body
LE: loop exit
PB: predicated region body
PF: predicated region fallthrough
CT: control target
= control target key end

     0   :  { %s796_s18 = smov 0   ;;  %s949_s0 = inlined_call_operand.vmem [shape: bf16[128,16], index: 0, kind: input, shape index: {}]   ;;  %s950_s1 = inlined_call_operand.vmem [shape: bf16[16,32], index: 1, kind: input, shape index: {}]   ;;  %s951_s2 = inlined_call_operand.vmem [shape: f32[1,32], index: 2, kind: input, shape index: {}]   ;;  %s952_s3 = inlined_call_operand.vmem [shape: f32[1,16], index: 3, kind: input, shape index: {}]   ;;  %s953_s4 = inlined_call_operand.vmem [shape: f32[1,16], index: 4, kind: input, shape index: {}]   ;;  %s954_s5 = inlined_call_operand.vmem [shape: bf16[128,32], index: 5, kind: output, shape index: {}]  }
   0x1 LB: > { %s646_s19 = sadd.s32 4294967295, %s764_s18   ;;  %p650_p0 = scmp.ge.s32.totalorder %s764_s18, 1  ;;  %s764_s18 = sphi %s796_s18, %s15_s18  }
   0x2   : > { %p188_p1 = scmp.lt.s32.totalorder %s764_s18, 3 }
   0x4   : > { %p189_p2 = pnand %p650_p0, %p188_p1 }
   0x5   : > { %s651_s20 = sshll.u32 (!%p189_p2), %s646_s19, 3  ;;  %vm245_vm0 = vcmask (!%p189_p2), 130048   ;;  %v725_v60 = vld [vmem:[%s950_s1] sm:$0xff] (!%p189_p2)   ;;  %vm581_vm1 = vcmask (!%p189_p2), 257024  }
   0x6   : > { %192 = sbr.rel (%p189_p2) target bundleno = 597 (0x255), region = 40  ;;  %p217_p3 = scmp.lt.s32.totalorder (!%p189_p2), %s651_s20, 15  ;;  %705 = vmatprep.subr.bf16.mxu0 (!%p189_p2), %v725_v60  ;;  %715 = vmatprep.subr.bf16.mxu1 (!%p189_p2), %v725_v60 }
   0x7   : > { %706 = vmatpush3.bf16.msra.mxu0 (!%p189_p2), %v725_v60  ;;  %716 = vmatpush3.bf16.msra.mxu1 (!%p189_p2), %v725_v60 }
   0xd   : > { %s956_s20 = smov (!%p217_p3, %s651_s20), 15 }
   0xe   : > { %s652_s21 = sshll.u32 %s956_s20, 2 }
   0xf   : > { %s220_s24 = scalar_lea.vmem %s949_s0, %s652_s21  ;;  %s226_s10 = scalar_lea.vmem %s954_s5, %s652_s21 }
  0x10   : > { %v682_v0 = vld [vmem:[%s220_s24] sm:$0xff]   ;;  %v698_v1 = vld [vmem:[%s220_s24 + $0x10] sm:$0xff]   ;;  %v697_v6 = vld [vmem:[%s220_s24 + $0x8] sm:$0xff]  }
  0x11   : > { %v683_v2 = vunpack.c.l.bf16 %v682_v0  ;;  %v691_v3 = vunpack.c.l.bf16 %v698_v1  ;;  %v684_v4 = vunpack.c.h.bf16 %v682_v0  ;;  %v692_v5 = vunpack.c.h.bf16 %v698_v1  ;;  %v699_v13 = vld [vmem:[%s220_s24 + $0x18] sm:$0xff]  }
  0x12   : > { %v687_v11 = vunpack.c.l.bf16 %v697_v6  ;;  %v688_v12 = vunpack.c.h.bf16 %v697_v6  ;;  %v695_v16 = vunpack.c.l.bf16 %v699_v13  ;;  %v696_v17 = vunpack.c.h.bf16 %v699_v13 }
  0x13   : > { %v246_v7 = vsel %vm245_vm0, %v683_v2, 0.0  ;;  %v258_v8 = vsel %vm245_vm0, %v691_v3, 0.0  ;;  %v249_v9 = vsel %vm245_vm0, %v684_v4, 0.0  ;;  %v261_v10 = vsel %vm245_vm0, %v692_v5, 0.0 }
  0x14   : > { %247 = vadd.xlane.f32.xlu0 %v246_v7  ;;  %259 = vadd.xlane.f32.xlu1 %v258_v8  ;;  %v252_v14 = vsel %vm245_vm0, %v687_v11, 0.0  ;;  %v255_v15 = vsel %vm245_vm0, %v688_v12, 0.0  ;;  %v264_v18 = vsel %vm245_vm0, %v695_v16, 0.0  ;;  %v267_v19 = vsel %vm245_vm0, %v696_v17, 0.0 }
  0x18   : > { %250 = vadd.xlane.f32.xlu0 %v249_v9  ;;  %262 = vadd.xlane.f32.xlu1 %v261_v10 }
  0x1c   : > { %253 = vadd.xlane.f32.xlu0 %v252_v14  ;;  %256 = vadd.xlane.f32.xlu1 %v255_v15 }
  0x20   : > { %265 = vadd.xlane.f32.xlu0 %v264_v18  ;;  %268 = vadd.xlane.f32.xlu1 %v267_v19 }
  0xa1   : > { %v248_v20 = vpop.xlane.xlu0 %247  ;;  %v260_v21 = vpop.xlane.xlu1 %259 }
  0xa2   : > { %v271_v22 = vmul.f32 0.0625, %v248_v20  ;;  %v275_v23 = vmul.f32 0.0625, %v260_v21 }
  0xa4   : > { %v820_v24 = vsub.f32 %v683_v2, %v271_v22  ;;  %v822_v25 = vsub.f32 %v691_v3, %v275_v23  ;;  %v656_v22 = vld [vmem:[%s953_s4] ss:$0 sm:$0xff] }
  0xa5   : > { %v251_v26 = vpop.xlane.xlu0 %250  ;;  %v263_v27 = vpop.xlane.xlu1 %262 }
  0xa6   : > { %v272_v28 = vmul.f32 0.0625, %v251_v26  ;;  %v276_v29 = vmul.f32 0.0625, %v263_v27  ;;  %v287_v30 = vmul.f32 %v820_v24, %v820_v24  ;;  %v291_v31 = vmul.f32 %v822_v25, %v822_v25 }
  0xa8   : > { %v828_v32 = vsub.f32 %v684_v4, %v272_v28  ;;  %v830_v33 = vsub.f32 %v692_v5, %v276_v29  ;;  %v295_v34 = vsel %vm245_vm0, %v287_v30, 0.0  ;;  %v307_v37 = vsel %vm245_vm0, %v291_v31, 0.0 }
  0xa9   : > { %296 = vadd.xlane.f32.xlu0 %v295_v34  ;;  %v254_v35 = vpop.xlane.xlu0 %253  ;;  %v257_v36 = vpop.xlane.xlu1 %256 }
  0xaa   : > { %v273_v38 = vmul.f32 0.0625, %v254_v35  ;;  %v274_v39 = vmul.f32 0.0625, %v257_v36  ;;  %v288_v40 = vmul.f32 %v828_v32, %v828_v32  ;;  %v292_v41 = vmul.f32 %v830_v33, %v830_v33 }
  0xac   : > { %v838_v42 = vsub.f32 %v687_v11, %v273_v38  ;;  %v840_v43 = vsub.f32 %v688_v12, %v274_v39  ;;  %v298_v44 = vsel %vm245_vm0, %v288_v40, 0.0  ;;  %v310_v47 = vsel %vm245_vm0, %v292_v41, 0.0 }
  0xad   : > { %308 = vadd.xlane.f32.xlu0 %v307_v37  ;;  %299 = vadd.xlane.f32.xlu1 %v298_v44  ;;  %v266_v45 = vpop.xlane.xlu0 %265  ;;  %v269_v46 = vpop.xlane.xlu1 %268 }
  0xae   : > { %v277_v48 = vmul.f32 0.0625, %v266_v45  ;;  %v278_v49 = vmul.f32 0.0625, %v269_v46  ;;  %v289_v50 = vmul.f32 %v838_v42, %v838_v42  ;;  %v290_v51 = vmul.f32 %v840_v43, %v840_v43 }
  0xb0   : > { %v848_v52 = vsub.f32 %v695_v16, %v277_v48  ;;  %v850_v53 = vsub.f32 %v696_v17, %v278_v49  ;;  %v301_v54 = vsel %vm245_vm0, %v289_v50, 0.0  ;;  %v304_v55 = vsel %vm245_vm0, %v290_v51, 0.0  ;;  %v655_v17 = vld [vmem:[%s952_s3] ss:$0 sm:$0xff] }
  0xb1   : > { %311 = vadd.xlane.f32.xlu1 %v310_v47  ;;  %302 = vadd.xlane.f32.xlu0 %v301_v54 }
  0xb2   : > { %v293_v56 = vmul.f32 %v848_v52, %v848_v52  ;;  %v294_v57 = vmul.f32 %v850_v53, %v850_v53 }
  0xb4   : > { %v313_v58 = vsel %vm245_vm0, %v293_v56, 0.0  ;;  %v316_v59 = vsel %vm245_vm0, %v294_v57, 0.0 }
  0xb5   : > { %305 = vadd.xlane.f32.xlu1 %v304_v55  ;;  %314 = vadd.xlane.f32.xlu0 %v313_v58 }
  0xb9   : > { %317 = vadd.xlane.f32.xlu1 %v316_v59 }
 0x136   : > { %v297_v61 = vpop.xlane.xlu0 %296 }
 0x137   : > { %v319_v62 = vmul.f32 0.0625, %v297_v61 }
 0x139   : > { %v327_v63 = vadd.f32 1e-06, %v319_v62 }
 0x13a   : > { %v300_v0 = vpop.xlane.xlu1 %299  ;;  %v309_v1 = vpop.xlane.xlu0 %308 }
 0x13b   : > { %726 = vrsqrt.f32 %v327_v63  ;;  %v320_v2 = vmul.f32 0.0625, %v300_v0  ;;  %v323_v3 = vmul.f32 0.0625, %v309_v1 }
 0x13d   : > { %v328_v4 = vadd.f32 1e-06, %v320_v2  ;;  %v331_v5 = vadd.f32 1e-06, %v323_v3 }
 0x13e   : > { %v312_v6 = vpop.xlane.xlu1 %311  ;;  %v303_v7 = vpop.xlane.xlu0 %302 }
 0x13f   : > { %728 = vrsqrt.f32 %v328_v4  ;;  %v324_v8 = vmul.f32 0.0625, %v312_v6  ;;  %v321_v9 = vmul.f32 0.0625, %v303_v7 }
 0x140   : > { %730 = vrsqrt.f32 %v331_v5 }
 0x141   : > { %v332_v10 = vadd.f32 1e-06, %v324_v8  ;;  %v329_v11 = vadd.f32 1e-06, %v321_v9 }
 0x142   : > { %v306_v12 = vpop.xlane.xlu1 %305  ;;  %v315_v13 = vpop.xlane.xlu0 %314 }
 0x143   : > { %732 = vrsqrt.f32 %v332_v10  ;;  %v322_v14 = vmul.f32 0.0625, %v306_v12  ;;  %v325_v15 = vmul.f32 0.0625, %v315_v13 }
 0x144   : > { %734 = vrsqrt.f32 %v329_v11 }
 0x145   : > { %v727_v16 = vpop.eup %726  ;;  %v330_v18 = vadd.f32 1e-06, %v322_v14  ;;  %v333_v19 = vadd.f32 1e-06, %v325_v15 }
 0x146   : > { %v343_v20 = vmul.f32 %v727_v16, %v820_v24  ;;  %v318_v21 = vpop.xlane.xlu1 %317 }
 0x147   : > { %736 = vrsqrt.f32 %v330_v18  ;;  %v326_v23 = vmul.f32 0.0625, %v318_v21 }
 0x148   : > { %738 = vrsqrt.f32 %v333_v19  ;;  %v358_v26 = vmul.f32 %v655_v17, %v343_v20 }
 0x149   : > { %v729_v27 = vpop.eup %728  ;;  %v334_v28 = vadd.f32 1e-06, %v326_v23 }
 0x14a   : > { %v731_v29 = vpop.eup %730  ;;  %v344_v30 = vmul.f32 %v729_v27, %v828_v32  ;;  %v871_v31 = vadd.f32 %v656_v22, %v358_v26 }
 0x14b   : > { %v347_v34 = vmul.f32 %v731_v29, %v822_v25  ;;  %740 = vrsqrt.f32 %v334_v28 }
 0x14c   : > { %v359_v24 = vmul.f32 %v655_v17, %v344_v30  ;;  %v381_v35 = vmul.f32 %v871_v31, %v871_v31 }
 0x14d   : > { %v733_v36 = vpop.eup %732  ;;  %v362_v37 = vmul.f32 %v655_v17, %v347_v34 }
 0x14e   : > { %v735_v38 = vpop.eup %734  ;;  %v348_v39 = vmul.f32 %v733_v36, %v830_v33  ;;  %v877_v40 = vadd.f32 %v656_v22, %v359_v24  ;;  %v389_v41 = vmul.f32 %v381_v35, %v871_v31 }
 0x14f   : > { %v345_v32 = vmul.f32 %v735_v38, %v838_v42  ;;  %v881_v44 = vadd.f32 %v656_v22, %v362_v37 }
 0x150   : > { %v382_v25 = vmul.f32 %v877_v40, %v877_v40  ;;  %v397_v45 = vmul.f32 0.044715, %v389_v41  ;;  %v363_v46 = vmul.f32 %v655_v17, %v348_v39 }
 0x151   : > { %v737_v47 = vpop.eup %736  ;;  %v360_v48 = vmul.f32 %v655_v17, %v345_v32  ;;  %v385_v49 = vmul.f32 %v881_v44, %v881_v44 }
 0x152   : > { %v739_v50 = vpop.eup %738  ;;  %v346_v33 = vmul.f32 %v737_v47, %v840_v43  ;;  %v390_v51 = vmul.f32 %v382_v25, %v877_v40  ;;  %v405_v54 = vadd.f32 %v397_v45, %v871_v31  ;;  %v890_v42 = vadd.f32 %v656_v22, %v363_v46 }
 0x153   : > { %v892_v55 = vadd.f32 %v656_v22, %v360_v48  ;;  %v349_v56 = vmul.f32 %v739_v50, %v848_v52  ;;  %v393_v57 = vmul.f32 %v385_v49, %v881_v44 }
 0x154   : > { %v361_v58 = vmul.f32 %v655_v17, %v346_v33  ;;  %v398_v59 = vmul.f32 0.044715, %v390_v51  ;;  %v413_v60 = vmul.f32 0.7978846, %v405_v54  ;;  %v386_v61 = vmul.f32 %v890_v42, %v890_v42 }
 0x155   : > { %v741_v62 = vpop.eup %740  ;;  %v364_v43 = vmul.f32 %v655_v17, %v349_v56  ;;  %v401_v63 = vmul.f32 0.044715, %v393_v57  ;;  %v383_v0 = vmul.f32 %v892_v55, %v892_v55 }
 0x156   : > { %v900_v1 = vadd.f32 %v656_v22, %v361_v58  ;;  %v350_v2 = vmul.f32 %v741_v62, %v850_v53  ;;  %v406_v52 = vadd.f32 %v398_v59, %v877_v40  ;;  %742 = vtanh.f32 %v413_v60 }
 0x157   : > { %v904_v3 = vadd.f32 %v656_v22, %v364_v43  ;;  %v394_v4 = vmul.f32 %v386_v61, %v890_v42  ;;  %v409_v5 = vadd.f32 %v401_v63, %v881_v44  ;;  %v391_v6 = vmul.f32 %v383_v0, %v892_v55 }
 0x158   : > { %v365_v7 = vmul.f32 %v655_v17, %v350_v2  ;;  %v414_v8 = vmul.f32 0.7978846, %v406_v52  ;;  %v384_v9 = vmul.f32 %v900_v1, %v900_v1 }
 0x159   : > { %v402_v10 = vmul.f32 0.044715, %v394_v4  ;;  %v417_v11 = vmul.f32 0.7978846, %v409_v5  ;;  %v399_v12 = vmul.f32 0.044715, %v391_v6  ;;  %v387_v53 = vmul.f32 %v904_v3, %v904_v3 }
 0x15a   : > { %v380_v13 = vadd.f32 %v656_v22, %v365_v7  ;;  %744 = vtanh.f32 %v414_v8  ;;  %v392_v14 = vmul.f32 %v384_v9, %v900_v1 }
 0x15b   : > { %v410_v15 = vadd.f32 %v402_v10, %v890_v42  ;;  %746 = vtanh.f32 %v417_v11  ;;  %v407_v16 = vadd.f32 %v399_v12, %v892_v55  ;;  %v395_v17 = vmul.f32 %v387_v53, %v904_v3 }
 0x15c   : > { %v400_v18 = vmul.f32 0.044715, %v392_v14  ;;  %v388_v19 = vmul.f32 %v380_v13, %v380_v13 }
 0x15d   : > { %v418_v20 = vmul.f32 0.7978846, %v410_v15  ;;  %v415_v21 = vmul.f32 0.7978846, %v407_v16  ;;  %v403_v23 = vmul.f32 0.044715, %v395_v17 }
 0x15e   : > { %v408_v26 = vadd.f32 %v400_v18, %v900_v1  ;;  %v396_v27 = vmul.f32 %v388_v19, %v380_v13 }
 0x15f   : > { %748 = vtanh.f32 %v418_v20  ;;  %v411_v22 = vadd.f32 %v403_v23, %v904_v3 }
 0x160   : > { %v743_v28 = vpop.eup %742  ;;  %v416_v29 = vmul.f32 0.7978846, %v408_v26  ;;  %750 = vtanh.f32 %v415_v21  ;;  %v404_v30 = vmul.f32 0.044715, %v396_v27 }
 0x161   : > { %v429_v34 = vadd.f32 1.0, %v743_v28  ;;  %v419_v24 = vmul.f32 0.7978846, %v411_v22 }
 0x162   : > { %752 = vtanh.f32 %v416_v29  ;;  %v412_v35 = vadd.f32 %v404_v30, %v380_v13 }
 0x163   : > { %754 = vtanh.f32 %v419_v24  ;;  %v437_v41 = vmul.f32 0.5, %v429_v34 }
 0x164   : > { %v745_v36 = vpop.eup %744  ;;  %v420_v37 = vmul.f32 0.7978846, %v412_v35 }
 0x165   : > { %v747_v38 = vpop.eup %746  ;;  %v430_v39 = vadd.f32 1.0, %v745_v36  ;;  %v445_v46 = vmul.f32 %v437_v41, %v871_v31 }
 0x166   : > { %v433_v32 = vadd.f32 1.0, %v747_v38  ;;  %756 = vtanh.f32 %v420_v37 }
 0x167   : > { %v438_v25 = vmul.f32 0.5, %v430_v39 }
 0x168   : > { %v441_v50 = vmul.f32 0.5, %v433_v32 }
 0x169   : > { %v749_v45 = vpop.eup %748  ;;  %v446_v47 = vmul.f32 %v438_v25, %v877_v40 }
 0x16a   : > { %v751_v48 = vpop.eup %750  ;;  %v434_v49 = vadd.f32 1.0, %v749_v45  ;;  %v449_v60 = vmul.f32 %v441_v50, %v881_v44 }
 0x16b   : > { %v455_v33 = vpack.c.bf16 %v446_v47, %v445_v46  ;;  %v431_v51 = vadd.f32 1.0, %v751_v48 }
 0x16c   : > { %v753_v54 = vpop.eup %752  ;;  %v442_v56 = vmul.f32 0.5, %v434_v49 }
 0x16d   : > { %v755_v57 = vpop.eup %754  ;;  %707 = vmatprep.mubr.msk.bf16.mxu0 %vm245_vm0, %v455_v33  ;;  %v432_v58 = vadd.f32 1.0, %v753_v54  ;;  %v439_v59 = vmul.f32 0.5, %v431_v51 }
 0x16e   : > { %v450_v61 = vmul.f32 %v442_v56, %v890_v42  ;;  %v435_v62 = vadd.f32 1.0, %v755_v57 }
 0x16f   : > { %v440_v31 = vmul.f32 0.5, %v432_v58  ;;  %v447_v63 = vmul.f32 %v439_v59, %v892_v55  ;;  %v657_v55 = vld [vmem:[%s951_s2] ss:$0 sm:$0xff] }
 0x170   : > { %v757_v43 = vpop.eup %756  ;;  %v457_v40 = vpack.c.bf16 %v450_v61, %v449_v60  ;;  %v443_v52 = vmul.f32 0.5, %v435_v62 }
 0x171   : > { %v448_v0 = vmul.f32 %v440_v31, %v900_v1  ;;  %v436_v2 = vadd.f32 1.0, %v757_v43 }
 0x172   : > { %711 = vmatprep.mubr.msk.bf16.mxu1 %vm245_vm0, %v457_v40  ;;  %v451_v44 = vmul.f32 %v443_v52, %v904_v3 }
 0x173   : > { %v456_v4 = vpack.c.bf16 %v448_v0, %v447_v63  ;;  %v444_v5 = vmul.f32 0.5, %v436_v2 }
 0x175   : > { %708 = vmatmul.mubr.msk.bf16.vlgmr.msra.gmra.mrb[0].mxu0 %vm245_vm0, %v456_v4  ;;  %v452_v42 = vmul.f32 %v444_v5, %v380_v13 }
 0x177   : > { %v458_v6 = vpack.c.bf16 %v452_v42, %v451_v44 }
 0x179   : > { %712 = vmatmul.mubr.msk.bf16.vlgmr.msra.gmra.mrb[0].mxu1 %vm245_vm0, %v458_v6 }
 0x248   : > { %v709_v7 = vpop.f32.mrb[0].mxu0 }
 0x249   : > { %v527_v1 = vadd.f32 %v709_v7, %v657_v55  ;;  %v518_v8 = vpop.f32.mrb[1].mxu0 }
 0x24a   : > { %v519_v9 = vadd.f32 %v657_v55, %v518_v8  ;;  %v710_v10 = vpop.f32.mrb[2].mxu0 }
 0x24b   : > { %v675_v3 = vpack.c.bf16 %v527_v1, %v527_v1  ;;  %v530_v11 = vadd.f32 %v710_v10, %v657_v55  ;;  %v521_v12 = vpop.f32.mrb[3].mxu0 }
 0x24c   : > { %v673_v53 = vpack.c.bf16 %v519_v9, %v519_v9  ;;  %v522_v13 = vadd.f32 %v657_v55, %v521_v12  ;;  %v713_v14 = vpop.f32.mrb[0].mxu1 }
 0x24d   : > { %584 = vst.msk [vmem:[%s226_s10 + $0x8] sm:$0xf] %vm581_vm1, %v675_v3  ;;  %v676_v15 = vpack.c.bf16 %v530_v11, %v530_v11  ;;  %v543_v16 = vadd.f32 %v713_v14, %v657_v55  ;;  %v534_v17 = vpop.f32.mrb[1].mxu1 }
 0x24e   : > { %582 = vst.msk [vmem:[%s226_s10] sm:$0xf] %vm581_vm1, %v673_v53  ;;  %v674_v18 = vpack.c.bf16 %v522_v13, %v522_v13  ;;  %v535_v19 = vadd.f32 %v657_v55, %v534_v17  ;;  %v714_v20 = vpop.f32.mrb[2].mxu1 }
 0x24f   : > { %585 = vst.msk [vmem:[%s226_s10 + $0xc] sm:$0xf] %vm581_vm1, %v676_v15  ;;  %v679_v21 = vpack.c.bf16 %v543_v16, %v543_v16  ;;  %v546_v23 = vadd.f32 %v714_v20, %v657_v55  ;;  %v537_v26 = vpop.f32.mrb[3].mxu1 }
 0x250   : > { %583 = vst.msk [vmem:[%s226_s10 + $0x4] sm:$0xf] %vm581_vm1, %v674_v18  ;;  %v677_v27 = vpack.c.bf16 %v535_v19, %v535_v19  ;;  %v538_v22 = vadd.f32 %v657_v55, %v537_v26 }
 0x251   : > { %588 = vst.msk [vmem:[%s226_s10 + $0x18] sm:$0xf] %vm581_vm1, %v679_v21  ;;  %v680_v28 = vpack.c.bf16 %v546_v23, %v546_v23 }
 0x252   : > { %586 = vst.msk [vmem:[%s226_s10 + $0x10] sm:$0xf] %vm581_vm1, %v677_v27  ;;  %v678_v29 = vpack.c.bf16 %v538_v22, %v538_v22 }
 0x253   : > { %589 = vst.msk [vmem:[%s226_s10 + $0x1c] sm:$0xf] %vm581_vm1, %v680_v28 }
 0x254   : > { %587 = vst.msk [vmem:[%s226_s10 + $0x14] sm:$0xf] %vm581_vm1, %v678_v29 }
 0x255 PF: > { %s15_s18 = sadd.s32 1, %s764_s18  }
 0x256   : > { %p12_p4 = scmp.ge.s32.totalorder %s15_s18, 4  }
 0x258   :  { %14 = sbr.rel (!%p12_p4) target bundleno = 1 (0x1), region = 70 }

// kernel: sam_fpn_forward.13
= control target key start
LH: loop header
LB: loop body
LE: loop exit
PB: predicated region body
PF: predicated region fallthrough
CT: control target
= control target key end

     0   :  { %s2431_s30 = smov 0   ;;  %s2778_s0 = inlined_call_operand.vmem [shape: bf16[2,8,8,16], index: 0, kind: input, shape index: {}]   ;;  %s2779_s1 = inlined_call_operand.vmem [shape: bf16[16,32], index: 1, kind: input, shape index: {}]   ;;  %s2780_s2 = inlined_call_operand.vmem [shape: f32[1,32], index: 2, kind: input, shape index: {}]   ;;  %s2781_s3 = inlined_call_operand.vmem [shape: f32[1,32], index: 3, kind: input, shape index: {}]   ;;  %s2782_s4 = inlined_call_operand.vmem [shape: bf16[9,32,32], index: 4, kind: input, shape index: {}]   ;;  %s2783_s5 = inlined_call_operand.vmem [shape: f32[1,32], index: 5, kind: input, shape index: {}]   ;;  %s2784_s6 = inlined_call_operand.vmem [shape: f32[1,32], index: 6, kind: input, shape index: {}]   ;;  %s2785_s7 = inlined_call_operand.vmem [shape: bf16[16,32], index: 7, kind: input, shape index: {}]   ;;  %s2786_s8 = inlined_call_operand.vmem [shape: f32[16,1], index: 8, kind: input, shape index: {}]   ;;  %s2787_s9 = inlined_call_operand.vmem [shape: f32[2,16,64], index: 9, kind: output, shape index: {}]  }
   0x1 LB: > { %s1929_s10 = sadd.s32 4294967295, %s2376_s30   ;;  %p1933_p0 = scmp.ge.s32.totalorder %s2376_s30, 1  ;;  %s2376_s30 = sphi %s2431_s30, %s19_s30  }
   0x2   : > { %p287_p1 = scmp.lt.s32.totalorder %s2376_s30, 3 }
   0x4   : > { %p288_p2 = pnand %p1933_p0, %p287_p1 }
   0x5   : > { %v2314_v0 = vld [vmem:[%s2779_s1] sm:$0xff] (!%p288_p2)   ;;  %p323_p3 = scmp.lt.s32.totalorder (!%p288_p2), %s1929_s10, 1  ;;  %vm370_vm0 = vcmask (!%p288_p2), 130048   ;;  %vm448_vm1 = vcmask (!%p288_p2), 261120   ;;  %v2378_v21 = vmov (!%p288_p2), 0.0   ;;  %vm586_vm2 = vcmask (!%p288_p2), 253952  }
   0x6   : > { %291 = sbr.rel (%p288_p2) target bundleno = 1427 (0x593), region = 56  ;;  %2107 = vmatprep.subr.bf16.mxu0 (!%p288_p2), %v2314_v0  ;;  %610 = vst.msk [vmem:[#allocation2 + $0xc8] sm:$0xff] (!%p288_p2), %vm448_vm1, %v2378_v21  ;;  %606 = vst.msk [vmem:[#allocation2 + $0xa8] sm:$0xff] (!%p288_p2), %vm448_vm1, %v2378_v21  ;;  %v2319_v62 = vld [vmem:[%s2782_s4 + $0x10] sm:$0xff] (!%p288_p2)   ;;  %vm2379_vm3 = vmmov (!%p288_p2), 0   ;;  %vm1871_vm4 = vcmask (!%p288_p2), 523264  }
   0x7   : > { %2108 = vmatpush3.bf16.msra.mxu0 (!%p288_p2), %v2314_v0  ;;  %607 = vst.msk [vmem:[#allocation2 + $0xb0] sm:$0xff] (!%p288_p2), %vm448_vm1, %v2378_v21  ;;  %609 = vst.msk [vmem:[#allocation2 + $0xc0] sm:$0xff] (!%p288_p2), %vm448_vm1, %v2378_v21  ;;  %v2320_v63 = vld [vmem:[%s2782_s4 + $0x30] sm:$0xff] (!%p288_p2)   ;;  %v2321_v0 = vld [vmem:[%s2782_s4 + $0x18] sm:$0xff] (!%p288_p2)  }
   0x8   : > { %612 = vst.msk [vmem:[#allocation2 + $0xd8] sm:$0xff] (!%p288_p2), %vm448_vm1, %v2378_v21  ;;  %613 = vst.msk [vmem:[#allocation2 + $0xe0] sm:$0xff] (!%p288_p2), %vm448_vm1, %v2378_v21  ;;  %2117 = vmatprep.subr.bf16.mxu0 (!%p288_p2), %v2319_v62  ;;  %2153 = vmatprep.subr.bf16.mxu1 (!%p288_p2), %v2320_v63 }
   0x9   : > { %615 = vst.msk [vmem:[#allocation2 + $0xf0] sm:$0xff] (!%p288_p2), %vm448_vm1, %v2378_v21  ;;  %616 = vst.msk [vmem:[#allocation2 + $0xf8] sm:$0xff] (!%p288_p2), %vm448_vm1, %v2378_v21  ;;  %2154 = vmatpush3.bf16.msra.mxu1 (!%p288_p2), %v2320_v63 }
   0xa   : > { %618 = vst.msk [vmem:[#allocation2 + $0x108] sm:$0xff] (!%p288_p2), %vm448_vm1, %v2378_v21  ;;  %619 = vst.msk [vmem:[#allocation2 + $0x110] sm:$0xff] (!%p288_p2), %vm448_vm1, %v2378_v21 }
   0xb   : > { %621 = vst.msk [vmem:[#allocation2 + $0x120] sm:$0xff] (!%p288_p2), %vm448_vm1, %v2378_v21  ;;  %622 = vst.msk [vmem:[#allocation2 + $0x128] sm:$0xff] (!%p288_p2), %vm448_vm1, %v2378_v21 }
   0xc   : > { %624 = vst.msk [vmem:[#allocation2 + $0x138] sm:$0xff] (!%p288_p2), %vm448_vm1, %v2378_v21  ;;  %625 = vst.msk [vmem:[#allocation2 + $0x140] sm:$0xff] (!%p288_p2), %vm448_vm1, %v2378_v21 }
   0xd   : > { %s2789_s10 = smov (!%p323_p3, %s1929_s10), 1  ;;  %627 = vst.msk [vmem:[#allocation2 + $0x150] sm:$0xff] %vm448_vm1, %v2378_v21  ;;  %628 = vst.msk [vmem:[#allocation2 + $0x158] sm:$0xff] %vm448_vm1, %v2378_v21 }
   0xe   : > { %s2041_s13 = sshll.u32 %s2789_s10, 5  ;;  %630 = vst.msk [vmem:[#allocation2 + $0x168] sm:$0xff] %vm448_vm1, %v2378_v21  ;;  %631 = vst.msk [vmem:[#allocation2 + $0x170] sm:$0xff] %vm448_vm1, %v2378_v21  ;;  %s2042_s29 = sshll.u32 %s2789_s10, 4 }
   0xf   : > { %s327_s16 = scalar_lea.vmem %s2778_s0, %s2041_s13  ;;  %633 = vst.msk [vmem:[#allocation2 + $0x180] sm:$0xff] %vm448_vm1, %v2378_v21  ;;  %634 = vst.msk [vmem:[#allocation2 + $0x188] sm:$0xff] %vm448_vm1, %v2378_v21  ;;  %s332_s13 = scalar_lea.vmem %s2787_s9, %s2042_s29 }
  0x10   : > { %v2315_v1 = vld [vmem:[%s327_s16] sm:$0xff]   ;;  %v2316_v2 = vld [vmem:[%s327_s16 + $0x8] sm:$0xff]   ;;  %v2317_v3 = vld [vmem:[%s327_s16 + $0x10] sm:$0xff]   ;;  %608 = vst.msk [vmem:[#allocation2 + $0xb8] sm:$0x1] %vm586_vm2, %v2378_v21 }
  0x11   : > { %2109 = vmatprep.mubr.msk.bf16.mxu0 %vm370_vm0, %v2315_v1  ;;  %v2318_v4 = vld [vmem:[%s327_s16 + $0x18] sm:$0xff]   ;;  %611 = vst.msk [vmem:[#allocation2 + $0xd0] sm:$0x1] %vm586_vm2, %v2378_v21  ;;  %614 = vst.msk [vmem:[#allocation2 + $0xe8] sm:$0x1] %vm586_vm2, %v2378_v21 }
  0x12   : > { %2110 = vmatmul.mubr.msk.bf16.vlgmr.msra.gmra.mrb[0].mxu0 %vm370_vm0, %v2316_v2  ;;  %617 = vst.msk [vmem:[#allocation2 + $0x100] sm:$0x1] %vm586_vm2, %v2378_v21  ;;  %620 = vst.msk [vmem:[#allocation2 + $0x118] sm:$0x1] %vm586_vm2, %v2378_v21  ;;  %v2322_v1 = vld [vmem:[%s2782_s4 + $0x38] sm:$0xff]   ;;  %v2569_v2 = vld [vmem:[%s2782_s4 + $0x40] sm:$0xff]  }
  0x13   : > { %2113 = vmatprep.mubr.msk.bf16.mxu0 %vm370_vm0, %v2317_v3  ;;  %623 = vst.msk [vmem:[#allocation2 + $0x130] sm:$0x1] %vm586_vm2, %v2378_v21  ;;  %626 = vst.msk [vmem:[#allocation2 + $0x148] sm:$0x1] %vm586_vm2, %v2378_v21  ;;  %2118 = vmatpush3.bf16.msra.mxu0 %v2319_v62  ;;  %v2575_v3 = vld [vmem:[%s2782_s4] sm:$0xff]  }
  0x14   : > { %629 = vst.msk [vmem:[#allocation2 + $0x160] sm:$0x1] %vm586_vm2, %v2378_v21  ;;  %632 = vst.msk [vmem:[#allocation2 + $0x178] sm:$0x1] %vm586_vm2, %v2378_v21  ;;  %2119 = vmatprep.subr.bf16.mxu0 %v2321_v0  ;;  %2155 = vmatprep.subr.bf16.mxu1 %v2322_v1 }
  0x15   : > { %635 = vst.msk [vmem:[#allocation2 + $0x190] sm:$0x1] %vm586_vm2, %v2378_v21  ;;  %2156 = vmatpush3.bf16.msra.mxu1 %v2322_v1 }
  0x16   : > { %2165 = vmatprep.subr.bf16.mxu1 %v2569_v2 }
  0x17   : > { %2120 = vmatpush3.bf16.msra.mxu0 %v2321_v0 }
  0x18   : > { %2129 = vmatprep.subr.bf16.mxu0 %v2575_v3 }
  0x1a   : > { %2114 = vmatmul.mubr.msk.bf16.gmra.mrb[4].mxu0 %vm370_vm0, %v2318_v4 }
  0xe5   : > { %v2111_v5 = vpop.f32.mrb[0].mxu0 }
  0xe6   : > { %v417_v6 = vpop.f32.mrb[1].mxu0  ;;  %v455_v7 = vsel %vm448_vm1, %v2111_v5, 0.0 }
  0xe7   : > { %456 = vadd.xlane.f32.xlu1 %v455_v7  ;;  %v2112_v8 = vpop.f32.mrb[2].mxu0  ;;  %v449_v9 = vsel %vm448_vm1, %v417_v6, 0.0 }
  0xe8   : > { %450 = vadd.xlane.f32.xlu0 %v449_v9  ;;  %v420_v10 = vpop.f32.mrb[3].mxu0  ;;  %v458_v11 = vsel %vm448_vm1, %v2112_v8, 0.0 }
  0xe9   : > { %v452_v12 = vsel %vm448_vm1, %v420_v10, 0.0 }
  0xeb   : > { %459 = vadd.xlane.f32.xlu1 %v458_v11 }
  0xec   : > { %453 = vadd.xlane.f32.xlu0 %v452_v12 }
  0xed   : > { %v2452_v13 = vpop.f32.mrb[4].mxu0 }
  0xee   : > { %v433_v14 = vpop.f32.mrb[5].mxu0  ;;  %v467_v19 = vsel %vm448_vm1, %v2452_v13, 0.0 }
  0xef   : > { %v2454_v15 = vpop.f32.mrb[6].mxu0  ;;  %v461_v16 = vsel %vm448_vm1, %v433_v14, 0.0 }
  0xf0   : > { %462 = vadd.xlane.f32.xlu0 %v461_v16  ;;  %v436_v17 = vpop.f32.mrb[7].mxu0  ;;  %v470_v20 = vsel %vm448_vm1, %v2454_v15, 0.0 }
  0xf1   : > { %v464_v18 = vsel %vm448_vm1, %v436_v17, 0.0 }
  0xf2   : > { %465 = vadd.xlane.f32.xlu1 %v464_v18 }
  0xf4   : > { %468 = vadd.xlane.f32.xlu0 %v467_v19 }
  0xf6   : > { %471 = vadd.xlane.f32.xlu1 %v470_v20 }
 0x174   : > { %v457_v22 = vpop.xlane.xlu1 %456 }
 0x175   : > { %v476_v23 = vmul.f32 0.03125, %v457_v22  ;;  %v451_v24 = vpop.xlane.xlu0 %450 }
 0x176   : > { %v474_v25 = vmul.f32 0.03125, %v451_v24 }
 0x177   : > { %v2502_v26 = vsub.f32 %v2111_v5, %v476_v23 }
 0x178   : > { %v2504_v27 = vsub.f32 %v417_v6, %v474_v25  ;;  %v460_v28 = vpop.xlane.xlu1 %459  ;;  %v1947_v25 = vld [vmem:[%s2780_s2] ss:$0 sm:$0xff] }
 0x179   : > { %v477_v29 = vmul.f32 0.03125, %v460_v28  ;;  %v454_v30 = vpop.xlane.xlu0 %453  ;;  %v492_v36 = vmul.f32 %v2502_v26, %v2502_v26 }
 0x17a   : > { %v475_v31 = vmul.f32 0.03125, %v454_v30  ;;  %v490_v32 = vmul.f32 %v2504_v27, %v2504_v27 }
 0x17b   : > { %v2508_v33 = vsub.f32 %v2112_v8, %v477_v29  ;;  %v504_v44 = vsel %vm448_vm1, %v492_v36, 0.0 }
 0x17c   : > { %v2510_v34 = vsub.f32 %v420_v10, %v475_v31  ;;  %v498_v35 = vsel %vm448_vm1, %v490_v32, 0.0  ;;  %v1948_v32 = vld [vmem:[%s2781_s3] ss:$0 sm:$0xff] }
 0x17d   : > { %499 = vadd.xlane.f32.xlu0 %v498_v35  ;;  %v463_v37 = vpop.xlane.xlu0 %462  ;;  %v493_v41 = vmul.f32 %v2508_v33, %v2508_v33 }
 0x17e   : > { %v478_v38 = vmul.f32 0.03125, %v463_v37  ;;  %v491_v39 = vmul.f32 %v2510_v34, %v2510_v34 }
 0x17f   : > { %v466_v40 = vpop.xlane.xlu1 %465  ;;  %v507_v51 = vsel %vm448_vm1, %v493_v41, 0.0 }
 0x180   : > { %v2519_v42 = vsub.f32 %v433_v14, %v478_v38  ;;  %v479_v43 = vmul.f32 0.03125, %v466_v40  ;;  %v501_v45 = vsel %vm448_vm1, %v491_v39, 0.0 }
 0x181   : > { %505 = vadd.xlane.f32.xlu0 %v504_v44  ;;  %v469_v46 = vpop.xlane.xlu0 %468  ;;  %502 = vadd.xlane.f32.xlu1 %v501_v45 }
 0x182   : > { %v2523_v47 = vsub.f32 %v436_v17, %v479_v43  ;;  %v480_v48 = vmul.f32 0.03125, %v469_v46  ;;  %v494_v49 = vmul.f32 %v2519_v42, %v2519_v42 }
 0x183   : > { %v472_v50 = vpop.xlane.xlu1 %471 }
 0x184   : > { %v2529_v52 = vsub.f32 %v2452_v13, %v480_v48  ;;  %v481_v53 = vmul.f32 0.03125, %v472_v50  ;;  %v510_v54 = vsel %vm448_vm1, %v494_v49, 0.0  ;;  %v495_v55 = vmul.f32 %v2523_v47, %v2523_v47 }
 0x185   : > { %511 = vadd.xlane.f32.xlu0 %v510_v54  ;;  %508 = vadd.xlane.f32.xlu1 %v507_v51 }
 0x186   : > { %v2535_v56 = vsub.f32 %v2454_v15, %v481_v53  ;;  %v496_v57 = vmul.f32 %v2529_v52, %v2529_v52  ;;  %v513_v59 = vsel %vm448_vm1, %v495_v55, 0.0 }
 0x188   : > { %v516_v58 = vsel %vm448_vm1, %v496_v57, 0.0  ;;  %v497_v60 = vmul.f32 %v2535_v56, %v2535_v56 }
 0x189   : > { %517 = vadd.xlane.f32.xlu0 %v516_v58  ;;  %514 = vadd.xlane.f32.xlu1 %v513_v59 }
 0x18a   : > { %v519_v61 = vsel %vm448_vm1, %v497_v60, 0.0 }
 0x18d   : > { %520 = vadd.xlane.f32.xlu1 %v519_v61 }
 0x20a   : > { %v500_v4 = vpop.xlane.xlu0 %499 }
 0x20b   : > { %v522_v5 = vmul.f32 0.03125, %v500_v4 }
 0x20d   : > { %v530_v6 = vadd.f32 1e-06, %v522_v5 }
 0x20e   : > { %v506_v7 = vpop.xlane.xlu0 %505  ;;  %v503_v8 = vpop.xlane.xlu1 %502 }
 0x20f   : > { %2338 = vrsqrt.f32 %v530_v6  ;;  %v524_v9 = vmul.f32 0.03125, %v506_v7  ;;  %v523_v10 = vmul.f32 0.03125, %v503_v8 }
 0x211   : > { %v532_v11 = vadd.f32 1e-06, %v524_v9  ;;  %v531_v12 = vadd.f32 1e-06, %v523_v10  ;;  %v2326_v10 = vld [vmem:[%s2782_s4 + $0x8] sm:$0xff]  }
 0x212   : > { %v512_v13 = vpop.xlane.xlu0 %511  ;;  %v509_v14 = vpop.xlane.xlu1 %508 }
 0x213   : > { %2340 = vrsqrt.f32 %v532_v11  ;;  %v526_v15 = vmul.f32 0.03125, %v512_v13  ;;  %v525_v16 = vmul.f32 0.03125, %v509_v14 }
 0x214   : > { %2342 = vrsqrt.f32 %v531_v12 }
 0x215   : > { %v534_v17 = vadd.f32 1e-06, %v526_v15  ;;  %v533_v18 = vadd.f32 1e-06, %v525_v16 }
 0x216   : > { %v518_v19 = vpop.xlane.xlu0 %517  ;;  %v515_v20 = vpop.xlane.xlu1 %514 }
 0x217   : > { %2344 = vrsqrt.f32 %v534_v17  ;;  %v528_v22 = vmul.f32 0.03125, %v518_v19  ;;  %v527_v23 = vmul.f32 0.03125, %v515_v20  ;;  %v2325_v17 = vld [vmem:[%s2782_s4 + $0x48] sm:$0xff]  }
 0x218   : > { %2346 = vrsqrt.f32 %v533_v18  ;;  %v2328_v18 = vld [vmem:[%s2782_s4 + $0x20] sm:$0xff]   ;;  %v646_v20 = vld [vmem:[#allocation2 + $0xaf] sm:$0xff] }
 0x219   : > { %v2339_v24 = vpop.eup %2338  ;;  %v536_v28 = vadd.f32 1e-06, %v528_v22  ;;  %v535_v29 = vadd.f32 1e-06, %v527_v23 }
 0x21a   : > { %v546_v30 = vmul.f32 %v2339_v24, %v2504_v27  ;;  %v521_v31 = vpop.xlane.xlu1 %520 }
 0x21b   : > { %2348 = vrsqrt.f32 %v536_v28  ;;  %v529_v35 = vmul.f32 0.03125, %v521_v31  ;;  %v2327_v28 = vld [vmem:[%s2782_s4 + $0x50] sm:$0xff]  }
 0x21c   : > { %v561_v36 = vmul.f32 %v1947_v25, %v546_v30  ;;  %2350 = vrsqrt.f32 %v535_v29 }
 0x21d   : > { %v2341_v37 = vpop.eup %2340  ;;  %v537_v38 = vadd.f32 1e-06, %v529_v35 }
 0x21e   : > { %v2343_v39 = vpop.eup %2342  ;;  %v576_v40 = vadd.f32 %v1948_v32, %v561_v36  ;;  %v548_v41 = vmul.f32 %v2341_v37, %v2502_v26  ;;  %v2330_v36 = vld [vmem:[%s2782_s4 + $0x28] sm:$0xff]  }
 0x21f   : > { %v547_v43 = vmul.f32 %v2343_v39, %v2510_v34  ;;  %2352 = vrsqrt.f32 %v537_v38  ;;  %v662_v34 = vld [vmem:[#allocation2 + $0xb0] sm:$0xff]  ;;  %v2329_v39 = vld [vmem:[%s2782_s4 + $0x58] sm:$0xff]  }
 0x220   : > { %637 = vst.msk [vmem:[#allocation2 + $0xc8] sm:$0xff] %vm448_vm1, %v576_v40  ;;  %v563_v27 = vmul.f32 %v1947_v25, %v548_v41  ;;  %v857_v41 = vld [vmem:[#allocation2 + $0xb1] sm:$0xff] }
 0x221   : > { %v2345_v44 = vpop.eup %2344  ;;  %v562_v45 = vmul.f32 %v1947_v25, %v547_v43 }
 0x222   : > { %v2347_v46 = vpop.eup %2346  ;;  %v578_v48 = vadd.f32 %v1948_v32, %v563_v27  ;;  %v550_v49 = vmul.f32 %v2345_v44, %v2519_v42  ;;  %v2331_v44 = vld [vmem:[%s2782_s4 + $0x60] sm:$0xff]  }
 0x223   : > { %v577_v50 = vadd.f32 %v1948_v32, %v562_v45  ;;  %v549_v51 = vmul.f32 %v2347_v46, %v2508_v33 }
 0x224   : > { %639 = vst.msk [vmem:[#allocation2 + $0xf8] sm:$0xff] %vm448_vm1, %v578_v48  ;;  %v565_v53 = vmul.f32 %v1947_v25, %v550_v49 }
 0x225   : > { %v2349_v54 = vpop.eup %2348  ;;  %638 = vst.msk [vmem:[#allocation2 + $0xe0] sm:$0xff] %vm448_vm1, %v577_v50  ;;  %v564_v26 = vmul.f32 %v1947_v25, %v549_v51 }
 0x226   : > { %v2351_v55 = vpop.eup %2350  ;;  %v580_v57 = vadd.f32 %v1948_v32, %v565_v53  ;;  %v552_v58 = vmul.f32 %v2349_v54, %v2529_v52 }
 0x227   : > { %v579_v59 = vadd.f32 %v1948_v32, %v564_v26  ;;  %v551_v60 = vmul.f32 %v2351_v55, %v2523_v47  ;;  %v663_v61 = vld [vmem:[#allocation2 + $0xc8] sm:$0xff] }
 0x228   : > { %641 = vst.msk [vmem:[#allocation2 + $0x128] sm:$0xff] %vm448_vm1, %v580_v57  ;;  %v567_v42 = vmul.f32 %v1947_v25, %v552_v58  ;;  %v675_v33 = vpack.c.bf16 %v663_v61, %v662_v34  ;;  %v971_v6 = vld [vmem:[#allocation2 + $0xc7] sm:$0xff] }
 0x229   : > { %v2353_v62 = vpop.eup %2352  ;;  %640 = vst.msk [vmem:[#allocation2 + $0x110] sm:$0xff] %vm448_vm1, %v579_v59  ;;  %v566_v63 = vmul.f32 %v1947_v25, %v551_v60  ;;  %v658_v29 = vpack.c.bf16 %v971_v6, %v646_v20  ;;  %v858_v43 = vld [vmem:[#allocation2 + $0xc9] sm:$0xff] }
 0x22a   : > { %v582_v0 = vadd.f32 %v1948_v32, %v567_v42  ;;  %v553_v1 = vmul.f32 %v2353_v62, %v2535_v56  ;;  %2121 = vmatprep.mubr.msk.bf16.mxu0 %vm448_vm1, %v675_v33  ;;  %v870_v45 = vpack.c.bf16 %v858_v43, %v857_v41  ;;  %v2332_v58 = vld [vmem:[%s2782_s4 + $0x68] sm:$0xff]   ;;  %v2333_v42 = vld [vmem:[%s2782_s4 + $0x70] sm:$0xff]  }
 0x22b   : > { %v581_v4 = vadd.f32 %v1948_v32, %v566_v63  ;;  %v665_v5 = vld [vmem:[#allocation2 + $0xf8] sm:$0xff] }
 0x22c   : > { %643 = vst.msk [vmem:[#allocation2 + $0x158] sm:$0xff] %vm448_vm1, %v582_v0  ;;  %v568_v52 = vmul.f32 %v1947_v25, %v553_v1  ;;  %v664_v47 = vld [vmem:[#allocation2 + $0xe0] sm:$0xff]  ;;  %v973_v13 = vld [vmem:[#allocation2 + $0xf7] sm:$0xff] }
 0x22d   : > { %v972_v7 = vld [vmem:[#allocation2 + $0xdf] sm:$0xff]  ;;  %642 = vst.msk [vmem:[#allocation2 + $0x140] sm:$0xff] %vm448_vm1, %v581_v4  ;;  %v2600_v8 = vpack.c.bf16 %v665_v5, %v664_v47  ;;  %v1321_v1 = vld [vmem:[#allocation2 + $0x187] sm:$0xff] }
 0x22e   : > { %v984_v9 = vpack.c.bf16 %v972_v7, %v971_v6  ;;  %v583_v56 = vadd.f32 %v1948_v32, %v568_v52  ;;  %v1098_v32 = vpack.c.bf16 %v664_v47, %v663_v61  ;;  %v659_v35 = vpack.c.bf16 %v973_v13, %v972_v7  ;;  %v1200_v48 = vld [vmem:[#allocation2 + $0xe1] sm:$0xff]  ;;  %v860_v51 = vld [vmem:[#allocation2 + $0xf9] sm:$0xff]  ;;  %v1549_v6 = vld [vmem:[#allocation2 + $0x189] sm:$0xff] }
 0x22f   : > { %2122 = vmatmul.mubr.msk.bf16.vlgmr.msra.gmra.mrb[8].mxu0 %vm448_vm1, %v2600_v8  ;;  %v667_v11 = vld [vmem:[#allocation2 + $0x128] sm:$0xff]  ;;  %v1212_v50 = vpack.c.bf16 %v1200_v48, %v858_v43  ;;  %v871_v26 = vpack.c.bf16 %v860_v51, %v1200_v48  ;;  %v2334_v63 = vld [vmem:[%s2782_s4 + $0x78] sm:$0xff]   ;;  %v2335_v0 = vld [vmem:[%s2782_s4 + $0x80] sm:$0xff]  }
 0x230   : > { %2157 = vmatprep.mubr.msk.bf16.mxu1 %vm448_vm1, %v984_v9  ;;  %644 = vst.msk [vmem:[#allocation2 + $0x170] sm:$0xff] %vm448_vm1, %v583_v56  ;;  %v666_v12 = vld [vmem:[#allocation2 + $0x110] sm:$0xff]  ;;  %2130 = vmatpush3.bf16.msra.mxu0 %v2575_v3  ;;  %v975_v22 = vld [vmem:[#allocation2 + $0x127] sm:$0xff] }
 0x231   : > { %v974_v14 = vld [vmem:[#allocation2 + $0x10f] sm:$0xff]  ;;  %v2610_v15 = vpack.c.bf16 %v667_v11, %v666_v12  ;;  %2131 = vmatprep.subr.bf16.mxu0 %v2326_v10  ;;  %v1099_v38 = vpack.c.bf16 %v666_v12, %v665_v5 }
 0x232   : > { %v985_v16 = vpack.c.bf16 %v974_v14, %v973_v13  ;;  %v660_v37 = vpack.c.bf16 %v975_v22, %v974_v14  ;;  %v861_v53 = vld [vmem:[#allocation2 + $0x111] sm:$0xff]  ;;  %v862_v54 = vld [vmem:[#allocation2 + $0x129] sm:$0xff] }
 0x233   : > { %2125 = vmatprep.mubr.msk.bf16.mxu0 %vm448_vm1, %v2610_v15  ;;  %v669_v19 = vld [vmem:[#allocation2 + $0x158] sm:$0xff]  ;;  %v872_v34 = vpack.c.bf16 %v862_v54, %v861_v53  ;;  %v1213_v57 = vpack.c.bf16 %v861_v53, %v860_v51  ;;  %v2336_v5 = vld [vmem:[%s2782_s4 + $0x88] sm:$0xff]  }
 0x234   : > { %2158 = vmatmul.mubr.msk.bf16.vlgmr.msra.gmra.mrb[0].mxu1 %vm448_vm1, %v985_v16  ;;  %v668_v3 = vld [vmem:[#allocation2 + $0x140] sm:$0xff]  ;;  %2132 = vmatpush3.bf16.msra.mxu0 %v2326_v10  ;;  %v1435_v52 = vld [vmem:[#allocation2 + $0x188] sm:$0xff] }
 0x235   : > { %2166 = vmatpush3.bf16.msra.mxu1 %v2569_v2  ;;  %v976_v23 = vld [vmem:[#allocation2 + $0x13f] sm:$0xff]  ;;  %v2622_v24 = vpack.c.bf16 %v669_v19, %v668_v3  ;;  %2141 = vmatprep.subr.bf16.mxu0 %v2328_v18  ;;  %v977_v2 = vld [vmem:[#allocation2 + $0x157] sm:$0xff]  ;;  %v1100_v40 = vpack.c.bf16 %v668_v3, %v667_v11 }
 0x236   : > { %v986_v25 = vpack.c.bf16 %v976_v23, %v975_v22  ;;  %2167 = vmatprep.subr.bf16.mxu1 %v2325_v17  ;;  %v661_v27 = vpack.c.bf16 %v977_v2, %v976_v23  ;;  %v1204_v55 = vld [vmem:[#allocation2 + $0x141] sm:$0xff]  ;;  %v864_v60 = vld [vmem:[#allocation2 + $0x159] sm:$0xff] }
 0x237   : > { %2126 = vmatmul.mubr.msk.bf16.gmra.mrb[12].mxu0 %vm448_vm1, %v2622_v24  ;;  %v2630_v30 = vld [vmem:[#allocation2 + $0x16f] sm:$0xff]  ;;  %v1214_v59 = vpack.c.bf16 %v1204_v55, %v862_v54  ;;  %v873_v61 = vpack.c.bf16 %v864_v60, %v1204_v55 }
 0x238   : > { %2161 = vmatprep.mubr.msk.bf16.mxu1 %vm448_vm1, %v986_v25  ;;  %2133 = vmatprep.mubr.msk.bf16.mxu0 %vm448_vm1, %v658_v29  ;;  %v987_v31 = vpack.c.bf16 %v2630_v30, %v977_v2  ;;  %v1092_v46 = vld [vmem:[#allocation2 + $0x170] sm:$0xff]  ;;  %v1330_v4 = vpack.c.bf16 %v1321_v1, %v2630_v30 }
 0x239   : > { %2168 = vmatpush3.bf16.msra.mxu1 %v2325_v17  ;;  %v1101_v49 = vpack.c.bf16 %v1092_v46, %v669_v19  ;;  %v1206_v33 = vld [vmem:[#allocation2 + $0x171] sm:$0xff]  ;;  %v1444_v47 = vpack.c.bf16 %v1435_v52, %v1092_v46 }
 0x23a   : > { %2177 = vmatprep.subr.bf16.mxu1 %v2327_v28  ;;  %v1215_v62 = vpack.c.bf16 %v1206_v33, %v864_v60  ;;  %v1558_v7 = vpack.c.bf16 %v1549_v6, %v1206_v33 }
 0x23c   : > { %2162 = vmatmul.mubr.msk.bf16.gmra.mrb[4].mxu1 %vm448_vm1, %v987_v31 }
 0x23d   : > { %2169 = vmatprep.mubr.msk.bf16.mxu1 %vm448_vm1, %v1098_v32 }
 0x23f   : > { %2134 = vmatmul.mubr.msk.bf16.vlgmr.msra.gmra.mrb[8].mxu0 %vm448_vm1, %v659_v35 }
 0x240   : > { %2137 = vmatprep.mubr.msk.bf16.mxu0 %vm448_vm1, %v660_v37  ;;  %2142 = vmatpush3.bf16.msra.mxu0 %v2328_v18 }
 0x241   : > { %2143 = vmatprep.subr.bf16.mxu0 %v2330_v36 }
 0x244   : > { %2170 = vmatmul.mubr.msk.bf16.vlgmr.msra.gmra.mrb[0].mxu1 %vm448_vm1, %v1099_v38  ;;  %2144 = vmatpush3.bf16.msra.mxu0 %v2330_v36 }
 0x245   : > { %2178 = vmatpush3.bf16.msra.mxu1 %v2327_v28  ;;  %2173 = vmatprep.mubr.msk.bf16.mxu1 %vm448_vm1, %v1100_v40 }
 0x246   : > { %2179 = vmatprep.subr.bf16.mxu1 %v2329_v39  ;;  %2225 = vmatprep.subr.bf16.mxu0 %v2378_v21 }
 0x247   : > { %2138 = vmatmul.mubr.msk.bf16.gmra.mrb[12].mxu0 %vm448_vm1, %v661_v27 }
 0x248   : > { %2145 = vmatprep.mubr.msk.bf16.mxu0 %vm448_vm1, %v870_v45 }
 0x249   : > { %2180 = vmatpush3.bf16.msra.mxu1 %v2329_v39 }
 0x24a   : > { %2189 = vmatprep.subr.bf16.mxu1 %v2331_v44 }
 0x24c   : > { %2174 = vmatmul.mubr.msk.bf16.gmra.mrb[4].mxu1 %vm448_vm1, %v1101_v49 }
 0x24d   : > { %2181 = vmatprep.mubr.msk.bf16.mxu1 %vm448_vm1, %v1212_v50 }
 0x24f   : > { %2146 = vmatmul.mubr.msk.bf16.vlgmr.msra.gmra.mrb[8].mxu0 %vm448_vm1, %v871_v26 }
 0x250   : > { %2149 = vmatprep.mubr.msk.bf16.mxu0 %vm448_vm1, %v872_v34 }
 0x254   : > { %2182 = vmatmul.mubr.msk.bf16.vlgmr.msra.gmra.mrb[0].mxu1 %vm448_vm1, %v1213_v57 }
 0x255   : > { %2190 = vmatpush3.bf16.msra.mxu1 %v2331_v44  ;;  %2185 = vmatprep.mubr.msk.bf16.mxu1 %vm448_vm1, %v1214_v59 }
 0x256   : > { %2191 = vmatprep.subr.bf16.mxu1 %v2332_v58 }
 0x257   : > { %2150 = vmatmul.mubr.msk.bf16.gmra.mrb[12].mxu0 %vm448_vm1, %v873_v61 }
 0x258   : > { %2233 = vmatprep.mubr.msk.bf16.mxu0 %vm2379_vm3, %v2378_v21 }
 0x259   : > { %2192 = vmatpush3.bf16.msra.mxu1 %v2332_v58 }
 0x25a   : > { %2201 = vmatprep.subr.bf16.mxu1 %v2333_v42 }
 0x25c   : > { %2186 = vmatmul.mubr.msk.bf16.gmra.mrb[4].mxu1 %vm448_vm1, %v1215_v62 }
 0x25d   : > { %2193 = vmatprep.mubr.msk.bf16.mxu1 %vm448_vm1, %v659_v35 }
 0x264   : > { %2194 = vmatmul.mubr.msk.bf16.vlgmr.msra.gmra.mrb[0].mxu1 %vm448_vm1, %v660_v37 }
 0x265   : > { %2202 = vmatpush3.bf16.msra.mxu1 %v2333_v42  ;;  %2197 = vmatprep.mubr.msk.bf16.mxu1 %vm448_vm1, %v661_v27 }
 0x266   : > { %2203 = vmatprep.subr.bf16.mxu1 %v2334_v63 }
 0x269   : > { %2204 = vmatpush3.bf16.msra.mxu1 %v2334_v63 }
 0x26a   : > { %2213 = vmatprep.subr.bf16.mxu1 %v2335_v0 }
 0x26c   : > { %2198 = vmatmul.mubr.msk.bf16.gmra.mrb[4].mxu1 %vm448_vm1, %v1330_v4 }
 0x26d   : > { %2205 = vmatprep.mubr.msk.bf16.mxu1 %vm448_vm1, %v2600_v8 }
 0x274   : > { %2206 = vmatmul.mubr.msk.bf16.vlgmr.msra.gmra.mrb[0].mxu1 %vm448_vm1, %v2610_v15 }
 0x275   : > { %2214 = vmatpush3.bf16.msra.mxu1 %v2335_v0  ;;  %2209 = vmatprep.mubr.msk.bf16.mxu1 %vm448_vm1, %v2622_v24 }
 0x276   : > { %2215 = vmatprep.subr.bf16.mxu1 %v2336_v5 }
 0x279   : > { %2216 = vmatpush3.bf16.msra.mxu1 %v2336_v5 }
 0x27c   : > { %2210 = vmatmul.mubr.msk.bf16.gmra.mrb[4].mxu1 %vm448_vm1, %v1444_v47 }
 0x27d   : > { %2217 = vmatprep.mubr.msk.bf16.mxu1 %vm448_vm1, %v871_v26 }
 0x284   : > { %2218 = vmatmul.mubr.msk.bf16.vlgmr.msra.gmra.mrb[0].mxu1 %vm448_vm1, %v872_v34 }
 0x285   : > { %2221 = vmatprep.mubr.msk.bf16.mxu1 %vm448_vm1, %v873_v61 }
 0x28c   : > { %2222 = vmatmul.mubr.msk.bf16.gmra.mrb[4].mxu1 %vm448_vm1, %v1558_v7 }
 0x322   : > { %v2147_v8 = vpop.f32.mrb[8].mxu0 }
 0x323   : > { %v932_v9 = vpop.f32.mrb[9].mxu0 }
 0x324   : > { %v2148_v10 = vpop.f32.mrb[10].mxu0 }
 0x325   : > { %v935_v56 = vpop.f32.mrb[11].mxu0 }
 0x32a   : > { %v2151_v11 = vpop.f32.mrb[12].mxu0 }
 0x32b   : > { %v948_v12 = vpop.f32.mrb[13].mxu0 }
 0x32c   : > { %v2152_v13 = vpop.f32.mrb[14].mxu0 }
 0x32d   : > { %v951_v14 = vpop.f32.mrb[15].mxu0 }
 0x357   : > { %v2219_v15 = vpop.f32.mrb[0].mxu1 }
 0x358   : > { %v2237_v16 = vadd.f32 %v2219_v15, %v2147_v8  ;;  %v1617_v17 = vpop.f32.mrb[1].mxu1 }
 0x359   : > { %v2238_v18 = vadd.f32 %v1617_v17, %v932_v9  ;;  %v2220_v19 = vpop.f32.mrb[2].mxu1  ;;  %v1797_v17 = vld [vmem:[%s2786_s8 + $0x8] sm:$0xff] }
 0x35a   : > { %v2239_v20 = vadd.f32 %v2220_v19, %v2148_v10  ;;  %v1620_v3 = vpop.f32.mrb[3].mxu1  ;;  %v1662_v28 = vsel %vm448_vm1, %v2237_v16, 0.0 }
 0x35b   : > { %v2240_v22 = vadd.f32 %v1620_v3, %v935_v56  ;;  %v1656_v23 = vsel %vm448_vm1, %v2238_v18, 0.0 }
 0x35c   : > { %1657 = vadd.xlane.f32.xlu0 %v1656_v23  ;;  %v1665_v32 = vsel %vm448_vm1, %v2239_v20, 0.0 }
 0x35d   : > { %v1659_v24 = vsel %vm448_vm1, %v2240_v22, 0.0 }
 0x35e   : > { %1660 = vadd.xlane.f32.xlu1 %v1659_v24 }
 0x35f   : > { %v2223_v25 = vpop.f32.mrb[4].mxu1 }
 0x360   : > { %v2241_v29 = vadd.f32 %v2223_v25, %v2151_v11  ;;  %1663 = vadd.xlane.f32.xlu0 %v1662_v28  ;;  %v1633_v2 = vpop.f32.mrb[5].mxu1 }
 0x361   : > { %v2242_v30 = vadd.f32 %v1633_v2, %v948_v12  ;;  %v2224_v31 = vpop.f32.mrb[6].mxu1 }
 0x362   : > { %v2243_v35 = vadd.f32 %v2224_v31, %v2152_v13  ;;  %1666 = vadd.xlane.f32.xlu1 %v1665_v32  ;;  %v1636_v36 = vpop.f32.mrb[7].mxu1  ;;  %v1674_v40 = vsel %vm448_vm1, %v2241_v29, 0.0 }
 0x363   : > { %v2244_v37 = vadd.f32 %v1636_v36, %v951_v14  ;;  %v1668_v38 = vsel %vm448_vm1, %v2242_v30, 0.0 }
 0x364   : > { %1669 = vadd.xlane.f32.xlu0 %v1668_v38  ;;  %v1677_v41 = vsel %vm448_vm1, %v2243_v35, 0.0 }
 0x365   : > { %v1671_v39 = vsel %vm448_vm1, %v2244_v37, 0.0 }
 0x366   : > { %1672 = vadd.xlane.f32.xlu1 %v1671_v39 }
 0x368   : > { %1675 = vadd.xlane.f32.xlu0 %v1674_v40 }
 0x36a   : > { %1678 = vadd.xlane.f32.xlu1 %v1677_v41 }
 0x3e9   : > { %v1658_v43 = vpop.xlane.xlu0 %1657 }
 0x3ea   : > { %v1680_v27 = vmul.f32 0.03125, %v1658_v43 }
 0x3eb   : > { %v1661_v44 = vpop.xlane.xlu1 %1660 }
 0x3ec   : > { %v2699_v45 = vsub.f32 %v2238_v18, %v1680_v27  ;;  %v1681_v46 = vmul.f32 0.03125, %v1661_v44  ;;  %v2380_v18 = vmov 0  }
 0x3ed   : > { %v1664_v48 = vpop.xlane.xlu0 %1663  ;;  %2312 = vset.pattern.permute.xlu0 %v2380_v18  ;;  %2313 = vset.pattern.permute.xlu1 %v2380_v18 }
 0x3ee   : > { %v2701_v49 = vsub.f32 %v2240_v22, %v1681_v46  ;;  %v1682_v50 = vmul.f32 0.03125, %v1664_v48  ;;  %v1696_v51 = vmul.f32 %v2699_v45, %v2699_v45  ;;  %v2035_v46 = vld [vmem:[%s2783_s5] ss:$0 sm:$0xff] }
 0x3ef   : > { %v1667_v53 = vpop.xlane.xlu1 %1666 }
 0x3f0   : > { %v2705_v54 = vsub.f32 %v2237_v16, %v1682_v50  ;;  %v1683_v26 = vmul.f32 0.03125, %v1667_v53  ;;  %v1704_v34 = vsel %vm448_vm1, %v1696_v51, 0.0  ;;  %v1697_v55 = vmul.f32 %v2701_v49, %v2701_v49  ;;  %v1796_v16 = vld [vmem:[%s2786_s8] sm:$0xff] }
 0x3f1   : > { %1705 = vadd.xlane.f32.xlu0 %v1704_v34  ;;  %v1670_v57 = vpop.xlane.xlu0 %1669 }
 0x3f2   : > { %v2710_v58 = vsub.f32 %v2239_v20, %v1683_v26  ;;  %v1684_v59 = vmul.f32 0.03125, %v1670_v57  ;;  %v1707_v60 = vsel %vm448_vm1, %v1697_v55, 0.0  ;;  %v1698_v61 = vmul.f32 %v2705_v54, %v2705_v54  ;;  %v2036_v57 = vld [vmem:[%s2784_s6] ss:$0 sm:$0xff] }
 0x3f3   : > { %1708 = vadd.xlane.f32.xlu1 %v1707_v60  ;;  %v1673_v42 = vpop.xlane.xlu1 %1672 }
 0x3f4   : > { %v2715_v33 = vsub.f32 %v2242_v30, %v1684_v59  ;;  %v1685_v62 = vmul.f32 0.03125, %v1673_v42  ;;  %v1710_v63 = vsel %vm448_vm1, %v1698_v61, 0.0  ;;  %v1699_v0 = vmul.f32 %v2710_v58, %v2710_v58 }
 0x3f5   : > { %1711 = vadd.xlane.f32.xlu0 %v1710_v63  ;;  %v1676_v1 = vpop.xlane.xlu0 %1675 }
 0x3f6   : > { %v2720_v4 = vsub.f32 %v2244_v37, %v1685_v62  ;;  %v1686_v5 = vmul.f32 0.03125, %v1676_v1  ;;  %v1713_v52 = vsel %vm448_vm1, %v1699_v0, 0.0  ;;  %v1700_v47 = vmul.f32 %v2715_v33, %v2715_v33 }
 0x3f7   : > { %1714 = vadd.xlane.f32.xlu1 %v1713_v52  ;;  %v1679_v6 = vpop.xlane.xlu1 %1678 }
 0x3f8   : > { %v2725_v7 = vsub.f32 %v2241_v29, %v1686_v5  ;;  %v1687_v8 = vmul.f32 0.03125, %v1679_v6  ;;  %v1716_v9 = vsel %vm448_vm1, %v1700_v47, 0.0  ;;  %v1701_v10 = vmul.f32 %v2720_v4, %v2720_v4 }
 0x3f9   : > { %1717 = vadd.xlane.f32.xlu0 %v1716_v9 }
 0x3fa   : > { %v2730_v56 = vsub.f32 %v2243_v35, %v1687_v8  ;;  %v1719_v11 = vsel %vm448_vm1, %v1701_v10, 0.0  ;;  %v1702_v12 = vmul.f32 %v2725_v7, %v2725_v7 }
 0x3fb   : > { %1720 = vadd.xlane.f32.xlu1 %v1719_v11 }
 0x3fc   : > { %v1722_v13 = vsel %vm448_vm1, %v1702_v12, 0.0  ;;  %v1703_v14 = vmul.f32 %v2730_v56, %v2730_v56 }
 0x3fd   : > { %1723 = vadd.xlane.f32.xlu0 %v1722_v13 }
 0x3fe   : > { %v1725_v15 = vsel %vm448_vm1, %v1703_v14, 0.0 }
 0x3ff   : > { %1726 = vadd.xlane.f32.xlu1 %v1725_v15 }
 0x410   : > { %1805 = vperm.xlu1 %2313, %v1797_v17  }
 0x413   : > { %1800 = vperm.xlu0 %2312, %v1796_v16  }
 0x47e   : > { %v1706_v19 = vpop.xlane.xlu0 %1705 }
 0x47f   : > { %v1728_v20 = vmul.f32 0.03125, %v1706_v19 }
 0x480   : > { %v1709_v3 = vpop.xlane.xlu1 %1708 }
 0x481   : > { %v1736_v22 = vadd.f32 1e-06, %v1728_v20  ;;  %v1729_v23 = vmul.f32 0.03125, %v1709_v3 }
 0x482   : > { %v1712_v24 = vpop.xlane.xlu0 %1711 }
 0x483   : > { %2354 = vrsqrt.f32 %v1736_v22  ;;  %v1737_v25 = vadd.f32 1e-06, %v1729_v23  ;;  %v1730_v28 = vmul.f32 0.03125, %v1712_v24  ;;  %v2337_v23 = vld [vmem:[%s2785_s7] sm:$0xff]  }
 0x484   : > { %v1715_v29 = vpop.xlane.xlu1 %1714 }
 0x485   : > { %2356 = vrsqrt.f32 %v1737_v25  ;;  %v1738_v2 = vadd.f32 1e-06, %v1730_v28  ;;  %v1731_v30 = vmul.f32 0.03125, %v1715_v29 }
 0x486   : > { %v1718_v31 = vpop.xlane.xlu0 %1717 }
 0x487   : > { %2358 = vrsqrt.f32 %v1738_v2  ;;  %v1739_v32 = vadd.f32 1e-06, %v1731_v30  ;;  %v1732_v35 = vmul.f32 0.03125, %v1718_v31 }
 0x488   : > { %v1721_v36 = vpop.xlane.xlu1 %1720 }
 0x489   : > { %2360 = vrsqrt.f32 %v1739_v32  ;;  %v1740_v37 = vadd.f32 1e-06, %v1732_v35  ;;  %v1733_v38 = vmul.f32 0.03125, %v1721_v36 }
 0x48a   : > { %v1724_v39 = vpop.xlane.xlu0 %1723 }
 0x48b   : > { %v1741_v40 = vadd.f32 1e-06, %v1733_v38  ;;  %2362 = vrsqrt.f32 %v1740_v37  ;;  %v1734_v27 = vmul.f32 0.03125, %v1724_v39 }
 0x48c   : > { %v1727_v41 = vpop.xlane.xlu1 %1726 }
 0x48d   : > { %v2355_v43 = vpop.eup %2354  ;;  %2364 = vrsqrt.f32 %v1741_v40  ;;  %v1735_v44 = vmul.f32 0.03125, %v1727_v41  ;;  %v1742_v55 = vadd.f32 1e-06, %v1734_v27 }
 0x48e   : > { %v1752_v48 = vmul.f32 %v2355_v43, %v2699_v45 }
 0x48f   : > { %v2357_v50 = vpop.eup %2356  ;;  %v1743_v51 = vadd.f32 1e-06, %v1735_v44 }
 0x490   : > { %v1753_v53 = vmul.f32 %v2357_v50, %v2701_v49  ;;  %v1767_v26 = vmul.f32 %v2035_v46, %v1752_v48  ;;  %v1806_v25 = vpop.permute.xlu1 %1805 }
 0x491   : > { %v2359_v34 = vpop.eup %2358  ;;  %2366 = vrsqrt.f32 %v1743_v51 }
 0x492   : > { %v1768_v59 = vmul.f32 %v2035_v46, %v1753_v53  ;;  %v1754_v60 = vmul.f32 %v2359_v34, %v2705_v54  ;;  %v1782_v42 = vadd.f32 %v2036_v57, %v1767_v26  ;;  %2368 = vrsqrt.f32 %v1742_v55 }
 0x493   : > { %v2361_v61 = vpop.eup %2360 }
 0x494   : > { %v1783_v62 = vadd.f32 %v2036_v57, %v1768_v59  ;;  %v1755_v45 = vmul.f32 %v2361_v61, %v2710_v58  ;;  %v1769_v49 = vmul.f32 %v2035_v46, %v1754_v60 }
 0x495   : > { %v2363_v63 = vpop.eup %2362 }
 0x496   : > { %v1792_v0 = vpack.c.bf16 %v1783_v62, %v1782_v42  ;;  %v1770_v1 = vmul.f32 %v2035_v46, %v1755_v45  ;;  %v1784_v54 = vadd.f32 %v2036_v57, %v1769_v49  ;;  %v1756_v8 = vmul.f32 %v2363_v63, %v2715_v33 }
 0x497   : > { %v2365_v5 = vpop.eup %2364 }
 0x498   : > { %v1817_v52 = vsel %vm448_vm1, %v1792_v0, 0  ;;  %v1785_v47 = vadd.f32 %v2036_v57, %v1770_v1  ;;  %v1757_v6 = vmul.f32 %v2365_v5, %v2720_v4  ;;  %v1771_v11 = vmul.f32 %v2035_v46, %v1756_v8 }
 0x499   : > { %2226 = vmatpush3.bf16.xpose.msra.mxu0 %v1817_v52 }
 0x49a   : > { %2227 = vmatprep.subr.bf16.mxu0 %v2378_v21  ;;  %v1793_v9 = vpack.c.bf16 %v1785_v47, %v1784_v54  ;;  %v1772_v10 = vmul.f32 %v2035_v46, %v1757_v6  ;;  %v1786_v4 = vadd.f32 %v2036_v57, %v1771_v11 }
 0x49b   : > { %v2367_v58 = vpop.eup %2366 }
 0x49c   : > { %v2369_v12 = vpop.eup %2368  ;;  %v1820_v13 = vsel %vm448_vm1, %v1793_v9, 0  ;;  %v1787_v14 = vadd.f32 %v2036_v57, %v1772_v10  ;;  %v1759_v15 = vmul.f32 %v2367_v58, %v2730_v56 }
 0x49d   : > { %v1758_v16 = vmul.f32 %v2369_v12, %v2725_v7  ;;  %v1801_v7 = vpop.permute.xlu0 %1800 }
 0x49e   : > { %v1794_v17 = vpack.c.bf16 %v1787_v14, %v1786_v4  ;;  %v1774_v18 = vmul.f32 %v2035_v46, %v1759_v15 }
 0x49f   : > { %v1773_v33 = vmul.f32 %v2035_v46, %v1758_v16 }
 0x4a0   : > { %v1823_v19 = vsel %vm448_vm1, %v1794_v17, 0  ;;  %v1789_v20 = vadd.f32 %v2036_v57, %v1774_v18 }
 0x4a1   : > { %2228 = vmatpush3.bf16.xpose.msra.mxu0 %v1820_v13  ;;  %v1788_v3 = vadd.f32 %v2036_v57, %v1773_v33 }
 0x4a2   : > { %2229 = vmatprep.subr.bf16.mxu0 %v2378_v21 }
 0x4a3   : > { %v1795_v22 = vpack.c.bf16 %v1789_v20, %v1788_v3 }
 0x4a5   : > { %v1826_v56 = vsel %vm448_vm1, %v1795_v22, 0 }
 0x4a9   : > { %2230 = vmatpush3.bf16.xpose.msra.mxu0 %v1823_v19 }
 0x4aa   : > { %2231 = vmatprep.subr.bf16.mxu0 %v2378_v21 }
 0x4b1   : > { %2232 = vmatpush3.bf16.xpose.msra.mxu0 %v1826_v56 }
 0x4b8   : > { %2234 = vmatmul.mubr.msk.bf16.vlgmr.msra.gmra.mrb[16].mxu0 %vm448_vm1, %v2337_v23 }
 0x58b   : > { %v1862_v24 = vpop.f32.mrb[16].mxu0 }
 0x58c   : > { %v1863_v28 = vadd.f32 %v1862_v24, %v1801_v7  ;;  %v2235_v29 = vpop.f32.mrb[17].mxu0 }
 0x58d   : > { %v1865_v21 = vpop.f32.mrb[18].mxu0 }
 0x58e   : > { %v1869_v2 = vmax.f32 %v1863_v28, 0.0  ;;  %v1866_v30 = vadd.f32 %v1865_v21, %v1806_v25  ;;  %v2236_v31 = vpop.f32.mrb[19].mxu0 }
 0x590   : > { %1872 = vst.msk [vmem:[%s332_s13] sm:$0xff] %vm1871_vm4, %v1869_v2  ;;  %v1870_v32 = vmax.f32 %v1866_v30, 0.0 }
 0x592   : > { %1873 = vst.msk [vmem:[%s332_s13 + $0x8] sm:$0xff] %vm1871_vm4, %v1870_v32 }
 0x593 PF: > { %s19_s30 = sadd.s32 1, %s2376_s30  }
 0x594   : > { %p16_p4 = scmp.ge.s32.totalorder %s19_s30, 4  }
 0x596   :  { %18 = sbr.rel (!%p16_p4) target bundleno = 1 (0x1), region = 97 }

// kernel: sam_fpn_forward.11
= control target key start
LH: loop header
LB: loop body
LE: loop exit
PB: predicated region body
PF: predicated region fallthrough
CT: control target
= control target key end

     0   :  { %s5968_s30 = smov 0   ;;  %s7546_s0 = inlined_call_operand.vmem [shape: bf16[2,16,16,8], index: 0, kind: input, shape index: {}]   ;;  %s7547_s1 = inlined_call_operand.vmem [shape: bf16[8,32], index: 1, kind: input, shape index: {}]   ;;  %s7548_s2 = inlined_call_operand.vmem [shape: f32[1,32], index: 2, kind: input, shape index: {}]   ;;  %s7549_s3 = inlined_call_operand.vmem [shape: f32[1,32], index: 3, kind: input, shape index: {}]   ;;  %s7550_s4 = inlined_call_operand.vmem [shape: bf16[9,32,32], index: 4, kind: input, shape index: {}]   ;;  %s7551_s5 = inlined_call_operand.vmem [shape: f32[1,32], index: 5, kind: input, shape index: {}]   ;;  %s7552_s6 = inlined_call_operand.vmem [shape: f32[1,32], index: 6, kind: input, shape index: {}]   ;;  %s7553_s7 = inlined_call_operand.vmem [shape: bf16[16,32], index: 7, kind: input, shape index: {}]   ;;  %s7554_s8 = inlined_call_operand.vmem [shape: f32[16,1], index: 8, kind: input, shape index: {}]   ;;  %s7555_s9 = inlined_call_operand.vmem [shape: f32[2,16,256], index: 9, kind: output, shape index: {}]  }
   0x1 LB: > { %s4668_s10 = sadd.s32 4294967295, %s5914_s30   ;;  %p4672_p0 = scmp.ge.s32.totalorder %s5914_s30, 1  ;;  %s5914_s30 = sphi %s5968_s30, %s19_s30  }
   0x2   : > { %p287_p1 = scmp.lt.s32.totalorder %s5914_s30, 3 }
   0x4   : > { %p288_p2 = pnand %p4672_p0, %p287_p1 }
   0x5   : > { %v366_v0 = vld [vmem:[%s7547_s1] sm:$0xf] (!%p288_p2)  ;;  %vm496_vm0 = vcmask (!%p288_p2), 1043456   ;;  %p323_p3 = scmp.lt.s32.totalorder (!%p288_p2), %s4668_s10, 1  ;;  %vm447_vm1 = vcmask (!%p288_p2), 64512   ;;  %vm661_vm2 = vcmask (!%p288_p2), 261120  }
   0x6   : > { %291 = sbr.rel (%p288_p2) target bundleno = 1667 (0x683), region = 56  ;;  %5724 = vmatprep.subr.msk.bf16.mxu0 (!%p288_p2), %vm496_vm0, %v366_v0  ;;  %v498_v1 = vsel (!%p288_p2), %vm496_vm0, %v366_v0, 0  ;;  %vm1160_vm3 = vcmask (!%p288_p2), 253952  }
   0x7   : > { %5111 = vmatpush3.bf16.msra.mxu0 (!%p288_p2), %v498_v1 }
   0xd   : > { %s7557_s10 = smov (!%p323_p3, %s4668_s10), 1 }
   0xe   : > { %s4911_s13 = sshll.u32 %s7557_s10, 7  ;;  %s4912_s29 = sshll.u32 %s7557_s10, 5 }
   0xf   : > { %s5985_s16 = scalar_lea.vmem %s7546_s0, %s4911_s13  ;;  %s332_s13 = scalar_lea.vmem %s7555_s9, %s4912_s29 }
  0x10   : > { %v5745_v2 = vld [vmem:[%s5985_s16] sm:$0xff]   ;;  %v5746_v3 = vld [vmem:[%s5985_s16 + $0x8] sm:$0xff]   ;;  %v5747_v4 = vld [vmem:[%s5985_s16 + $0x10] sm:$0xff]  }
  0x11   : > { %5112 = vmatprep.mubr.msk.bf16.mxu0 %vm447_vm1, %v5745_v2  ;;  %v5748_v5 = vld [vmem:[%s5985_s16 + $0x18] sm:$0xff]   ;;  %v5749_v6 = vld [vmem:[%s5985_s16 + $0x20] sm:$0xff]   ;;  %v5750_v7 = vld [vmem:[%s5985_s16 + $0x28] sm:$0xff]  }
  0x12   : > { %5113 = vmatmul.mubr.msk.bf16.vlgmr.msra.gmra.mrb[0].mxu0 %vm447_vm1, %v5746_v3  ;;  %v5751_v8 = vld [vmem:[%s5985_s16 + $0x30] sm:$0xff]   ;;  %v5752_v9 = vld [vmem:[%s5985_s16 + $0x38] sm:$0xff]   ;;  %v5753_v10 = vld [vmem:[%s5985_s16 + $0x40] sm:$0xff]  }
  0x13   : > { %5116 = vmatprep.mubr.msk.bf16.mxu0 %vm447_vm1, %v5747_v4  ;;  %v5754_v11 = vld [vmem:[%s5985_s16 + $0x48] sm:$0xff]   ;;  %v5755_v12 = vld [vmem:[%s5985_s16 + $0x50] sm:$0xff]   ;;  %v5756_v13 = vld [vmem:[%s5985_s16 + $0x58] sm:$0xff]  }
  0x14   : > { %v5757_v14 = vld [vmem:[%s5985_s16 + $0x60] sm:$0xff]   ;;  %v5758_v15 = vld [vmem:[%s5985_s16 + $0x68] sm:$0xff]   ;;  %v5759_v16 = vld [vmem:[%s5985_s16 + $0x70] sm:$0xff]  }
  0x15   : > { %v5760_v17 = vld [vmem:[%s5985_s16 + $0x78] sm:$0xff]  }
  0x1a   : > { %5117 = vmatmul.mubr.msk.bf16.gmra.mrb[4].mxu0 %vm447_vm1, %v5748_v5 }
  0x1b   : > { %5120 = vmatprep.mubr.msk.bf16.mxu0 %vm447_vm1, %v5749_v6 }
  0x22   : > { %5121 = vmatmul.mubr.msk.bf16.gmra.mrb[8].mxu0 %vm447_vm1, %v5750_v7 }
  0x23   : > { %5124 = vmatprep.mubr.msk.bf16.mxu0 %vm447_vm1, %v5751_v8 }
  0x2a   : > { %5125 = vmatmul.mubr.msk.bf16.gmra.mrb[12].mxu0 %vm447_vm1, %v5752_v9 }
  0x2b   : > { %5128 = vmatprep.mubr.msk.bf16.mxu0 %vm447_vm1, %v5753_v10 }
  0x32   : > { %5129 = vmatmul.mubr.msk.bf16.gmra.mrb[16].mxu0 %vm447_vm1, %v5754_v11 }
  0x33   : > { %5132 = vmatprep.mubr.msk.bf16.mxu0 %vm447_vm1, %v5755_v12 }
  0x3a   : > { %5133 = vmatmul.mubr.msk.bf16.gmra.mrb[20].mxu0 %vm447_vm1, %v5756_v13 }
  0x3b   : > { %5136 = vmatprep.mubr.msk.bf16.mxu0 %vm447_vm1, %v5757_v14 }
  0x42   : > { %5137 = vmatmul.mubr.msk.bf16.gmra.mrb[24].mxu0 %vm447_vm1, %v5758_v15 }
  0x43   : > { %5140 = vmatprep.mubr.msk.bf16.mxu0 %vm447_vm1, %v5759_v16 }
  0x4a   : > { %5141 = vmatmul.mubr.msk.bf16.gmra.mrb[28].mxu0 %vm447_vm1, %v5760_v17 }
  0xe5   : > { %v6019_v18 = vpop.f32.mrb[0].mxu0 }
  0xe6   : > { %v6021_v19 = vpop.f32.mrb[1].mxu0  ;;  %v668_v20 = vsel %vm661_vm2, %v6019_v18, 0.0 }
  0xe7   : > { %669 = vadd.xlane.f32.xlu1 %v668_v20  ;;  %v6025_v21 = vpop.f32.mrb[2].mxu0  ;;  %v662_v22 = vsel %vm661_vm2, %v6021_v19, 0.0  ;;  %v5916_v20 = vmov 0.0  }
  0xe8   : > { %663 = vadd.xlane.f32.xlu0 %v662_v22  ;;  %v6029_v23 = vpop.f32.mrb[3].mxu0  ;;  %v671_v24 = vsel %vm661_vm2, %v6025_v21, 0.0  ;;  %1191 = vst.msk [vmem:[#allocation2 + $0x108] sm:$0xff] %vm661_vm2, %v5916_v20  ;;  %1186 = vst.msk [vmem:[#allocation2 + $0xe0] sm:$0xff] %vm661_vm2, %v5916_v20 }
  0xe9   : > { %v665_v25 = vsel %vm661_vm2, %v6029_v23, 0.0  ;;  %1187 = vst.msk [vmem:[#allocation2 + $0xe8] sm:$0xff] %vm661_vm2, %v5916_v20  ;;  %1188 = vst.msk [vmem:[#allocation2 + $0xf0] sm:$0xff] %vm661_vm2, %v5916_v20 }
  0xea   : > { %1190 = vst.msk [vmem:[#allocation2 + $0x100] sm:$0xff] %vm661_vm2, %v5916_v20  ;;  %1192 = vst.msk [vmem:[#allocation2 + $0x110] sm:$0xff] %vm661_vm2, %v5916_v20 }
  0xeb   : > { %672 = vadd.xlane.f32.xlu1 %v671_v24  ;;  %1194 = vst.msk [vmem:[#allocation2 + $0x120] sm:$0xff] %vm661_vm2, %v5916_v20  ;;  %1195 = vst.msk [vmem:[#allocation2 + $0x128] sm:$0xff] %vm661_vm2, %v5916_v20 }
  0xec   : > { %666 = vadd.xlane.f32.xlu0 %v665_v25  ;;  %1196 = vst.msk [vmem:[#allocation2 + $0x130] sm:$0xff] %vm661_vm2, %v5916_v20  ;;  %1198 = vst.msk [vmem:[#allocation2 + $0x140] sm:$0xff] %vm661_vm2, %v5916_v20 }
  0xed   : > { %v6035_v26 = vpop.f32.mrb[4].mxu0  ;;  %1199 = vst.msk [vmem:[#allocation2 + $0x148] sm:$0xff] %vm661_vm2, %v5916_v20  ;;  %1200 = vst.msk [vmem:[#allocation2 + $0x150] sm:$0xff] %vm661_vm2, %v5916_v20 }
  0xee   : > { %v6037_v27 = vpop.f32.mrb[5].mxu0  ;;  %v680_v32 = vsel %vm661_vm2, %v6035_v26, 0.0  ;;  %1202 = vst.msk [vmem:[#allocation2 + $0x160] sm:$0xff] %vm661_vm2, %v5916_v20  ;;  %1203 = vst.msk [vmem:[#allocation2 + $0x168] sm:$0xff] %vm661_vm2, %v5916_v20 }
  0xef   : > { %v6039_v28 = vpop.f32.mrb[6].mxu0  ;;  %v674_v29 = vsel %vm661_vm2, %v6037_v27, 0.0  ;;  %1204 = vst.msk [vmem:[#allocation2 + $0x170] sm:$0xff] %vm661_vm2, %v5916_v20  ;;  %1206 = vst.msk [vmem:[#allocation2 + $0x180] sm:$0xff] %vm661_vm2, %v5916_v20 }
  0xf0   : > { %675 = vadd.xlane.f32.xlu0 %v674_v29  ;;  %v6043_v30 = vpop.f32.mrb[7].mxu0  ;;  %v683_v34 = vsel %vm661_vm2, %v6039_v28, 0.0  ;;  %1207 = vst.msk [vmem:[#allocation2 + $0x188] sm:$0xff] %vm661_vm2, %v5916_v20  ;;  %1208 = vst.msk [vmem:[#allocation2 + $0x190] sm:$0xff] %vm661_vm2, %v5916_v20 }
  0xf1   : > { %v677_v31 = vsel %vm661_vm2, %v6043_v30, 0.0  ;;  %1210 = vst.msk [vmem:[#allocation2 + $0x1a0] sm:$0xff] %vm661_vm2, %v5916_v20  ;;  %1211 = vst.msk [vmem:[#allocation2 + $0x1a8] sm:$0xff] %vm661_vm2, %v5916_v20 }
  0xf2   : > { %678 = vadd.xlane.f32.xlu1 %v677_v31  ;;  %1212 = vst.msk [vmem:[#allocation2 + $0x1b0] sm:$0xff] %vm661_vm2, %v5916_v20  ;;  %1214 = vst.msk [vmem:[#allocation2 + $0x1c0] sm:$0xff] %vm661_vm2, %v5916_v20 }
  0xf3   : > { %1215 = vst.msk [vmem:[#allocation2 + $0x1c8] sm:$0xff] %vm661_vm2, %v5916_v20  ;;  %1216 = vst.msk [vmem:[#allocation2 + $0x1d0] sm:$0xff] %vm661_vm2, %v5916_v20 }
  0xf4   : > { %681 = vadd.xlane.f32.xlu0 %v680_v32  ;;  %1218 = vst.msk [vmem:[#allocation2 + $0x1e0] sm:$0xff] %vm661_vm2, %v5916_v20  ;;  %1219 = vst.msk [vmem:[#allocation2 + $0x1e8] sm:$0xff] %vm661_vm2, %v5916_v20 }
  0xf5   : > { %v6049_v33 = vpop.f32.mrb[8].mxu0  ;;  %1220 = vst.msk [vmem:[#allocation2 + $0x1f0] sm:$0xff] %vm661_vm2, %v5916_v20  ;;  %1222 = vst.msk [vmem:[#allocation2 + $0x200] sm:$0xff] %vm661_vm2, %v5916_v20 }
  0xf6   : > { %684 = vadd.xlane.f32.xlu1 %v683_v34  ;;  %v6053_v35 = vpop.f32.mrb[9].mxu0  ;;  %v692_v40 = vsel %vm661_vm2, %v6049_v33, 0.0  ;;  %1223 = vst.msk [vmem:[#allocation2 + $0x208] sm:$0xff] %vm661_vm2, %v5916_v20  ;;  %1224 = vst.msk [vmem:[#allocation2 + $0x210] sm:$0xff] %vm661_vm2, %v5916_v20 }
  0xf7   : > { %v6055_v36 = vpop.f32.mrb[10].mxu0  ;;  %v686_v37 = vsel %vm661_vm2, %v6053_v35, 0.0  ;;  %1226 = vst.msk [vmem:[#allocation2 + $0x220] sm:$0xff] %vm661_vm2, %v5916_v20  ;;  %1227 = vst.msk [vmem:[#allocation2 + $0x228] sm:$0xff] %vm661_vm2, %v5916_v20 }
  0xf8   : > { %687 = vadd.xlane.f32.xlu0 %v686_v37  ;;  %v6059_v38 = vpop.f32.mrb[11].mxu0  ;;  %v695_v42 = vsel %vm661_vm2, %v6055_v36, 0.0  ;;  %1228 = vst.msk [vmem:[#allocation2 + $0x230] sm:$0xff] %vm661_vm2, %v5916_v20  ;;  %1230 = vst.msk [vmem:[#allocation2 + $0x240] sm:$0xff] %vm661_vm2, %v5916_v20 }
  0xf9   : > { %v689_v39 = vsel %vm661_vm2, %v6059_v38, 0.0  ;;  %1231 = vst.msk [vmem:[#allocation2 + $0x248] sm:$0xff] %vm661_vm2, %v5916_v20  ;;  %1232 = vst.msk [vmem:[#allocation2 + $0x250] sm:$0xff] %vm661_vm2, %v5916_v20 }
  0xfa   : > { %690 = vadd.xlane.f32.xlu1 %v689_v39  ;;  %1234 = vst.msk [vmem:[#allocation2 + $0x260] sm:$0xff] %vm661_vm2, %v5916_v20  ;;  %1235 = vst.msk [vmem:[#allocation2 + $0x268] sm:$0xff] %vm661_vm2, %v5916_v20 }
  0xfb   : > { %1236 = vst.msk [vmem:[#allocation2 + $0x270] sm:$0xff] %vm661_vm2, %v5916_v20  ;;  %1238 = vst.msk [vmem:[#allocation2 + $0x280] sm:$0xff] %vm661_vm2, %v5916_v20 }
  0xfc   : > { %693 = vadd.xlane.f32.xlu0 %v692_v40  ;;  %1239 = vst.msk [vmem:[#allocation2 + $0x288] sm:$0xff] %vm661_vm2, %v5916_v20  ;;  %1240 = vst.msk [vmem:[#allocation2 + $0x290] sm:$0xff] %vm661_vm2, %v5916_v20 }
  0xfd   : > { %v6065_v41 = vpop.f32.mrb[12].mxu0  ;;  %1242 = vst.msk [vmem:[#allocation2 + $0x2a0] sm:$0xff] %vm661_vm2, %v5916_v20  ;;  %1243 = vst.msk [vmem:[#allocation2 + $0x2a8] sm:$0xff] %vm661_vm2, %v5916_v20 }
  0xfe   : > { %696 = vadd.xlane.f32.xlu1 %v695_v42  ;;  %v6069_v43 = vpop.f32.mrb[13].mxu0  ;;  %v704_v48 = vsel %vm661_vm2, %v6065_v41, 0.0  ;;  %1244 = vst.msk [vmem:[#allocation2 + $0x2b0] sm:$0xff] %vm661_vm2, %v5916_v20  ;;  %1246 = vst.msk [vmem:[#allocation2 + $0x2c0] sm:$0xff] %vm661_vm2, %v5916_v20 }
  0xff   : > { %v6071_v44 = vpop.f32.mrb[14].mxu0  ;;  %v698_v45 = vsel %vm661_vm2, %v6069_v43, 0.0  ;;  %1247 = vst.msk [vmem:[#allocation2 + $0x2c8] sm:$0xff] %vm661_vm2, %v5916_v20  ;;  %1248 = vst.msk [vmem:[#allocation2 + $0x2d0] sm:$0xff] %vm661_vm2, %v5916_v20 }
 0x100   : > { %699 = vadd.xlane.f32.xlu0 %v698_v45  ;;  %v6075_v46 = vpop.f32.mrb[15].mxu0  ;;  %v707_v50 = vsel %vm661_vm2, %v6071_v44, 0.0  ;;  %1250 = vst.msk [vmem:[#allocation2 + $0x2e0] sm:$0xff] %vm661_vm2, %v5916_v20  ;;  %1251 = vst.msk [vmem:[#allocation2 + $0x2e8] sm:$0xff] %vm661_vm2, %v5916_v20 }
 0x101   : > { %v701_v47 = vsel %vm661_vm2, %v6075_v46, 0.0  ;;  %1252 = vst.msk [vmem:[#allocation2 + $0x2f0] sm:$0xff] %vm661_vm2, %v5916_v20  ;;  %1254 = vst.msk [vmem:[#allocation2 + $0x300] sm:$0xff] %vm661_vm2, %v5916_v20 }
 0x102   : > { %702 = vadd.xlane.f32.xlu1 %v701_v47  ;;  %1255 = vst.msk [vmem:[#allocation2 + $0x308] sm:$0xff] %vm661_vm2, %v5916_v20  ;;  %1256 = vst.msk [vmem:[#allocation2 + $0x310] sm:$0xff] %vm661_vm2, %v5916_v20 }
 0x103   : > { %1193 = vst.msk [vmem:[#allocation2 + $0x118] sm:$0x1] %vm1160_vm3, %v5916_v20  ;;  %1189 = vst.msk [vmem:[#allocation2 + $0xf8] sm:$0x1] %vm1160_vm3, %v5916_v20 }
 0x104   : > { %705 = vadd.xlane.f32.xlu0 %v704_v48  ;;  %1197 = vst.msk [vmem:[#allocation2 + $0x138] sm:$0x1] %vm1160_vm3, %v5916_v20  ;;  %1201 = vst.msk [vmem:[#allocation2 + $0x158] sm:$0x1] %vm1160_vm3, %v5916_v20 }
 0x105   : > { %v6081_v49 = vpop.f32.mrb[16].mxu0  ;;  %1205 = vst.msk [vmem:[#allocation2 + $0x178] sm:$0x1] %vm1160_vm3, %v5916_v20  ;;  %1209 = vst.msk [vmem:[#allocation2 + $0x198] sm:$0x1] %vm1160_vm3, %v5916_v20 }
 0x106   : > { %708 = vadd.xlane.f32.xlu1 %v707_v50  ;;  %v6085_v51 = vpop.f32.mrb[17].mxu0  ;;  %v716_v56 = vsel %vm661_vm2, %v6081_v49, 0.0  ;;  %1213 = vst.msk [vmem:[#allocation2 + $0x1b8] sm:$0x1] %vm1160_vm3, %v5916_v20  ;;  %1217 = vst.msk [vmem:[#allocation2 + $0x1d8] sm:$0x1] %vm1160_vm3, %v5916_v20 }
 0x107   : > { %v6087_v52 = vpop.f32.mrb[18].mxu0  ;;  %v710_v53 = vsel %vm661_vm2, %v6085_v51, 0.0  ;;  %1221 = vst.msk [vmem:[#allocation2 + $0x1f8] sm:$0x1] %vm1160_vm3, %v5916_v20  ;;  %1225 = vst.msk [vmem:[#allocation2 + $0x218] sm:$0x1] %vm1160_vm3, %v5916_v20 }
 0x108   : > { %711 = vadd.xlane.f32.xlu0 %v710_v53  ;;  %v6091_v54 = vpop.f32.mrb[19].mxu0  ;;  %v719_v58 = vsel %vm661_vm2, %v6087_v52, 0.0  ;;  %1229 = vst.msk [vmem:[#allocation2 + $0x238] sm:$0x1] %vm1160_vm3, %v5916_v20  ;;  %1233 = vst.msk [vmem:[#allocation2 + $0x258] sm:$0x1] %vm1160_vm3, %v5916_v20 }
 0x109   : > { %v713_v55 = vsel %vm661_vm2, %v6091_v54, 0.0  ;;  %1237 = vst.msk [vmem:[#allocation2 + $0x278] sm:$0x1] %vm1160_vm3, %v5916_v20  ;;  %1241 = vst.msk [vmem:[#allocation2 + $0x298] sm:$0x1] %vm1160_vm3, %v5916_v20 }
 0x10a   : > { %714 = vadd.xlane.f32.xlu1 %v713_v55  ;;  %1245 = vst.msk [vmem:[#allocation2 + $0x2b8] sm:$0x1] %vm1160_vm3, %v5916_v20  ;;  %1249 = vst.msk [vmem:[#allocation2 + $0x2d8] sm:$0x1] %vm1160_vm3, %v5916_v20 }
 0x10b   : > { %1253 = vst.msk [vmem:[#allocation2 + $0x2f8] sm:$0x1] %vm1160_vm3, %v5916_v20  ;;  %1257 = vst.msk [vmem:[#allocation2 + $0x318] sm:$0x1] %vm1160_vm3, %v5916_v20  ;;  %v5762_v20 = vld [vmem:[%s7550_s4 + $0x18] sm:$0xff]  }
 0x10c   : > { %717 = vadd.xlane.f32.xlu0 %v716_v56 }
 0x10d   : > { %v6097_v57 = vpop.f32.mrb[20].mxu0 }
 0x10e   : > { %720 = vadd.xlane.f32.xlu1 %v719_v58  ;;  %v6101_v59 = vpop.f32.mrb[21].mxu0  ;;  %v728_v0 = vsel %vm661_vm2, %v6097_v57, 0.0 }
 0x10f   : > { %v6103_v60 = vpop.f32.mrb[22].mxu0  ;;  %v722_v61 = vsel %vm661_vm2, %v6101_v59, 0.0 }
 0x110   : > { %723 = vadd.xlane.f32.xlu0 %v722_v61  ;;  %v6107_v62 = vpop.f32.mrb[23].mxu0  ;;  %v731_v2 = vsel %vm661_vm2, %v6103_v60, 0.0 }
 0x111   : > { %v725_v63 = vsel %vm661_vm2, %v6107_v62, 0.0 }
 0x112   : > { %726 = vadd.xlane.f32.xlu1 %v725_v63 }
 0x114   : > { %729 = vadd.xlane.f32.xlu0 %v728_v0 }
 0x115   : > { %v6113_v1 = vpop.f32.mrb[24].mxu0 }
 0x116   : > { %732 = vadd.xlane.f32.xlu1 %v731_v2  ;;  %v6117_v3 = vpop.f32.mrb[25].mxu0  ;;  %v740_v8 = vsel %vm661_vm2, %v6113_v1, 0.0 }
 0x117   : > { %v6119_v4 = vpop.f32.mrb[26].mxu0  ;;  %v734_v5 = vsel %vm661_vm2, %v6117_v3, 0.0 }
 0x118   : > { %735 = vadd.xlane.f32.xlu0 %v734_v5  ;;  %v6123_v6 = vpop.f32.mrb[27].mxu0  ;;  %v743_v10 = vsel %vm661_vm2, %v6119_v4, 0.0 }
 0x119   : > { %v737_v7 = vsel %vm661_vm2, %v6123_v6, 0.0 }
 0x11a   : > { %738 = vadd.xlane.f32.xlu1 %v737_v7 }
 0x11c   : > { %741 = vadd.xlane.f32.xlu0 %v740_v8 }
 0x11d   : > { %v6129_v9 = vpop.f32.mrb[28].mxu0 }
 0x11e   : > { %744 = vadd.xlane.f32.xlu1 %v743_v10  ;;  %v6133_v11 = vpop.f32.mrb[29].mxu0  ;;  %v752_v16 = vsel %vm661_vm2, %v6129_v9, 0.0 }
 0x11f   : > { %v6135_v12 = vpop.f32.mrb[30].mxu0  ;;  %v746_v13 = vsel %vm661_vm2, %v6133_v11, 0.0 }
 0x120   : > { %747 = vadd.xlane.f32.xlu0 %v746_v13  ;;  %v6139_v14 = vpop.f32.mrb[31].mxu0  ;;  %v755_v17 = vsel %vm661_vm2, %v6135_v12, 0.0 }
 0x121   : > { %v749_v15 = vsel %vm661_vm2, %v6139_v14, 0.0 }
 0x122   : > { %750 = vadd.xlane.f32.xlu1 %v749_v15 }
 0x124   : > { %753 = vadd.xlane.f32.xlu0 %v752_v16 }
 0x126   : > { %756 = vadd.xlane.f32.xlu1 %v755_v17 }
 0x174   : > { %v670_v22 = vpop.xlane.xlu1 %669 }
 0x175   : > { %v761_v24 = vmul.f32 0.03125, %v670_v22  ;;  %v664_v25 = vpop.xlane.xlu0 %663 }
 0x176   : > { %v759_v29 = vmul.f32 0.03125, %v664_v25 }
 0x177   : > { %v6256_v31 = vsub.f32 %v6019_v18, %v761_v24 }
 0x178   : > { %v6259_v32 = vsub.f32 %v6021_v19, %v759_v29  ;;  %v673_v34 = vpop.xlane.xlu1 %672 }
 0x179   : > { %v762_v37 = vmul.f32 0.03125, %v673_v34  ;;  %v667_v39 = vpop.xlane.xlu0 %666  ;;  %v825_v18 = vmul.f32 %v6256_v31, %v6256_v31 }
 0x17a   : > { %v760_v40 = vmul.f32 0.03125, %v667_v39  ;;  %v823_v42 = vmul.f32 %v6259_v32, %v6259_v32 }
 0x17b   : > { %v6264_v45 = vsub.f32 %v6025_v21, %v762_v37  ;;  %v861_v58 = vsel %vm661_vm2, %v825_v18, 0.0 }
 0x17c   : > { %v6267_v47 = vsub.f32 %v6029_v23, %v760_v40  ;;  %v855_v48 = vsel %vm661_vm2, %v823_v42, 0.0 }
 0x17d   : > { %v676_v19 = vpop.xlane.xlu0 %675  ;;  %856 = vadd.xlane.f32.xlu0 %v855_v48  ;;  %v826_v56 = vmul.f32 %v6264_v45, %v6264_v45 }
 0x17e   : > { %v763_v50 = vmul.f32 0.03125, %v676_v19  ;;  %v824_v53 = vmul.f32 %v6267_v47, %v6267_v47 }
 0x17f   : > { %v679_v55 = vpop.xlane.xlu1 %678  ;;  %v864_v8 = vsel %vm661_vm2, %v826_v56, 0.0 }
 0x180   : > { %v6277_v21 = vsub.f32 %v6037_v27, %v763_v50  ;;  %v764_v23 = vmul.f32 0.03125, %v679_v55  ;;  %v858_v61 = vsel %vm661_vm2, %v824_v53, 0.0 }
 0x181   : > { %v682_v63 = vpop.xlane.xlu0 %681  ;;  %862 = vadd.xlane.f32.xlu0 %v861_v58  ;;  %859 = vadd.xlane.f32.xlu1 %v858_v61 }
 0x182   : > { %v6282_v0 = vsub.f32 %v6043_v30, %v764_v23  ;;  %v765_v2 = vmul.f32 0.03125, %v682_v63  ;;  %v827_v5 = vmul.f32 %v6277_v21, %v6277_v21 }
 0x183   : > { %v685_v7 = vpop.xlane.xlu1 %684 }
 0x184   : > { %v6288_v27 = vsub.f32 %v6035_v26, %v765_v2  ;;  %v766_v10 = vmul.f32 0.03125, %v685_v7  ;;  %v867_v13 = vsel %vm661_vm2, %v827_v5, 0.0  ;;  %v828_v15 = vmul.f32 %v6282_v0, %v6282_v0 }
 0x185   : > { %v688_v16 = vpop.xlane.xlu0 %687  ;;  %868 = vadd.xlane.f32.xlu0 %v867_v13  ;;  %865 = vadd.xlane.f32.xlu1 %v864_v8 }
 0x186   : > { %v6294_v30 = vsub.f32 %v6039_v28, %v766_v10  ;;  %v767_v17 = vmul.f32 0.03125, %v688_v16  ;;  %v829_v22 = vmul.f32 %v6288_v27, %v6288_v27  ;;  %v870_v26 = vsel %vm661_vm2, %v828_v15, 0.0 }
 0x187   : > { %v691_v24 = vpop.xlane.xlu1 %690 }
 0x188   : > { %v6300_v25 = vsub.f32 %v6053_v35, %v767_v17  ;;  %v768_v29 = vmul.f32 0.03125, %v691_v24  ;;  %v873_v34 = vsel %vm661_vm2, %v829_v22, 0.0  ;;  %v830_v37 = vmul.f32 %v6294_v30, %v6294_v30 }
 0x189   : > { %v694_v39 = vpop.xlane.xlu0 %693  ;;  %874 = vadd.xlane.f32.xlu0 %v873_v34  ;;  %871 = vadd.xlane.f32.xlu1 %v870_v26 }
 0x18a   : > { %v6306_v28 = vsub.f32 %v6059_v38, %v768_v29  ;;  %v769_v40 = vmul.f32 0.03125, %v694_v39  ;;  %v831_v42 = vmul.f32 %v6300_v25, %v6300_v25  ;;  %v876_v35 = vsel %vm661_vm2, %v830_v37, 0.0 }
 0x18b   : > { %v697_v48 = vpop.xlane.xlu1 %696 }
 0x18c   : > { %v6312_v18 = vsub.f32 %v6049_v33, %v769_v40  ;;  %v770_v19 = vmul.f32 0.03125, %v697_v48  ;;  %v879_v50 = vsel %vm661_vm2, %v831_v42, 0.0  ;;  %v832_v53 = vmul.f32 %v6306_v28, %v6306_v28 }
 0x18d   : > { %v700_v55 = vpop.xlane.xlu0 %699  ;;  %880 = vadd.xlane.f32.xlu0 %v879_v50  ;;  %877 = vadd.xlane.f32.xlu1 %v876_v35 }
 0x18e   : > { %v6318_v38 = vsub.f32 %v6055_v36, %v770_v19  ;;  %v771_v56 = vmul.f32 0.03125, %v700_v55  ;;  %v833_v23 = vmul.f32 %v6312_v18, %v6312_v18  ;;  %v882_v33 = vsel %vm661_vm2, %v832_v53, 0.0 }
 0x18f   : > { %v703_v58 = vpop.xlane.xlu1 %702 }
 0x190   : > { %v6324_v61 = vsub.f32 %v6069_v43, %v771_v56  ;;  %v772_v63 = vmul.f32 0.03125, %v703_v58  ;;  %v885_v2 = vsel %vm661_vm2, %v833_v23, 0.0  ;;  %v834_v5 = vmul.f32 %v6318_v38, %v6318_v38 }
 0x191   : > { %v706_v7 = vpop.xlane.xlu0 %705  ;;  %886 = vadd.xlane.f32.xlu0 %v885_v2  ;;  %883 = vadd.xlane.f32.xlu1 %v882_v33 }
 0x192   : > { %v6330_v36 = vsub.f32 %v6075_v46, %v772_v63  ;;  %v773_v8 = vmul.f32 0.03125, %v706_v7  ;;  %v835_v10 = vmul.f32 %v6324_v61, %v6324_v61  ;;  %v888_v43 = vsel %vm661_vm2, %v834_v5, 0.0 }
 0x193   : > { %v709_v13 = vpop.xlane.xlu1 %708 }
 0x194   : > { %v6336_v15 = vsub.f32 %v6065_v41, %v773_v8  ;;  %v774_v16 = vmul.f32 0.03125, %v709_v13  ;;  %v891_v17 = vsel %vm661_vm2, %v835_v10, 0.0  ;;  %v836_v22 = vmul.f32 %v6330_v36, %v6330_v36 }
 0x195   : > { %v712_v24 = vpop.xlane.xlu0 %711  ;;  %892 = vadd.xlane.f32.xlu0 %v891_v17  ;;  %889 = vadd.xlane.f32.xlu1 %v888_v43 }
 0x196   : > { %v6342_v46 = vsub.f32 %v6071_v44, %v774_v16  ;;  %v775_v26 = vmul.f32 0.03125, %v712_v24  ;;  %v837_v29 = vmul.f32 %v6336_v15, %v6336_v15  ;;  %v894_v41 = vsel %vm661_vm2, %v836_v22, 0.0 }
 0x197   : > { %v715_v34 = vpop.xlane.xlu1 %714 }
 0x198   : > { %v6348_v37 = vsub.f32 %v6085_v51, %v775_v26  ;;  %v776_v39 = vmul.f32 0.03125, %v715_v34  ;;  %v897_v40 = vsel %vm661_vm2, %v837_v29, 0.0  ;;  %v838_v42 = vmul.f32 %v6342_v46, %v6342_v46 }
 0x199   : > { %v718_v48 = vpop.xlane.xlu0 %717  ;;  %898 = vadd.xlane.f32.xlu0 %v897_v40  ;;  %895 = vadd.xlane.f32.xlu1 %v894_v41 }
 0x19a   : > { %v6354_v44 = vsub.f32 %v6091_v54, %v776_v39  ;;  %v777_v35 = vmul.f32 0.03125, %v718_v48  ;;  %v839_v19 = vmul.f32 %v6348_v37, %v6348_v37  ;;  %v900_v51 = vsel %vm661_vm2, %v838_v42, 0.0 }
 0x19b   : > { %v721_v50 = vpop.xlane.xlu1 %720 }
 0x19c   : > { %v6360_v53 = vsub.f32 %v6081_v49, %v777_v35  ;;  %v778_v55 = vmul.f32 0.03125, %v721_v50  ;;  %v903_v56 = vsel %vm661_vm2, %v839_v19, 0.0  ;;  %v840_v23 = vmul.f32 %v6354_v44, %v6354_v44 }
 0x19d   : > { %v724_v58 = vpop.xlane.xlu0 %723  ;;  %904 = vadd.xlane.f32.xlu0 %v903_v56  ;;  %901 = vadd.xlane.f32.xlu1 %v900_v51  ;;  %v5763_v51 = vld [vmem:[%s7550_s4 + $0x40] sm:$0xff]  }
 0x19e   : > { %v6366_v54 = vsub.f32 %v6087_v52, %v778_v55  ;;  %v779_v33 = vmul.f32 0.03125, %v724_v58  ;;  %v841_v63 = vmul.f32 %v6360_v53, %v6360_v53  ;;  %v906_v49 = vsel %vm661_vm2, %v840_v23, 0.0  ;;  %5288 = vmatprep.subr.bf16.mxu1 %v5763_v51 }
 0x19f   : > { %v727_v2 = vpop.xlane.xlu1 %726  ;;  %5289 = vmatpush3.bf16.msra.mxu1 %v5763_v51 }
 0x1a0   : > { %v6372_v5 = vsub.f32 %v6101_v59, %v779_v33  ;;  %v780_v7 = vmul.f32 0.03125, %v727_v2  ;;  %v909_v8 = vsel %vm661_vm2, %v841_v63, 0.0  ;;  %v842_v10 = vmul.f32 %v6366_v54, %v6366_v54  ;;  %v1344_v33 = vld [vmem:[#allocation2 + $0xe8] sm:$0xff]  ;;  %v1345_v63 = vld [vmem:[#allocation2 + $0xf0] sm:$0xff] }
 0x1a1   : > { %v730_v13 = vpop.xlane.xlu0 %729  ;;  %910 = vadd.xlane.f32.xlu0 %v909_v8  ;;  %907 = vadd.xlane.f32.xlu1 %v906_v49 }
 0x1a2   : > { %v6378_v52 = vsub.f32 %v6107_v62, %v780_v7  ;;  %v781_v43 = vmul.f32 0.03125, %v730_v13  ;;  %v843_v16 = vmul.f32 %v6372_v5, %v6372_v5  ;;  %v912_v59 = vsel %vm661_vm2, %v842_v10, 0.0  ;;  %v5761_v62 = vld [vmem:[%s7550_s4 + $0x10] sm:$0xff]   ;;  %v5764_v13 = vld [vmem:[%s7550_s4 + $0x48] sm:$0xff]  }
 0x1a3   : > { %v733_v17 = vpop.xlane.xlu1 %732  ;;  %5144 = vmatprep.subr.bf16.mxu0 %v5761_v62  ;;  %v1381_v10 = vpack.c.bf16 %v1345_v63, %v1344_v33  ;;  %5290 = vmatprep.subr.bf16.mxu1 %v5764_v13 }
 0x1a4   : > { %v6384_v22 = vsub.f32 %v6097_v57, %v781_v43  ;;  %v782_v24 = vmul.f32 0.03125, %v733_v17  ;;  %v915_v26 = vsel %vm661_vm2, %v843_v16, 0.0  ;;  %v844_v29 = vmul.f32 %v6378_v52, %v6378_v52  ;;  %5145 = vmatpush3.bf16.msra.mxu0 %v5761_v62  ;;  %5291 = vmatpush3.bf16.msra.mxu1 %v5764_v13 }
 0x1a5   : > { %v736_v34 = vpop.xlane.xlu0 %735  ;;  %916 = vadd.xlane.f32.xlu0 %v915_v26  ;;  %913 = vadd.xlane.f32.xlu1 %v912_v59 }
 0x1a6   : > { %v6393_v41 = vsub.f32 %v6103_v60, %v782_v24  ;;  %v783_v39 = vmul.f32 0.03125, %v736_v34  ;;  %v845_v57 = vmul.f32 %v6384_v22, %v6384_v22  ;;  %v918_v40 = vsel %vm661_vm2, %v844_v29, 0.0  ;;  %5146 = vmatprep.subr.bf16.mxu0 %v5762_v20  ;;  %5148 = vmatprep.mubr.msk.bf16.mxu0 %vm661_vm2, %v1381_v10 }
 0x1a7   : > { %v739_v60 = vpop.xlane.xlu1 %738 }
 0x1a8   : > { %v6435_v42 = vsub.f32 %v6117_v3, %v783_v39  ;;  %v784_v48 = vmul.f32 0.03125, %v739_v60  ;;  %v921_v35 = vsel %vm661_vm2, %v845_v57, 0.0  ;;  %v846_v19 = vmul.f32 %v6393_v41, %v6393_v41  ;;  %5147 = vmatpush3.bf16.msra.mxu0 %v5762_v20 }
 0x1a9   : > { %v742_v50 = vpop.xlane.xlu0 %741  ;;  %922 = vadd.xlane.f32.xlu0 %v921_v35  ;;  %919 = vadd.xlane.f32.xlu1 %v918_v40 }
 0x1aa   : > { %v6447_v3 = vsub.f32 %v6123_v6, %v784_v48  ;;  %v785_v55 = vmul.f32 0.03125, %v742_v50  ;;  %v847_v56 = vmul.f32 %v6435_v42, %v6435_v42  ;;  %v924_v58 = vsel %vm661_vm2, %v846_v19, 0.0 }
 0x1ab   : > { %v745_v23 = vpop.xlane.xlu1 %744 }
 0x1ac   : > { %v6453_v2 = vsub.f32 %v6113_v1, %v785_v55  ;;  %v786_v49 = vmul.f32 0.03125, %v745_v23  ;;  %v927_v7 = vsel %vm661_vm2, %v847_v56, 0.0  ;;  %v848_v6 = vmul.f32 %v6447_v3, %v6447_v3  ;;  %v6505_v56 = vld [vmem:[%s7550_s4] sm:$0xff]  }
 0x1ad   : > { %928 = vadd.xlane.f32.xlu0 %v927_v7  ;;  %v748_v8 = vpop.xlane.xlu0 %747  ;;  %925 = vadd.xlane.f32.xlu1 %v924_v58 }
 0x1ae   : > { %v6462_v43 = vsub.f32 %v6119_v4, %v786_v49  ;;  %v787_v1 = vmul.f32 0.03125, %v748_v8  ;;  %v849_v16 = vmul.f32 %v6453_v2, %v6453_v2  ;;  %v930_v59 = vsel %vm661_vm2, %v848_v6, 0.0  ;;  %5180 = vmatprep.subr.bf16.mxu0 %v6505_v56 }
 0x1af   : > { %v751_v17 = vpop.xlane.xlu1 %750 }
 0x1b0   : > { %v6469_v24 = vsub.f32 %v6133_v11, %v787_v1  ;;  %v788_v26 = vmul.f32 0.03125, %v751_v17  ;;  %v933_v29 = vsel %vm661_vm2, %v849_v16, 0.0  ;;  %v850_v4 = vmul.f32 %v6462_v43, %v6462_v43 }
 0x1b1   : > { %934 = vadd.xlane.f32.xlu0 %v933_v29  ;;  %v754_v34 = vpop.xlane.xlu0 %753  ;;  %931 = vadd.xlane.f32.xlu1 %v930_v59 }
 0x1b2   : > { %v6475_v62 = vsub.f32 %v6139_v14, %v788_v26  ;;  %v789_v39 = vmul.f32 0.03125, %v754_v34  ;;  %v851_v57 = vmul.f32 %v6469_v24, %v6469_v24  ;;  %v936_v11 = vsel %vm661_vm2, %v850_v4, 0.0 }
 0x1b3   : > { %v757_v60 = vpop.xlane.xlu1 %756 }
 0x1b4   : > { %v6481_v40 = vsub.f32 %v6129_v9, %v789_v39  ;;  %v790_v48 = vmul.f32 0.03125, %v757_v60  ;;  %v939_v35 = vsel %vm661_vm2, %v851_v57, 0.0  ;;  %v852_v19 = vmul.f32 %v6475_v62, %v6475_v62  ;;  %v6511_v60 = vld [vmem:[%s7548_s2] ss:$0 sm:$0xff] }
 0x1b5   : > { %940 = vadd.xlane.f32.xlu0 %v939_v35  ;;  %937 = vadd.xlane.f32.xlu1 %v936_v11 }
 0x1b6   : > { %v6487_v14 = vsub.f32 %v6135_v12, %v790_v48  ;;  %v853_v50 = vmul.f32 %v6481_v40, %v6481_v40  ;;  %v942_v51 = vsel %vm661_vm2, %v852_v19, 0.0  ;;  %v6499_v12 = vld [vmem:[%s7550_s4 + $0x50] sm:$0xff]  }
 0x1b7   : > { %5324 = vmatprep.subr.bf16.mxu1 %v6499_v12 }
 0x1b8   : > { %v945_v20 = vsel %vm661_vm2, %v853_v50, 0.0  ;;  %v854_v9 = vmul.f32 %v6487_v14, %v6487_v14 }
 0x1b9   : > { %946 = vadd.xlane.f32.xlu0 %v945_v20  ;;  %943 = vadd.xlane.f32.xlu1 %v942_v51  ;;  %v6517_v20 = vld [vmem:[%s7549_s3] ss:$0 sm:$0xff] }
 0x1ba   : > { %v948_v55 = vsel %vm661_vm2, %v854_v9, 0.0 }
 0x1bd   : > { %949 = vadd.xlane.f32.xlu1 %v948_v55 }
 0x20a   : > { %v857_v23 = vpop.xlane.xlu0 %856 }
 0x20b   : > { %v951_v58 = vmul.f32 0.03125, %v857_v23 }
 0x20d   : > { %v983_v33 = vadd.f32 1e-06, %v951_v58 }
 0x20e   : > { %v863_v63 = vpop.xlane.xlu0 %862  ;;  %v860_v49 = vpop.xlane.xlu1 %859 }
 0x20f   : > { %5780 = vrsqrt.f32 %v983_v33  ;;  %v953_v7 = vmul.f32 0.03125, %v863_v63  ;;  %v952_v6 = vmul.f32 0.03125, %v860_v49 }
 0x211   : > { %v985_v8 = vadd.f32 1e-06, %v953_v7  ;;  %v984_v10 = vadd.f32 1e-06, %v952_v6 }
 0x212   : > { %v869_v13 = vpop.xlane.xlu0 %868  ;;  %v866_v1 = vpop.xlane.xlu1 %865 }
 0x213   : > { %5782 = vrsqrt.f32 %v985_v8  ;;  %v955_v16 = vmul.f32 0.03125, %v869_v13  ;;  %v954_v17 = vmul.f32 0.03125, %v866_v1 }
 0x214   : > { %5784 = vrsqrt.f32 %v984_v10 }
 0x215   : > { %v987_v59 = vadd.f32 1e-06, %v955_v16  ;;  %v986_v26 = vadd.f32 1e-06, %v954_v17 }
 0x216   : > { %v875_v29 = vpop.xlane.xlu0 %874  ;;  %v872_v4 = vpop.xlane.xlu1 %871 }
 0x217   : > { %5786 = vrsqrt.f32 %v987_v59  ;;  %v957_v34 = vmul.f32 0.03125, %v875_v29  ;;  %v956_v39 = vmul.f32 0.03125, %v872_v4 }
 0x218   : > { %5788 = vrsqrt.f32 %v986_v26 }
 0x219   : > { %v5781_v57 = vpop.eup %5780  ;;  %v989_v11 = vadd.f32 1e-06, %v957_v34  ;;  %v988_v48 = vadd.f32 1e-06, %v956_v39 }
 0x21a   : > { %v1047_v35 = vmul.f32 %v5781_v57, %v6259_v32  ;;  %v881_v19 = vpop.xlane.xlu0 %880  ;;  %v878_v50 = vpop.xlane.xlu1 %877 }
 0x21b   : > { %5790 = vrsqrt.f32 %v989_v11  ;;  %v959_v51 = vmul.f32 0.03125, %v881_v19  ;;  %v958_v9 = vmul.f32 0.03125, %v878_v50 }
 0x21c   : > { %v1086_v55 = vmul.f32 %v6511_v60, %v1047_v35  ;;  %5792 = vrsqrt.f32 %v988_v48 }
 0x21d   : > { %v5783_v23 = vpop.eup %5782  ;;  %v991_v58 = vadd.f32 1e-06, %v959_v51  ;;  %v990_v33 = vadd.f32 1e-06, %v958_v9 }
 0x21e   : > { %v5785_v63 = vpop.eup %5784  ;;  %v1125_v49 = vadd.f32 %v6517_v20, %v1086_v55  ;;  %v1049_v32 = vmul.f32 %v5783_v23, %v6256_v31  ;;  %v887_v7 = vpop.xlane.xlu0 %886 }
 0x21f   : > { %v884_v6 = vpop.xlane.xlu1 %883  ;;  %v1048_v8 = vmul.f32 %v5785_v63, %v6267_v47  ;;  %5794 = vrsqrt.f32 %v991_v58  ;;  %v961_v10 = vmul.f32 0.03125, %v887_v7 }
 0x220   : > { %v960_v13 = vmul.f32 0.03125, %v884_v6  ;;  %1259 = vst.msk [vmem:[#allocation2 + $0x108] sm:$0xff] %vm661_vm2, %v1125_v49  ;;  %v1088_v1 = vmul.f32 %v6511_v60, %v1049_v32  ;;  %5796 = vrsqrt.f32 %v990_v33 }
 0x221   : > { %v5787_v16 = vpop.eup %5786  ;;  %v1087_v17 = vmul.f32 %v6511_v60, %v1048_v8  ;;  %v993_v59 = vadd.f32 1e-06, %v961_v10 }
 0x222   : > { %v992_v26 = vadd.f32 1e-06, %v960_v13  ;;  %v5789_v29 = vpop.eup %5788  ;;  %v1127_v31 = vadd.f32 %v6517_v20, %v1088_v1  ;;  %v1051_v4 = vmul.f32 %v5787_v16, %v6277_v21  ;;  %v893_v34 = vpop.xlane.xlu0 %892 }
 0x223   : > { %v890_v47 = vpop.xlane.xlu1 %889  ;;  %v1126_v39 = vadd.f32 %v6517_v20, %v1087_v17  ;;  %v1050_v57 = vmul.f32 %v5789_v29, %v6264_v45  ;;  %5798 = vrsqrt.f32 %v993_v59  ;;  %v963_v11 = vmul.f32 0.03125, %v893_v34 }
 0x224   : > { %1261 = vst.msk [vmem:[#allocation2 + $0x128] sm:$0xff] %vm661_vm2, %v1127_v31  ;;  %v1090_v48 = vmul.f32 %v6511_v60, %v1051_v4  ;;  %5800 = vrsqrt.f32 %v992_v26  ;;  %v962_v35 = vmul.f32 0.03125, %v890_v47 }
 0x225   : > { %v5791_v19 = vpop.eup %5790  ;;  %1260 = vst.msk [vmem:[#allocation2 + $0x110] sm:$0xff] %vm661_vm2, %v1126_v39  ;;  %v1089_v50 = vmul.f32 %v6511_v60, %v1050_v57  ;;  %v995_v21 = vadd.f32 1e-06, %v963_v11 }
 0x226   : > { %v5793_v51 = vpop.eup %5792  ;;  %v1129_v9 = vadd.f32 %v6517_v20, %v1090_v48  ;;  %v1053_v55 = vmul.f32 %v5791_v19, %v6288_v27  ;;  %v994_v45 = vadd.f32 1e-06, %v962_v35  ;;  %v899_v23 = vpop.xlane.xlu0 %898 }
 0x227   : > { %v896_v58 = vpop.xlane.xlu1 %895  ;;  %v1128_v33 = vadd.f32 %v6517_v20, %v1089_v50  ;;  %v1052_v63 = vmul.f32 %v5793_v51, %v6282_v0  ;;  %5802 = vrsqrt.f32 %v995_v21  ;;  %v965_v49 = vmul.f32 0.03125, %v899_v23  ;;  %v1346_v34 = vld [vmem:[#allocation2 + $0x108] sm:$0xff] }
 0x228   : > { %1263 = vst.msk [vmem:[#allocation2 + $0x148] sm:$0xff] %vm661_vm2, %v1129_v9  ;;  %v1092_v32 = vmul.f32 %v6511_v60, %v1053_v55  ;;  %5804 = vrsqrt.f32 %v994_v45  ;;  %v964_v7 = vmul.f32 0.03125, %v896_v58 }
 0x229   : > { %v5795_v6 = vpop.eup %5794  ;;  %1262 = vst.msk [vmem:[#allocation2 + $0x130] sm:$0xff] %vm661_vm2, %v1128_v33  ;;  %v1091_v27 = vmul.f32 %v6511_v60, %v1052_v63  ;;  %v997_v8 = vadd.f32 1e-06, %v965_v49 }
 0x22a   : > { %v5797_v10 = vpop.eup %5796  ;;  %v1131_v13 = vadd.f32 %v6517_v20, %v1092_v32  ;;  %v1055_v1 = vmul.f32 %v5795_v6, %v6300_v25  ;;  %v996_v0 = vadd.f32 1e-06, %v964_v7  ;;  %v905_v16 = vpop.xlane.xlu0 %904  ;;  %v5766_v7 = vld [vmem:[%s7550_s4 + $0x58] sm:$0xff]   ;;  %v6570_v6 = vld [vmem:[%s7550_s4 + $0x20] sm:$0xff]  }
 0x22b   : > { %v902_v17 = vpop.xlane.xlu1 %901  ;;  %v1130_v59 = vadd.f32 %v6517_v20, %v1091_v27  ;;  %v1054_v26 = vmul.f32 %v5797_v10, %v6294_v30  ;;  %5806 = vrsqrt.f32 %v997_v8  ;;  %v967_v29 = vmul.f32 0.03125, %v905_v16  ;;  %v5768_v30 = vld [vmem:[%s7550_s4 + $0x8] sm:$0xff]  }
 0x22c   : > { %1265 = vst.msk [vmem:[#allocation2 + $0x168] sm:$0xff] %vm661_vm2, %v1131_v13  ;;  %v1094_v31 = vmul.f32 %v6511_v60, %v1055_v1  ;;  %5808 = vrsqrt.f32 %v996_v0  ;;  %v966_v4 = vmul.f32 0.03125, %v902_v17  ;;  %v1347_v47 = vld [vmem:[#allocation2 + $0x110] sm:$0xff] }
 0x22d   : > { %v5799_v39 = vpop.eup %5798  ;;  %1264 = vst.msk [vmem:[#allocation2 + $0x150] sm:$0xff] %vm661_vm2, %v1130_v59  ;;  %v1093_v25 = vmul.f32 %v6511_v60, %v1054_v26  ;;  %v999_v57 = vadd.f32 1e-06, %v967_v29  ;;  %v1382_v11 = vpack.c.bf16 %v1347_v47, %v1346_v34  ;;  %v6586_v47 = vld [vmem:[%s7550_s4 + $0x60] sm:$0xff]  }
 0x22e   : > { %v5801_v48 = vpop.eup %5800  ;;  %v1133_v35 = vadd.f32 %v6517_v20, %v1094_v31  ;;  %v1057_v19 = vmul.f32 %v5799_v39, %v6312_v18  ;;  %v998_v50 = vadd.f32 1e-06, %v966_v4  ;;  %v911_v21 = vpop.xlane.xlu0 %910  ;;  %v1348_v18 = vld [vmem:[#allocation2 + $0x128] sm:$0xff] }
 0x22f   : > { %v908_v51 = vpop.xlane.xlu1 %907  ;;  %v1132_v9 = vadd.f32 %v6517_v20, %v1093_v25  ;;  %v1056_v55 = vmul.f32 %v5801_v48, %v6306_v28  ;;  %5810 = vrsqrt.f32 %v999_v57  ;;  %v969_v45 = vmul.f32 0.03125, %v911_v21  ;;  %5149 = vmatmul.mubr.msk.bf16.vlgmr.msra.gmra.mrb[32].mxu0 %vm661_vm2, %v1382_v11  ;;  %5292 = vmatprep.mubr.msk.bf16.mxu1 %vm661_vm2, %v1382_v11 }
 0x230   : > { %1267 = vst.msk [vmem:[#allocation2 + $0x188] sm:$0xff] %vm661_vm2, %v1133_v35  ;;  %v1096_v23 = vmul.f32 %v6511_v60, %v1057_v19  ;;  %5812 = vrsqrt.f32 %v998_v50  ;;  %v968_v58 = vmul.f32 0.03125, %v908_v51  ;;  %v1349_v33 = vld [vmem:[#allocation2 + $0x130] sm:$0xff]  ;;  %5181 = vmatpush3.bf16.msra.mxu0 %v6505_v56 }
 0x231   : > { %v5803_v63 = vpop.eup %5802  ;;  %1266 = vst.msk [vmem:[#allocation2 + $0x170] sm:$0xff] %vm661_vm2, %v1132_v9  ;;  %v1095_v28 = vmul.f32 %v6511_v60, %v1056_v55  ;;  %v1001_v49 = vadd.f32 1e-06, %v969_v45  ;;  %v1383_v32 = vpack.c.bf16 %v1349_v33, %v1348_v18  ;;  %5182 = vmatprep.subr.bf16.mxu0 %v5768_v30 }
 0x232   : > { %v5805_v27 = vpop.eup %5804  ;;  %v1135_v56 = vadd.f32 %v6517_v20, %v1096_v23  ;;  %v1059_v8 = vmul.f32 %v5803_v63, %v6324_v61  ;;  %v1000_v10 = vadd.f32 1e-06, %v968_v58  ;;  %v917_v13 = vpop.xlane.xlu0 %916  ;;  %v1350_v61 = vld [vmem:[#allocation2 + $0x148] sm:$0xff] }
 0x233   : > { %v914_v1 = vpop.xlane.xlu1 %913  ;;  %v1134_v0 = vadd.f32 %v6517_v20, %v1095_v28  ;;  %v1058_v16 = vmul.f32 %v5805_v27, %v6318_v38  ;;  %5814 = vrsqrt.f32 %v1001_v49  ;;  %v971_v17 = vmul.f32 0.03125, %v917_v13  ;;  %5152 = vmatprep.mubr.msk.bf16.mxu0 %vm661_vm2, %v1383_v32  ;;  %5293 = vmatmul.mubr.msk.bf16.vlgmr.msra.gmra.mrb[0].mxu1 %vm661_vm2, %v1383_v32 }
 0x234   : > { %1269 = vst.msk [vmem:[#allocation2 + $0x1a8] sm:$0xff] %vm661_vm2, %v1135_v56  ;;  %v1098_v59 = vmul.f32 %v6511_v60, %v1059_v8  ;;  %5816 = vrsqrt.f32 %v1000_v10  ;;  %v970_v26 = vmul.f32 0.03125, %v914_v1  ;;  %5325 = vmatpush3.bf16.msra.mxu1 %v6499_v12  ;;  %v1351_v29 = vld [vmem:[#allocation2 + $0x150] sm:$0xff]  ;;  %5183 = vmatpush3.bf16.msra.mxu0 %v5768_v30 }
 0x235   : > { %v5807_v31 = vpop.eup %5806  ;;  %1268 = vst.msk [vmem:[#allocation2 + $0x190] sm:$0xff] %vm661_vm2, %v1134_v0  ;;  %v1097_v38 = vmul.f32 %v6511_v60, %v1058_v16  ;;  %v1003_v4 = vadd.f32 1e-06, %v971_v17  ;;  %v1384_v34 = vpack.c.bf16 %v1351_v29, %v1350_v61  ;;  %5326 = vmatprep.subr.bf16.mxu1 %v5766_v7  ;;  %5216 = vmatprep.subr.bf16.mxu0 %v6570_v6 }
 0x236   : > { %v5809_v39 = vpop.eup %5808  ;;  %v1137_v12 = vadd.f32 %v6517_v20, %v1098_v59  ;;  %v1061_v25 = vmul.f32 %v5807_v31, %v6336_v15  ;;  %v1002_v57 = vadd.f32 1e-06, %v970_v26  ;;  %v923_v11 = vpop.xlane.xlu0 %922  ;;  %v1352_v15 = vld [vmem:[#allocation2 + $0x168] sm:$0xff] }
 0x237   : > { %v920_v30 = vpop.xlane.xlu1 %919  ;;  %v1136_v48 = vadd.f32 %v6517_v20, %v1097_v38  ;;  %v1060_v35 = vmul.f32 %v5809_v39, %v6330_v36  ;;  %5818 = vrsqrt.f32 %v1003_v4  ;;  %v973_v19 = vmul.f32 0.03125, %v923_v11  ;;  %5153 = vmatmul.mubr.msk.bf16.gmra.mrb[36].mxu0 %vm661_vm2, %v1384_v34  ;;  %5296 = vmatprep.mubr.msk.bf16.mxu1 %vm661_vm2, %v1384_v34 }
 0x238   : > { %1271 = vst.msk [vmem:[#allocation2 + $0x1c8] sm:$0xff] %vm661_vm2, %v1137_v12  ;;  %v1100_v50 = vmul.f32 %v6511_v60, %v1061_v25  ;;  %5820 = vrsqrt.f32 %v1002_v57  ;;  %v972_v21 = vmul.f32 0.03125, %v920_v30  ;;  %v1353_v51 = vld [vmem:[#allocation2 + $0x170] sm:$0xff]  ;;  %5327 = vmatpush3.bf16.msra.mxu1 %v5766_v7 }
 0x239   : > { %v5811_v9 = vpop.eup %5810  ;;  %1270 = vst.msk [vmem:[#allocation2 + $0x1b0] sm:$0xff] %vm661_vm2, %v1136_v48  ;;  %v1099_v36 = vmul.f32 %v6511_v60, %v1060_v35  ;;  %v1005_v55 = vadd.f32 1e-06, %v973_v19  ;;  %v1385_v45 = vpack.c.bf16 %v1353_v51, %v1352_v15  ;;  %5360 = vmatprep.subr.bf16.mxu1 %v6586_v47 }
 0x23a   : > { %v5813_v23 = vpop.eup %5812  ;;  %v1139_v58 = vadd.f32 %v6517_v20, %v1100_v50  ;;  %v1063_v18 = vmul.f32 %v5811_v9, %v6348_v37  ;;  %v1004_v33 = vadd.f32 1e-06, %v972_v21  ;;  %v929_v63 = vpop.xlane.xlu0 %928  ;;  %v1354_v37 = vld [vmem:[#allocation2 + $0x188] sm:$0xff] }
 0x23b   : > { %v926_v28 = vpop.xlane.xlu1 %925  ;;  %v1138_v49 = vadd.f32 %v6517_v20, %v1099_v36  ;;  %v1062_v32 = vmul.f32 %v5813_v23, %v6342_v46  ;;  %5822 = vrsqrt.f32 %v1005_v55  ;;  %v975_v7 = vmul.f32 0.03125, %v929_v63  ;;  %5156 = vmatprep.mubr.msk.bf16.mxu0 %vm661_vm2, %v1385_v45  ;;  %5297 = vmatmul.mubr.msk.bf16.gmra.mrb[4].mxu1 %vm661_vm2, %v1385_v45 }
 0x23c   : > { %1273 = vst.msk [vmem:[#allocation2 + $0x1e8] sm:$0xff] %vm661_vm2, %v1139_v58  ;;  %v1102_v27 = vmul.f32 %v6511_v60, %v1063_v18  ;;  %5824 = vrsqrt.f32 %v1004_v33  ;;  %v974_v56 = vmul.f32 0.03125, %v926_v28  ;;  %v1355_v8 = vld [vmem:[#allocation2 + $0x190] sm:$0xff] }
 0x23d   : > { %v5815_v10 = vpop.eup %5814  ;;  %1272 = vst.msk [vmem:[#allocation2 + $0x1d0] sm:$0xff] %vm661_vm2, %v1138_v49  ;;  %v1101_v13 = vmul.f32 %v6511_v60, %v1062_v32  ;;  %v1007_v46 = vadd.f32 1e-06, %v975_v7  ;;  %v1386_v1 = vpack.c.bf16 %v1355_v8, %v1354_v37 }
 0x23e   : > { %v5817_v0 = vpop.eup %5816  ;;  %v1141_v16 = vadd.f32 %v6517_v20, %v1102_v27  ;;  %v1065_v17 = vmul.f32 %v5815_v10, %v6360_v53  ;;  %v1006_v59 = vadd.f32 1e-06, %v974_v56  ;;  %v935_v26 = vpop.xlane.xlu0 %934  ;;  %v1356_v53 = vld [vmem:[#allocation2 + $0x1a8] sm:$0xff] }
 0x23f   : > { %v932_v61 = vpop.xlane.xlu1 %931  ;;  %v1140_v29 = vadd.f32 %v6517_v20, %v1101_v13  ;;  %v1064_v31 = vmul.f32 %v5817_v0, %v6354_v44  ;;  %5826 = vrsqrt.f32 %v1007_v46  ;;  %v977_v38 = vmul.f32 0.03125, %v935_v26  ;;  %5157 = vmatmul.mubr.msk.bf16.gmra.mrb[40].mxu0 %vm661_vm2, %v1386_v1  ;;  %5300 = vmatprep.mubr.msk.bf16.mxu1 %vm661_vm2, %v1386_v1  ;;  %v1358_v36 = vld [vmem:[#allocation2 + $0x1c8] sm:$0xff] }
 0x240   : > { %1275 = vst.msk [vmem:[#allocation2 + $0x208] sm:$0xff] %vm661_vm2, %v1141_v16  ;;  %v1104_v4 = vmul.f32 %v6511_v60, %v1065_v17  ;;  %5828 = vrsqrt.f32 %v1006_v59  ;;  %v976_v34 = vmul.f32 0.03125, %v932_v61  ;;  %v1357_v39 = vld [vmem:[#allocation2 + $0x1b0] sm:$0xff] }
 0x241   : > { %v5819_v12 = vpop.eup %5818  ;;  %1274 = vst.msk [vmem:[#allocation2 + $0x1f0] sm:$0xff] %vm661_vm2, %v1140_v29  ;;  %v1103_v25 = vmul.f32 %v6511_v60, %v1064_v31  ;;  %v1009_v44 = vadd.f32 1e-06, %v977_v38  ;;  %v6620_v57 = vpack.c.bf16 %v1357_v39, %v1356_v53 }
 0x242   : > { %v5821_v11 = vpop.eup %5820  ;;  %v1143_v30 = vadd.f32 %v6517_v20, %v1104_v4  ;;  %v1067_v48 = vmul.f32 %v5819_v12, %v6372_v5  ;;  %v1008_v35 = vadd.f32 1e-06, %v976_v34  ;;  %v941_v19 = vpop.xlane.xlu0 %940 }
 0x243   : > { %v938_v50 = vpop.xlane.xlu1 %937  ;;  %v1142_v21 = vadd.f32 %v6517_v20, %v1103_v25  ;;  %v1066_v15 = vmul.f32 %v5821_v11, %v6366_v54  ;;  %5830 = vrsqrt.f32 %v1009_v44  ;;  %v979_v51 = vmul.f32 0.03125, %v941_v19  ;;  %5160 = vmatprep.mubr.msk.bf16.mxu0 %vm661_vm2, %v6620_v57  ;;  %5301 = vmatmul.mubr.msk.bf16.gmra.mrb[8].mxu1 %vm661_vm2, %v6620_v57  ;;  %v1360_v8 = vld [vmem:[#allocation2 + $0x1e8] sm:$0xff] }
 0x244   : > { %1277 = vst.msk [vmem:[#allocation2 + $0x228] sm:$0xff] %vm661_vm2, %v1143_v30  ;;  %v1106_v9 = vmul.f32 %v6511_v60, %v1067_v48  ;;  %5832 = vrsqrt.f32 %v1008_v35  ;;  %v978_v5 = vmul.f32 0.03125, %v938_v50  ;;  %v1359_v55 = vld [vmem:[#allocation2 + $0x1d0] sm:$0xff] }
 0x245   : > { %v5823_v45 = vpop.eup %5822  ;;  %1276 = vst.msk [vmem:[#allocation2 + $0x210] sm:$0xff] %vm661_vm2, %v1142_v21  ;;  %v1105_v54 = vmul.f32 %v6511_v60, %v1066_v15  ;;  %v1011_v23 = vadd.f32 1e-06, %v979_v51  ;;  %v6634_v58 = vpack.c.bf16 %v1359_v55, %v1358_v36 }
 0x246   : > { %v5825_v18 = vpop.eup %5824  ;;  %v1145_v33 = vadd.f32 %v6517_v20, %v1106_v9  ;;  %v1069_v63 = vmul.f32 %v5823_v45, %v6384_v22  ;;  %v1010_v28 = vadd.f32 1e-06, %v978_v5  ;;  %v947_v49 = vpop.xlane.xlu0 %946 }
 0x247   : > { %v944_v32 = vpop.xlane.xlu1 %943  ;;  %v1144_v7 = vadd.f32 %v6517_v20, %v1105_v54  ;;  %v1068_v27 = vmul.f32 %v5825_v18, %v6378_v52  ;;  %5834 = vrsqrt.f32 %v1011_v23  ;;  %v981_v56 = vmul.f32 0.03125, %v947_v49  ;;  %5161 = vmatmul.mubr.msk.bf16.gmra.mrb[44].mxu0 %vm661_vm2, %v6634_v58  ;;  %5304 = vmatprep.mubr.msk.bf16.mxu1 %vm661_vm2, %v6634_v58 }
 0x248   : > { %1279 = vst.msk [vmem:[#allocation2 + $0x248] sm:$0xff] %vm661_vm2, %v1145_v33  ;;  %v1108_v37 = vmul.f32 %v6511_v60, %v1069_v63  ;;  %5836 = vrsqrt.f32 %v1010_v28  ;;  %v980_v22 = vmul.f32 0.03125, %v944_v32  ;;  %v1361_v10 = vld [vmem:[#allocation2 + $0x1f0] sm:$0xff] }
 0x249   : > { %v5827_v13 = vpop.eup %5826  ;;  %1278 = vst.msk [vmem:[#allocation2 + $0x230] sm:$0xff] %vm661_vm2, %v1144_v7  ;;  %v1107_v52 = vmul.f32 %v6511_v60, %v1068_v27  ;;  %v1013_v46 = vadd.f32 1e-06, %v981_v56  ;;  %v6648_v1 = vpack.c.bf16 %v1361_v10, %v1360_v8 }
 0x24a   : > { %v5829_v0 = vpop.eup %5828  ;;  %v1147_v16 = vadd.f32 %v6517_v20, %v1108_v37  ;;  %v1071_v17 = vmul.f32 %v5827_v13, %v6435_v42  ;;  %v1012_v59 = vadd.f32 1e-06, %v980_v22  ;;  %v1362_v42 = vld [vmem:[#allocation2 + $0x208] sm:$0xff] }
 0x24b   : > { %v950_v26 = vpop.xlane.xlu1 %949  ;;  %v1146_v61 = vadd.f32 %v6517_v20, %v1107_v52  ;;  %v1070_v29 = vmul.f32 %v5829_v0, %v6393_v41  ;;  %5838 = vrsqrt.f32 %v1013_v46  ;;  %5164 = vmatprep.mubr.msk.bf16.mxu0 %vm661_vm2, %v6648_v1  ;;  %5305 = vmatmul.mubr.msk.bf16.gmra.mrb[12].mxu1 %vm661_vm2, %v6648_v1  ;;  %v1364_v35 = vld [vmem:[#allocation2 + $0x228] sm:$0xff] }
 0x24c   : > { %v982_v31 = vmul.f32 0.03125, %v950_v26  ;;  %1281 = vst.msk [vmem:[#allocation2 + $0x268] sm:$0xff] %vm661_vm2, %v1147_v16  ;;  %v1110_v38 = vmul.f32 %v6511_v60, %v1071_v17  ;;  %5840 = vrsqrt.f32 %v1012_v59  ;;  %v1363_v4 = vld [vmem:[#allocation2 + $0x210] sm:$0xff] }
 0x24d   : > { %v5831_v34 = vpop.eup %5830  ;;  %1280 = vst.msk [vmem:[#allocation2 + $0x250] sm:$0xff] %vm661_vm2, %v1146_v61  ;;  %v1109_v41 = vmul.f32 %v6511_v60, %v1070_v29  ;;  %v6662_v39 = vpack.c.bf16 %v1363_v4, %v1362_v42  ;;  %v1293_v17 = vld [vmem:[#allocation2 + $0xef] sm:$0xff] }
 0x24e   : > { %v1014_v53 = vadd.f32 1e-06, %v982_v31  ;;  %v5833_v12 = vpop.eup %5832  ;;  %v1149_v25 = vadd.f32 %v6517_v20, %v1110_v38  ;;  %v1073_v44 = vmul.f32 %v5831_v34, %v6453_v2  ;;  %v2757_v29 = vld [vmem:[#allocation2 + $0x109] sm:$0xff]  ;;  %v2758_v42 = vld [vmem:[#allocation2 + $0x111] sm:$0xff] }
 0x24f   : > { %v1148_v11 = vadd.f32 %v6517_v20, %v1109_v41  ;;  %v1072_v30 = vmul.f32 %v5833_v12, %v6447_v3  ;;  %5165 = vmatmul.mubr.msk.bf16.gmra.mrb[48].mxu0 %vm661_vm2, %v6662_v39  ;;  %5308 = vmatprep.mubr.msk.bf16.mxu1 %vm661_vm2, %v6662_v39  ;;  %v1366_v55 = vld [vmem:[#allocation2 + $0x248] sm:$0xff]  ;;  %v6739_v34 = vpack.c.bf16 %v2758_v42, %v2757_v29 }
 0x250   : > { %5842 = vrsqrt.f32 %v1014_v53  ;;  %1283 = vst.msk [vmem:[#allocation2 + $0x288] sm:$0xff] %vm661_vm2, %v1149_v25  ;;  %v1112_v48 = vmul.f32 %v6511_v60, %v1073_v44  ;;  %v1365_v19 = vld [vmem:[#allocation2 + $0x230] sm:$0xff]  ;;  %v1294_v12 = vld [vmem:[#allocation2 + $0x107] sm:$0xff] }
 0x251   : > { %v5835_v50 = vpop.eup %5834  ;;  %1282 = vst.msk [vmem:[#allocation2 + $0x270] sm:$0xff] %vm661_vm2, %v1148_v11  ;;  %v1111_v2 = vmul.f32 %v6511_v60, %v1072_v30  ;;  %v6676_v21 = vpack.c.bf16 %v1365_v19, %v1364_v35  ;;  %v1295_v41 = vld [vmem:[#allocation2 + $0x10f] sm:$0xff]  ;;  %v1296_v44 = vld [vmem:[#allocation2 + $0x127] sm:$0xff] }
 0x252   : > { %v5837_v3 = vpop.eup %5836  ;;  %v1151_v15 = vadd.f32 %v6517_v20, %v1112_v48  ;;  %v1075_v51 = vmul.f32 %v5835_v50, %v6469_v24  ;;  %v1297_v53 = vld [vmem:[#allocation2 + $0x12f] sm:$0xff]  ;;  %v6745_v25 = vpack.c.bf16 %v1295_v41, %v1294_v12  ;;  %v1310_v12 = vld [vmem:[#allocation2 + $0x207] sm:$0xff] }
 0x253   : > { %v1150_v9 = vadd.f32 %v6517_v20, %v1111_v2  ;;  %v1074_v5 = vmul.f32 %v5837_v3, %v6462_v43  ;;  %5168 = vmatprep.mubr.msk.bf16.mxu0 %vm661_vm2, %v6676_v21  ;;  %5309 = vmatmul.mubr.msk.bf16.gmra.mrb[16].mxu1 %vm661_vm2, %v6676_v21  ;;  %v1368_v32 = vld [vmem:[#allocation2 + $0x268] sm:$0xff]  ;;  %v6750_v30 = vpack.c.bf16 %v1297_v53, %v1296_v44  ;;  %v2760_v35 = vld [vmem:[#allocation2 + $0x131] sm:$0xff] }
 0x254   : > { %1285 = vst.msk [vmem:[#allocation2 + $0x2a8] sm:$0xff] %vm661_vm2, %v1151_v15  ;;  %v1114_v36 = vmul.f32 %v6511_v60, %v1075_v51  ;;  %v1367_v45 = vld [vmem:[#allocation2 + $0x250] sm:$0xff]  ;;  %v5772_v11 = vld [vmem:[%s7550_s4 + $0x28] sm:$0xff]  }
 0x255   : > { %v5839_v54 = vpop.eup %5838  ;;  %1284 = vst.msk [vmem:[#allocation2 + $0x290] sm:$0xff] %vm661_vm2, %v1150_v9  ;;  %v1113_v24 = vmul.f32 %v6511_v60, %v1074_v5  ;;  %v6690_v23 = vpack.c.bf16 %v1367_v45, %v1366_v55  ;;  %v2759_v48 = vld [vmem:[#allocation2 + $0x129] sm:$0xff]  ;;  %v2762_v50 = vld [vmem:[#allocation2 + $0x151] sm:$0xff] }
 0x256   : > { %v5841_v43 = vpop.eup %5840  ;;  %v1153_v18 = vadd.f32 %v6517_v20, %v1114_v36  ;;  %v1077_v33 = vmul.f32 %v5839_v54, %v6481_v40  ;;  %v2761_v19 = vld [vmem:[#allocation2 + $0x149] sm:$0xff]  ;;  %v6757_v2 = vpack.c.bf16 %v2760_v35, %v2759_v48 }
 0x257   : > { %v1152_v63 = vadd.f32 %v6517_v20, %v1113_v24  ;;  %v1076_v28 = vmul.f32 %v5841_v43, %v6475_v62  ;;  %5169 = vmatmul.mubr.msk.bf16.gmra.mrb[52].mxu0 %vm661_vm2, %v6690_v23  ;;  %5312 = vmatprep.mubr.msk.bf16.mxu1 %vm661_vm2, %v6690_v23  ;;  %v1370_v10 = vld [vmem:[#allocation2 + $0x288] sm:$0xff]  ;;  %v6762_v15 = vpack.c.bf16 %v2762_v50, %v2761_v19  ;;  %v6767_v9 = vld [vmem:[%s7550_s4 + $0x30] sm:$0xff]  }
 0x258   : > { %1287 = vst.msk [vmem:[#allocation2 + $0x2c8] sm:$0xff] %vm661_vm2, %v1153_v18  ;;  %v1116_v49 = vmul.f32 %v6511_v60, %v1077_v33  ;;  %v1369_v7 = vld [vmem:[#allocation2 + $0x270] sm:$0xff]  ;;  %v5770_v3 = vld [vmem:[%s7550_s4 + $0x68] sm:$0xff]  }
 0x259   : > { %1286 = vst.msk [vmem:[#allocation2 + $0x2b0] sm:$0xff] %vm661_vm2, %v1152_v63  ;;  %v1115_v40 = vmul.f32 %v6511_v60, %v1076_v28  ;;  %v6704_v56 = vpack.c.bf16 %v1369_v7, %v1368_v32  ;;  %v1299_v51 = vld [vmem:[#allocation2 + $0x14f] sm:$0xff]  ;;  %v1300_v55 = vld [vmem:[#allocation2 + $0x167] sm:$0xff] }
 0x25a   : > { %v5843_v27 = vpop.eup %5842  ;;  %v1155_v62 = vadd.f32 %v6517_v20, %v1116_v49  ;;  %v1301_v5 = vld [vmem:[#allocation2 + $0x16f] sm:$0xff]  ;;  %v1302_v32 = vld [vmem:[#allocation2 + $0x187] sm:$0xff] }
 0x25b   : > { %v1078_v37 = vmul.f32 %v5843_v27, %v6487_v14  ;;  %v1154_v22 = vadd.f32 %v6517_v20, %v1115_v40  ;;  %5172 = vmatprep.mubr.msk.bf16.mxu0 %vm661_vm2, %v6704_v56  ;;  %5313 = vmatmul.mubr.msk.bf16.gmra.mrb[20].mxu1 %vm661_vm2, %v6704_v56  ;;  %v1372_v46 = vld [vmem:[#allocation2 + $0x2a8] sm:$0xff]  ;;  %v6779_v45 = vld [vmem:[%s7550_s4 + $0x70] sm:$0xff]   ;;  %v6781_v54 = vpack.c.bf16 %v1301_v5, %v1300_v55 }
 0x25c   : > { %1289 = vst.msk [vmem:[#allocation2 + $0x2e8] sm:$0xff] %vm661_vm2, %v1155_v62  ;;  %v1371_v13 = vld [vmem:[#allocation2 + $0x290] sm:$0xff]  ;;  %v1304_v27 = vld [vmem:[#allocation2 + $0x1a7] sm:$0xff] }
 0x25d   : > { %v1117_v8 = vmul.f32 %v6511_v60, %v1078_v37  ;;  %1288 = vst.msk [vmem:[#allocation2 + $0x2d0] sm:$0xff] %vm661_vm2, %v1154_v22  ;;  %v6716_v52 = vpack.c.bf16 %v1371_v13, %v1370_v10  ;;  %v1292_v60 = vld [vmem:[#allocation2 + $0xe7] sm:$0xff]  ;;  %v2764_v43 = vld [vmem:[#allocation2 + $0x171] sm:$0xff] }
 0x25e   : > { %v1328_v26 = vpack.c.bf16 %v1293_v17, %v1292_v60  ;;  %v2763_v24 = vld [vmem:[#allocation2 + $0x169] sm:$0xff]  ;;  %v2766_v18 = vld [vmem:[#allocation2 + $0x191] sm:$0xff] }
 0x25f   : > { %v1156_v14 = vadd.f32 %v6517_v20, %v1117_v8  ;;  %5173 = vmatmul.mubr.msk.bf16.gmra.mrb[56].mxu0 %vm661_vm2, %v6716_v52  ;;  %5316 = vmatprep.mubr.msk.bf16.mxu1 %vm661_vm2, %v6716_v52  ;;  %v1374_v20 = vld [vmem:[#allocation2 + $0x2c8] sm:$0xff]  ;;  %v6788_v33 = vpack.c.bf16 %v2764_v43, %v2763_v24  ;;  %v2768_v37 = vld [vmem:[#allocation2 + $0x1b1] sm:$0xff] }
 0x260   : > { %v1373_v0 = vld [vmem:[#allocation2 + $0x2b0] sm:$0xff]  ;;  %v1308_v17 = vld [vmem:[#allocation2 + $0x1e7] sm:$0xff] }
 0x261   : > { %1290 = vst.msk [vmem:[#allocation2 + $0x2f0] sm:$0xff] %vm661_vm2, %v1156_v14  ;;  %v6724_v16 = vpack.c.bf16 %v1373_v0, %v1372_v46  ;;  %v1303_v28 = vld [vmem:[#allocation2 + $0x18f] sm:$0xff]  ;;  %v1306_v0 = vld [vmem:[#allocation2 + $0x1c7] sm:$0xff] }
 0x262   : > { %v1305_v49 = vld [vmem:[#allocation2 + $0x1af] sm:$0xff]  ;;  %v6797_v7 = vpack.c.bf16 %v1303_v28, %v1302_v32  ;;  %v1314_v24 = vld [vmem:[#allocation2 + $0x247] sm:$0xff] }
 0x263   : > { %5176 = vmatprep.mubr.msk.bf16.mxu0 %vm661_vm2, %v6724_v16  ;;  %5317 = vmatmul.mubr.msk.bf16.gmra.mrb[24].mxu1 %vm661_vm2, %v6724_v16  ;;  %v2481_v31 = vld [vmem:[#allocation2 + $0x2e8] sm:$0xff]  ;;  %v6799_v40 = vpack.c.bf16 %v1305_v49, %v1304_v27  ;;  %v2770_v8 = vld [vmem:[#allocation2 + $0x1d1] sm:$0xff] }
 0x264   : > { %v1375_v59 = vld [vmem:[#allocation2 + $0x2d0] sm:$0xff] }
 0x265   : > { %v6730_v61 = vpack.c.bf16 %v1375_v59, %v1374_v20  ;;  %v2767_v62 = vld [vmem:[#allocation2 + $0x1a9] sm:$0xff]  ;;  %v2776_v19 = vld [vmem:[#allocation2 + $0x231] sm:$0xff] }
 0x266   : > { %v2769_v22 = vld [vmem:[#allocation2 + $0x1c9] sm:$0xff]  ;;  %v6805_v10 = vpack.c.bf16 %v2768_v37, %v2767_v62  ;;  %v2780_v49 = vld [vmem:[#allocation2 + $0x271] sm:$0xff] }
 0x267   : > { %5177 = vmatmul.mubr.msk.bf16.gmra.mrb[60].mxu0 %vm661_vm2, %v6730_v61  ;;  %5320 = vmatprep.mubr.msk.bf16.mxu1 %vm661_vm2, %v6730_v61  ;;  %v6807_v13 = vpack.c.bf16 %v2770_v8, %v2769_v22  ;;  %v1307_v14 = vld [vmem:[#allocation2 + $0x1cf] sm:$0xff] }
 0x268   : > { %v2482_v38 = vld [vmem:[#allocation2 + $0x2f0] sm:$0xff]  ;;  %5184 = vmatprep.mubr.msk.bf16.mxu0 %vm661_vm2, %v1328_v26  ;;  %v6813_v60 = vpack.c.bf16 %v1307_v14, %v1306_v0  ;;  %v1318_v14 = vld [vmem:[#allocation2 + $0x287] sm:$0xff] }
 0x269   : > { %v6736_v4 = vpack.c.bf16 %v2482_v38, %v2481_v31  ;;  %v1309_v46 = vld [vmem:[#allocation2 + $0x1ef] sm:$0xff]  ;;  %v1320_v0 = vld [vmem:[#allocation2 + $0x2a7] sm:$0xff] }
 0x26a   : > { %v6815_v20 = vpack.c.bf16 %v1309_v46, %v1308_v17  ;;  %v2771_v59 = vld [vmem:[#allocation2 + $0x1e9] sm:$0xff]  ;;  %v2772_v26 = vld [vmem:[#allocation2 + $0x1f1] sm:$0xff] }
 0x26b   : > { %5321 = vmatmul.mubr.msk.bf16.gmra.mrb[28].mxu1 %vm661_vm2, %v6736_v4  ;;  %v2773_v29 = vld [vmem:[#allocation2 + $0x209] sm:$0xff]  ;;  %v2774_v31 = vld [vmem:[#allocation2 + $0x211] sm:$0xff]  ;;  %v6821_v38 = vpack.c.bf16 %v2772_v26, %v2771_v59 }
 0x26c   : > { %5328 = vmatprep.mubr.msk.bf16.mxu1 %vm661_vm2, %v6739_v34  ;;  %v6823_v42 = vpack.c.bf16 %v2774_v31, %v2773_v29  ;;  %v1311_v41 = vld [vmem:[#allocation2 + $0x20f] sm:$0xff] }
 0x26d   : > { %v1313_v53 = vld [vmem:[#allocation2 + $0x22f] sm:$0xff]  ;;  %v6829_v44 = vpack.c.bf16 %v1311_v41, %v1310_v12 }
 0x26e   : > { %v2775_v35 = vld [vmem:[#allocation2 + $0x229] sm:$0xff]  ;;  %v2782_v27 = vld [vmem:[#allocation2 + $0x291] sm:$0xff] }
 0x26f   : > { %5185 = vmatmul.mubr.msk.bf16.vlgmr.msra.gmra.mrb[32].mxu0 %vm661_vm2, %v6745_v25  ;;  %v2777_v50 = vld [vmem:[#allocation2 + $0x249] sm:$0xff]  ;;  %v2784_v26 = vld [vmem:[#allocation2 + $0x2b1] sm:$0xff] }
 0x270   : > { %5188 = vmatprep.mubr.msk.bf16.mxu0 %vm661_vm2, %v6750_v30  ;;  %5217 = vmatpush3.bf16.msra.mxu0 %v6570_v6  ;;  %v1298_v6 = vld [vmem:[#allocation2 + $0x147] sm:$0xff]  ;;  %v1317_v55 = vld [vmem:[#allocation2 + $0x26f] sm:$0xff] }
 0x271   : > { %5218 = vmatprep.subr.bf16.mxu0 %v5772_v11  ;;  %v6774_v36 = vpack.c.bf16 %v1299_v51, %v1298_v6  ;;  %v6837_v51 = vpack.c.bf16 %v2776_v19, %v2775_v35  ;;  %v1315_v6 = vld [vmem:[#allocation2 + $0x24f] sm:$0xff]  ;;  %v1322_v19 = vld [vmem:[#allocation2 + $0x2c7] sm:$0xff] }
 0x272   : > { %v6845_v43 = vpack.c.bf16 %v1315_v6, %v1314_v24  ;;  %v2779_v28 = vld [vmem:[#allocation2 + $0x269] sm:$0xff]  ;;  %v2786_v31 = vld [vmem:[#allocation2 + $0x2d1] sm:$0xff] }
 0x273   : > { %5329 = vmatmul.mubr.msk.bf16.vlgmr.msra.gmra.mrb[0].mxu1 %vm661_vm2, %v6757_v2  ;;  %v2781_v32 = vld [vmem:[#allocation2 + $0x289] sm:$0xff]  ;;  %v6853_v62 = vpack.c.bf16 %v2780_v49, %v2779_v28  ;;  %v1840_v12 = vld [vmem:[#allocation2 + $0xf1] sm:$0xff] }
 0x274   : > { %5332 = vmatprep.mubr.msk.bf16.mxu1 %vm661_vm2, %v6762_v15  ;;  %5361 = vmatpush3.bf16.msra.mxu1 %v6586_v47  ;;  %v2765_v47 = vld [vmem:[#allocation2 + $0x189] sm:$0xff]  ;;  %v6855_v37 = vpack.c.bf16 %v2782_v27, %v2781_v32  ;;  %v5774_v28 = vld [vmem:[%s7550_s4 + $0x78] sm:$0xff]  }
 0x275   : > { %5362 = vmatprep.subr.bf16.mxu1 %v5770_v3  ;;  %5219 = vmatpush3.bf16.msra.mxu0 %v5772_v11  ;;  %v6791_v63 = vpack.c.bf16 %v2766_v18, %v2765_v47  ;;  %v1312_v11 = vld [vmem:[#allocation2 + $0x227] sm:$0xff]  ;;  %v1319_v22 = vld [vmem:[#allocation2 + $0x28f] sm:$0xff] }
 0x276   : > { %5252 = vmatprep.subr.bf16.mxu0 %v6767_v9  ;;  %v6831_v48 = vpack.c.bf16 %v1313_v53, %v1312_v11  ;;  %v1316_v47 = vld [vmem:[#allocation2 + $0x267] sm:$0xff]  ;;  %v1321_v8 = vld [vmem:[#allocation2 + $0x2af] sm:$0xff]  ;;  %v6861_v46 = vpack.c.bf16 %v1319_v22, %v1318_v14 }
 0x277   : > { %5189 = vmatmul.mubr.msk.bf16.gmra.mrb[36].mxu0 %vm661_vm2, %v6774_v36  ;;  %v6847_v18 = vpack.c.bf16 %v1317_v55, %v1316_v47  ;;  %v6863_v17 = vpack.c.bf16 %v1321_v8, %v1320_v0  ;;  %v2783_v59 = vld [vmem:[#allocation2 + $0x2a9] sm:$0xff]  ;;  %v2788_v55 = vld [vmem:[#allocation2 + $0x2f1] sm:$0xff] }
 0x278   : > { %5192 = vmatprep.mubr.msk.bf16.mxu0 %vm661_vm2, %v6781_v54  ;;  %5363 = vmatpush3.bf16.msra.mxu1 %v5770_v3  ;;  %v2778_v3 = vld [vmem:[#allocation2 + $0x251] sm:$0xff]  ;;  %v2785_v29 = vld [vmem:[#allocation2 + $0x2c9] sm:$0xff]  ;;  %v6869_v41 = vpack.c.bf16 %v2784_v26, %v2783_v59 }
 0x279   : > { %5396 = vmatprep.subr.bf16.mxu1 %v6779_v45  ;;  %v6839_v5 = vpack.c.bf16 %v2778_v3, %v2777_v50  ;;  %v1839_v53 = vld [vmem:[#allocation2 + $0xe9] sm:$0xff]  ;;  %v6871_v11 = vpack.c.bf16 %v2786_v31, %v2785_v29  ;;  %v5776_v47 = vld [vmem:[%s7550_s4 + $0x38] sm:$0xff]  }
 0x27a   : > { %v1323_v35 = vld [vmem:[#allocation2 + $0x2cf] sm:$0xff]  ;;  %v1876_v50 = vpack.c.bf16 %v1840_v12, %v1839_v53  ;;  %v3094_v32 = vld [vmem:[#allocation2 + $0x307] sm:$0xff] }
 0x27b   : > { %5333 = vmatmul.mubr.msk.bf16.gmra.mrb[4].mxu1 %vm661_vm2, %v6788_v33  ;;  %v6877_v3 = vpack.c.bf16 %v1323_v35, %v1322_v19  ;;  %v2787_v6 = vld [vmem:[#allocation2 + $0x2e9] sm:$0xff] }
 0x27c   : > { %5336 = vmatprep.mubr.msk.bf16.mxu1 %vm661_vm2, %v6791_v63  ;;  %v6882_v24 = vpack.c.bf16 %v2788_v55, %v2787_v6  ;;  %v3095_v27 = vld [vmem:[#allocation2 + $0x30f] sm:$0xff] }
 0x27d   : > { %v3116_v22 = vpack.c.bf16 %v3095_v27, %v3094_v32  ;;  %v3371_v8 = vld [vmem:[#allocation2 + $0x130] sm:$0xff]  ;;  %v3370_v14 = vld [vmem:[#allocation2 + $0x128] sm:$0xff] }
 0x27e   : > { %v3407_v0 = vpack.c.bf16 %v3371_v8, %v3370_v14  ;;  %v3373_v59 = vld [vmem:[#allocation2 + $0x150] sm:$0xff]  ;;  %v3372_v29 = vld [vmem:[#allocation2 + $0x148] sm:$0xff] }
 0x27f   : > { %5193 = vmatmul.mubr.msk.bf16.gmra.mrb[40].mxu0 %vm661_vm2, %v6797_v7  ;;  %v3375_v26 = vld [vmem:[#allocation2 + $0x170] sm:$0xff]  ;;  %v3408_v31 = vpack.c.bf16 %v3373_v59, %v3372_v29  ;;  %v3374_v53 = vld [vmem:[#allocation2 + $0x168] sm:$0xff] }
 0x280   : > { %5196 = vmatprep.mubr.msk.bf16.mxu0 %vm661_vm2, %v6799_v40  ;;  %v3409_v12 = vpack.c.bf16 %v3375_v26, %v3374_v53  ;;  %v3377_v35 = vld [vmem:[#allocation2 + $0x190] sm:$0xff] }
 0x283   : > { %5337 = vmatmul.mubr.msk.bf16.gmra.mrb[8].mxu1 %vm661_vm2, %v6805_v10 }
 0x284   : > { %5340 = vmatprep.mubr.msk.bf16.mxu1 %vm661_vm2, %v6807_v13 }
 0x287   : > { %5197 = vmatmul.mubr.msk.bf16.gmra.mrb[44].mxu0 %vm661_vm2, %v6813_v60 }
 0x288   : > { %5200 = vmatprep.mubr.msk.bf16.mxu0 %vm661_vm2, %v6815_v20 }
 0x28b   : > { %5341 = vmatmul.mubr.msk.bf16.gmra.mrb[12].mxu1 %vm661_vm2, %v6821_v38 }
 0x28c   : > { %5344 = vmatprep.mubr.msk.bf16.mxu1 %vm661_vm2, %v6823_v42 }
 0x28f   : > { %5201 = vmatmul.mubr.msk.bf16.gmra.mrb[48].mxu0 %vm661_vm2, %v6829_v44 }
 0x290   : > { %5204 = vmatprep.mubr.msk.bf16.mxu0 %vm661_vm2, %v6831_v48 }
 0x293   : > { %5345 = vmatmul.mubr.msk.bf16.gmra.mrb[16].mxu1 %vm661_vm2, %v6837_v51 }
 0x294   : > { %5348 = vmatprep.mubr.msk.bf16.mxu1 %vm661_vm2, %v6839_v5 }
 0x297   : > { %5205 = vmatmul.mubr.msk.bf16.gmra.mrb[52].mxu0 %vm661_vm2, %v6845_v43 }
 0x298   : > { %5208 = vmatprep.mubr.msk.bf16.mxu0 %vm661_vm2, %v6847_v18 }
 0x29b   : > { %5349 = vmatmul.mubr.msk.bf16.gmra.mrb[20].mxu1 %vm661_vm2, %v6853_v62 }
 0x29c   : > { %5352 = vmatprep.mubr.msk.bf16.mxu1 %vm661_vm2, %v6855_v37 }
 0x29f   : > { %5209 = vmatmul.mubr.msk.bf16.gmra.mrb[56].mxu0 %vm661_vm2, %v6861_v46 }
 0x2a0   : > { %5212 = vmatprep.mubr.msk.bf16.mxu0 %vm661_vm2, %v6863_v17 }
 0x2a3   : > { %5353 = vmatmul.mubr.msk.bf16.gmra.mrb[24].mxu1 %vm661_vm2, %v6869_v41 }
 0x2a4   : > { %5356 = vmatprep.mubr.msk.bf16.mxu1 %vm661_vm2, %v6871_v11 }
 0x2a7   : > { %5213 = vmatmul.mubr.msk.bf16.gmra.mrb[60].mxu0 %vm661_vm2, %v6877_v3 }
 0x2a8   : > { %5220 = vmatprep.mubr.msk.bf16.mxu0 %vm661_vm2, %v1876_v50 }
 0x2ab   : > { %5357 = vmatmul.mubr.msk.bf16.gmra.mrb[28].mxu1 %vm661_vm2, %v6882_v24 }
 0x2ac   : > { %5364 = vmatprep.mubr.msk.bf16.mxu1 %vm661_vm2, %v6750_v30 }
 0x2af   : > { %5221 = vmatmul.mubr.msk.bf16.vlgmr.msra.gmra.mrb[32].mxu0 %vm661_vm2, %v6739_v34  ;;  %v5777_v34 = vld [vmem:[%s7550_s4 + $0x80] sm:$0xff]  }
 0x2b0   : > { %5224 = vmatprep.mubr.msk.bf16.mxu0 %vm661_vm2, %v6757_v2  ;;  %5253 = vmatpush3.bf16.msra.mxu0 %v6767_v9  ;;  %v3093_v9 = vld [vmem:[#allocation2 + $0x2ef] sm:$0xff] }
 0x2b1   : > { %5254 = vmatprep.subr.bf16.mxu0 %v5776_v47 }
 0x2b3   : > { %5365 = vmatmul.mubr.msk.bf16.vlgmr.msra.gmra.mrb[0].mxu1 %vm661_vm2, %v6774_v36 }
 0x2b4   : > { %5368 = vmatprep.mubr.msk.bf16.mxu1 %vm661_vm2, %v6781_v54  ;;  %5397 = vmatpush3.bf16.msra.mxu1 %v6779_v45  ;;  %v3092_v45 = vld [vmem:[#allocation2 + $0x2e7] sm:$0xff] }
 0x2b5   : > { %5398 = vmatprep.subr.bf16.mxu1 %v5774_v28  ;;  %5255 = vmatpush3.bf16.msra.mxu0 %v5776_v47  ;;  %v3115_v49 = vpack.c.bf16 %v3093_v9, %v3092_v45 }
 0x2b7   : > { %5225 = vmatmul.mubr.msk.bf16.gmra.mrb[36].mxu0 %vm661_vm2, %v6762_v15 }
 0x2b8   : > { %5228 = vmatprep.mubr.msk.bf16.mxu0 %vm661_vm2, %v6788_v33  ;;  %5399 = vmatpush3.bf16.msra.mxu1 %v5774_v28 }
 0x2b9   : > { %5432 = vmatprep.subr.bf16.mxu1 %v5777_v34 }
 0x2bb   : > { %5369 = vmatmul.mubr.msk.bf16.gmra.mrb[4].mxu1 %vm661_vm2, %v6797_v7 }
 0x2bc   : > { %5372 = vmatprep.mubr.msk.bf16.mxu1 %vm661_vm2, %v6799_v40 }
 0x2bf   : > { %5229 = vmatmul.mubr.msk.bf16.gmra.mrb[40].mxu0 %vm661_vm2, %v6791_v63 }
 0x2c0   : > { %5232 = vmatprep.mubr.msk.bf16.mxu0 %vm661_vm2, %v6805_v10 }
 0x2c3   : > { %5373 = vmatmul.mubr.msk.bf16.gmra.mrb[8].mxu1 %vm661_vm2, %v6813_v60 }
 0x2c4   : > { %5376 = vmatprep.mubr.msk.bf16.mxu1 %vm661_vm2, %v6815_v20 }
 0x2c7   : > { %5233 = vmatmul.mubr.msk.bf16.gmra.mrb[44].mxu0 %vm661_vm2, %v6807_v13 }
 0x2c8   : > { %5236 = vmatprep.mubr.msk.bf16.mxu0 %vm661_vm2, %v6821_v38 }
 0x2cb   : > { %5377 = vmatmul.mubr.msk.bf16.gmra.mrb[12].mxu1 %vm661_vm2, %v6829_v44 }
 0x2cc   : > { %5380 = vmatprep.mubr.msk.bf16.mxu1 %vm661_vm2, %v6831_v48 }
 0x2cf   : > { %5237 = vmatmul.mubr.msk.bf16.gmra.mrb[48].mxu0 %vm661_vm2, %v6823_v42 }
 0x2d0   : > { %5240 = vmatprep.mubr.msk.bf16.mxu0 %vm661_vm2, %v6837_v51 }
 0x2d3   : > { %5381 = vmatmul.mubr.msk.bf16.gmra.mrb[16].mxu1 %vm661_vm2, %v6845_v43 }
 0x2d4   : > { %5384 = vmatprep.mubr.msk.bf16.mxu1 %vm661_vm2, %v6847_v18 }
 0x2d7   : > { %5241 = vmatmul.mubr.msk.bf16.gmra.mrb[52].mxu0 %vm661_vm2, %v6839_v5 }
 0x2d8   : > { %5244 = vmatprep.mubr.msk.bf16.mxu0 %vm661_vm2, %v6853_v62 }
 0x2db   : > { %5385 = vmatmul.mubr.msk.bf16.gmra.mrb[20].mxu1 %vm661_vm2, %v6861_v46 }
 0x2dc   : > { %5388 = vmatprep.mubr.msk.bf16.mxu1 %vm661_vm2, %v6863_v17 }
 0x2df   : > { %5245 = vmatmul.mubr.msk.bf16.gmra.mrb[56].mxu0 %vm661_vm2, %v6855_v37 }
 0x2e0   : > { %5248 = vmatprep.mubr.msk.bf16.mxu0 %vm661_vm2, %v6869_v41 }
 0x2e3   : > { %5389 = vmatmul.mubr.msk.bf16.gmra.mrb[24].mxu1 %vm661_vm2, %v6877_v3 }
 0x2e4   : > { %5392 = vmatprep.mubr.msk.bf16.mxu1 %vm661_vm2, %v3115_v49 }
 0x2e7   : > { %5249 = vmatmul.mubr.msk.bf16.gmra.mrb[60].mxu0 %vm661_vm2, %v6871_v11 }
 0x2e8   : > { %5256 = vmatprep.mubr.msk.bf16.mxu0 %vm661_vm2, %v6745_v25  ;;  %v5778_v25 = vld [vmem:[%s7550_s4 + $0x88] sm:$0xff]  }
 0x2eb   : > { %5393 = vmatmul.mubr.msk.bf16.gmra.mrb[28].mxu1 %vm661_vm2, %v3116_v22 }
 0x2ec   : > { %5400 = vmatprep.mubr.msk.bf16.mxu1 %vm661_vm2, %v3407_v0 }
 0x2ef   : > { %5257 = vmatmul.mubr.msk.bf16.vlgmr.msra.gmra.mrb[32].mxu0 %vm661_vm2, %v6750_v30  ;;  %v3376_v30 = vld [vmem:[#allocation2 + $0x188] sm:$0xff] }
 0x2f0   : > { %5260 = vmatprep.mubr.msk.bf16.mxu0 %vm661_vm2, %v6774_v36  ;;  %v3410_v36 = vpack.c.bf16 %v3377_v35, %v3376_v30 }
 0x2f3   : > { %5401 = vmatmul.mubr.msk.bf16.vlgmr.msra.gmra.mrb[0].mxu1 %vm661_vm2, %v3408_v31 }
 0x2f4   : > { %5404 = vmatprep.mubr.msk.bf16.mxu1 %vm661_vm2, %v3409_v12  ;;  %5433 = vmatpush3.bf16.msra.mxu1 %v5777_v34 }
 0x2f5   : > { %5434 = vmatprep.subr.bf16.mxu1 %v5778_v25 }
 0x2f7   : > { %5261 = vmatmul.mubr.msk.bf16.gmra.mrb[36].mxu0 %vm661_vm2, %v6781_v54 }
 0x2f8   : > { %5264 = vmatprep.mubr.msk.bf16.mxu0 %vm661_vm2, %v6797_v7  ;;  %5435 = vmatpush3.bf16.msra.mxu1 %v5778_v25 }
 0x2fb   : > { %5405 = vmatmul.mubr.msk.bf16.gmra.mrb[4].mxu1 %vm661_vm2, %v3410_v36 }
 0x2fc   : > { %5408 = vmatprep.mubr.msk.bf16.mxu1 %vm661_vm2, %v6620_v57  ;;  %v3400_v57 = vld [vmem:[#allocation2 + $0x308] sm:$0xff] }
 0x2ff   : > { %5265 = vmatmul.mubr.msk.bf16.gmra.mrb[40].mxu0 %vm661_vm2, %v6799_v40 }
 0x300   : > { %5268 = vmatprep.mubr.msk.bf16.mxu0 %vm661_vm2, %v6813_v60 }
 0x303   : > { %5409 = vmatmul.mubr.msk.bf16.gmra.mrb[8].mxu1 %vm661_vm2, %v6634_v58  ;;  %v3401_v58 = vld [vmem:[#allocation2 + $0x310] sm:$0xff] }
 0x304   : > { %5412 = vmatprep.mubr.msk.bf16.mxu1 %vm661_vm2, %v6648_v1  ;;  %v3422_v1 = vpack.c.bf16 %v3401_v58, %v3400_v57 }
 0x307   : > { %5269 = vmatmul.mubr.msk.bf16.gmra.mrb[44].mxu0 %vm661_vm2, %v6815_v20 }
 0x308   : > { %5272 = vmatprep.mubr.msk.bf16.mxu0 %vm661_vm2, %v6829_v44 }
 0x30b   : > { %5413 = vmatmul.mubr.msk.bf16.gmra.mrb[12].mxu1 %vm661_vm2, %v6662_v39  ;;  %v3706_v39 = vld [vmem:[#allocation2 + $0x309] sm:$0xff] }
 0x30c   : > { %5416 = vmatprep.mubr.msk.bf16.mxu1 %vm661_vm2, %v6676_v21  ;;  %v3707_v21 = vld [vmem:[#allocation2 + $0x311] sm:$0xff] }
 0x30f   : > { %5273 = vmatmul.mubr.msk.bf16.gmra.mrb[48].mxu0 %vm661_vm2, %v6831_v48 }
 0x310   : > { %5276 = vmatprep.mubr.msk.bf16.mxu0 %vm661_vm2, %v6845_v43 }
 0x313   : > { %5417 = vmatmul.mubr.msk.bf16.gmra.mrb[16].mxu1 %vm661_vm2, %v6690_v23  ;;  %v3728_v23 = vpack.c.bf16 %v3707_v21, %v3706_v39 }
 0x314   : > { %5420 = vmatprep.mubr.msk.bf16.mxu1 %vm661_vm2, %v6704_v56 }
 0x317   : > { %5277 = vmatmul.mubr.msk.bf16.gmra.mrb[52].mxu0 %vm661_vm2, %v6847_v18 }
 0x318   : > { %5280 = vmatprep.mubr.msk.bf16.mxu0 %vm661_vm2, %v6861_v46 }
 0x31b   : > { %5421 = vmatmul.mubr.msk.bf16.gmra.mrb[20].mxu1 %vm661_vm2, %v6716_v52 }
 0x31c   : > { %5424 = vmatprep.mubr.msk.bf16.mxu1 %vm661_vm2, %v6724_v16 }
 0x31f   : > { %5281 = vmatmul.mubr.msk.bf16.gmra.mrb[56].mxu0 %vm661_vm2, %v6863_v17 }
 0x320   : > { %5284 = vmatprep.mubr.msk.bf16.mxu0 %vm661_vm2, %v6877_v3 }
 0x323   : > { %5425 = vmatmul.mubr.msk.bf16.gmra.mrb[24].mxu1 %vm661_vm2, %v6730_v61 }
 0x324   : > { %5428 = vmatprep.mubr.msk.bf16.mxu1 %vm661_vm2, %v6736_v4 }
 0x327   : > { %5285 = vmatmul.mubr.msk.bf16.gmra.mrb[60].mxu0 %vm661_vm2, %v3115_v49 }
 0x32b   : > { %5429 = vmatmul.mubr.msk.bf16.gmra.mrb[28].mxu1 %vm661_vm2, %v3422_v1 }
 0x32c   : > { %5436 = vmatprep.mubr.msk.bf16.mxu1 %vm661_vm2, %v6757_v2 }
 0x333   : > { %5437 = vmatmul.mubr.msk.bf16.vlgmr.msra.gmra.mrb[0].mxu1 %vm661_vm2, %v6762_v15 }
 0x334   : > { %5440 = vmatprep.mubr.msk.bf16.mxu1 %vm661_vm2, %v6788_v33 }
 0x33b   : > { %5441 = vmatmul.mubr.msk.bf16.gmra.mrb[4].mxu1 %vm661_vm2, %v6791_v63 }
 0x33c   : > { %5444 = vmatprep.mubr.msk.bf16.mxu1 %vm661_vm2, %v6805_v10 }
 0x343   : > { %5445 = vmatmul.mubr.msk.bf16.gmra.mrb[8].mxu1 %vm661_vm2, %v6807_v13 }
 0x344   : > { %5448 = vmatprep.mubr.msk.bf16.mxu1 %vm661_vm2, %v6821_v38 }
 0x34b   : > { %5449 = vmatmul.mubr.msk.bf16.gmra.mrb[12].mxu1 %vm661_vm2, %v6823_v42 }
 0x34c   : > { %5452 = vmatprep.mubr.msk.bf16.mxu1 %vm661_vm2, %v6837_v51 }
 0x353   : > { %5453 = vmatmul.mubr.msk.bf16.gmra.mrb[16].mxu1 %vm661_vm2, %v6839_v5 }
 0x354   : > { %5456 = vmatprep.mubr.msk.bf16.mxu1 %vm661_vm2, %v6853_v62 }
 0x35b   : > { %5457 = vmatmul.mubr.msk.bf16.gmra.mrb[20].mxu1 %vm661_vm2, %v6855_v37 }
 0x35c   : > { %5460 = vmatprep.mubr.msk.bf16.mxu1 %vm661_vm2, %v6869_v41 }
 0x363   : > { %5461 = vmatmul.mubr.msk.bf16.gmra.mrb[24].mxu1 %vm661_vm2, %v6871_v11 }
 0x364   : > { %5464 = vmatprep.mubr.msk.bf16.mxu1 %vm661_vm2, %v6882_v24 }
 0x36b   : > { %5465 = vmatmul.mubr.msk.bf16.gmra.mrb[28].mxu1 %vm661_vm2, %v3728_v23 }
 0x3c2   : > { %v5258_v56 = vpop.f32.mrb[32].mxu0 }
 0x3c3   : > { %v2292_v52 = vpop.f32.mrb[33].mxu0 }
 0x3c4   : > { %v5259_v16 = vpop.f32.mrb[34].mxu0 }
 0x3c5   : > { %v2295_v61 = vpop.f32.mrb[35].mxu0 }
 0x3ca   : > { %v5262_v4 = vpop.f32.mrb[36].mxu0 }
 0x3cb   : > { %v2308_v2 = vpop.f32.mrb[37].mxu0 }
 0x3cc   : > { %v5263_v15 = vpop.f32.mrb[38].mxu0 }
 0x3cd   : > { %v2311_v54 = vpop.f32.mrb[39].mxu0 }
 0x3d2   : > { %v5266_v33 = vpop.f32.mrb[40].mxu0 }
 0x3d3   : > { %v2324_v63 = vpop.f32.mrb[41].mxu0 }
 0x3d4   : > { %v5267_v7 = vpop.f32.mrb[42].mxu0 }
 0x3d5   : > { %v2327_v40 = vpop.f32.mrb[43].mxu0 }
 0x3da   : > { %v5270_v10 = vpop.f32.mrb[44].mxu0 }
 0x3db   : > { %v2340_v13 = vpop.f32.mrb[45].mxu0 }
 0x3dc   : > { %v5271_v60 = vpop.f32.mrb[46].mxu0 }
 0x3dd   : > { %v2343_v20 = vpop.f32.mrb[47].mxu0 }
 0x3e2   : > { %v5274_v38 = vpop.f32.mrb[48].mxu0 }
 0x3e3   : > { %v2356_v42 = vpop.f32.mrb[49].mxu0 }
 0x3e4   : > { %v5275_v44 = vpop.f32.mrb[50].mxu0 }
 0x3e5   : > { %v2359_v48 = vpop.f32.mrb[51].mxu0 }
 0x3ea   : > { %v5278_v51 = vpop.f32.mrb[52].mxu0 }
 0x3eb   : > { %v7049_v5 = vpop.f32.mrb[53].mxu0 }
 0x3ec   : > { %v7051_v43 = vpop.f32.mrb[54].mxu0 }
 0x3ed   : > { %v7053_v18 = vpop.f32.mrb[55].mxu0 }
 0x3f2   : > { %v7055_v62 = vpop.f32.mrb[56].mxu0 }
 0x3f3   : > { %v7057_v37 = vpop.f32.mrb[57].mxu0 }
 0x3f4   : > { %v7059_v46 = vpop.f32.mrb[58].mxu0 }
 0x3f5   : > { %v7061_v17 = vpop.f32.mrb[59].mxu0 }
 0x3fa   : > { %v7063_v41 = vpop.f32.mrb[60].mxu0 }
 0x3fb   : > { %v7065_v11 = vpop.f32.mrb[61].mxu0 }
 0x3fc   : > { %v7067_v19 = vpop.f32.mrb[62].mxu0 }
 0x3fd   : > { %v7069_v50 = vpop.f32.mrb[63].mxu0 }
 0x406   : > { %v5438_v3 = vpop.f32.mrb[0].mxu1 }
 0x407   : > { %v7071_v6 = vadd.f32 %v5438_v3, %v5258_v56  ;;  %v3823_v55 = vpop.f32.mrb[1].mxu1 }
 0x408   : > { %v7073_v24 = vadd.f32 %v3823_v55, %v2292_v52  ;;  %v5439_v47 = vpop.f32.mrb[2].mxu1 }
 0x409   : > { %v7075_v28 = vadd.f32 %v5439_v47, %v5259_v16  ;;  %v3826_v34 = vpop.f32.mrb[3].mxu1 }
 0x40a   : > { %v7077_v9 = vadd.f32 %v3826_v34, %v2295_v61  ;;  %v3982_v45 = vsel %vm661_vm2, %v7073_v24, 0.0 }
 0x40b   : > { %3983 = vadd.xlane.f32.xlu0 %v3982_v45 }
 0x40c   : > { %v3985_v49 = vsel %vm661_vm2, %v7077_v9, 0.0 }
 0x40d   : > { %3986 = vadd.xlane.f32.xlu1 %v3985_v49 }
 0x40e   : > { %v5442_v32 = vpop.f32.mrb[4].mxu1 }
 0x40f   : > { %v7083_v27 = vadd.f32 %v5442_v32, %v5262_v4  ;;  %v3839_v22 = vpop.f32.mrb[5].mxu1 }
 0x410   : > { %v7085_v8 = vadd.f32 %v3839_v22, %v2308_v2  ;;  %v5443_v14 = vpop.f32.mrb[6].mxu1 }
 0x411   : > { %v7087_v0 = vadd.f32 %v5443_v14, %v5263_v15  ;;  %v3842_v59 = vpop.f32.mrb[7].mxu1 }
 0x412   : > { %v7089_v26 = vadd.f32 %v3842_v59, %v2311_v54  ;;  %v3994_v34 = vsel %vm661_vm2, %v7085_v8, 0.0 }
 0x414   : > { %v3997_v32 = vsel %vm661_vm2, %v7089_v26, 0.0 }
 0x416   : > { %v5446_v29 = vpop.f32.mrb[8].mxu1 }
 0x417   : > { %v7091_v31 = vadd.f32 %v5446_v29, %v5266_v33  ;;  %v3855_v53 = vpop.f32.mrb[9].mxu1 }
 0x418   : > { %v7093_v25 = vadd.f32 %v3855_v53, %v2324_v63  ;;  %v5447_v12 = vpop.f32.mrb[10].mxu1  ;;  %v4000_v53 = vsel %vm661_vm2, %v7083_v27, 0.0 }
 0x419   : > { %v7095_v35 = vadd.f32 %v5447_v12, %v5267_v7  ;;  %v3858_v30 = vpop.f32.mrb[11].mxu1 }
 0x41a   : > { %v7097_v36 = vadd.f32 %v3858_v30, %v2327_v40 }
 0x41e   : > { %v5450_v57 = vpop.f32.mrb[12].mxu1 }
 0x41f   : > { %v7099_v58 = vadd.f32 %v5450_v57, %v5270_v10  ;;  %v3871_v1 = vpop.f32.mrb[13].mxu1  ;;  %v4003_v57 = vsel %vm661_vm2, %v7087_v0, 0.0 }
 0x420   : > { %v7101_v39 = vadd.f32 %v3871_v1, %v2340_v13  ;;  %v5451_v21 = vpop.f32.mrb[14].mxu1  ;;  %v3988_v13 = vsel %vm661_vm2, %v7071_v6, 0.0 }
 0x421   : > { %v7103_v23 = vadd.f32 %v5451_v21, %v5271_v60  ;;  %v3874_v56 = vpop.f32.mrb[15].mxu1 }
 0x422   : > { %v7105_v52 = vadd.f32 %v3874_v56, %v2343_v20 }
 0x426   : > { %v5454_v16 = vpop.f32.mrb[16].mxu1 }
 0x427   : > { %v7107_v61 = vadd.f32 %v5454_v16, %v5274_v38  ;;  %v3887_v4 = vpop.f32.mrb[17].mxu1  ;;  %v4006_v16 = vsel %vm661_vm2, %v7093_v25, 0.0 }
 0x428   : > { %v7109_v2 = vadd.f32 %v3887_v4, %v2356_v42  ;;  %v5455_v15 = vpop.f32.mrb[18].mxu1 }
 0x429   : > { %v7111_v54 = vadd.f32 %v5455_v15, %v5275_v44  ;;  %v3890_v33 = vpop.f32.mrb[19].mxu1  ;;  %v3991_v44 = vsel %vm661_vm2, %v7075_v28, 0.0  ;;  %v4012_v15 = vsel %vm661_vm2, %v7091_v31, 0.0 }
 0x42a   : > { %v7113_v63 = vadd.f32 %v3890_v33, %v2359_v48  ;;  %v4030_v7 = vsel %vm661_vm2, %v7109_v2, 0.0  ;;  %v4015_v33 = vsel %vm661_vm2, %v7095_v35, 0.0 }
 0x42b   : > { %4031 = vadd.xlane.f32.xlu0 %v4030_v7 }
 0x42c   : > { %v4033_v40 = vsel %vm661_vm2, %v7113_v63, 0.0 }
 0x42d   : > { %4034 = vadd.xlane.f32.xlu1 %v4033_v40 }
 0x42e   : > { %v5458_v10 = vpop.f32.mrb[20].mxu1 }
 0x42f   : > { %v7121_v60 = vadd.f32 %v5458_v10, %v5278_v51  ;;  %3989 = vadd.xlane.f32.xlu0 %v3988_v13  ;;  %v3903_v20 = vpop.f32.mrb[21].mxu1  ;;  %v4036_v51 = vsel %vm661_vm2, %v7107_v61, 0.0  ;;  %v4018_v10 = vsel %vm661_vm2, %v7101_v39, 0.0  ;;  %v4021_v13 = vsel %vm661_vm2, %v7105_v52, 0.0 }
 0x430   : > { %v7124_v38 = vadd.f32 %v3903_v20, %v7049_v5  ;;  %v5459_v42 = vpop.f32.mrb[22].mxu1  ;;  %v4039_v5 = vsel %vm661_vm2, %v7111_v54, 0.0 }
 0x431   : > { %v7129_v48 = vadd.f32 %v5459_v42, %v7051_v43  ;;  %3992 = vadd.xlane.f32.xlu1 %v3991_v44  ;;  %v3906_v3 = vpop.f32.mrb[23].mxu1  ;;  %v4024_v44 = vsel %vm661_vm2, %v7099_v58, 0.0 }
 0x432   : > { %v7132_v55 = vadd.f32 %v3906_v3, %v7053_v18  ;;  %v4027_v3 = vsel %vm661_vm2, %v7103_v23, 0.0 }
 0x433   : > { %4037 = vadd.xlane.f32.xlu0 %v4036_v51 }
 0x435   : > { %4040 = vadd.xlane.f32.xlu1 %v4039_v5 }
 0x436   : > { %v5462_v47 = vpop.f32.mrb[24].mxu1 }
 0x437   : > { %v7141_v43 = vadd.f32 %v5462_v47, %v7055_v62  ;;  %3995 = vadd.xlane.f32.xlu0 %v3994_v34  ;;  %v3919_v45 = vpop.f32.mrb[25].mxu1  ;;  %v4042_v62 = vsel %vm661_vm2, %v7124_v38, 0.0 }
 0x438   : > { %v7144_v18 = vadd.f32 %v3919_v45, %v7057_v37  ;;  %v5463_v49 = vpop.f32.mrb[26].mxu1  ;;  %v4045_v37 = vsel %vm661_vm2, %v7132_v55, 0.0 }
 0x439   : > { %v7149_v22 = vadd.f32 %v5463_v49, %v7059_v46  ;;  %3998 = vadd.xlane.f32.xlu1 %v3997_v32  ;;  %v3922_v14 = vpop.f32.mrb[27].mxu1  ;;  %v4060_v7 = vsel %vm661_vm2, %v7141_v43, 0.0 }
 0x43a   : > { %v7152_v59 = vadd.f32 %v3922_v14, %v7061_v17 }
 0x43b   : > { %4043 = vadd.xlane.f32.xlu0 %v4042_v62  ;;  %v4063_v40 = vsel %vm661_vm2, %v7149_v22, 0.0 }
 0x43c   : > { %v4057_v4 = vsel %vm661_vm2, %v7152_v59, 0.0 }
 0x43d   : > { %4046 = vadd.xlane.f32.xlu1 %v4045_v37 }
 0x43e   : > { %v5466_v29 = vpop.f32.mrb[28].mxu1 }
 0x43f   : > { %v7161_v46 = vadd.f32 %v5466_v29, %v7063_v41  ;;  %4001 = vadd.xlane.f32.xlu0 %v4000_v53  ;;  %v3935_v12 = vpop.f32.mrb[29].mxu1  ;;  %v4048_v41 = vsel %vm661_vm2, %v7121_v60, 0.0 }
 0x440   : > { %v7164_v17 = vadd.f32 %v3935_v12, %v7065_v11  ;;  %v5467_v30 = vpop.f32.mrb[30].mxu1  ;;  %v4051_v11 = vsel %vm661_vm2, %v7129_v48, 0.0 }
 0x441   : > { %v7169_v1 = vadd.f32 %v5467_v30, %v7067_v19  ;;  %4004 = vadd.xlane.f32.xlu1 %v4003_v57  ;;  %v3938_v21 = vpop.f32.mrb[31].mxu1  ;;  %v4009_v19 = vsel %vm661_vm2, %v7097_v36, 0.0  ;;  %v4072_v51 = vsel %vm661_vm2, %v7161_v46, 0.0 }
 0x442   : > { %v7172_v56 = vadd.f32 %v3938_v21, %v7069_v50  ;;  %v4054_v50 = vsel %vm661_vm2, %v7144_v18, 0.0  ;;  %v4066_v20 = vsel %vm661_vm2, %v7164_v17, 0.0 }
 0x443   : > { %4049 = vadd.xlane.f32.xlu0 %v4048_v41  ;;  %v4075_v5 = vsel %vm661_vm2, %v7169_v1, 0.0 }
 0x444   : > { %v4069_v42 = vsel %vm661_vm2, %v7172_v56, 0.0 }
 0x445   : > { %4052 = vadd.xlane.f32.xlu1 %v4051_v11 }
 0x447   : > { %4007 = vadd.xlane.f32.xlu0 %v4006_v16 }
 0x449   : > { %4010 = vadd.xlane.f32.xlu1 %v4009_v19 }
 0x44b   : > { %4055 = vadd.xlane.f32.xlu0 %v4054_v50 }
 0x44d   : > { %4058 = vadd.xlane.f32.xlu1 %v4057_v4 }
 0x44f   : > { %4013 = vadd.xlane.f32.xlu0 %v4012_v15 }
 0x451   : > { %4016 = vadd.xlane.f32.xlu1 %v4015_v33 }
 0x453   : > { %4061 = vadd.xlane.f32.xlu0 %v4060_v7 }
 0x455   : > { %4064 = vadd.xlane.f32.xlu1 %v4063_v40 }
 0x457   : > { %4019 = vadd.xlane.f32.xlu0 %v4018_v10 }
 0x459   : > { %4022 = vadd.xlane.f32.xlu1 %v4021_v13 }
 0x45b   : > { %4067 = vadd.xlane.f32.xlu0 %v4066_v20 }
 0x45d   : > { %4070 = vadd.xlane.f32.xlu1 %v4069_v42 }
 0x45f   : > { %4025 = vadd.xlane.f32.xlu0 %v4024_v44 }
 0x461   : > { %4028 = vadd.xlane.f32.xlu1 %v4027_v3 }
 0x463   : > { %4073 = vadd.xlane.f32.xlu0 %v4072_v51 }
 0x465   : > { %4076 = vadd.xlane.f32.xlu1 %v4075_v5 }
 0x498   : > { %v3984_v47 = vpop.xlane.xlu0 %3983 }
 0x499   : > { %v4078_v34 = vmul.f32 0.03125, %v3984_v47 }
 0x49a   : > { %v3987_v45 = vpop.xlane.xlu1 %3986 }
 0x49b   : > { %v7211_v49 = vsub.f32 %v7073_v24, %v4078_v34  ;;  %v4079_v32 = vmul.f32 0.03125, %v3987_v45 }
 0x49d   : > { %v7214_v14 = vsub.f32 %v7077_v9, %v4079_v32  ;;  %v4142_v62 = vmul.f32 %v7211_v49, %v7211_v49 }
 0x49f   : > { %v4174_v37 = vsel %vm661_vm2, %v4142_v62, 0.0  ;;  %v4143_v29 = vmul.f32 %v7214_v14, %v7214_v14 }
 0x4a0   : > { %4175 = vadd.xlane.f32.xlu0 %v4174_v37 }
 0x4a1   : > { %v4177_v53 = vsel %vm661_vm2, %v4143_v29, 0.0 }
 0x4a2   : > { %4178 = vadd.xlane.f32.xlu1 %v4177_v53 }
 0x4b8   : > { %v4032_v12 = vpop.xlane.xlu0 %4031 }
 0x4b9   : > { %v4094_v30 = vmul.f32 0.03125, %v4032_v12 }
 0x4ba   : > { %v4035_v24 = vpop.xlane.xlu1 %4034 }
 0x4bb   : > { %v7223_v57 = vsub.f32 %v7109_v2, %v4094_v30  ;;  %v4095_v9 = vmul.f32 0.03125, %v4035_v24 }
 0x4bc   : > { %v3990_v21 = vpop.xlane.xlu0 %3989 }
 0x4bd   : > { %v7226_v41 = vsub.f32 %v7113_v63, %v4095_v9  ;;  %v4080_v11 = vmul.f32 0.03125, %v3990_v21  ;;  %v4158_v16 = vmul.f32 %v7223_v57, %v7223_v57 }
 0x4be   : > { %v3993_v19 = vpop.xlane.xlu1 %3992 }
 0x4bf   : > { %v7231_v50 = vsub.f32 %v7071_v6, %v4080_v11  ;;  %v4081_v4 = vmul.f32 0.03125, %v3993_v19  ;;  %v4222_v15 = vsel %vm661_vm2, %v4158_v16, 0.0  ;;  %v4159_v2 = vmul.f32 %v7226_v41, %v7226_v41 }
 0x4c0   : > { %v4038_v33 = vpop.xlane.xlu0 %4037  ;;  %4223 = vadd.xlane.f32.xlu0 %v4222_v15 }
 0x4c1   : > { %v7237_v7 = vsub.f32 %v7075_v28, %v4081_v4  ;;  %v4096_v63 = vmul.f32 0.03125, %v4038_v33  ;;  %v4225_v40 = vsel %vm661_vm2, %v4159_v2, 0.0  ;;  %v4144_v10 = vmul.f32 %v7231_v50, %v7231_v50 }
 0x4c2   : > { %v4041_v13 = vpop.xlane.xlu1 %4040  ;;  %4226 = vadd.xlane.f32.xlu1 %v4225_v40 }
 0x4c3   : > { %v7243_v6 = vsub.f32 %v7107_v61, %v4096_v63  ;;  %v4097_v20 = vmul.f32 0.03125, %v4041_v13  ;;  %v4180_v42 = vsel %vm661_vm2, %v4144_v10, 0.0  ;;  %v4145_v44 = vmul.f32 %v7237_v7, %v7237_v7 }
 0x4c4   : > { %v3996_v3 = vpop.xlane.xlu0 %3995  ;;  %4181 = vadd.xlane.f32.xlu0 %v4180_v42 }
 0x4c5   : > { %v7249_v28 = vsub.f32 %v7111_v54, %v4097_v20  ;;  %v4082_v51 = vmul.f32 0.03125, %v3996_v3  ;;  %v4183_v5 = vsel %vm661_vm2, %v4145_v44, 0.0  ;;  %v4160_v47 = vmul.f32 %v7243_v6, %v7243_v6 }
 0x4c6   : > { %v3999_v34 = vpop.xlane.xlu1 %3998  ;;  %4184 = vadd.xlane.f32.xlu1 %v4183_v5 }
 0x4c7   : > { %v7255_v61 = vsub.f32 %v7085_v8, %v4082_v51  ;;  %v4083_v45 = vmul.f32 0.03125, %v3999_v34  ;;  %v4228_v32 = vsel %vm661_vm2, %v4160_v47, 0.0  ;;  %v4161_v62 = vmul.f32 %v7249_v28, %v7249_v28 }
 0x4c8   : > { %v4044_v37 = vpop.xlane.xlu0 %4043  ;;  %4229 = vadd.xlane.f32.xlu0 %v4228_v32 }
 0x4c9   : > { %v7261_v54 = vsub.f32 %v7089_v26, %v4083_v45  ;;  %v4098_v29 = vmul.f32 0.03125, %v4044_v37  ;;  %v4231_v53 = vsel %vm661_vm2, %v4161_v62, 0.0  ;;  %v4146_v12 = vmul.f32 %v7255_v61, %v7255_v61 }
 0x4ca   : > { %v4047_v30 = vpop.xlane.xlu1 %4046  ;;  %4232 = vadd.xlane.f32.xlu1 %v4231_v53 }
 0x4cb   : > { %v7267_v8 = vsub.f32 %v7124_v38, %v4098_v29  ;;  %v4099_v24 = vmul.f32 0.03125, %v4047_v30  ;;  %v4186_v9 = vsel %vm661_vm2, %v4146_v12, 0.0  ;;  %v4147_v21 = vmul.f32 %v7261_v54, %v7261_v54 }
 0x4cc   : > { %v4002_v11 = vpop.xlane.xlu0 %4001  ;;  %4187 = vadd.xlane.f32.xlu0 %v4186_v9 }
 0x4cd   : > { %v7273_v26 = vsub.f32 %v7132_v55, %v4099_v24  ;;  %v4084_v16 = vmul.f32 0.03125, %v4002_v11  ;;  %v4189_v19 = vsel %vm661_vm2, %v4147_v21, 0.0  ;;  %v4162_v4 = vmul.f32 %v7267_v8, %v7267_v8 }
 0x4ce   : > { %v4005_v15 = vpop.xlane.xlu1 %4004  ;;  %4190 = vadd.xlane.f32.xlu1 %v4189_v19 }
 0x4cf   : > { %v7279_v38 = vsub.f32 %v7083_v27, %v4084_v16  ;;  %v4085_v2 = vmul.f32 0.03125, %v4005_v15  ;;  %v4234_v33 = vsel %vm661_vm2, %v4162_v4, 0.0  ;;  %v4163_v63 = vmul.f32 %v7273_v26, %v7273_v26 }
 0x4d0   : > { %v4050_v40 = vpop.xlane.xlu0 %4049  ;;  %4235 = vadd.xlane.f32.xlu0 %v4234_v33 }
 0x4d1   : > { %v7285_v55 = vsub.f32 %v7087_v0, %v4085_v2  ;;  %v4100_v10 = vmul.f32 0.03125, %v4050_v40  ;;  %v4237_v13 = vsel %vm661_vm2, %v4163_v63, 0.0  ;;  %v4148_v20 = vmul.f32 %v7279_v38, %v7279_v38 }
 0x4d2   : > { %v4053_v42 = vpop.xlane.xlu1 %4052  ;;  %4238 = vadd.xlane.f32.xlu1 %v4237_v13 }
 0x4d3   : > { %v7291_v27 = vsub.f32 %v7121_v60, %v4100_v10  ;;  %v4101_v44 = vmul.f32 0.03125, %v4053_v42  ;;  %v4192_v3 = vsel %vm661_vm2, %v4148_v20, 0.0  ;;  %v4149_v51 = vmul.f32 %v7285_v55, %v7285_v55 }
 0x4d4   : > { %v4008_v5 = vpop.xlane.xlu0 %4007  ;;  %4193 = vadd.xlane.f32.xlu0 %v4192_v3 }
 0x4d5   : > { %v7297_v0 = vsub.f32 %v7129_v48, %v4101_v44  ;;  %v4086_v47 = vmul.f32 0.03125, %v4008_v5  ;;  %v4195_v34 = vsel %vm661_vm2, %v4149_v51, 0.0  ;;  %v4164_v45 = vmul.f32 %v7291_v27, %v7291_v27 }
 0x4d6   : > { %v4011_v32 = vpop.xlane.xlu1 %4010  ;;  %4196 = vadd.xlane.f32.xlu1 %v4195_v34 }
 0x4d7   : > { %v7303_v60 = vsub.f32 %v7093_v25, %v4086_v47  ;;  %v4087_v62 = vmul.f32 0.03125, %v4011_v32  ;;  %v4240_v37 = vsel %vm661_vm2, %v4164_v45, 0.0  ;;  %v4165_v29 = vmul.f32 %v7297_v0, %v7297_v0 }
 0x4d8   : > { %v4056_v53 = vpop.xlane.xlu0 %4055  ;;  %4241 = vadd.xlane.f32.xlu0 %v4240_v37 }
 0x4d9   : > { %v7309_v48 = vsub.f32 %v7097_v36, %v4087_v62  ;;  %v4102_v12 = vmul.f32 0.03125, %v4056_v53  ;;  %v4243_v30 = vsel %vm661_vm2, %v4165_v29, 0.0  ;;  %v4150_v24 = vmul.f32 %v7303_v60, %v7303_v60 }
 0x4da   : > { %v4059_v9 = vpop.xlane.xlu1 %4058  ;;  %4244 = vadd.xlane.f32.xlu1 %v4243_v30 }
 0x4db   : > { %v7315_v25 = vsub.f32 %v7144_v18, %v4102_v12  ;;  %v4103_v21 = vmul.f32 0.03125, %v4059_v9  ;;  %v4198_v11 = vsel %vm661_vm2, %v4150_v24, 0.0  ;;  %v4151_v16 = vmul.f32 %v7309_v48, %v7309_v48 }
 0x4dc   : > { %v4014_v19 = vpop.xlane.xlu0 %4013  ;;  %4199 = vadd.xlane.f32.xlu0 %v4198_v11 }
 0x4dd   : > { %v7321_v36 = vsub.f32 %v7152_v59, %v4103_v21  ;;  %v4088_v4 = vmul.f32 0.03125, %v4014_v19  ;;  %v4201_v15 = vsel %vm661_vm2, %v4151_v16, 0.0  ;;  %v4166_v2 = vmul.f32 %v7315_v25, %v7315_v25 }
 0x4de   : > { %v4017_v33 = vpop.xlane.xlu1 %4016  ;;  %4202 = vadd.xlane.f32.xlu1 %v4201_v15 }
 0x4df   : > { %v7327_v18 = vsub.f32 %v7091_v31, %v4088_v4  ;;  %v4089_v63 = vmul.f32 0.03125, %v4017_v33  ;;  %v4246_v40 = vsel %vm661_vm2, %v4166_v2, 0.0  ;;  %v4167_v10 = vmul.f32 %v7321_v36, %v7321_v36 }
 0x4e0   : > { %v4062_v13 = vpop.xlane.xlu0 %4061  ;;  %4247 = vadd.xlane.f32.xlu0 %v4246_v40 }
 0x4e1   : > { %v7333_v59 = vsub.f32 %v7095_v35, %v4089_v63  ;;  %v4104_v20 = vmul.f32 0.03125, %v4062_v13  ;;  %v4249_v42 = vsel %vm661_vm2, %v4167_v10, 0.0  ;;  %v4152_v44 = vmul.f32 %v7327_v18, %v7327_v18 }
 0x4e2   : > { %v4065_v3 = vpop.xlane.xlu1 %4064  ;;  %4250 = vadd.xlane.f32.xlu1 %v4249_v42 }
 0x4e3   : > { %v7339_v31 = vsub.f32 %v7141_v43, %v4104_v20  ;;  %v4105_v51 = vmul.f32 0.03125, %v4065_v3  ;;  %v4204_v5 = vsel %vm661_vm2, %v4152_v44, 0.0  ;;  %v4153_v47 = vmul.f32 %v7333_v59, %v7333_v59 }
 0x4e4   : > { %v4020_v34 = vpop.xlane.xlu0 %4019  ;;  %4205 = vadd.xlane.f32.xlu0 %v4204_v5 }
 0x4e5   : > { %v7345_v35 = vsub.f32 %v7149_v22, %v4105_v51  ;;  %v4090_v45 = vmul.f32 0.03125, %v4020_v34  ;;  %v4207_v32 = vsel %vm661_vm2, %v4153_v47, 0.0  ;;  %v4168_v62 = vmul.f32 %v7339_v31, %v7339_v31 }
 0x4e6   : > { %v4023_v37 = vpop.xlane.xlu1 %4022  ;;  %4208 = vadd.xlane.f32.xlu1 %v4207_v32 }
 0x4e7   : > { %v7351_v43 = vsub.f32 %v7101_v39, %v4090_v45  ;;  %v4091_v29 = vmul.f32 0.03125, %v4023_v37  ;;  %v4252_v53 = vsel %vm661_vm2, %v4168_v62, 0.0  ;;  %v4169_v12 = vmul.f32 %v7345_v35, %v7345_v35 }
 0x4e8   : > { %4253 = vadd.xlane.f32.xlu0 %v4252_v53  ;;  %v4068_v22 = vpop.xlane.xlu0 %4067  ;;  %v4494_v53 = vld [vmem:[%s7554_s8] sm:$0xff] }
 0x4e9   : > { %v7357_v30 = vsub.f32 %v7105_v52, %v4091_v29  ;;  %v4106_v24 = vmul.f32 0.03125, %v4068_v22  ;;  %v4255_v9 = vsel %vm661_vm2, %v4169_v12, 0.0  ;;  %v4154_v21 = vmul.f32 %v7351_v43, %v7351_v43  ;;  %v4495_v12 = vld [vmem:[%s7554_s8 + $0x8] sm:$0xff] }
 0x4ea   : > { %4256 = vadd.xlane.f32.xlu1 %v4255_v9  ;;  %v4071_v39 = vpop.xlane.xlu1 %4070  ;;  %v5917_v22 = vmov 0  }
 0x4eb   : > { %v7363_v11 = vsub.f32 %v7164_v17, %v4106_v24  ;;  %v4107_v16 = vmul.f32 0.03125, %v4071_v39  ;;  %v4210_v19 = vsel %vm661_vm2, %v4154_v21, 0.0  ;;  %v4155_v4 = vmul.f32 %v7357_v30, %v7357_v30  ;;  %5743 = vset.pattern.permute.xlu0 %v5917_v22  ;;  %5744 = vset.pattern.permute.xlu1 %v5917_v22  ;;  %v7420_v22 = vld [vmem:[%s7551_s5] ss:$0 sm:$0xff] }
 0x4ec   : > { %4211 = vadd.xlane.f32.xlu0 %v4210_v19  ;;  %v4026_v52 = vpop.xlane.xlu0 %4025 }
 0x4ed   : > { %v7369_v15 = vsub.f32 %v7172_v56, %v4107_v16  ;;  %v4092_v2 = vmul.f32 0.03125, %v4026_v52  ;;  %v4213_v33 = vsel %vm661_vm2, %v4155_v4, 0.0  ;;  %v4170_v63 = vmul.f32 %v7363_v11, %v7363_v11 }
 0x4ee   : > { %4214 = vadd.xlane.f32.xlu1 %v4213_v33  ;;  %v4029_v17 = vpop.xlane.xlu1 %4028 }
 0x4ef   : > { %v7375_v40 = vsub.f32 %v7099_v58, %v4092_v2  ;;  %v4093_v10 = vmul.f32 0.03125, %v4029_v17  ;;  %v4258_v13 = vsel %vm661_vm2, %v4170_v63, 0.0  ;;  %v4171_v20 = vmul.f32 %v7369_v15, %v7369_v15 }
 0x4f0   : > { %4259 = vadd.xlane.f32.xlu0 %v4258_v13  ;;  %v4074_v56 = vpop.xlane.xlu0 %4073 }
 0x4f1   : > { %v7381_v42 = vsub.f32 %v7103_v23, %v4093_v10  ;;  %v4108_v44 = vmul.f32 0.03125, %v4074_v56  ;;  %v4261_v3 = vsel %vm661_vm2, %v4171_v20, 0.0  ;;  %v4156_v51 = vmul.f32 %v7375_v40, %v7375_v40 }
 0x4f2   : > { %4262 = vadd.xlane.f32.xlu1 %v4261_v3  ;;  %v4077_v58 = vpop.xlane.xlu1 %4076 }
 0x4f3   : > { %v7387_v5 = vsub.f32 %v7161_v46, %v4108_v44  ;;  %v4109_v47 = vmul.f32 0.03125, %v4077_v58  ;;  %v4216_v34 = vsel %vm661_vm2, %v4156_v51, 0.0  ;;  %v4157_v45 = vmul.f32 %v7381_v42, %v7381_v42 }
 0x4f4   : > { %4217 = vadd.xlane.f32.xlu0 %v4216_v34 }
 0x4f5   : > { %v7393_v23 = vsub.f32 %v7169_v1, %v4109_v47  ;;  %v4219_v32 = vsel %vm661_vm2, %v4157_v45, 0.0  ;;  %v4172_v62 = vmul.f32 %v7387_v5, %v7387_v5  ;;  %v7405_v1 = vld [vmem:[%s7553_s7] sm:$0xff]  }
 0x4f6   : > { %4220 = vadd.xlane.f32.xlu1 %v4219_v32  ;;  %5108 = vmatprep.mubr.msk.bf16.mxu0 %vm661_vm2, %v7405_v1 }
 0x4f7   : > { %v4264_v37 = vsel %vm661_vm2, %v4172_v62, 0.0  ;;  %v4173_v46 = vmul.f32 %v7393_v23, %v7393_v23 }
 0x4f8   : > { %4265 = vadd.xlane.f32.xlu0 %v4264_v37 }
 0x4f9   : > { %v4267_v29 = vsel %vm661_vm2, %v4173_v46, 0.0 }
 0x4fa   : > { %4268 = vadd.xlane.f32.xlu1 %v4267_v29 }
 0x50b   : > { %4503 = vperm.xlu1 %5744, %v4495_v12  }
 0x50e   : > { %4498 = vperm.xlu0 %5743, %v4494_v53  }
 0x52d   : > { %v4176_v9 = vpop.xlane.xlu0 %4175 }
 0x52e   : > { %v4270_v39 = vmul.f32 0.03125, %v4176_v9 }
 0x52f   : > { %v4179_v24 = vpop.xlane.xlu1 %4178 }
 0x530   : > { %v4271_v21 = vmul.f32 0.03125, %v4179_v24  ;;  %v4302_v19 = vadd.f32 1e-06, %v4270_v39 }
 0x532   : > { %v4303_v16 = vadd.f32 1e-06, %v4271_v21 }
 0x534   : > { %5844 = vrsqrt.f32 %v4303_v16 }
 0x535   : > { %5846 = vrsqrt.f32 %v4302_v19 }
 0x53e   : > { %v5845_v56 = vpop.eup %5844 }
 0x53f   : > { %v5847_v58 = vpop.eup %5846  ;;  %v4367_v32 = vmul.f32 %v5845_v56, %v7214_v14 }
 0x540   : > { %v4366_v29 = vmul.f32 %v5847_v58, %v7211_v49 }
 0x541   : > { %v4406_v9 = vmul.f32 %v7420_v22, %v4367_v32 }
 0x542   : > { %v4405_v49 = vmul.f32 %v7420_v22, %v4366_v29 }
 0x54d   : > { %v4224_v4 = vpop.xlane.xlu0 %4223 }
 0x54e   : > { %v4286_v52 = vmul.f32 0.03125, %v4224_v4 }
 0x54f   : > { %v4227_v2 = vpop.xlane.xlu1 %4226 }
 0x550   : > { %v4318_v33 = vadd.f32 1e-06, %v4286_v52  ;;  %v4287_v63 = vmul.f32 0.03125, %v4227_v2 }
 0x551   : > { %v4182_v17 = vpop.xlane.xlu0 %4181 }
 0x552   : > { %5848 = vrsqrt.f32 %v4318_v33  ;;  %v4319_v10 = vadd.f32 1e-06, %v4287_v63  ;;  %v4272_v13 = vmul.f32 0.03125, %v4182_v17  ;;  %v7428_v33 = vld [vmem:[%s7552_s6] ss:$0 sm:$0xff] }
 0x553   : > { %v4185_v20 = vpop.xlane.xlu1 %4184 }
 0x554   : > { %5850 = vrsqrt.f32 %v4319_v10  ;;  %v4304_v44 = vadd.f32 1e-06, %v4272_v13  ;;  %v4273_v3 = vmul.f32 0.03125, %v4185_v20  ;;  %v4445_v13 = vadd.f32 %v7428_v33, %v4406_v9 }
 0x555   : > { %v4230_v51 = vpop.xlane.xlu0 %4229 }
 0x556   : > { %5852 = vrsqrt.f32 %v4304_v44  ;;  %v4305_v47 = vadd.f32 1e-06, %v4273_v3  ;;  %v4288_v34 = vmul.f32 0.03125, %v4230_v51  ;;  %v4444_v51 = vadd.f32 %v7428_v33, %v4405_v49 }
 0x557   : > { %v4233_v45 = vpop.xlane.xlu1 %4232 }
 0x558   : > { %5854 = vrsqrt.f32 %v4305_v47  ;;  %v4320_v62 = vadd.f32 1e-06, %v4288_v34  ;;  %v4289_v37 = vmul.f32 0.03125, %v4233_v45 }
 0x559   : > { %v4188_v46 = vpop.xlane.xlu0 %4187 }
 0x55a   : > { %5856 = vrsqrt.f32 %v4320_v62  ;;  %v4321_v53 = vadd.f32 1e-06, %v4289_v37  ;;  %v4274_v12 = vmul.f32 0.03125, %v4188_v46  ;;  %v4478_v37 = vpack.c.bf16 %v4445_v13, %v4444_v51 }
 0x55b   : > { %v4191_v24 = vpop.xlane.xlu1 %4190 }
 0x55c   : > { %v5849_v21 = vpop.eup %5848  ;;  %5858 = vrsqrt.f32 %v4321_v53  ;;  %v4306_v14 = vadd.f32 1e-06, %v4274_v12  ;;  %v4275_v39 = vmul.f32 0.03125, %v4191_v24 }
 0x55d   : > { %v4382_v16 = vmul.f32 %v5849_v21, %v7223_v57  ;;  %v4236_v19 = vpop.xlane.xlu0 %4235 }
 0x55e   : > { %v5851_v4 = vpop.eup %5850  ;;  %5860 = vrsqrt.f32 %v4306_v14  ;;  %v4307_v52 = vadd.f32 1e-06, %v4275_v39  ;;  %v4290_v2 = vmul.f32 0.03125, %v4236_v19 }
 0x55f   : > { %v4383_v63 = vmul.f32 %v5851_v4, %v7226_v41  ;;  %v4239_v17 = vpop.xlane.xlu1 %4238  ;;  %v4421_v10 = vmul.f32 %v7420_v22, %v4382_v16  ;;  %v4515_v4 = vsel %vm661_vm2, %v4478_v37, 0 }
 0x560   : > { %v5853_v57 = vpop.eup %5852  ;;  %5862 = vrsqrt.f32 %v4307_v52  ;;  %v4322_v20 = vadd.f32 1e-06, %v4290_v2  ;;  %v4291_v56 = vmul.f32 0.03125, %v4239_v17 }
 0x561   : > { %v4194_v44 = vpop.xlane.xlu0 %4193  ;;  %v4422_v3 = vmul.f32 %v7420_v22, %v4383_v63  ;;  %v4368_v58 = vmul.f32 %v5853_v57, %v7231_v50  ;;  %v4460_v32 = vadd.f32 %v7428_v33, %v4421_v10 }
 0x562   : > { %v5855_v47 = vpop.eup %5854  ;;  %5864 = vrsqrt.f32 %v4322_v20  ;;  %v4323_v34 = vadd.f32 1e-06, %v4291_v56  ;;  %v4276_v41 = vmul.f32 0.03125, %v4194_v44 }
 0x563   : > { %v4197_v45 = vpop.xlane.xlu1 %4196  ;;  %v4461_v62 = vadd.f32 %v7428_v33, %v4422_v3  ;;  %v4369_v46 = vmul.f32 %v5855_v47, %v7237_v7  ;;  %v4407_v21 = vmul.f32 %v7420_v22, %v4368_v58 }
 0x564   : > { %v5857_v29 = vpop.eup %5856  ;;  %5866 = vrsqrt.f32 %v4323_v34  ;;  %v4308_v53 = vadd.f32 1e-06, %v4276_v41  ;;  %v4277_v12 = vmul.f32 0.03125, %v4197_v45 }
 0x565   : > { %v4384_v24 = vmul.f32 %v5857_v29, %v7243_v6  ;;  %v4242_v9 = vpop.xlane.xlu0 %4241  ;;  %v4486_v50 = vpack.c.bf16 %v4461_v62, %v4460_v32  ;;  %v4408_v14 = vmul.f32 %v7420_v22, %v4369_v46  ;;  %v4446_v57 = vadd.f32 %v7428_v33, %v4407_v21 }
 0x566   : > { %v5859_v39 = vpop.eup %5858  ;;  %5868 = vrsqrt.f32 %v4308_v53  ;;  %v4309_v16 = vadd.f32 1e-06, %v4277_v12  ;;  %v4292_v19 = vmul.f32 0.03125, %v4242_v9 }
 0x567   : > { %v4385_v49 = vmul.f32 %v5859_v39, %v7249_v28  ;;  %5725 = vmatprep.subr.msk.bf16.mxu0 %vm661_vm2, %v4486_v50  ;;  %v4245_v7 = vpop.xlane.xlu1 %4244  ;;  %v4423_v52 = vmul.f32 %v7420_v22, %v4384_v24  ;;  %v4447_v6 = vadd.f32 %v7428_v33, %v4408_v14 }
 0x568   : > { %v5861_v2 = vpop.eup %5860  ;;  %5870 = vrsqrt.f32 %v4309_v16  ;;  %v4324_v63 = vadd.f32 1e-06, %v4292_v19  ;;  %v4293_v17 = vmul.f32 0.03125, %v4245_v7  ;;  %5093 = vmatpush3.bf16.xpose.msra.mxu0 %v4515_v4 }
 0x569   : > { %v4200_v10 = vpop.xlane.xlu0 %4199  ;;  %v4424_v13 = vmul.f32 %v7420_v22, %v4385_v49  ;;  %v4370_v28 = vmul.f32 %v5861_v2, %v7255_v61  ;;  %v4462_v51 = vadd.f32 %v7428_v33, %v4423_v52  ;;  %v4479_v47 = vpack.c.bf16 %v4447_v6, %v4446_v57 }
 0x56a   : > { %v5863_v20 = vpop.eup %5862  ;;  %5872 = vrsqrt.f32 %v4324_v63  ;;  %v4325_v56 = vadd.f32 1e-06, %v4293_v17  ;;  %v4278_v44 = vmul.f32 0.03125, %v4200_v10 }
 0x56b   : > { %v4203_v3 = vpop.xlane.xlu1 %4202  ;;  %v4463_v58 = vadd.f32 %v7428_v33, %v4424_v13  ;;  %v4371_v34 = vmul.f32 %v5863_v20, %v7261_v54  ;;  %v4409_v46 = vmul.f32 %v7420_v22, %v4370_v28  ;;  %v4518_v50 = vsel %vm661_vm2, %v4479_v47, 0 }
 0x56c   : > { %v5865_v41 = vpop.eup %5864  ;;  %5874 = vrsqrt.f32 %v4325_v56  ;;  %v4310_v45 = vadd.f32 1e-06, %v4278_v44  ;;  %v4279_v32 = vmul.f32 0.03125, %v4203_v3 }
 0x56d   : > { %v4386_v62 = vmul.f32 %v5865_v41, %v7267_v8  ;;  %v4248_v37 = vpop.xlane.xlu0 %4247  ;;  %v4487_v61 = vpack.c.bf16 %v4463_v58, %v4462_v51  ;;  %v4410_v29 = vmul.f32 %v7420_v22, %v4371_v34  ;;  %v4448_v7 = vadd.f32 %v7428_v33, %v4409_v46 }
 0x56e   : > { %v5867_v53 = vpop.eup %5866  ;;  %5876 = vrsqrt.f32 %v4310_v45  ;;  %v4311_v12 = vadd.f32 1e-06, %v4279_v32  ;;  %v4294_v24 = vmul.f32 0.03125, %v4248_v37 }
 0x56f   : > { %v4387_v9 = vmul.f32 %v5867_v53, %v7273_v26  ;;  %5726 = vmatprep.subr.msk.bf16.mxu0 %vm661_vm2, %v4487_v61  ;;  %v4251_v54 = vpop.xlane.xlu1 %4250  ;;  %v4425_v21 = vmul.f32 %v7420_v22, %v4386_v62  ;;  %v4449_v8 = vadd.f32 %v7428_v33, %v4410_v29 }
 0x570   : > { %v5869_v14 = vpop.eup %5868  ;;  %5878 = vrsqrt.f32 %v4311_v12  ;;  %v4326_v39 = vadd.f32 1e-06, %v4294_v24  ;;  %v4295_v16 = vmul.f32 0.03125, %v4251_v54  ;;  %5095 = vmatpush3.bf16.xpose.msra.mxu0 %v4518_v50 }
 0x571   : > { %v4206_v19 = vpop.xlane.xlu0 %4205  ;;  %v4426_v49 = vmul.f32 %v7420_v22, %v4387_v9  ;;  %v4372_v26 = vmul.f32 %v5869_v14, %v7279_v38  ;;  %v4464_v63 = vadd.f32 %v7428_v33, %v4425_v21  ;;  %v4480_v10 = vpack.c.bf16 %v4449_v8, %v4448_v7 }
 0x572   : > { %v5871_v4 = vpop.eup %5870  ;;  %5880 = vrsqrt.f32 %v4326_v39  ;;  %v4327_v52 = vadd.f32 1e-06, %v4295_v16  ;;  %v4280_v6 = vmul.f32 0.03125, %v4206_v19 }
 0x573   : > { %v4209_v2 = vpop.xlane.xlu1 %4208  ;;  %v4465_v17 = vadd.f32 %v7428_v33, %v4426_v49  ;;  %v4373_v13 = vmul.f32 %v5871_v4, %v7285_v55  ;;  %v4411_v3 = vmul.f32 %v7420_v22, %v4372_v26  ;;  %v4521_v45 = vsel %vm661_vm2, %v4480_v10, 0 }
 0x574   : > { %v5873_v57 = vpop.eup %5872  ;;  %5882 = vrsqrt.f32 %v4327_v52  ;;  %v4312_v28 = vadd.f32 1e-06, %v4280_v6  ;;  %v4281_v20 = vmul.f32 0.03125, %v4209_v2 }
 0x575   : > { %v4388_v56 = vmul.f32 %v5873_v57, %v7291_v27  ;;  %v4254_v44 = vpop.xlane.xlu0 %4253  ;;  %v4488_v38 = vpack.c.bf16 %v4465_v17, %v4464_v63  ;;  %v4412_v51 = vmul.f32 %v7420_v22, %v4373_v13  ;;  %v4450_v53 = vadd.f32 %v7428_v33, %v4411_v3 }
 0x576   : > { %v5875_v58 = vpop.eup %5874  ;;  %5884 = vrsqrt.f32 %v4312_v28  ;;  %v4313_v47 = vadd.f32 1e-06, %v4281_v20  ;;  %v4296_v34 = vmul.f32 0.03125, %v4254_v44 }
 0x577   : > { %v4389_v41 = vmul.f32 %v5875_v58, %v7297_v0  ;;  %5727 = vmatprep.subr.msk.bf16.mxu0 %vm661_vm2, %v4488_v38  ;;  %v4257_v55 = vpop.xlane.xlu1 %4256  ;;  %v4427_v32 = vmul.f32 %v7420_v22, %v4388_v56  ;;  %v4451_v27 = vadd.f32 %v7428_v33, %v4412_v51 }
 0x578   : > { %v5877_v62 = vpop.eup %5876  ;;  %5886 = vrsqrt.f32 %v4313_v47  ;;  %v4328_v37 = vadd.f32 1e-06, %v4296_v34  ;;  %v4297_v61 = vmul.f32 0.03125, %v4257_v55  ;;  %5097 = vmatpush3.bf16.xpose.msra.mxu0 %v4521_v45 }
 0x579   : > { %v4212_v46 = vpop.xlane.xlu0 %4211  ;;  %v4428_v29 = vmul.f32 %v7420_v22, %v4389_v41  ;;  %v4374_v0 = vmul.f32 %v5877_v62, %v7303_v60  ;;  %v4466_v50 = vadd.f32 %v7428_v33, %v4427_v32  ;;  %v4481_v8 = vpack.c.bf16 %v4451_v27, %v4450_v53 }
 0x57a   : > { %v5879_v12 = vpop.eup %5878  ;;  %5888 = vrsqrt.f32 %v4328_v37  ;;  %v4329_v24 = vadd.f32 1e-06, %v4297_v61  ;;  %v4282_v9 = vmul.f32 0.03125, %v4212_v46 }
 0x57b   : > { %v4215_v54 = vpop.xlane.xlu1 %4214  ;;  %v4467_v21 = vadd.f32 %v7428_v33, %v4428_v29  ;;  %v4375_v14 = vmul.f32 %v5879_v12, %v7309_v48  ;;  %v4413_v26 = vmul.f32 %v7420_v22, %v4374_v0  ;;  %v4524_v17 = vsel %vm661_vm2, %v4481_v8, 0 }
 0x57c   : > { %v5881_v39 = vpop.eup %5880  ;;  %5890 = vrsqrt.f32 %v4329_v24  ;;  %v4314_v16 = vadd.f32 1e-06, %v4282_v9  ;;  %v4283_v19 = vmul.f32 0.03125, %v4215_v54 }
 0x57d   : > { %v4390_v49 = vmul.f32 %v5881_v39, %v7315_v25  ;;  %v4260_v7 = vpop.xlane.xlu0 %4259  ;;  %v4489_v60 = vpack.c.bf16 %v4467_v21, %v4466_v50  ;;  %v4414_v4 = vmul.f32 %v7420_v22, %v4375_v14  ;;  %v4452_v44 = vadd.f32 %v7428_v33, %v4413_v26 }
 0x57e   : > { %v5883_v52 = vpop.eup %5882  ;;  %5892 = vrsqrt.f32 %v4314_v16  ;;  %v4315_v6 = vadd.f32 1e-06, %v4283_v19  ;;  %v4298_v2 = vmul.f32 0.03125, %v4260_v7 }
 0x57f   : > { %v4391_v63 = vmul.f32 %v5883_v52, %v7321_v36  ;;  %5728 = vmatprep.subr.msk.bf16.mxu0 %vm661_vm2, %v4489_v60  ;;  %v4263_v48 = vpop.xlane.xlu1 %4262  ;;  %v4429_v10 = vmul.f32 %v7420_v22, %v4390_v49  ;;  %v4453_v25 = vadd.f32 %v7428_v33, %v4414_v4 }
 0x580   : > { %v5885_v13 = vpop.eup %5884  ;;  %5894 = vrsqrt.f32 %v4315_v6  ;;  %v4330_v57 = vadd.f32 1e-06, %v4298_v2  ;;  %v4299_v28 = vmul.f32 0.03125, %v4263_v48  ;;  %5099 = vmatpush3.bf16.xpose.msra.mxu0 %v4524_v17 }
 0x581   : > { %v4218_v20 = vpop.xlane.xlu0 %4217  ;;  %v4430_v56 = vmul.f32 %v7420_v22, %v4391_v63  ;;  %v4376_v36 = vmul.f32 %v5885_v13, %v7327_v18  ;;  %v4468_v47 = vadd.f32 %v7428_v33, %v4429_v10  ;;  %v4482_v41 = vpack.c.bf16 %v4453_v25, %v4452_v44 }
 0x582   : > { %v5887_v38 = vpop.eup %5886  ;;  %5896 = vrsqrt.f32 %v4330_v57  ;;  %v4331_v3 = vadd.f32 1e-06, %v4299_v28  ;;  %v4284_v51 = vmul.f32 0.03125, %v4218_v20 }
 0x583   : > { %v4221_v58 = vpop.xlane.xlu1 %4220  ;;  %v4469_v34 = vadd.f32 %v7428_v33, %v4430_v56  ;;  %v4377_v55 = vmul.f32 %v5887_v38, %v7333_v59  ;;  %v4415_v61 = vmul.f32 %v7420_v22, %v4376_v36  ;;  %v4527_v24 = vsel %vm661_vm2, %v4482_v41, 0 }
 0x584   : > { %v5889_v45 = vpop.eup %5888  ;;  %5898 = vrsqrt.f32 %v4331_v3  ;;  %v4316_v32 = vadd.f32 1e-06, %v4284_v51  ;;  %v4285_v27 = vmul.f32 0.03125, %v4221_v58 }
 0x585   : > { %v4392_v62 = vmul.f32 %v5889_v45, %v7339_v31  ;;  %v4266_v37 = vpop.xlane.xlu0 %4265  ;;  %v4490_v18 = vpack.c.bf16 %v4469_v34, %v4468_v47  ;;  %v4416_v46 = vmul.f32 %v7420_v22, %v4377_v55  ;;  %v4454_v14 = vadd.f32 %v7428_v33, %v4415_v61 }
 0x586   : > { %v5891_v29 = vpop.eup %5890  ;;  %5900 = vrsqrt.f32 %v4316_v32  ;;  %v4317_v53 = vadd.f32 1e-06, %v4285_v27  ;;  %v4300_v0 = vmul.f32 0.03125, %v4266_v37 }
 0x587   : > { %v4393_v12 = vmul.f32 %v5891_v29, %v7345_v35  ;;  %5729 = vmatprep.subr.msk.bf16.mxu0 %vm661_vm2, %v4490_v18  ;;  %v4269_v59 = vpop.xlane.xlu1 %4268  ;;  %v4431_v9 = vmul.f32 %v7420_v22, %v4392_v62  ;;  %v4455_v31 = vadd.f32 %v7428_v33, %v4416_v46 }
 0x588   : > { %v5893_v54 = vpop.eup %5892  ;;  %5902 = vrsqrt.f32 %v4317_v53  ;;  %v4332_v50 = vadd.f32 1e-06, %v4300_v0  ;;  %v4301_v21 = vmul.f32 0.03125, %v4269_v59  ;;  %5101 = vmatpush3.bf16.xpose.msra.mxu0 %v4527_v24 }
 0x589   : > { %v4432_v8 = vmul.f32 %v7420_v22, %v4393_v12  ;;  %v4378_v35 = vmul.f32 %v5893_v54, %v7351_v43  ;;  %v4470_v19 = vadd.f32 %v7428_v33, %v4431_v9  ;;  %v4483_v7 = vpack.c.bf16 %v4455_v31, %v4454_v14 }
 0x58a   : > { %v5895_v39 = vpop.eup %5894  ;;  %5904 = vrsqrt.f32 %v4332_v50  ;;  %v4333_v16 = vadd.f32 1e-06, %v4301_v21 }
 0x58b   : > { %v4471_v49 = vadd.f32 %v7428_v33, %v4432_v8  ;;  %v4379_v60 = vmul.f32 %v5895_v39, %v7357_v30  ;;  %v4417_v6 = vmul.f32 %v7420_v22, %v4378_v35  ;;  %v4530_v48 = vsel %vm661_vm2, %v4483_v7, 0 }
 0x58c   : > { %v5897_v26 = vpop.eup %5896  ;;  %5906 = vrsqrt.f32 %v4333_v16 }
 0x58d   : > { %v4394_v4 = vmul.f32 %v5897_v26, %v7363_v11  ;;  %v4491_v52 = vpack.c.bf16 %v4471_v49, %v4470_v19  ;;  %v4418_v2 = vmul.f32 %v7420_v22, %v4379_v60  ;;  %v4456_v25 = vadd.f32 %v7428_v33, %v4417_v6  ;;  %v4499_v62 = vpop.permute.xlu0 %4498 }
 0x58e   : > { %v5899_v43 = vpop.eup %5898 }
 0x58f   : > { %v4395_v63 = vmul.f32 %v5899_v43, %v7369_v15  ;;  %5730 = vmatprep.subr.msk.bf16.mxu0 %vm661_vm2, %v4491_v52  ;;  %v4433_v17 = vmul.f32 %v7420_v22, %v4394_v4  ;;  %v4457_v30 = vadd.f32 %v7428_v33, %v4418_v2 }
 0x590   : > { %v5901_v10 = vpop.eup %5900  ;;  %5103 = vmatpush3.bf16.xpose.msra.mxu0 %v4530_v48 }
 0x591   : > { %v4434_v11 = vmul.f32 %v7420_v22, %v4395_v63  ;;  %v4380_v13 = vmul.f32 %v5901_v10, %v7375_v40  ;;  %v4472_v28 = vadd.f32 %v7428_v33, %v4433_v17  ;;  %v4484_v20 = vpack.c.bf16 %v4457_v30, %v4456_v25 }
 0x592   : > { %v5903_v57 = vpop.eup %5902 }
 0x593   : > { %v4473_v15 = vadd.f32 %v7428_v33, %v4434_v11  ;;  %v4381_v56 = vmul.f32 %v5903_v57, %v7381_v42  ;;  %v4419_v3 = vmul.f32 %v7420_v22, %v4380_v13  ;;  %v4533_v40 = vsel %vm661_vm2, %v4484_v20, 0 }
 0x594   : > { %v5905_v44 = vpop.eup %5904 }
 0x595   : > { %v4396_v36 = vmul.f32 %v5905_v44, %v7387_v5  ;;  %v4492_v38 = vpack.c.bf16 %v4473_v15, %v4472_v28  ;;  %v4420_v51 = vmul.f32 %v7420_v22, %v4381_v56  ;;  %v4458_v41 = vadd.f32 %v7428_v33, %v4419_v3 }
 0x596   : > { %v5907_v58 = vpop.eup %5906 }
 0x597   : > { %v4397_v47 = vmul.f32 %v5907_v58, %v7393_v23  ;;  %5731 = vmatprep.subr.msk.bf16.mxu0 %vm661_vm2, %v4492_v38  ;;  %v4435_v34 = vmul.f32 %v7420_v22, %v4396_v36  ;;  %v4459_v42 = vadd.f32 %v7428_v33, %v4420_v51 }
 0x598   : > { %5105 = vmatpush3.bf16.xpose.msra.mxu0 %v4533_v40 }
 0x599   : > { %v4436_v5 = vmul.f32 %v7420_v22, %v4397_v47  ;;  %v4474_v55 = vadd.f32 %v7428_v33, %v4435_v34  ;;  %v4485_v32 = vpack.c.bf16 %v4459_v42, %v4458_v41  ;;  %v4504_v22 = vpop.permute.xlu1 %4503 }
 0x59b   : > { %v4475_v45 = vadd.f32 %v7428_v33, %v4436_v5  ;;  %v4536_v27 = vsel %vm661_vm2, %v4485_v32, 0 }
 0x59d   : > { %v4493_v23 = vpack.c.bf16 %v4475_v45, %v4474_v55 }
 0x59f   : > { %5732 = vmatprep.subr.msk.bf16.mxu0 %vm661_vm2, %v4493_v23 }
 0x5a0   : > { %5107 = vmatpush3.bf16.xpose.msra.mxu0 %v4536_v27 }
 0x5a7   : > { %5109 = vmatmul.mubr.msk.bf16.vlgmr.msra.gmra.mrb[64].mxu0 %vm661_vm2, %v7405_v1 }
 0x67a   : > { %v4596_v37 = vpop.f32.mrb[64].mxu0 }
 0x67b   : > { %v4597_v18 = vadd.f32 %v4596_v37, %v4499_v62  ;;  %v4598_v61 = vpop.f32.mrb[65].mxu0 }
 0x67c   : > { %v4599_v33 = vadd.f32 %v4598_v61, %v4499_v62  ;;  %v4600_v46 = vpop.f32.mrb[66].mxu0 }
 0x67d   : > { %v4605_v29 = vmax.f32 %v4597_v18, 0.0  ;;  %v4601_v53 = vadd.f32 %v4600_v46, %v4504_v22  ;;  %v4602_v0 = vpop.f32.mrb[67].mxu0 }
 0x67e   : > { %v4606_v12 = vmax.f32 %v4599_v33, 0.0  ;;  %v4603_v59 = vadd.f32 %v4602_v0, %v4504_v22 }
 0x67f   : > { %4609 = vst [vmem:[%s332_s13] sm:$0xff] %v4605_v29  ;;  %v4607_v24 = vmax.f32 %v4601_v53, 0.0 }
 0x680   : > { %4610 = vst [vmem:[%s332_s13 + $0x8] sm:$0xff] %v4606_v12  ;;  %v4608_v1 = vmax.f32 %v4603_v59, 0.0 }
 0x681   : > { %4611 = vst [vmem:[%s332_s13 + $0x10] sm:$0xff] %v4607_v24 }
 0x682   : > { %4612 = vst [vmem:[%s332_s13 + $0x18] sm:$0xff] %v4608_v1 }
 0x683 PF: > { %s19_s30 = sadd.s32 1, %s5914_s30  }
 0x684   : > { %p16_p4 = scmp.ge.s32.totalorder %s19_s30, 4  }
 0x686   :  { %18 = sbr.rel (!%p16_p4) target bundleno = 1 (0x1), region = 97 }

</bundles_post_ra>
